<compile_context>
chip_gen: v7x
topology: tpu7x:2x2x1
jax: 0.10.0
libtpu: 0.0.40
codegen_flags: <defaults>
</compile_context>

<pallas_src>
import math
import jax
import jax.numpy as jnp
from jax.experimental import pallas as pl
from jax.experimental.pallas import tpu as pltpu

LN_EPS = 1e-6
RMS_EPS = 1e-5
NEG_INF = -1e30


# ----------------------------- in-kernel math helpers (trace-time) --------------------------

def _gelu_tanh(x):
    # GELU(approximate='tanh'), f32
    return 0.5 * x * (1.0 + jnp.tanh(0.7978845608028654 * (x + 0.044715 * x * x * x)))


def _layernorm_modulate(x, scale_1c, shift_1c):
    # affine-free LayerNorm followed by AdaLN modulation, all in f32
    mu = jnp.mean(x, axis=-1, keepdims=True)
    var = jnp.mean(jnp.square(x - mu), axis=-1, keepdims=True)
    xn = (x - mu) * jax.lax.rsqrt(var + LN_EPS)
    return xn * (scale_1c + 1.0) + shift_1c


# ----------------------------- fused block kernel --------------------------------------------

def _make_fused_block_kernel(*, H, L, C, Lkv, attn_scale, ca_scale, cdt, causal, has_bias):
    f32 = jnp.float32

    def _heads(q_src, kv_src, wq_ref, wk_ref, wv_ref, qb_ref, vb_ref, pw_ref, scale, bias):
        """Per-head q/k/v projection + softmax attention with the output projection folded
        into the head loop as an accumulation.  Head-major weight refs are indexed on the
        leading axis (no lane slicing, no concat); fori_loop bounds per-head live ranges.
        TODO(synk): production L -> flash-style online softmax over KV tiles here."""
        Lq = q_src.shape[0]

        def body(h, acc):
            qh = jnp.dot(q_src, wq_ref[h], preferred_element_type=f32) + qb_ref[h].astype(f32)
            kh = jnp.dot(kv_src, wk_ref[h], preferred_element_type=f32)      # k has no bias
            vh = jnp.dot(kv_src, wv_ref[h], preferred_element_type=f32) + vb_ref[h].astype(f32)
            s = jax.lax.dot_general(qh.astype(cdt), kh.astype(cdt),
                                    (((1,), (1,)), ((), ())),
                                    preferred_element_type=f32) * scale
            if bias is not None:
                s = s + bias
            s = s - jnp.max(s, axis=-1, keepdims=True)
            p = jnp.exp(s)                                                   # f32 stats
            l = jnp.sum(p, axis=-1, keepdims=True)
            # deferred (exact) normalization on the small (Lq, hd) output
            oh = jnp.dot(p.astype(cdt), vh.astype(cdt), preferred_element_type=f32) / l
            # fold the output projection into the loop: acc += oh @ proj_w[h]
            return acc + jnp.dot(oh.astype(cdt), pw_ref[h], preferred_element_type=f32)

        return jax.lax.fori_loop(0, H, body, jnp.zeros((Lq, C), f32), unroll=True)

    def body(x_ref, cond_ref, dino_ref, bias_ref,
             ada_w_ref, ada_b_ref,
             sa_wq_ref, sa_wk_ref, sa_wv_ref, sa_qb_ref, sa_vb_ref, sa_pw_ref, sa_pb_ref,
             rms_w_ref,
             ca_wq_ref, ca_qb_ref, ca_wk_ref, ca_wv_ref, ca_vb_ref, ca_pw_ref, ca_pb_ref,
             fc1_w_ref, fc1_b_ref, fc2_w_ref, fc2_b_ref,
             o_ref):
        x = x_ref[...].astype(f32)                           # (L, C) residual, VMEM-resident

        # ---- AdaLN: six (1, C) modulation vectors computed in-kernel (no HBM roundtrip) ----
        cond = cond_ref[...].astype(f32)                     # (1, D)
        hcond = (cond * jax.nn.sigmoid(cond)).astype(cdt)    # SiLU in f32
        ada = [jnp.dot(hcond, ada_w_ref[i], preferred_element_type=f32) + ada_b_ref[i].astype(f32)
               for i in range(6)]
        gamma1, gamma2, scale1, scale2, shift1, shift2 = ada

        # ---- attention bias: generated on the VPU when causal (no (L, L) DMA) --------------
        if causal:
            ri = jax.lax.broadcasted_iota(jnp.int32, (L, L), 0)
            ci = jax.lax.broadcasted_iota(jnp.int32, (L, L), 1)
            sa_bias = jnp.where(ci <= ri, 0.0, NEG_INF).astype(f32)
        elif has_bias:
            sa_bias = bias_ref[...].astype(f32)
        else:
            sa_bias = None

        # ---- branch 1: x += SelfAttention(LN(x)*(1+scale1)+shift1, bias) * gamma1 ----------
        h1 = _layernorm_modulate(x, scale1, shift1).astype(cdt)
        attn = _heads(h1, h1, sa_wq_ref, sa_wk_ref, sa_wv_ref, sa_qb_ref, sa_vb_ref,
                      sa_pw_ref, attn_scale, sa_bias)
        x = x + (attn + sa_pb_ref[...].astype(f32)) * gamma1

        # ---- branch 2: x += CrossAttention(RMSNorm(x), dino)  (gamma = 1) -------------------
        ms = jnp.mean(jnp.square(x), axis=-1, keepdims=True)
        xq = (x * jax.lax.rsqrt(ms + RMS_EPS) * rms_w_ref[...].astype(f32)).astype(cdt)
        dino = dino_ref[...].astype(cdt)                     # (Lkv, Ckv)
        ca = _heads(xq, dino, ca_wq_ref, ca_wk_ref, ca_wv_ref, ca_qb_ref, ca_vb_ref,
                    ca_pw_ref, ca_scale, None)
        x = x + ca + ca_pb_ref[...].astype(f32)

        # ---- branch 3: x += FFN(LN(x)*(1+scale2)+shift2) * gamma2 ---------------------------
        # TODO(synk): token-tile + hidden-dim-tile (emit_pipeline) for production L / Hm.
        h2 = _layernorm_modulate(x, scale2, shift2).astype(cdt)
        mid = jnp.dot(h2, fc1_w_ref[...], preferred_element_type=f32) + fc1_b_ref[...].astype(f32)
        mid = _gelu_tanh(mid)                                # f32 elementwise
        ffn = (jnp.dot(mid.astype(cdt), fc2_w_ref[...], preferred_element_type=f32)
               + fc2_b_ref[...].astype(f32))
        o_ref[...] = (x + ffn * gamma2).astype(o_ref.dtype)

    if has_bias:
        def kernel(x_ref, cond_ref, dino_ref, bias_ref, *rest):
            body(x_ref, cond_ref, dino_ref, bias_ref, *rest)
    else:
        def kernel(x_ref, cond_ref, dino_ref, *rest):
            body(x_ref, cond_ref, dino_ref, None, *rest)
    return kernel


# ----------------------------- one-time weight preparation -----------------------------------

def prepare_params(raw, compute_dtype=jnp.float32):
    """One-time weight re-layout + cast (do NOT call per forward):
       * per-head weights become head-major (H, in, hd) / (H, hd, C) so the kernel indexes
         heads on the leading axis (no lane-slice relayouts, no concat),
       * matmul weights are pre-cast to compute_dtype once (pass jnp.bfloat16 on v6e/v7x to
         halve weight HBM traffic); biases / norm weights stay f32, accumulation stays f32."""
    cdt = compute_dtype
    f32 = jnp.float32
    H = raw["num_heads"]
    C = raw["attn_proj_w"].shape[0]
    hd = C // H
    D = raw["ada_w"].shape[0]
    Ckv = raw["ca_kv_w"].shape[0]
    Hm = raw["fc1_w"].shape[1]

    def heads_cols(w):          # (in, C) -> (H, in, hd)
        return jnp.transpose(w.reshape(w.shape[0], H, hd), (1, 0, 2)).astype(cdt)

    def heads_bias(b):          # (C,) -> (H, 1, hd)
        return b.reshape(H, 1, hd).astype(f32)

    qkv_w, qkv_b = raw["attn_qkv_w"], raw["attn_qkv_b"]
    kv_w, kv_b = raw["ca_kv_w"], raw["ca_kv_b"]
    return dict(
        num_heads=H, C=C, hd=hd, D=D, Ckv=Ckv, Hm=Hm, cdt=cdt,
        attn_scale=raw["attn_scale"], ca_scale=raw["ca_scale"],
        ada_w=jnp.transpose(raw["ada_w"].reshape(D, 6, C), (1, 0, 2)).astype(cdt),  # (6, D, C)
        ada_b=raw["ada_b"].reshape(6, 1, C).astype(f32),
        sa_wq=heads_cols(qkv_w[:, 0 * C:1 * C]),
        sa_wk=heads_cols(qkv_w[:, 1 * C:2 * C]),
        sa_wv=heads_cols(qkv_w[:, 2 * C:3 * C]),
        sa_qb=heads_bias(qkv_b[0 * C:1 * C]),
        sa_vb=heads_bias(qkv_b[2 * C:3 * C]),
        sa_pw=raw["attn_proj_w"].reshape(H, hd, C).astype(cdt),
        sa_pb=raw["attn_proj_b"].reshape(1, C).astype(f32),
        rms_w=raw["rms_w"].reshape(1, C).astype(f32),
        ca_wq=heads_cols(raw["ca_q_w"]),
        ca_qb=heads_bias(raw["ca_q_b"]),
        ca_wk=heads_cols(kv_w[:, 0 * C:1 * C]),
        ca_wv=heads_cols(kv_w[:, 1 * C:2 * C]),
        ca_vb=heads_bias(kv_b[1 * C:2 * C]),
        ca_pw=raw["ca_proj_w"].reshape(H, hd, C).astype(cdt),
        ca_pb=raw["ca_proj_b"].reshape(1, C).astype(f32),
        fc1_w=raw["fc1_w"].astype(cdt),
        fc1_b=raw["fc1_b"].reshape(1, Hm).astype(f32),
        fc2_w=raw["fc2_w"].astype(cdt),
        fc2_b=raw["fc2_b"].reshape(1, C).astype(f32),
    )


# ----------------------------- full block forward ---------------------------------------------

def adaln_cross_self_attn_forward(p, x, cond_BD, dino_condition, attn_bias=None,
                                  causal=False, vmem_limit_bytes=48 * 1024 * 1024):
    """Fully fused forward of the AdaLN cross/self-attention block (one pallas_call, grid=(B,)).

    attn_bias handling:
      causal=True           -> causal mask generated in-kernel (iota + where), nothing DMA'd
      attn_bias=(L, L) array-> explicit additive bias
      both unset            -> no bias
    """
    B, L, C = x.shape
    Lkv, Ckv = dino_condition.shape[1], dino_condition.shape[2]
    H, D = p["num_heads"], p["D"]
    cdt = p["cdt"]
    has_bias = (not causal) and (attn_bias is not None)

    kernel = _make_fused_block_kernel(
        H=H, L=L, C=C, Lkv=Lkv, attn_scale=p["attn_scale"], ca_scale=p["ca_scale"],
        cdt=cdt, causal=causal, has_bias=has_bias)

    in_specs = [
        pl.BlockSpec((None, L, C), lambda b: (b, 0, 0)),        # x          (per-batch block)
        pl.BlockSpec((None, 1, D), lambda b: (b, 0, 0)),        # cond_BD    (per-batch block)
        pl.BlockSpec((None, Lkv, Ckv), lambda b: (b, 0, 0)),    # dino       (per-batch block)
    ]
    operands = [x, cond_BD.reshape(B, 1, D), dino_condition]
    if has_bias:
        in_specs.append(pl.BlockSpec((L, L), lambda b: (0, 0)))
        operands.append(attn_bias.reshape(L, L))

    # Grid-invariant weights / biases: constant index_map -> fetched once, held in VMEM.
    # TODO(synk): on v7x single-buffer these (pipeline_mode=pl.Buffered(1)) and tile fc1/fc2.
    weight_keys = ("ada_w", "ada_b",
                   "sa_wq", "sa_wk", "sa_wv", "sa_qb", "sa_vb", "sa_pw", "sa_pb",
                   "rms_w",
                   "ca_wq", "ca_qb", "ca_wk", "ca_wv", "ca_vb", "ca_pw", "ca_pb",
                   "fc1_w", "fc1_b", "fc2_w", "fc2_b")
    for k in weight_keys:
        w = p[k]
        in_specs.append(pl.BlockSpec(w.shape, lambda b, _nd=w.ndim: (0,) * _nd))
        operands.append(w)

    return pl.pallas_call(
        kernel,
        out_shape=jax.ShapeDtypeStruct((B, L, C), x.dtype),
        grid=(B,),
        in_specs=in_specs,
        out_specs=pl.BlockSpec((None, L, C), lambda b: (b, 0, 0)),
        compiler_params=pltpu.CompilerParams(
            dimension_semantics=("parallel",),
            vmem_limit_bytes=vmem_limit_bytes),
    )(*operands)


# ----------------------------- deterministic parameter init ----------------------------------

def init_params(key, C, D, H, Ckv, mlp_hidden):
    ks = jax.random.split(key, 16)
    s = 0.02
    hd = C // H
    kv_hd = Ckv // H
    p = {
        "num_heads": H,
        "attn_scale": 0.25 / math.sqrt(hd),
        "ca_scale": 0.25 / math.sqrt(kv_hd),
    }
    p["ada_w"] = jax.random.normal(ks[0], (D, 6 * C), jnp.float32) * s
    p["ada_b"] = jax.random.normal(ks[1], (6 * C,), jnp.float32) * s
    q_bias = jax.random.normal(ks[2], (C,), jnp.float32) * s
    v_bias = jax.random.normal(ks[3], (C,), jnp.float32) * s
    p["attn_qkv_w"] = jax.random.normal(ks[4], (C, 3 * C), jnp.float32) * s
    p["attn_qkv_b"] = jnp.concatenate([q_bias, jnp.zeros((C,), jnp.float32), v_bias])
    p["attn_proj_w"] = jax.random.normal(ks[5], (C, C), jnp.float32) * s
    p["attn_proj_b"] = jax.random.normal(ks[6], (C,), jnp.float32) * s
    p["rms_w"] = jnp.ones((C,), jnp.float32) + jax.random.normal(ks[7], (C,), jnp.float32) * s
    ca_q_bias = jax.random.normal(ks[8], (C,), jnp.float32) * s
    ca_v_bias = jax.random.normal(ks[9], (C,), jnp.float32) * s
    p["ca_q_w"] = jax.random.normal(ks[10], (C, C), jnp.float32) * s
    p["ca_q_b"] = ca_q_bias
    p["ca_kv_w"] = jax.random.normal(ks[11], (Ckv, 2 * C), jnp.float32) * s
    p["ca_kv_b"] = jnp.concatenate([jnp.zeros((C,), jnp.float32), ca_v_bias])
    p["ca_proj_w"] = jax.random.normal(ks[12], (C, C), jnp.float32) * s
    p["ca_proj_b"] = jax.random.normal(ks[13], (C,), jnp.float32) * s
    p["fc1_w"] = jax.random.normal(ks[14], (C, mlp_hidden), jnp.float32) * s
    p["fc1_b"] = jnp.zeros((mlp_hidden,), jnp.float32)
    p["fc2_w"] = jax.random.normal(ks[15], (mlp_hidden, C), jnp.float32) * s
    p["fc2_b"] = jnp.zeros((C,), jnp.float32)
    return p


# ----------------------------- pure-JAX reference (for verification) -------------------------

def reference_forward(params, x, cond_BD, dino, attn_bias):
    B, L, C = x.shape
    H = params["num_heads"]
    hd = C // H

    def ln(t):
        mu = t.mean(-1, keepdims=True)
        var = ((t - mu) ** 2).mean(-1, keepdims=True)
        return (t - mu) / jnp.sqrt(var + LN_EPS)

    def attn(q, k, v, bias, scale):
        s = jnp.einsum("bhqd,bhkd->bhqk", q, k) * scale + bias
        p = jax.nn.softmax(s, axis=-1)
        return jnp.einsum("bhqk,bhkd->bhqd", p, v)

    ada = (jax.nn.silu(cond_BD) @ params["ada_w"] + params["ada_b"]).reshape(B, 6, C)
    g1, g2, s1, s2, sh1, sh2 = [ada[:, i, :][:, None, :] for i in range(6)]

    h1 = ln(x) * (s1 + 1.0) + sh1
    qkv = (h1 @ params["attn_qkv_w"] + params["attn_qkv_b"]).reshape(B, L, 3, H, hd)
    qkv = qkv.transpose(2, 0, 3, 1, 4)
    o = attn(qkv[0], qkv[1], qkv[2], attn_bias[None, None], params["attn_scale"])
    o = o.transpose(0, 2, 1, 3).reshape(B, L, C)
    x = x + (o @ params["attn_proj_w"] + params["attn_proj_b"]) * g1

    ms = (x ** 2).mean(-1, keepdims=True)
    xq = x * jax.lax.rsqrt(ms + RMS_EPS) * params["rms_w"]
    q = (xq @ params["ca_q_w"] + params["ca_q_b"]).reshape(B, L, H, hd).transpose(0, 2, 1, 3)
    Lkv = dino.shape[1]
    kv = (dino @ params["ca_kv_w"] + params["ca_kv_b"]).reshape(B, Lkv, 2, H, hd)
    kv = kv.transpose(2, 0, 3, 1, 4)
    o = attn(q, kv[0], kv[1], 0.0, params["ca_scale"])
    o = o.transpose(0, 2, 1, 3).reshape(B, L, C)
    x = x + (o @ params["ca_proj_w"] + params["ca_proj_b"])

    h2 = ln(x) * (s2 + 1.0) + sh2
    mid = _gelu_tanh(h2 @ params["fc1_w"] + params["fc1_b"])
    x = x + (mid @ params["fc2_w"] + params["fc2_b"]) * g2
    return x


# ----------------------------- main -----------------------------------------------------------

if __name__ == "__main__":
    B, L, C, H = 2, 16, 64, 4          # embed_dim=64, num_heads=4 (head_dim=16)
    D = 32                              # cond_dim
    Ckv = 768                           # key_value_dim hard-coded in CrossAttention
    Lkv = 8                             # dino_condition sequence length
    mlp_hidden = round(C * 4.0)

    key = jax.random.PRNGKey(0)
    kp, kx, kc, kd = jax.random.split(key, 4)
    raw = init_params(kp, C, D, H, Ckv, mlp_hidden)
    # NOTE: pass compute_dtype=jnp.bfloat16 on v6e/v7x (re-validate with a bf16 tolerance).
    params = prepare_params(raw, compute_dtype=jnp.float32)

    x = jax.random.normal(kx, (B, L, C), jnp.float32)
    cond_BD = jax.random.normal(kc, (B, D), jnp.float32)
    dino_condition = jax.random.normal(kd, (B, Lkv, Ckv), jnp.float32)

    # explicit causal bias, used only by the reference and by the explicit-bias kernel path
    mask = jnp.tril(jnp.ones((L, L), dtype=bool))
    attn_bias = jnp.where(mask, 0.0, NEG_INF).astype(jnp.float32)

    # Path 1 (preferred): causal mask generated inside the kernel -> no (L, L) DMA.
    out_causal = adaln_cross_self_attn_forward(params, x, cond_BD, dino_condition, causal=True)
    out_causal = jax.block_until_ready(out_causal)

    # Path 2: explicit attention-bias array (module-faithful signature).
    out_bias = adaln_cross_self_attn_forward(params, x, cond_BD, dino_condition,
                                             attn_bias=attn_bias)
    out_bias = jax.block_until_ready(out_bias)

    ref = reference_forward(raw, x, cond_BD, dino_condition, attn_bias)
    err1 = float(jnp.max(jnp.abs(out_causal - ref)))
    err2 = float(jnp.max(jnp.abs(out_bias - ref)))
    assert jnp.allclose(out_causal, ref, atol=3e-3, rtol=3e-3), f"causal path max abs err = {err1}"
    assert jnp.allclose(out_bias, ref, atol=3e-3, rtol=3e-3), f"bias path max abs err = {err2}"

    print("KERNEL_OK")
</pallas_src>

<mosaic_0001>
module attributes {stable_mosaic.version = 11 : i64} {
  func.func @kernel(%arg0: i32, %arg1: memref<1x16x64xf32, #tpu.memory_space<vmem>>, %arg2: memref<1x1x32xf32, #tpu.memory_space<vmem>>, %arg3: memref<1x8x768xf32, #tpu.memory_space<vmem>>, %arg4: memref<6x32x64xf32, #tpu.memory_space<vmem>>, %arg5: memref<6x1x64xf32, #tpu.memory_space<vmem>>, %arg6: memref<4x64x16xf32, #tpu.memory_space<vmem>>, %arg7: memref<4x64x16xf32, #tpu.memory_space<vmem>>, %arg8: memref<4x64x16xf32, #tpu.memory_space<vmem>>, %arg9: memref<4x1x16xf32, #tpu.memory_space<vmem>>, %arg10: memref<4x1x16xf32, #tpu.memory_space<vmem>>, %arg11: memref<4x16x64xf32, #tpu.memory_space<vmem>>, %arg12: memref<1x64xf32, #tpu.memory_space<vmem>>, %arg13: memref<1x64xf32, #tpu.memory_space<vmem>>, %arg14: memref<4x64x16xf32, #tpu.memory_space<vmem>>, %arg15: memref<4x1x16xf32, #tpu.memory_space<vmem>>, %arg16: memref<4x768x16xf32, #tpu.memory_space<vmem>>, %arg17: memref<4x768x16xf32, #tpu.memory_space<vmem>>, %arg18: memref<4x1x16xf32, #tpu.memory_space<vmem>>, %arg19: memref<4x16x64xf32, #tpu.memory_space<vmem>>, %arg20: memref<1x64xf32, #tpu.memory_space<vmem>>, %arg21: memref<64x256xf32, #tpu.memory_space<vmem>>, %arg22: memref<1x256xf32, #tpu.memory_space<vmem>>, %arg23: memref<256x64xf32, #tpu.memory_space<vmem>>, %arg24: memref<1x64xf32, #tpu.memory_space<vmem>>, %arg25: memref<1x16x64xf32, #tpu.memory_space<vmem>>) attributes {dimension_semantics = [#tpu.dimension_semantics<parallel>], iteration_bounds = array<i64: 2>, scalar_prefetch = 0 : i64, scratch_operands = 0 : i64, tpu.core_type = #tpu.core_type<tc>, window_params = [{transform_indices = @transform_0, window_bounds = array<i64: 1, 16, 64>}, {transform_indices = @transform_1, window_bounds = array<i64: 1, 1, 32>}, {transform_indices = @transform_2, window_bounds = array<i64: 1, 8, 768>}, {pipeline_mode = #tpu.pipeline_mode<synchronous>, transform_indices = @transform_3, window_bounds = array<i64: 6, 32, 64>}, {pipeline_mode = #tpu.pipeline_mode<synchronous>, transform_indices = @transform_4, window_bounds = array<i64: 6, 1, 64>}, {pipeline_mode = #tpu.pipeline_mode<synchronous>, transform_indices = @transform_5, window_bounds = array<i64: 4, 64, 16>}, {pipeline_mode = #tpu.pipeline_mode<synchronous>, transform_indices = @transform_6, window_bounds = array<i64: 4, 64, 16>}, {pipeline_mode = #tpu.pipeline_mode<synchronous>, transform_indices = @transform_7, window_bounds = array<i64: 4, 64, 16>}, {pipeline_mode = #tpu.pipeline_mode<synchronous>, transform_indices = @transform_8, window_bounds = array<i64: 4, 1, 16>}, {pipeline_mode = #tpu.pipeline_mode<synchronous>, transform_indices = @transform_9, window_bounds = array<i64: 4, 1, 16>}, {pipeline_mode = #tpu.pipeline_mode<synchronous>, transform_indices = @transform_10, window_bounds = array<i64: 4, 16, 64>}, {pipeline_mode = #tpu.pipeline_mode<synchronous>, transform_indices = @transform_11, window_bounds = array<i64: 1, 64>}, {pipeline_mode = #tpu.pipeline_mode<synchronous>, transform_indices = @transform_12, window_bounds = array<i64: 1, 64>}, {pipeline_mode = #tpu.pipeline_mode<synchronous>, transform_indices = @transform_13, window_bounds = array<i64: 4, 64, 16>}, {pipeline_mode = #tpu.pipeline_mode<synchronous>, transform_indices = @transform_14, window_bounds = array<i64: 4, 1, 16>}, {pipeline_mode = #tpu.pipeline_mode<synchronous>, transform_indices = @transform_15, window_bounds = array<i64: 4, 768, 16>}, {pipeline_mode = #tpu.pipeline_mode<synchronous>, transform_indices = @transform_16, window_bounds = array<i64: 4, 768, 16>}, {pipeline_mode = #tpu.pipeline_mode<synchronous>, transform_indices = @transform_17, window_bounds = array<i64: 4, 1, 16>}, {pipeline_mode = #tpu.pipeline_mode<synchronous>, transform_indices = @transform_18, window_bounds = array<i64: 4, 16, 64>}, {pipeline_mode = #tpu.pipeline_mode<synchronous>, transform_indices = @transform_19, window_bounds = array<i64: 1, 64>}, {pipeline_mode = #tpu.pipeline_mode<synchronous>, transform_indices = @transform_20, window_bounds = array<i64: 64, 256>}, {pipeline_mode = #tpu.pipeline_mode<synchronous>, transform_indices = @transform_21, window_bounds = array<i64: 1, 256>}, {pipeline_mode = #tpu.pipeline_mode<synchronous>, transform_indices = @transform_22, window_bounds = array<i64: 256, 64>}, {pipeline_mode = #tpu.pipeline_mode<synchronous>, transform_indices = @transform_23, window_bounds = array<i64: 1, 64>}, {transform_indices = @transform_24, window_bounds = array<i64: 1, 16, 64>}]} {
    %c0 = arith.constant 0 : index
    %c0_0 = arith.constant 0 : index
    %c0_1 = arith.constant 0 : index
    %0 = vector.load %arg1[%c0, %c0_0, %c0_1] : memref<1x16x64xf32, #tpu.memory_space<vmem>>, vector<1x16x64xf32>
    %1 = vector.shape_cast %0 : vector<1x16x64xf32> to vector<16x64xf32>
    %c0_2 = arith.constant 0 : index
    %c0_3 = arith.constant 0 : index
    %c0_4 = arith.constant 0 : index
    %2 = vector.load %arg2[%c0_2, %c0_3, %c0_4] : memref<1x1x32xf32, #tpu.memory_space<vmem>>, vector<1x1x32xf32>
    %3 = vector.shape_cast %2 : vector<1x1x32xf32> to vector<1x32xf32>
    %4 = arith.negf %3 : vector<1x32xf32>
    %5 = math.exp %4 : vector<1x32xf32>
    %cst = arith.constant 1.000000e+00 : f32
    %6 = vector.broadcast %cst : f32 to vector<1x32xf32>
    %7 = arith.addf %6, %5 : vector<1x32xf32>
    %8 = arith.divf %6, %7 : vector<1x32xf32>
    %9 = arith.mulf %3, %8 : vector<1x32xf32>
    %c0_5 = arith.constant 0 : index
    %c0_6 = arith.constant 0 : index
    %c0_7 = arith.constant 0 : index
    %10 = vector.load %arg4[%c0_5, %c0_6, %c0_7] : memref<6x32x64xf32, #tpu.memory_space<vmem>>, vector<1x32x64xf32>
    %11 = vector.shape_cast %10 : vector<1x32x64xf32> to vector<32x64xf32>
    %cst_8 = arith.constant dense<0.000000e+00> : vector<1x64xf32>
    %12 = tpu.matmul %9, %11, %cst_8 {dimension_numbers = #tpu.dot_dimension_numbers<[1], [0], [0], [1], [0, 0, 1, 1], [], []>} : vector<1x32xf32>, vector<32x64xf32>, vector<1x64xf32> -> vector<1x64xf32>
    %c0_9 = arith.constant 0 : index
    %c0_10 = arith.constant 0 : index
    %c0_11 = arith.constant 0 : index
    %13 = vector.load %arg5[%c0_9, %c0_10, %c0_11] : memref<6x1x64xf32, #tpu.memory_space<vmem>>, vector<1x1x64xf32>
    %14 = vector.shape_cast %13 : vector<1x1x64xf32> to vector<1x64xf32>
    %15 = arith.addf %12, %14 : vector<1x64xf32>
    %c1 = arith.constant 1 : index
    %c0_12 = arith.constant 0 : index
    %c0_13 = arith.constant 0 : index
    %16 = vector.load %arg4[%c1, %c0_12, %c0_13] : memref<6x32x64xf32, #tpu.memory_space<vmem>>, vector<1x32x64xf32>
    %17 = vector.shape_cast %16 : vector<1x32x64xf32> to vector<32x64xf32>
    %cst_14 = arith.constant dense<0.000000e+00> : vector<1x64xf32>
    %18 = tpu.matmul %9, %17, %cst_14 {dimension_numbers = #tpu.dot_dimension_numbers<[1], [0], [0], [1], [0, 0, 1, 1], [], []>} : vector<1x32xf32>, vector<32x64xf32>, vector<1x64xf32> -> vector<1x64xf32>
    %c1_15 = arith.constant 1 : index
    %c0_16 = arith.constant 0 : index
    %c0_17 = arith.constant 0 : index
    %19 = vector.load %arg5[%c1_15, %c0_16, %c0_17] : memref<6x1x64xf32, #tpu.memory_space<vmem>>, vector<1x1x64xf32>
    %20 = vector.shape_cast %19 : vector<1x1x64xf32> to vector<1x64xf32>
    %21 = arith.addf %18, %20 : vector<1x64xf32>
    %c2 = arith.constant 2 : index
    %c0_18 = arith.constant 0 : index
    %c0_19 = arith.constant 0 : index
    %22 = vector.load %arg4[%c2, %c0_18, %c0_19] : memref<6x32x64xf32, #tpu.memory_space<vmem>>, vector<1x32x64xf32>
    %23 = vector.shape_cast %22 : vector<1x32x64xf32> to vector<32x64xf32>
    %cst_20 = arith.constant dense<0.000000e+00> : vector<1x64xf32>
    %24 = tpu.matmul %9, %23, %cst_20 {dimension_numbers = #tpu.dot_dimension_numbers<[1], [0], [0], [1], [0, 0, 1, 1], [], []>} : vector<1x32xf32>, vector<32x64xf32>, vector<1x64xf32> -> vector<1x64xf32>
    %c2_21 = arith.constant 2 : index
    %c0_22 = arith.constant 0 : index
    %c0_23 = arith.constant 0 : index
    %25 = vector.load %arg5[%c2_21, %c0_22, %c0_23] : memref<6x1x64xf32, #tpu.memory_space<vmem>>, vector<1x1x64xf32>
    %26 = vector.shape_cast %25 : vector<1x1x64xf32> to vector<1x64xf32>
    %27 = arith.addf %24, %26 : vector<1x64xf32>
    %c3 = arith.constant 3 : index
    %c0_24 = arith.constant 0 : index
    %c0_25 = arith.constant 0 : index
    %28 = vector.load %arg4[%c3, %c0_24, %c0_25] : memref<6x32x64xf32, #tpu.memory_space<vmem>>, vector<1x32x64xf32>
    %29 = vector.shape_cast %28 : vector<1x32x64xf32> to vector<32x64xf32>
    %cst_26 = arith.constant dense<0.000000e+00> : vector<1x64xf32>
    %30 = tpu.matmul %9, %29, %cst_26 {dimension_numbers = #tpu.dot_dimension_numbers<[1], [0], [0], [1], [0, 0, 1, 1], [], []>} : vector<1x32xf32>, vector<32x64xf32>, vector<1x64xf32> -> vector<1x64xf32>
    %c3_27 = arith.constant 3 : index
    %c0_28 = arith.constant 0 : index
    %c0_29 = arith.constant 0 : index
    %31 = vector.load %arg5[%c3_27, %c0_28, %c0_29] : memref<6x1x64xf32, #tpu.memory_space<vmem>>, vector<1x1x64xf32>
    %32 = vector.shape_cast %31 : vector<1x1x64xf32> to vector<1x64xf32>
    %33 = arith.addf %30, %32 : vector<1x64xf32>
    %c4 = arith.constant 4 : index
    %c0_30 = arith.constant 0 : index
    %c0_31 = arith.constant 0 : index
    %34 = vector.load %arg4[%c4, %c0_30, %c0_31] : memref<6x32x64xf32, #tpu.memory_space<vmem>>, vector<1x32x64xf32>
    %35 = vector.shape_cast %34 : vector<1x32x64xf32> to vector<32x64xf32>
    %cst_32 = arith.constant dense<0.000000e+00> : vector<1x64xf32>
    %36 = tpu.matmul %9, %35, %cst_32 {dimension_numbers = #tpu.dot_dimension_numbers<[1], [0], [0], [1], [0, 0, 1, 1], [], []>} : vector<1x32xf32>, vector<32x64xf32>, vector<1x64xf32> -> vector<1x64xf32>
    %c4_33 = arith.constant 4 : index
    %c0_34 = arith.constant 0 : index
    %c0_35 = arith.constant 0 : index
    %37 = vector.load %arg5[%c4_33, %c0_34, %c0_35] : memref<6x1x64xf32, #tpu.memory_space<vmem>>, vector<1x1x64xf32>
    %38 = vector.shape_cast %37 : vector<1x1x64xf32> to vector<1x64xf32>
    %39 = arith.addf %36, %38 : vector<1x64xf32>
    %c5 = arith.constant 5 : index
    %c0_36 = arith.constant 0 : index
    %c0_37 = arith.constant 0 : index
    %40 = vector.load %arg4[%c5, %c0_36, %c0_37] : memref<6x32x64xf32, #tpu.memory_space<vmem>>, vector<1x32x64xf32>
    %41 = vector.shape_cast %40 : vector<1x32x64xf32> to vector<32x64xf32>
    %cst_38 = arith.constant dense<0.000000e+00> : vector<1x64xf32>
    %42 = tpu.matmul %9, %41, %cst_38 {dimension_numbers = #tpu.dot_dimension_numbers<[1], [0], [0], [1], [0, 0, 1, 1], [], []>} : vector<1x32xf32>, vector<32x64xf32>, vector<1x64xf32> -> vector<1x64xf32>
    %c5_39 = arith.constant 5 : index
    %c0_40 = arith.constant 0 : index
    %c0_41 = arith.constant 0 : index
    %43 = vector.load %arg5[%c5_39, %c0_40, %c0_41] : memref<6x1x64xf32, #tpu.memory_space<vmem>>, vector<1x1x64xf32>
    %44 = vector.shape_cast %43 : vector<1x1x64xf32> to vector<1x64xf32>
    %45 = arith.addf %42, %44 : vector<1x64xf32>
    %46 = tpu.iota {dimensions = array<i32: 0>} : vector<16x16xi32>
    %47 = tpu.iota {dimensions = array<i32: 1>} : vector<16x16xi32>
    %48 = arith.cmpi sle, %47, %46 : vector<16x16xi32>
    %cst_42 = arith.constant 0.000000e+00 : f32
    %cst_43 = arith.constant -1.000000e+30 : f32
    %49 = vector.broadcast %cst_42 : f32 to vector<16x16xf32>
    %50 = vector.broadcast %cst_43 : f32 to vector<16x16xf32>
    %51 = arith.select %48, %49, %50 : vector<16x16xi1>, vector<16x16xf32>
    %cst_44 = arith.constant dense<0.000000e+00> : vector<16xf32>
    %52 = vector.multi_reduction <add>, %1, %cst_44 [1] : vector<16x64xf32> to vector<16xf32>
    %53 = vector.shape_cast %52 : vector<16xf32> to vector<16x1xf32>
    %cst_45 = arith.constant 6.400000e+01 : f32
    %54 = vector.broadcast %cst_45 : f32 to vector<16x1xf32>
    %55 = arith.divf %53, %54 : vector<16x1xf32>
    %56 = vector.broadcast %55 : vector<16x1xf32> to vector<16x64xf32>
    %57 = arith.subf %1, %56 : vector<16x64xf32>
    %58 = arith.mulf %57, %57 : vector<16x64xf32>
    %cst_46 = arith.constant dense<0.000000e+00> : vector<16xf32>
    %59 = vector.multi_reduction <add>, %58, %cst_46 [1] : vector<16x64xf32> to vector<16xf32>
    %60 = vector.shape_cast %59 : vector<16xf32> to vector<16x1xf32>
    %cst_47 = arith.constant 6.400000e+01 : f32
    %61 = vector.broadcast %cst_47 : f32 to vector<16x1xf32>
    %62 = arith.divf %60, %61 : vector<16x1xf32>
    %63 = vector.broadcast %55 : vector<16x1xf32> to vector<16x64xf32>
    %64 = arith.subf %1, %63 : vector<16x64xf32>
    %cst_48 = arith.constant 9.99999997E-7 : f32
    %65 = vector.broadcast %cst_48 : f32 to vector<16x1xf32>
    %66 = arith.addf %62, %65 : vector<16x1xf32>
    %67 = math.rsqrt %66 : vector<16x1xf32>
    %68 = vector.broadcast %67 : vector<16x1xf32> to vector<16x64xf32>
    %69 = arith.mulf %64, %68 : vector<16x64xf32>
    %cst_49 = arith.constant 1.000000e+00 : f32
    %70 = vector.broadcast %cst_49 : f32 to vector<1x64xf32>
    %71 = arith.addf %27, %70 : vector<1x64xf32>
    %72 = vector.broadcast %71 : vector<1x64xf32> to vector<16x64xf32>
    %73 = arith.mulf %69, %72 : vector<16x64xf32>
    %74 = vector.broadcast %39 : vector<1x64xf32> to vector<16x64xf32>
    %75 = arith.addf %73, %74 : vector<16x64xf32>
    %cst_50 = arith.constant 0.000000e+00 : f32
    %76 = vector.broadcast %cst_50 : f32 to vector<16x64xf32>
    %c0_i32 = arith.constant 0 : i32
    %77 = arith.index_cast %c0_i32 : i32 to index
    %c0_51 = arith.constant 0 : index
    %c0_52 = arith.constant 0 : index
    %78 = vector.load %arg6[%77, %c0_51, %c0_52] : memref<4x64x16xf32, #tpu.memory_space<vmem>>, vector<1x64x16xf32>
    %79 = vector.shape_cast %78 : vector<1x64x16xf32> to vector<64x16xf32>
    %cst_53 = arith.constant dense<0.000000e+00> : vector<16x16xf32>
    %80 = tpu.matmul %75, %79, %cst_53 {dimension_numbers = #tpu.dot_dimension_numbers<[1], [0], [0], [1], [0, 0, 1, 1], [], []>} : vector<16x64xf32>, vector<64x16xf32>, vector<16x16xf32> -> vector<16x16xf32>
    %81 = arith.index_cast %c0_i32 : i32 to index
    %c0_54 = arith.constant 0 : index
    %c0_55 = arith.constant 0 : index
    %82 = vector.load %arg9[%81, %c0_54, %c0_55] : memref<4x1x16xf32, #tpu.memory_space<vmem>>, vector<1x1x16xf32>
    %83 = vector.shape_cast %82 : vector<1x1x16xf32> to vector<1x16xf32>
    %84 = vector.broadcast %83 : vector<1x16xf32> to vector<16x16xf32>
    %85 = arith.addf %80, %84 : vector<16x16xf32>
    %86 = arith.index_cast %c0_i32 : i32 to index
    %c0_56 = arith.constant 0 : index
    %c0_57 = arith.constant 0 : index
    %87 = vector.load %arg7[%86, %c0_56, %c0_57] : memref<4x64x16xf32, #tpu.memory_space<vmem>>, vector<1x64x16xf32>
    %88 = vector.shape_cast %87 : vector<1x64x16xf32> to vector<64x16xf32>
    %cst_58 = arith.constant dense<0.000000e+00> : vector<16x16xf32>
    %89 = tpu.matmul %75, %88, %cst_58 {dimension_numbers = #tpu.dot_dimension_numbers<[1], [0], [0], [1], [0, 0, 1, 1], [], []>} : vector<16x64xf32>, vector<64x16xf32>, vector<16x16xf32> -> vector<16x16xf32>
    %90 = arith.index_cast %c0_i32 : i32 to index
    %c0_59 = arith.constant 0 : index
    %c0_60 = arith.constant 0 : index
    %91 = vector.load %arg8[%90, %c0_59, %c0_60] : memref<4x64x16xf32, #tpu.memory_space<vmem>>, vector<1x64x16xf32>
    %92 = vector.shape_cast %91 : vector<1x64x16xf32> to vector<64x16xf32>
    %cst_61 = arith.constant dense<0.000000e+00> : vector<16x16xf32>
    %93 = tpu.matmul %75, %92, %cst_61 {dimension_numbers = #tpu.dot_dimension_numbers<[1], [0], [0], [1], [0, 0, 1, 1], [], []>} : vector<16x64xf32>, vector<64x16xf32>, vector<16x16xf32> -> vector<16x16xf32>
    %94 = arith.index_cast %c0_i32 : i32 to index
    %c0_62 = arith.constant 0 : index
    %c0_63 = arith.constant 0 : index
    %95 = vector.load %arg10[%94, %c0_62, %c0_63] : memref<4x1x16xf32, #tpu.memory_space<vmem>>, vector<1x1x16xf32>
    %96 = vector.shape_cast %95 : vector<1x1x16xf32> to vector<1x16xf32>
    %97 = vector.broadcast %96 : vector<1x16xf32> to vector<16x16xf32>
    %98 = arith.addf %93, %97 : vector<16x16xf32>
    %cst_64 = arith.constant dense<0.000000e+00> : vector<16x16xf32>
    %99 = tpu.matmul %85, %89, %cst_64 {dimension_numbers = #tpu.dot_dimension_numbers<[1], [1], [0], [0], [0, 0, 1, 0], [], []>} : vector<16x16xf32>, vector<16x16xf32>, vector<16x16xf32> -> vector<16x16xf32>
    %cst_65 = arith.constant 6.250000e-02 : f32
    %100 = vector.broadcast %cst_65 : f32 to vector<16x16xf32>
    %101 = arith.mulf %99, %100 : vector<16x16xf32>
    %102 = arith.addf %101, %51 : vector<16x16xf32>
    %cst_66 = arith.constant dense<0xFF800000> : vector<16xf32>
    %103 = vector.multi_reduction <maximumf>, %102, %cst_66 [1] : vector<16x16xf32> to vector<16xf32>
    %104 = vector.shape_cast %103 : vector<16xf32> to vector<16x1xf32>
    %105 = vector.broadcast %104 : vector<16x1xf32> to vector<16x16xf32>
    %106 = arith.subf %102, %105 : vector<16x16xf32>
    %107 = math.exp %106 : vector<16x16xf32>
    %cst_67 = arith.constant dense<0.000000e+00> : vector<16xf32>
    %108 = vector.multi_reduction <add>, %107, %cst_67 [1] : vector<16x16xf32> to vector<16xf32>
    %109 = vector.shape_cast %108 : vector<16xf32> to vector<16x1xf32>
    %cst_68 = arith.constant dense<0.000000e+00> : vector<16x16xf32>
    %110 = tpu.matmul %107, %98, %cst_68 {dimension_numbers = #tpu.dot_dimension_numbers<[1], [0], [0], [1], [0, 0, 1, 1], [], []>} : vector<16x16xf32>, vector<16x16xf32>, vector<16x16xf32> -> vector<16x16xf32>
    %111 = vector.broadcast %109 : vector<16x1xf32> to vector<16x16xf32>
    %112 = arith.divf %110, %111 : vector<16x16xf32>
    %113 = arith.index_cast %c0_i32 : i32 to index
    %c0_69 = arith.constant 0 : index
    %c0_70 = arith.constant 0 : index
    %114 = vector.load %arg11[%113, %c0_69, %c0_70] : memref<4x16x64xf32, #tpu.memory_space<vmem>>, vector<1x16x64xf32>
    %115 = vector.shape_cast %114 : vector<1x16x64xf32> to vector<16x64xf32>
    %cst_71 = arith.constant dense<0.000000e+00> : vector<16x64xf32>
    %116 = tpu.matmul %112, %115, %cst_71 {dimension_numbers = #tpu.dot_dimension_numbers<[1], [0], [0], [1], [0, 0, 1, 1], [], []>} : vector<16x16xf32>, vector<16x64xf32>, vector<16x64xf32> -> vector<16x64xf32>
    %117 = arith.addf %76, %116 : vector<16x64xf32>
    %c1_i32 = arith.constant 1 : i32
    %118 = arith.index_cast %c1_i32 : i32 to index
    %c0_72 = arith.constant 0 : index
    %c0_73 = arith.constant 0 : index
    %119 = vector.load %arg6[%118, %c0_72, %c0_73] : memref<4x64x16xf32, #tpu.memory_space<vmem>>, vector<1x64x16xf32>
    %120 = vector.shape_cast %119 : vector<1x64x16xf32> to vector<64x16xf32>
    %cst_74 = arith.constant dense<0.000000e+00> : vector<16x16xf32>
    %121 = tpu.matmul %75, %120, %cst_74 {dimension_numbers = #tpu.dot_dimension_numbers<[1], [0], [0], [1], [0, 0, 1, 1], [], []>} : vector<16x64xf32>, vector<64x16xf32>, vector<16x16xf32> -> vector<16x16xf32>
    %122 = arith.index_cast %c1_i32 : i32 to index
    %c0_75 = arith.constant 0 : index
    %c0_76 = arith.constant 0 : index
    %123 = vector.load %arg9[%122, %c0_75, %c0_76] : memref<4x1x16xf32, #tpu.memory_space<vmem>>, vector<1x1x16xf32>
    %124 = vector.shape_cast %123 : vector<1x1x16xf32> to vector<1x16xf32>
    %125 = vector.broadcast %124 : vector<1x16xf32> to vector<16x16xf32>
    %126 = arith.addf %121, %125 : vector<16x16xf32>
    %127 = arith.index_cast %c1_i32 : i32 to index
    %c0_77 = arith.constant 0 : index
    %c0_78 = arith.constant 0 : index
    %128 = vector.load %arg7[%127, %c0_77, %c0_78] : memref<4x64x16xf32, #tpu.memory_space<vmem>>, vector<1x64x16xf32>
    %129 = vector.shape_cast %128 : vector<1x64x16xf32> to vector<64x16xf32>
    %cst_79 = arith.constant dense<0.000000e+00> : vector<16x16xf32>
    %130 = tpu.matmul %75, %129, %cst_79 {dimension_numbers = #tpu.dot_dimension_numbers<[1], [0], [0], [1], [0, 0, 1, 1], [], []>} : vector<16x64xf32>, vector<64x16xf32>, vector<16x16xf32> -> vector<16x16xf32>
    %131 = arith.index_cast %c1_i32 : i32 to index
    %c0_80 = arith.constant 0 : index
    %c0_81 = arith.constant 0 : index
    %132 = vector.load %arg8[%131, %c0_80, %c0_81] : memref<4x64x16xf32, #tpu.memory_space<vmem>>, vector<1x64x16xf32>
    %133 = vector.shape_cast %132 : vector<1x64x16xf32> to vector<64x16xf32>
    %cst_82 = arith.constant dense<0.000000e+00> : vector<16x16xf32>
    %134 = tpu.matmul %75, %133, %cst_82 {dimension_numbers = #tpu.dot_dimension_numbers<[1], [0], [0], [1], [0, 0, 1, 1], [], []>} : vector<16x64xf32>, vector<64x16xf32>, vector<16x16xf32> -> vector<16x16xf32>
    %135 = arith.index_cast %c1_i32 : i32 to index
    %c0_83 = arith.constant 0 : index
    %c0_84 = arith.constant 0 : index
    %136 = vector.load %arg10[%135, %c0_83, %c0_84] : memref<4x1x16xf32, #tpu.memory_space<vmem>>, vector<1x1x16xf32>
    %137 = vector.shape_cast %136 : vector<1x1x16xf32> to vector<1x16xf32>
    %138 = vector.broadcast %137 : vector<1x16xf32> to vector<16x16xf32>
    %139 = arith.addf %134, %138 : vector<16x16xf32>
    %cst_85 = arith.constant dense<0.000000e+00> : vector<16x16xf32>
    %140 = tpu.matmul %126, %130, %cst_85 {dimension_numbers = #tpu.dot_dimension_numbers<[1], [1], [0], [0], [0, 0, 1, 0], [], []>} : vector<16x16xf32>, vector<16x16xf32>, vector<16x16xf32> -> vector<16x16xf32>
    %cst_86 = arith.constant 6.250000e-02 : f32
    %141 = vector.broadcast %cst_86 : f32 to vector<16x16xf32>
    %142 = arith.mulf %140, %141 : vector<16x16xf32>
    %143 = arith.addf %142, %51 : vector<16x16xf32>
    %cst_87 = arith.constant dense<0xFF800000> : vector<16xf32>
    %144 = vector.multi_reduction <maximumf>, %143, %cst_87 [1] : vector<16x16xf32> to vector<16xf32>
    %145 = vector.shape_cast %144 : vector<16xf32> to vector<16x1xf32>
    %146 = vector.broadcast %145 : vector<16x1xf32> to vector<16x16xf32>
    %147 = arith.subf %143, %146 : vector<16x16xf32>
    %148 = math.exp %147 : vector<16x16xf32>
    %cst_88 = arith.constant dense<0.000000e+00> : vector<16xf32>
    %149 = vector.multi_reduction <add>, %148, %cst_88 [1] : vector<16x16xf32> to vector<16xf32>
    %150 = vector.shape_cast %149 : vector<16xf32> to vector<16x1xf32>
    %cst_89 = arith.constant dense<0.000000e+00> : vector<16x16xf32>
    %151 = tpu.matmul %148, %139, %cst_89 {dimension_numbers = #tpu.dot_dimension_numbers<[1], [0], [0], [1], [0, 0, 1, 1], [], []>} : vector<16x16xf32>, vector<16x16xf32>, vector<16x16xf32> -> vector<16x16xf32>
    %152 = vector.broadcast %150 : vector<16x1xf32> to vector<16x16xf32>
    %153 = arith.divf %151, %152 : vector<16x16xf32>
    %154 = arith.index_cast %c1_i32 : i32 to index
    %c0_90 = arith.constant 0 : index
    %c0_91 = arith.constant 0 : index
    %155 = vector.load %arg11[%154, %c0_90, %c0_91] : memref<4x16x64xf32, #tpu.memory_space<vmem>>, vector<1x16x64xf32>
    %156 = vector.shape_cast %155 : vector<1x16x64xf32> to vector<16x64xf32>
    %cst_92 = arith.constant dense<0.000000e+00> : vector<16x64xf32>
    %157 = tpu.matmul %153, %156, %cst_92 {dimension_numbers = #tpu.dot_dimension_numbers<[1], [0], [0], [1], [0, 0, 1, 1], [], []>} : vector<16x16xf32>, vector<16x64xf32>, vector<16x64xf32> -> vector<16x64xf32>
    %158 = arith.addf %117, %157 : vector<16x64xf32>
    %c2_i32 = arith.constant 2 : i32
    %159 = arith.index_cast %c2_i32 : i32 to index
    %c0_93 = arith.constant 0 : index
    %c0_94 = arith.constant 0 : index
    %160 = vector.load %arg6[%159, %c0_93, %c0_94] : memref<4x64x16xf32, #tpu.memory_space<vmem>>, vector<1x64x16xf32>
    %161 = vector.shape_cast %160 : vector<1x64x16xf32> to vector<64x16xf32>
    %cst_95 = arith.constant dense<0.000000e+00> : vector<16x16xf32>
    %162 = tpu.matmul %75, %161, %cst_95 {dimension_numbers = #tpu.dot_dimension_numbers<[1], [0], [0], [1], [0, 0, 1, 1], [], []>} : vector<16x64xf32>, vector<64x16xf32>, vector<16x16xf32> -> vector<16x16xf32>
    %163 = arith.index_cast %c2_i32 : i32 to index
    %c0_96 = arith.constant 0 : index
    %c0_97 = arith.constant 0 : index
    %164 = vector.load %arg9[%163, %c0_96, %c0_97] : memref<4x1x16xf32, #tpu.memory_space<vmem>>, vector<1x1x16xf32>
    %165 = vector.shape_cast %164 : vector<1x1x16xf32> to vector<1x16xf32>
    %166 = vector.broadcast %165 : vector<1x16xf32> to vector<16x16xf32>
    %167 = arith.addf %162, %166 : vector<16x16xf32>
    %168 = arith.index_cast %c2_i32 : i32 to index
    %c0_98 = arith.constant 0 : index
    %c0_99 = arith.constant 0 : index
    %169 = vector.load %arg7[%168, %c0_98, %c0_99] : memref<4x64x16xf32, #tpu.memory_space<vmem>>, vector<1x64x16xf32>
    %170 = vector.shape_cast %169 : vector<1x64x16xf32> to vector<64x16xf32>
    %cst_100 = arith.constant dense<0.000000e+00> : vector<16x16xf32>
    %171 = tpu.matmul %75, %170, %cst_100 {dimension_numbers = #tpu.dot_dimension_numbers<[1], [0], [0], [1], [0, 0, 1, 1], [], []>} : vector<16x64xf32>, vector<64x16xf32>, vector<16x16xf32> -> vector<16x16xf32>
    %172 = arith.index_cast %c2_i32 : i32 to index
    %c0_101 = arith.constant 0 : index
    %c0_102 = arith.constant 0 : index
    %173 = vector.load %arg8[%172, %c0_101, %c0_102] : memref<4x64x16xf32, #tpu.memory_space<vmem>>, vector<1x64x16xf32>
    %174 = vector.shape_cast %173 : vector<1x64x16xf32> to vector<64x16xf32>
    %cst_103 = arith.constant dense<0.000000e+00> : vector<16x16xf32>
    %175 = tpu.matmul %75, %174, %cst_103 {dimension_numbers = #tpu.dot_dimension_numbers<[1], [0], [0], [1], [0, 0, 1, 1], [], []>} : vector<16x64xf32>, vector<64x16xf32>, vector<16x16xf32> -> vector<16x16xf32>
    %176 = arith.index_cast %c2_i32 : i32 to index
    %c0_104 = arith.constant 0 : index
    %c0_105 = arith.constant 0 : index
    %177 = vector.load %arg10[%176, %c0_104, %c0_105] : memref<4x1x16xf32, #tpu.memory_space<vmem>>, vector<1x1x16xf32>
    %178 = vector.shape_cast %177 : vector<1x1x16xf32> to vector<1x16xf32>
    %179 = vector.broadcast %178 : vector<1x16xf32> to vector<16x16xf32>
    %180 = arith.addf %175, %179 : vector<16x16xf32>
    %cst_106 = arith.constant dense<0.000000e+00> : vector<16x16xf32>
    %181 = tpu.matmul %167, %171, %cst_106 {dimension_numbers = #tpu.dot_dimension_numbers<[1], [1], [0], [0], [0, 0, 1, 0], [], []>} : vector<16x16xf32>, vector<16x16xf32>, vector<16x16xf32> -> vector<16x16xf32>
    %cst_107 = arith.constant 6.250000e-02 : f32
    %182 = vector.broadcast %cst_107 : f32 to vector<16x16xf32>
    %183 = arith.mulf %181, %182 : vector<16x16xf32>
    %184 = arith.addf %183, %51 : vector<16x16xf32>
    %cst_108 = arith.constant dense<0xFF800000> : vector<16xf32>
    %185 = vector.multi_reduction <maximumf>, %184, %cst_108 [1] : vector<16x16xf32> to vector<16xf32>
    %186 = vector.shape_cast %185 : vector<16xf32> to vector<16x1xf32>
    %187 = vector.broadcast %186 : vector<16x1xf32> to vector<16x16xf32>
    %188 = arith.subf %184, %187 : vector<16x16xf32>
    %189 = math.exp %188 : vector<16x16xf32>
    %cst_109 = arith.constant dense<0.000000e+00> : vector<16xf32>
    %190 = vector.multi_reduction <add>, %189, %cst_109 [1] : vector<16x16xf32> to vector<16xf32>
    %191 = vector.shape_cast %190 : vector<16xf32> to vector<16x1xf32>
    %cst_110 = arith.constant dense<0.000000e+00> : vector<16x16xf32>
    %192 = tpu.matmul %189, %180, %cst_110 {dimension_numbers = #tpu.dot_dimension_numbers<[1], [0], [0], [1], [0, 0, 1, 1], [], []>} : vector<16x16xf32>, vector<16x16xf32>, vector<16x16xf32> -> vector<16x16xf32>
    %193 = vector.broadcast %191 : vector<16x1xf32> to vector<16x16xf32>
    %194 = arith.divf %192, %193 : vector<16x16xf32>
    %195 = arith.index_cast %c2_i32 : i32 to index
    %c0_111 = arith.constant 0 : index
    %c0_112 = arith.constant 0 : index
    %196 = vector.load %arg11[%195, %c0_111, %c0_112] : memref<4x16x64xf32, #tpu.memory_space<vmem>>, vector<1x16x64xf32>
    %197 = vector.shape_cast %196 : vector<1x16x64xf32> to vector<16x64xf32>
    %cst_113 = arith.constant dense<0.000000e+00> : vector<16x64xf32>
    %198 = tpu.matmul %194, %197, %cst_113 {dimension_numbers = #tpu.dot_dimension_numbers<[1], [0], [0], [1], [0, 0, 1, 1], [], []>} : vector<16x16xf32>, vector<16x64xf32>, vector<16x64xf32> -> vector<16x64xf32>
    %199 = arith.addf %158, %198 : vector<16x64xf32>
    %c3_i32 = arith.constant 3 : i32
    %200 = arith.index_cast %c3_i32 : i32 to index
    %c0_114 = arith.constant 0 : index
    %c0_115 = arith.constant 0 : index
    %201 = vector.load %arg6[%200, %c0_114, %c0_115] : memref<4x64x16xf32, #tpu.memory_space<vmem>>, vector<1x64x16xf32>
    %202 = vector.shape_cast %201 : vector<1x64x16xf32> to vector<64x16xf32>
    %cst_116 = arith.constant dense<0.000000e+00> : vector<16x16xf32>
    %203 = tpu.matmul %75, %202, %cst_116 {dimension_numbers = #tpu.dot_dimension_numbers<[1], [0], [0], [1], [0, 0, 1, 1], [], []>} : vector<16x64xf32>, vector<64x16xf32>, vector<16x16xf32> -> vector<16x16xf32>
    %204 = arith.index_cast %c3_i32 : i32 to index
    %c0_117 = arith.constant 0 : index
    %c0_118 = arith.constant 0 : index
    %205 = vector.load %arg9[%204, %c0_117, %c0_118] : memref<4x1x16xf32, #tpu.memory_space<vmem>>, vector<1x1x16xf32>
    %206 = vector.shape_cast %205 : vector<1x1x16xf32> to vector<1x16xf32>
    %207 = vector.broadcast %206 : vector<1x16xf32> to vector<16x16xf32>
    %208 = arith.addf %203, %207 : vector<16x16xf32>
    %209 = arith.index_cast %c3_i32 : i32 to index
    %c0_119 = arith.constant 0 : index
    %c0_120 = arith.constant 0 : index
    %210 = vector.load %arg7[%209, %c0_119, %c0_120] : memref<4x64x16xf32, #tpu.memory_space<vmem>>, vector<1x64x16xf32>
    %211 = vector.shape_cast %210 : vector<1x64x16xf32> to vector<64x16xf32>
    %cst_121 = arith.constant dense<0.000000e+00> : vector<16x16xf32>
    %212 = tpu.matmul %75, %211, %cst_121 {dimension_numbers = #tpu.dot_dimension_numbers<[1], [0], [0], [1], [0, 0, 1, 1], [], []>} : vector<16x64xf32>, vector<64x16xf32>, vector<16x16xf32> -> vector<16x16xf32>
    %213 = arith.index_cast %c3_i32 : i32 to index
    %c0_122 = arith.constant 0 : index
    %c0_123 = arith.constant 0 : index
    %214 = vector.load %arg8[%213, %c0_122, %c0_123] : memref<4x64x16xf32, #tpu.memory_space<vmem>>, vector<1x64x16xf32>
    %215 = vector.shape_cast %214 : vector<1x64x16xf32> to vector<64x16xf32>
    %cst_124 = arith.constant dense<0.000000e+00> : vector<16x16xf32>
    %216 = tpu.matmul %75, %215, %cst_124 {dimension_numbers = #tpu.dot_dimension_numbers<[1], [0], [0], [1], [0, 0, 1, 1], [], []>} : vector<16x64xf32>, vector<64x16xf32>, vector<16x16xf32> -> vector<16x16xf32>
    %217 = arith.index_cast %c3_i32 : i32 to index
    %c0_125 = arith.constant 0 : index
    %c0_126 = arith.constant 0 : index
    %218 = vector.load %arg10[%217, %c0_125, %c0_126] : memref<4x1x16xf32, #tpu.memory_space<vmem>>, vector<1x1x16xf32>
    %219 = vector.shape_cast %218 : vector<1x1x16xf32> to vector<1x16xf32>
    %220 = vector.broadcast %219 : vector<1x16xf32> to vector<16x16xf32>
    %221 = arith.addf %216, %220 : vector<16x16xf32>
    %cst_127 = arith.constant dense<0.000000e+00> : vector<16x16xf32>
    %222 = tpu.matmul %208, %212, %cst_127 {dimension_numbers = #tpu.dot_dimension_numbers<[1], [1], [0], [0], [0, 0, 1, 0], [], []>} : vector<16x16xf32>, vector<16x16xf32>, vector<16x16xf32> -> vector<16x16xf32>
    %cst_128 = arith.constant 6.250000e-02 : f32
    %223 = vector.broadcast %cst_128 : f32 to vector<16x16xf32>
    %224 = arith.mulf %222, %223 : vector<16x16xf32>
    %225 = arith.addf %224, %51 : vector<16x16xf32>
    %cst_129 = arith.constant dense<0xFF800000> : vector<16xf32>
    %226 = vector.multi_reduction <maximumf>, %225, %cst_129 [1] : vector<16x16xf32> to vector<16xf32>
    %227 = vector.shape_cast %226 : vector<16xf32> to vector<16x1xf32>
    %228 = vector.broadcast %227 : vector<16x1xf32> to vector<16x16xf32>
    %229 = arith.subf %225, %228 : vector<16x16xf32>
    %230 = math.exp %229 : vector<16x16xf32>
    %cst_130 = arith.constant dense<0.000000e+00> : vector<16xf32>
    %231 = vector.multi_reduction <add>, %230, %cst_130 [1] : vector<16x16xf32> to vector<16xf32>
    %232 = vector.shape_cast %231 : vector<16xf32> to vector<16x1xf32>
    %cst_131 = arith.constant dense<0.000000e+00> : vector<16x16xf32>
    %233 = tpu.matmul %230, %221, %cst_131 {dimension_numbers = #tpu.dot_dimension_numbers<[1], [0], [0], [1], [0, 0, 1, 1], [], []>} : vector<16x16xf32>, vector<16x16xf32>, vector<16x16xf32> -> vector<16x16xf32>
    %234 = vector.broadcast %232 : vector<16x1xf32> to vector<16x16xf32>
    %235 = arith.divf %233, %234 : vector<16x16xf32>
    %236 = arith.index_cast %c3_i32 : i32 to index
    %c0_132 = arith.constant 0 : index
    %c0_133 = arith.constant 0 : index
    %237 = vector.load %arg11[%236, %c0_132, %c0_133] : memref<4x16x64xf32, #tpu.memory_space<vmem>>, vector<1x16x64xf32>
    %238 = vector.shape_cast %237 : vector<1x16x64xf32> to vector<16x64xf32>
    %cst_134 = arith.constant dense<0.000000e+00> : vector<16x64xf32>
    %239 = tpu.matmul %235, %238, %cst_134 {dimension_numbers = #tpu.dot_dimension_numbers<[1], [0], [0], [1], [0, 0, 1, 1], [], []>} : vector<16x16xf32>, vector<16x64xf32>, vector<16x64xf32> -> vector<16x64xf32>
    %240 = arith.addf %199, %239 : vector<16x64xf32>
    %c4_i32 = arith.constant 4 : i32
    %c0_135 = arith.constant 0 : index
    %c0_136 = arith.constant 0 : index
    %241 = vector.load %arg12[%c0_135, %c0_136] : memref<1x64xf32, #tpu.memory_space<vmem>>, vector<1x64xf32>
    %242 = vector.broadcast %241 : vector<1x64xf32> to vector<16x64xf32>
    %243 = arith.addf %240, %242 : vector<16x64xf32>
    %244 = vector.broadcast %15 : vector<1x64xf32> to vector<16x64xf32>
    %245 = arith.mulf %243, %244 : vector<16x64xf32>
    %246 = arith.addf %1, %245 : vector<16x64xf32>
    %247 = arith.mulf %246, %246 : vector<16x64xf32>
    %cst_137 = arith.constant dense<0.000000e+00> : vector<16xf32>
    %248 = vector.multi_reduction <add>, %247, %cst_137 [1] : vector<16x64xf32> to vector<16xf32>
    %249 = vector.shape_cast %248 : vector<16xf32> to vector<16x1xf32>
    %cst_138 = arith.constant 6.400000e+01 : f32
    %250 = vector.broadcast %cst_138 : f32 to vector<16x1xf32>
    %251 = arith.divf %249, %250 : vector<16x1xf32>
    %cst_139 = arith.constant 9.99999974E-6 : f32
    %252 = vector.broadcast %cst_139 : f32 to vector<16x1xf32>
    %253 = arith.addf %251, %252 : vector<16x1xf32>
    %254 = math.rsqrt %253 : vector<16x1xf32>
    %255 = vector.broadcast %254 : vector<16x1xf32> to vector<16x64xf32>
    %256 = arith.mulf %246, %255 : vector<16x64xf32>
    %c0_140 = arith.constant 0 : index
    %c0_141 = arith.constant 0 : index
    %257 = vector.load %arg13[%c0_140, %c0_141] : memref<1x64xf32, #tpu.memory_space<vmem>>, vector<1x64xf32>
    %258 = vector.broadcast %257 : vector<1x64xf32> to vector<16x64xf32>
    %259 = arith.mulf %256, %258 : vector<16x64xf32>
    %c0_142 = arith.constant 0 : index
    %c0_143 = arith.constant 0 : index
    %c0_144 = arith.constant 0 : index
    %260 = vector.load %arg3[%c0_142, %c0_143, %c0_144] : memref<1x8x768xf32, #tpu.memory_space<vmem>>, vector<1x8x768xf32>
    %261 = vector.shape_cast %260 : vector<1x8x768xf32> to vector<8x768xf32>
    %cst_145 = arith.constant 0.000000e+00 : f32
    %262 = vector.broadcast %cst_145 : f32 to vector<16x64xf32>
    %c0_i32_146 = arith.constant 0 : i32
    %263 = arith.index_cast %c0_i32_146 : i32 to index
    %c0_147 = arith.constant 0 : index
    %c0_148 = arith.constant 0 : index
    %264 = vector.load %arg14[%263, %c0_147, %c0_148] : memref<4x64x16xf32, #tpu.memory_space<vmem>>, vector<1x64x16xf32>
    %265 = vector.shape_cast %264 : vector<1x64x16xf32> to vector<64x16xf32>
    %cst_149 = arith.constant dense<0.000000e+00> : vector<16x16xf32>
    %266 = tpu.matmul %259, %265, %cst_149 {dimension_numbers = #tpu.dot_dimension_numbers<[1], [0], [0], [1], [0, 0, 1, 1], [], []>} : vector<16x64xf32>, vector<64x16xf32>, vector<16x16xf32> -> vector<16x16xf32>
    %267 = arith.index_cast %c0_i32_146 : i32 to index
    %c0_150 = arith.constant 0 : index
    %c0_151 = arith.constant 0 : index
    %268 = vector.load %arg15[%267, %c0_150, %c0_151] : memref<4x1x16xf32, #tpu.memory_space<vmem>>, vector<1x1x16xf32>
    %269 = vector.shape_cast %268 : vector<1x1x16xf32> to vector<1x16xf32>
    %270 = vector.broadcast %269 : vector<1x16xf32> to vector<16x16xf32>
    %271 = arith.addf %266, %270 : vector<16x16xf32>
    %272 = arith.index_cast %c0_i32_146 : i32 to index
    %c0_152 = arith.constant 0 : index
    %c0_153 = arith.constant 0 : index
    %273 = vector.load %arg16[%272, %c0_152, %c0_153] : memref<4x768x16xf32, #tpu.memory_space<vmem>>, vector<1x768x16xf32>
    %274 = vector.shape_cast %273 : vector<1x768x16xf32> to vector<768x16xf32>
    %cst_154 = arith.constant dense<0.000000e+00> : vector<8x16xf32>
    %275 = tpu.matmul %261, %274, %cst_154 {dimension_numbers = #tpu.dot_dimension_numbers<[1], [0], [0], [1], [0, 0, 1, 1], [], []>} : vector<8x768xf32>, vector<768x16xf32>, vector<8x16xf32> -> vector<8x16xf32>
    %276 = arith.index_cast %c0_i32_146 : i32 to index
    %c0_155 = arith.constant 0 : index
    %c0_156 = arith.constant 0 : index
    %277 = vector.load %arg17[%276, %c0_155, %c0_156] : memref<4x768x16xf32, #tpu.memory_space<vmem>>, vector<1x768x16xf32>
    %278 = vector.shape_cast %277 : vector<1x768x16xf32> to vector<768x16xf32>
    %cst_157 = arith.constant dense<0.000000e+00> : vector<8x16xf32>
    %279 = tpu.matmul %261, %278, %cst_157 {dimension_numbers = #tpu.dot_dimension_numbers<[1], [0], [0], [1], [0, 0, 1, 1], [], []>} : vector<8x768xf32>, vector<768x16xf32>, vector<8x16xf32> -> vector<8x16xf32>
    %280 = arith.index_cast %c0_i32_146 : i32 to index
    %c0_158 = arith.constant 0 : index
    %c0_159 = arith.constant 0 : index
    %281 = vector.load %arg18[%280, %c0_158, %c0_159] : memref<4x1x16xf32, #tpu.memory_space<vmem>>, vector<1x1x16xf32>
    %282 = vector.shape_cast %281 : vector<1x1x16xf32> to vector<1x16xf32>
    %283 = vector.broadcast %282 : vector<1x16xf32> to vector<8x16xf32>
    %284 = arith.addf %279, %283 : vector<8x16xf32>
    %cst_160 = arith.constant dense<0.000000e+00> : vector<16x8xf32>
    %285 = tpu.matmul %271, %275, %cst_160 {dimension_numbers = #tpu.dot_dimension_numbers<[1], [1], [0], [0], [0, 0, 1, 0], [], []>} : vector<16x16xf32>, vector<8x16xf32>, vector<16x8xf32> -> vector<16x8xf32>
    %cst_161 = arith.constant 0.0180421956 : f32
    %286 = vector.broadcast %cst_161 : f32 to vector<16x8xf32>
    %287 = arith.mulf %285, %286 : vector<16x8xf32>
    %cst_162 = arith.constant dense<0xFF800000> : vector<16xf32>
    %288 = vector.multi_reduction <maximumf>, %287, %cst_162 [1] : vector<16x8xf32> to vector<16xf32>
    %289 = vector.shape_cast %288 : vector<16xf32> to vector<16x1xf32>
    %290 = vector.broadcast %289 : vector<16x1xf32> to vector<16x8xf32>
    %291 = arith.subf %287, %290 : vector<16x8xf32>
    %292 = math.exp %291 : vector<16x8xf32>
    %cst_163 = arith.constant dense<0.000000e+00> : vector<16xf32>
    %293 = vector.multi_reduction <add>, %292, %cst_163 [1] : vector<16x8xf32> to vector<16xf32>
    %294 = vector.shape_cast %293 : vector<16xf32> to vector<16x1xf32>
    %cst_164 = arith.constant dense<0.000000e+00> : vector<16x16xf32>
    %295 = tpu.matmul %292, %284, %cst_164 {dimension_numbers = #tpu.dot_dimension_numbers<[1], [0], [0], [1], [0, 0, 1, 1], [], []>} : vector<16x8xf32>, vector<8x16xf32>, vector<16x16xf32> -> vector<16x16xf32>
    %296 = vector.broadcast %294 : vector<16x1xf32> to vector<16x16xf32>
    %297 = arith.divf %295, %296 : vector<16x16xf32>
    %298 = arith.index_cast %c0_i32_146 : i32 to index
    %c0_165 = arith.constant 0 : index
    %c0_166 = arith.constant 0 : index
    %299 = vector.load %arg19[%298, %c0_165, %c0_166] : memref<4x16x64xf32, #tpu.memory_space<vmem>>, vector<1x16x64xf32>
    %300 = vector.shape_cast %299 : vector<1x16x64xf32> to vector<16x64xf32>
    %cst_167 = arith.constant dense<0.000000e+00> : vector<16x64xf32>
    %301 = tpu.matmul %297, %300, %cst_167 {dimension_numbers = #tpu.dot_dimension_numbers<[1], [0], [0], [1], [0, 0, 1, 1], [], []>} : vector<16x16xf32>, vector<16x64xf32>, vector<16x64xf32> -> vector<16x64xf32>
    %302 = arith.addf %262, %301 : vector<16x64xf32>
    %c1_i32_168 = arith.constant 1 : i32
    %303 = arith.index_cast %c1_i32_168 : i32 to index
    %c0_169 = arith.constant 0 : index
    %c0_170 = arith.constant 0 : index
    %304 = vector.load %arg14[%303, %c0_169, %c0_170] : memref<4x64x16xf32, #tpu.memory_space<vmem>>, vector<1x64x16xf32>
    %305 = vector.shape_cast %304 : vector<1x64x16xf32> to vector<64x16xf32>
    %cst_171 = arith.constant dense<0.000000e+00> : vector<16x16xf32>
    %306 = tpu.matmul %259, %305, %cst_171 {dimension_numbers = #tpu.dot_dimension_numbers<[1], [0], [0], [1], [0, 0, 1, 1], [], []>} : vector<16x64xf32>, vector<64x16xf32>, vector<16x16xf32> -> vector<16x16xf32>
    %307 = arith.index_cast %c1_i32_168 : i32 to index
    %c0_172 = arith.constant 0 : index
    %c0_173 = arith.constant 0 : index
    %308 = vector.load %arg15[%307, %c0_172, %c0_173] : memref<4x1x16xf32, #tpu.memory_space<vmem>>, vector<1x1x16xf32>
    %309 = vector.shape_cast %308 : vector<1x1x16xf32> to vector<1x16xf32>
    %310 = vector.broadcast %309 : vector<1x16xf32> to vector<16x16xf32>
    %311 = arith.addf %306, %310 : vector<16x16xf32>
    %312 = arith.index_cast %c1_i32_168 : i32 to index
    %c0_174 = arith.constant 0 : index
    %c0_175 = arith.constant 0 : index
    %313 = vector.load %arg16[%312, %c0_174, %c0_175] : memref<4x768x16xf32, #tpu.memory_space<vmem>>, vector<1x768x16xf32>
    %314 = vector.shape_cast %313 : vector<1x768x16xf32> to vector<768x16xf32>
    %cst_176 = arith.constant dense<0.000000e+00> : vector<8x16xf32>
    %315 = tpu.matmul %261, %314, %cst_176 {dimension_numbers = #tpu.dot_dimension_numbers<[1], [0], [0], [1], [0, 0, 1, 1], [], []>} : vector<8x768xf32>, vector<768x16xf32>, vector<8x16xf32> -> vector<8x16xf32>
    %316 = arith.index_cast %c1_i32_168 : i32 to index
    %c0_177 = arith.constant 0 : index
    %c0_178 = arith.constant 0 : index
    %317 = vector.load %arg17[%316, %c0_177, %c0_178] : memref<4x768x16xf32, #tpu.memory_space<vmem>>, vector<1x768x16xf32>
    %318 = vector.shape_cast %317 : vector<1x768x16xf32> to vector<768x16xf32>
    %cst_179 = arith.constant dense<0.000000e+00> : vector<8x16xf32>
    %319 = tpu.matmul %261, %318, %cst_179 {dimension_numbers = #tpu.dot_dimension_numbers<[1], [0], [0], [1], [0, 0, 1, 1], [], []>} : vector<8x768xf32>, vector<768x16xf32>, vector<8x16xf32> -> vector<8x16xf32>
    %320 = arith.index_cast %c1_i32_168 : i32 to index
    %c0_180 = arith.constant 0 : index
    %c0_181 = arith.constant 0 : index
    %321 = vector.load %arg18[%320, %c0_180, %c0_181] : memref<4x1x16xf32, #tpu.memory_space<vmem>>, vector<1x1x16xf32>
    %322 = vector.shape_cast %321 : vector<1x1x16xf32> to vector<1x16xf32>
    %323 = vector.broadcast %322 : vector<1x16xf32> to vector<8x16xf32>
    %324 = arith.addf %319, %323 : vector<8x16xf32>
    %cst_182 = arith.constant dense<0.000000e+00> : vector<16x8xf32>
    %325 = tpu.matmul %311, %315, %cst_182 {dimension_numbers = #tpu.dot_dimension_numbers<[1], [1], [0], [0], [0, 0, 1, 0], [], []>} : vector<16x16xf32>, vector<8x16xf32>, vector<16x8xf32> -> vector<16x8xf32>
    %cst_183 = arith.constant 0.0180421956 : f32
    %326 = vector.broadcast %cst_183 : f32 to vector<16x8xf32>
    %327 = arith.mulf %325, %326 : vector<16x8xf32>
    %cst_184 = arith.constant dense<0xFF800000> : vector<16xf32>
    %328 = vector.multi_reduction <maximumf>, %327, %cst_184 [1] : vector<16x8xf32> to vector<16xf32>
    %329 = vector.shape_cast %328 : vector<16xf32> to vector<16x1xf32>
    %330 = vector.broadcast %329 : vector<16x1xf32> to vector<16x8xf32>
    %331 = arith.subf %327, %330 : vector<16x8xf32>
    %332 = math.exp %331 : vector<16x8xf32>
    %cst_185 = arith.constant dense<0.000000e+00> : vector<16xf32>
    %333 = vector.multi_reduction <add>, %332, %cst_185 [1] : vector<16x8xf32> to vector<16xf32>
    %334 = vector.shape_cast %333 : vector<16xf32> to vector<16x1xf32>
    %cst_186 = arith.constant dense<0.000000e+00> : vector<16x16xf32>
    %335 = tpu.matmul %332, %324, %cst_186 {dimension_numbers = #tpu.dot_dimension_numbers<[1], [0], [0], [1], [0, 0, 1, 1], [], []>} : vector<16x8xf32>, vector<8x16xf32>, vector<16x16xf32> -> vector<16x16xf32>
    %336 = vector.broadcast %334 : vector<16x1xf32> to vector<16x16xf32>
    %337 = arith.divf %335, %336 : vector<16x16xf32>
    %338 = arith.index_cast %c1_i32_168 : i32 to index
    %c0_187 = arith.constant 0 : index
    %c0_188 = arith.constant 0 : index
    %339 = vector.load %arg19[%338, %c0_187, %c0_188] : memref<4x16x64xf32, #tpu.memory_space<vmem>>, vector<1x16x64xf32>
    %340 = vector.shape_cast %339 : vector<1x16x64xf32> to vector<16x64xf32>
    %cst_189 = arith.constant dense<0.000000e+00> : vector<16x64xf32>
    %341 = tpu.matmul %337, %340, %cst_189 {dimension_numbers = #tpu.dot_dimension_numbers<[1], [0], [0], [1], [0, 0, 1, 1], [], []>} : vector<16x16xf32>, vector<16x64xf32>, vector<16x64xf32> -> vector<16x64xf32>
    %342 = arith.addf %302, %341 : vector<16x64xf32>
    %c2_i32_190 = arith.constant 2 : i32
    %343 = arith.index_cast %c2_i32_190 : i32 to index
    %c0_191 = arith.constant 0 : index
    %c0_192 = arith.constant 0 : index
    %344 = vector.load %arg14[%343, %c0_191, %c0_192] : memref<4x64x16xf32, #tpu.memory_space<vmem>>, vector<1x64x16xf32>
    %345 = vector.shape_cast %344 : vector<1x64x16xf32> to vector<64x16xf32>
    %cst_193 = arith.constant dense<0.000000e+00> : vector<16x16xf32>
    %346 = tpu.matmul %259, %345, %cst_193 {dimension_numbers = #tpu.dot_dimension_numbers<[1], [0], [0], [1], [0, 0, 1, 1], [], []>} : vector<16x64xf32>, vector<64x16xf32>, vector<16x16xf32> -> vector<16x16xf32>
    %347 = arith.index_cast %c2_i32_190 : i32 to index
    %c0_194 = arith.constant 0 : index
    %c0_195 = arith.constant 0 : index
    %348 = vector.load %arg15[%347, %c0_194, %c0_195] : memref<4x1x16xf32, #tpu.memory_space<vmem>>, vector<1x1x16xf32>
    %349 = vector.shape_cast %348 : vector<1x1x16xf32> to vector<1x16xf32>
    %350 = vector.broadcast %349 : vector<1x16xf32> to vector<16x16xf32>
    %351 = arith.addf %346, %350 : vector<16x16xf32>
    %352 = arith.index_cast %c2_i32_190 : i32 to index
    %c0_196 = arith.constant 0 : index
    %c0_197 = arith.constant 0 : index
    %353 = vector.load %arg16[%352, %c0_196, %c0_197] : memref<4x768x16xf32, #tpu.memory_space<vmem>>, vector<1x768x16xf32>
    %354 = vector.shape_cast %353 : vector<1x768x16xf32> to vector<768x16xf32>
    %cst_198 = arith.constant dense<0.000000e+00> : vector<8x16xf32>
    %355 = tpu.matmul %261, %354, %cst_198 {dimension_numbers = #tpu.dot_dimension_numbers<[1], [0], [0], [1], [0, 0, 1, 1], [], []>} : vector<8x768xf32>, vector<768x16xf32>, vector<8x16xf32> -> vector<8x16xf32>
    %356 = arith.index_cast %c2_i32_190 : i32 to index
    %c0_199 = arith.constant 0 : index
    %c0_200 = arith.constant 0 : index
    %357 = vector.load %arg17[%356, %c0_199, %c0_200] : memref<4x768x16xf32, #tpu.memory_space<vmem>>, vector<1x768x16xf32>
    %358 = vector.shape_cast %357 : vector<1x768x16xf32> to vector<768x16xf32>
    %cst_201 = arith.constant dense<0.000000e+00> : vector<8x16xf32>
    %359 = tpu.matmul %261, %358, %cst_201 {dimension_numbers = #tpu.dot_dimension_numbers<[1], [0], [0], [1], [0, 0, 1, 1], [], []>} : vector<8x768xf32>, vector<768x16xf32>, vector<8x16xf32> -> vector<8x16xf32>
    %360 = arith.index_cast %c2_i32_190 : i32 to index
    %c0_202 = arith.constant 0 : index
    %c0_203 = arith.constant 0 : index
    %361 = vector.load %arg18[%360, %c0_202, %c0_203] : memref<4x1x16xf32, #tpu.memory_space<vmem>>, vector<1x1x16xf32>
    %362 = vector.shape_cast %361 : vector<1x1x16xf32> to vector<1x16xf32>
    %363 = vector.broadcast %362 : vector<1x16xf32> to vector<8x16xf32>
    %364 = arith.addf %359, %363 : vector<8x16xf32>
    %cst_204 = arith.constant dense<0.000000e+00> : vector<16x8xf32>
    %365 = tpu.matmul %351, %355, %cst_204 {dimension_numbers = #tpu.dot_dimension_numbers<[1], [1], [0], [0], [0, 0, 1, 0], [], []>} : vector<16x16xf32>, vector<8x16xf32>, vector<16x8xf32> -> vector<16x8xf32>
    %cst_205 = arith.constant 0.0180421956 : f32
    %366 = vector.broadcast %cst_205 : f32 to vector<16x8xf32>
    %367 = arith.mulf %365, %366 : vector<16x8xf32>
    %cst_206 = arith.constant dense<0xFF800000> : vector<16xf32>
    %368 = vector.multi_reduction <maximumf>, %367, %cst_206 [1] : vector<16x8xf32> to vector<16xf32>
    %369 = vector.shape_cast %368 : vector<16xf32> to vector<16x1xf32>
    %370 = vector.broadcast %369 : vector<16x1xf32> to vector<16x8xf32>
    %371 = arith.subf %367, %370 : vector<16x8xf32>
    %372 = math.exp %371 : vector<16x8xf32>
    %cst_207 = arith.constant dense<0.000000e+00> : vector<16xf32>
    %373 = vector.multi_reduction <add>, %372, %cst_207 [1] : vector<16x8xf32> to vector<16xf32>
    %374 = vector.shape_cast %373 : vector<16xf32> to vector<16x1xf32>
    %cst_208 = arith.constant dense<0.000000e+00> : vector<16x16xf32>
    %375 = tpu.matmul %372, %364, %cst_208 {dimension_numbers = #tpu.dot_dimension_numbers<[1], [0], [0], [1], [0, 0, 1, 1], [], []>} : vector<16x8xf32>, vector<8x16xf32>, vector<16x16xf32> -> vector<16x16xf32>
    %376 = vector.broadcast %374 : vector<16x1xf32> to vector<16x16xf32>
    %377 = arith.divf %375, %376 : vector<16x16xf32>
    %378 = arith.index_cast %c2_i32_190 : i32 to index
    %c0_209 = arith.constant 0 : index
    %c0_210 = arith.constant 0 : index
    %379 = vector.load %arg19[%378, %c0_209, %c0_210] : memref<4x16x64xf32, #tpu.memory_space<vmem>>, vector<1x16x64xf32>
    %380 = vector.shape_cast %379 : vector<1x16x64xf32> to vector<16x64xf32>
    %cst_211 = arith.constant dense<0.000000e+00> : vector<16x64xf32>
    %381 = tpu.matmul %377, %380, %cst_211 {dimension_numbers = #tpu.dot_dimension_numbers<[1], [0], [0], [1], [0, 0, 1, 1], [], []>} : vector<16x16xf32>, vector<16x64xf32>, vector<16x64xf32> -> vector<16x64xf32>
    %382 = arith.addf %342, %381 : vector<16x64xf32>
    %c3_i32_212 = arith.constant 3 : i32
    %383 = arith.index_cast %c3_i32_212 : i32 to index
    %c0_213 = arith.constant 0 : index
    %c0_214 = arith.constant 0 : index
    %384 = vector.load %arg14[%383, %c0_213, %c0_214] : memref<4x64x16xf32, #tpu.memory_space<vmem>>, vector<1x64x16xf32>
    %385 = vector.shape_cast %384 : vector<1x64x16xf32> to vector<64x16xf32>
    %cst_215 = arith.constant dense<0.000000e+00> : vector<16x16xf32>
    %386 = tpu.matmul %259, %385, %cst_215 {dimension_numbers = #tpu.dot_dimension_numbers<[1], [0], [0], [1], [0, 0, 1, 1], [], []>} : vector<16x64xf32>, vector<64x16xf32>, vector<16x16xf32> -> vector<16x16xf32>
    %387 = arith.index_cast %c3_i32_212 : i32 to index
    %c0_216 = arith.constant 0 : index
    %c0_217 = arith.constant 0 : index
    %388 = vector.load %arg15[%387, %c0_216, %c0_217] : memref<4x1x16xf32, #tpu.memory_space<vmem>>, vector<1x1x16xf32>
    %389 = vector.shape_cast %388 : vector<1x1x16xf32> to vector<1x16xf32>
    %390 = vector.broadcast %389 : vector<1x16xf32> to vector<16x16xf32>
    %391 = arith.addf %386, %390 : vector<16x16xf32>
    %392 = arith.index_cast %c3_i32_212 : i32 to index
    %c0_218 = arith.constant 0 : index
    %c0_219 = arith.constant 0 : index
    %393 = vector.load %arg16[%392, %c0_218, %c0_219] : memref<4x768x16xf32, #tpu.memory_space<vmem>>, vector<1x768x16xf32>
    %394 = vector.shape_cast %393 : vector<1x768x16xf32> to vector<768x16xf32>
    %cst_220 = arith.constant dense<0.000000e+00> : vector<8x16xf32>
    %395 = tpu.matmul %261, %394, %cst_220 {dimension_numbers = #tpu.dot_dimension_numbers<[1], [0], [0], [1], [0, 0, 1, 1], [], []>} : vector<8x768xf32>, vector<768x16xf32>, vector<8x16xf32> -> vector<8x16xf32>
    %396 = arith.index_cast %c3_i32_212 : i32 to index
    %c0_221 = arith.constant 0 : index
    %c0_222 = arith.constant 0 : index
    %397 = vector.load %arg17[%396, %c0_221, %c0_222] : memref<4x768x16xf32, #tpu.memory_space<vmem>>, vector<1x768x16xf32>
    %398 = vector.shape_cast %397 : vector<1x768x16xf32> to vector<768x16xf32>
    %cst_223 = arith.constant dense<0.000000e+00> : vector<8x16xf32>
    %399 = tpu.matmul %261, %398, %cst_223 {dimension_numbers = #tpu.dot_dimension_numbers<[1], [0], [0], [1], [0, 0, 1, 1], [], []>} : vector<8x768xf32>, vector<768x16xf32>, vector<8x16xf32> -> vector<8x16xf32>
    %400 = arith.index_cast %c3_i32_212 : i32 to index
    %c0_224 = arith.constant 0 : index
    %c0_225 = arith.constant 0 : index
    %401 = vector.load %arg18[%400, %c0_224, %c0_225] : memref<4x1x16xf32, #tpu.memory_space<vmem>>, vector<1x1x16xf32>
    %402 = vector.shape_cast %401 : vector<1x1x16xf32> to vector<1x16xf32>
    %403 = vector.broadcast %402 : vector<1x16xf32> to vector<8x16xf32>
    %404 = arith.addf %399, %403 : vector<8x16xf32>
    %cst_226 = arith.constant dense<0.000000e+00> : vector<16x8xf32>
    %405 = tpu.matmul %391, %395, %cst_226 {dimension_numbers = #tpu.dot_dimension_numbers<[1], [1], [0], [0], [0, 0, 1, 0], [], []>} : vector<16x16xf32>, vector<8x16xf32>, vector<16x8xf32> -> vector<16x8xf32>
    %cst_227 = arith.constant 0.0180421956 : f32
    %406 = vector.broadcast %cst_227 : f32 to vector<16x8xf32>
    %407 = arith.mulf %405, %406 : vector<16x8xf32>
    %cst_228 = arith.constant dense<0xFF800000> : vector<16xf32>
    %408 = vector.multi_reduction <maximumf>, %407, %cst_228 [1] : vector<16x8xf32> to vector<16xf32>
    %409 = vector.shape_cast %408 : vector<16xf32> to vector<16x1xf32>
    %410 = vector.broadcast %409 : vector<16x1xf32> to vector<16x8xf32>
    %411 = arith.subf %407, %410 : vector<16x8xf32>
    %412 = math.exp %411 : vector<16x8xf32>
    %cst_229 = arith.constant dense<0.000000e+00> : vector<16xf32>
    %413 = vector.multi_reduction <add>, %412, %cst_229 [1] : vector<16x8xf32> to vector<16xf32>
    %414 = vector.shape_cast %413 : vector<16xf32> to vector<16x1xf32>
    %cst_230 = arith.constant dense<0.000000e+00> : vector<16x16xf32>
    %415 = tpu.matmul %412, %404, %cst_230 {dimension_numbers = #tpu.dot_dimension_numbers<[1], [0], [0], [1], [0, 0, 1, 1], [], []>} : vector<16x8xf32>, vector<8x16xf32>, vector<16x16xf32> -> vector<16x16xf32>
    %416 = vector.broadcast %414 : vector<16x1xf32> to vector<16x16xf32>
    %417 = arith.divf %415, %416 : vector<16x16xf32>
    %418 = arith.index_cast %c3_i32_212 : i32 to index
    %c0_231 = arith.constant 0 : index
    %c0_232 = arith.constant 0 : index
    %419 = vector.load %arg19[%418, %c0_231, %c0_232] : memref<4x16x64xf32, #tpu.memory_space<vmem>>, vector<1x16x64xf32>
    %420 = vector.shape_cast %419 : vector<1x16x64xf32> to vector<16x64xf32>
    %cst_233 = arith.constant dense<0.000000e+00> : vector<16x64xf32>
    %421 = tpu.matmul %417, %420, %cst_233 {dimension_numbers = #tpu.dot_dimension_numbers<[1], [0], [0], [1], [0, 0, 1, 1], [], []>} : vector<16x16xf32>, vector<16x64xf32>, vector<16x64xf32> -> vector<16x64xf32>
    %422 = arith.addf %382, %421 : vector<16x64xf32>
    %c4_i32_234 = arith.constant 4 : i32
    %423 = arith.addf %246, %422 : vector<16x64xf32>
    %c0_235 = arith.constant 0 : index
    %c0_236 = arith.constant 0 : index
    %424 = vector.load %arg20[%c0_235, %c0_236] : memref<1x64xf32, #tpu.memory_space<vmem>>, vector<1x64xf32>
    %425 = vector.broadcast %424 : vector<1x64xf32> to vector<16x64xf32>
    %426 = arith.addf %423, %425 : vector<16x64xf32>
    %cst_237 = arith.constant dense<0.000000e+00> : vector<16xf32>
    %427 = vector.multi_reduction <add>, %426, %cst_237 [1] : vector<16x64xf32> to vector<16xf32>
    %428 = vector.shape_cast %427 : vector<16xf32> to vector<16x1xf32>
    %cst_238 = arith.constant 6.400000e+01 : f32
    %429 = vector.broadcast %cst_238 : f32 to vector<16x1xf32>
    %430 = arith.divf %428, %429 : vector<16x1xf32>
    %431 = vector.broadcast %430 : vector<16x1xf32> to vector<16x64xf32>
    %432 = arith.subf %426, %431 : vector<16x64xf32>
    %433 = arith.mulf %432, %432 : vector<16x64xf32>
    %cst_239 = arith.constant dense<0.000000e+00> : vector<16xf32>
    %434 = vector.multi_reduction <add>, %433, %cst_239 [1] : vector<16x64xf32> to vector<16xf32>
    %435 = vector.shape_cast %434 : vector<16xf32> to vector<16x1xf32>
    %cst_240 = arith.constant 6.400000e+01 : f32
    %436 = vector.broadcast %cst_240 : f32 to vector<16x1xf32>
    %437 = arith.divf %435, %436 : vector<16x1xf32>
    %438 = vector.broadcast %430 : vector<16x1xf32> to vector<16x64xf32>
    %439 = arith.subf %426, %438 : vector<16x64xf32>
    %cst_241 = arith.constant 9.99999997E-7 : f32
    %440 = vector.broadcast %cst_241 : f32 to vector<16x1xf32>
    %441 = arith.addf %437, %440 : vector<16x1xf32>
    %442 = math.rsqrt %441 : vector<16x1xf32>
    %443 = vector.broadcast %442 : vector<16x1xf32> to vector<16x64xf32>
    %444 = arith.mulf %439, %443 : vector<16x64xf32>
    %cst_242 = arith.constant 1.000000e+00 : f32
    %445 = vector.broadcast %cst_242 : f32 to vector<1x64xf32>
    %446 = arith.addf %33, %445 : vector<1x64xf32>
    %447 = vector.broadcast %446 : vector<1x64xf32> to vector<16x64xf32>
    %448 = arith.mulf %444, %447 : vector<16x64xf32>
    %449 = vector.broadcast %45 : vector<1x64xf32> to vector<16x64xf32>
    %450 = arith.addf %448, %449 : vector<16x64xf32>
    %c0_243 = arith.constant 0 : index
    %c0_244 = arith.constant 0 : index
    %451 = vector.load %arg21[%c0_243, %c0_244] : memref<64x256xf32, #tpu.memory_space<vmem>>, vector<64x256xf32>
    %cst_245 = arith.constant dense<0.000000e+00> : vector<16x256xf32>
    %452 = tpu.matmul %450, %451, %cst_245 {dimension_numbers = #tpu.dot_dimension_numbers<[1], [0], [0], [1], [0, 0, 1, 1], [], []>} : vector<16x64xf32>, vector<64x256xf32>, vector<16x256xf32> -> vector<16x256xf32>
    %c0_246 = arith.constant 0 : index
    %c0_247 = arith.constant 0 : index
    %453 = vector.load %arg22[%c0_246, %c0_247] : memref<1x256xf32, #tpu.memory_space<vmem>>, vector<1x256xf32>
    %454 = vector.broadcast %453 : vector<1x256xf32> to vector<16x256xf32>
    %455 = arith.addf %452, %454 : vector<16x256xf32>
    %cst_248 = arith.constant 5.000000e-01 : f32
    %456 = vector.broadcast %cst_248 : f32 to vector<16x256xf32>
    %457 = arith.mulf %456, %455 : vector<16x256xf32>
    %cst_249 = arith.constant 4.471500e-02 : f32
    %458 = vector.broadcast %cst_249 : f32 to vector<16x256xf32>
    %459 = arith.mulf %458, %455 : vector<16x256xf32>
    %460 = arith.mulf %459, %455 : vector<16x256xf32>
    %461 = arith.mulf %460, %455 : vector<16x256xf32>
    %462 = arith.addf %455, %461 : vector<16x256xf32>
    %cst_250 = arith.constant 0.797884583 : f32
    %463 = vector.broadcast %cst_250 : f32 to vector<16x256xf32>
    %464 = arith.mulf %463, %462 : vector<16x256xf32>
    %465 = math.tanh %464 : vector<16x256xf32>
    %cst_251 = arith.constant 1.000000e+00 : f32
    %466 = vector.broadcast %cst_251 : f32 to vector<16x256xf32>
    %467 = arith.addf %466, %465 : vector<16x256xf32>
    %468 = arith.mulf %457, %467 : vector<16x256xf32>
    %c0_252 = arith.constant 0 : index
    %c0_253 = arith.constant 0 : index
    %469 = vector.load %arg23[%c0_252, %c0_253] : memref<256x64xf32, #tpu.memory_space<vmem>>, vector<256x64xf32>
    %cst_254 = arith.constant dense<0.000000e+00> : vector<16x64xf32>
    %470 = tpu.matmul %468, %469, %cst_254 {dimension_numbers = #tpu.dot_dimension_numbers<[1], [0], [0], [1], [0, 0, 1, 1], [], []>} : vector<16x256xf32>, vector<256x64xf32>, vector<16x64xf32> -> vector<16x64xf32>
    %c0_255 = arith.constant 0 : index
    %c0_256 = arith.constant 0 : index
    %471 = vector.load %arg24[%c0_255, %c0_256] : memref<1x64xf32, #tpu.memory_space<vmem>>, vector<1x64xf32>
    %472 = vector.broadcast %471 : vector<1x64xf32> to vector<16x64xf32>
    %473 = arith.addf %470, %472 : vector<16x64xf32>
    %474 = vector.broadcast %21 : vector<1x64xf32> to vector<16x64xf32>
    %475 = arith.mulf %473, %474 : vector<16x64xf32>
    %476 = arith.addf %426, %475 : vector<16x64xf32>
    %c0_257 = arith.constant 0 : index
    %c0_258 = arith.constant 0 : index
    %c0_259 = arith.constant 0 : index
    %477 = vector.load %arg25[%c0_257, %c0_258, %c0_259] : memref<1x16x64xf32, #tpu.memory_space<vmem>>, vector<1x16x64xf32>
    %478 = vector.shape_cast %477 : vector<1x16x64xf32> to vector<16x64xf32>
    %479 = vector.shape_cast %476 : vector<16x64xf32> to vector<1x16x64xf32>
    tpu.vector_store %arg25[%c0_257, %c0_258, %c0_259], %479 {strides = array<i32>} : memref<1x16x64xf32, #tpu.memory_space<vmem>>, vector<1x16x64xf32>,
    return
  }
  func.func @transform_0(%arg0: i32) -> (i32, i32, i32) {
    %c0_i32 = arith.constant 0 : i32
    %c0_i32_0 = arith.constant 0 : i32
    %c0_i32_1 = arith.constant 0 : i32
    return %arg0, %c0_i32, %c0_i32_0 : i32, i32, i32
  }
  func.func @transform_1(%arg0: i32) -> (i32, i32, i32) {
    %c0_i32 = arith.constant 0 : i32
    %c0_i32_0 = arith.constant 0 : i32
    %c0_i32_1 = arith.constant 0 : i32
    return %arg0, %c0_i32, %c0_i32_0 : i32, i32, i32
  }
  func.func @transform_2(%arg0: i32) -> (i32, i32, i32) {
    %c0_i32 = arith.constant 0 : i32
    %c0_i32_0 = arith.constant 0 : i32
    %c0_i32_1 = arith.constant 0 : i32
    return %arg0, %c0_i32, %c0_i32_0 : i32, i32, i32
  }
  func.func @transform_3(%arg0: i32) -> (i32, i32, i32) {
    %c0_i32 = arith.constant 0 : i32
    %c0_i32_0 = arith.constant 0 : i32
    %c0_i32_1 = arith.constant 0 : i32
    %c0_i32_2 = arith.constant 0 : i32
    return %c0_i32, %c0_i32_0, %c0_i32_1 : i32, i32, i32
  }
  func.func @transform_4(%arg0: i32) -> (i32, i32, i32) {
    %c0_i32 = arith.constant 0 : i32
    %c0_i32_0 = arith.constant 0 : i32
    %c0_i32_1 = arith.constant 0 : i32
    %c0_i32_2 = arith.constant 0 : i32
    return %c0_i32, %c0_i32_0, %c0_i32_1 : i32, i32, i32
  }
  func.func @transform_5(%arg0: i32) -> (i32, i32, i32) {
    %c0_i32 = arith.constant 0 : i32
    %c0_i32_0 = arith.constant 0 : i32
    %c0_i32_1 = arith.constant 0 : i32
    %c0_i32_2 = arith.constant 0 : i32
    return %c0_i32, %c0_i32_0, %c0_i32_1 : i32, i32, i32
  }
  func.func @transform_6(%arg0: i32) -> (i32, i32, i32) {
    %c0_i32 = arith.constant 0 : i32
    %c0_i32_0 = arith.constant 0 : i32
    %c0_i32_1 = arith.constant 0 : i32
    %c0_i32_2 = arith.constant 0 : i32
    return %c0_i32, %c0_i32_0, %c0_i32_1 : i32, i32, i32
  }
  func.func @transform_7(%arg0: i32) -> (i32, i32, i32) {
    %c0_i32 = arith.constant 0 : i32
    %c0_i32_0 = arith.constant 0 : i32
    %c0_i32_1 = arith.constant 0 : i32
    %c0_i32_2 = arith.constant 0 : i32
    return %c0_i32, %c0_i32_0, %c0_i32_1 : i32, i32, i32
  }
  func.func @transform_8(%arg0: i32) -> (i32, i32, i32) {
    %c0_i32 = arith.constant 0 : i32
    %c0_i32_0 = arith.constant 0 : i32
    %c0_i32_1 = arith.constant 0 : i32
    %c0_i32_2 = arith.constant 0 : i32
    return %c0_i32, %c0_i32_0, %c0_i32_1 : i32, i32, i32
  }
  func.func @transform_9(%arg0: i32) -> (i32, i32, i32) {
    %c0_i32 = arith.constant 0 : i32
    %c0_i32_0 = arith.constant 0 : i32
    %c0_i32_1 = arith.constant 0 : i32
    %c0_i32_2 = arith.constant 0 : i32
    return %c0_i32, %c0_i32_0, %c0_i32_1 : i32, i32, i32
  }
  func.func @transform_10(%arg0: i32) -> (i32, i32, i32) {
    %c0_i32 = arith.constant 0 : i32
    %c0_i32_0 = arith.constant 0 : i32
    %c0_i32_1 = arith.constant 0 : i32
    %c0_i32_2 = arith.constant 0 : i32
    return %c0_i32, %c0_i32_0, %c0_i32_1 : i32, i32, i32
  }
  func.func @transform_11(%arg0: i32) -> (i32, i32) {
    %c0_i32 = arith.constant 0 : i32
    %c0_i32_0 = arith.constant 0 : i32
    %c0_i32_1 = arith.constant 0 : i32
    return %c0_i32, %c0_i32_0 : i32, i32
  }
  func.func @transform_12(%arg0: i32) -> (i32, i32) {
    %c0_i32 = arith.constant 0 : i32
    %c0_i32_0 = arith.constant 0 : i32
    %c0_i32_1 = arith.constant 0 : i32
    return %c0_i32, %c0_i32_0 : i32, i32
  }
  func.func @transform_13(%arg0: i32) -> (i32, i32, i32) {
    %c0_i32 = arith.constant 0 : i32
    %c0_i32_0 = arith.constant 0 : i32
    %c0_i32_1 = arith.constant 0 : i32
    %c0_i32_2 = arith.constant 0 : i32
    return %c0_i32, %c0_i32_0, %c0_i32_1 : i32, i32, i32
  }
  func.func @transform_14(%arg0: i32) -> (i32, i32, i32) {
    %c0_i32 = arith.constant 0 : i32
    %c0_i32_0 = arith.constant 0 : i32
    %c0_i32_1 = arith.constant 0 : i32
    %c0_i32_2 = arith.constant 0 : i32
    return %c0_i32, %c0_i32_0, %c0_i32_1 : i32, i32, i32
  }
  func.func @transform_15(%arg0: i32) -> (i32, i32, i32) {
    %c0_i32 = arith.constant 0 : i32
    %c0_i32_0 = arith.constant 0 : i32
    %c0_i32_1 = arith.constant 0 : i32
    %c0_i32_2 = arith.constant 0 : i32
    return %c0_i32, %c0_i32_0, %c0_i32_1 : i32, i32, i32
  }
  func.func @transform_16(%arg0: i32) -> (i32, i32, i32) {
    %c0_i32 = arith.constant 0 : i32
    %c0_i32_0 = arith.constant 0 : i32
    %c0_i32_1 = arith.constant 0 : i32
    %c0_i32_2 = arith.constant 0 : i32
    return %c0_i32, %c0_i32_0, %c0_i32_1 : i32, i32, i32
  }
  func.func @transform_17(%arg0: i32) -> (i32, i32, i32) {
    %c0_i32 = arith.constant 0 : i32
    %c0_i32_0 = arith.constant 0 : i32
    %c0_i32_1 = arith.constant 0 : i32
    %c0_i32_2 = arith.constant 0 : i32
    return %c0_i32, %c0_i32_0, %c0_i32_1 : i32, i32, i32
  }
  func.func @transform_18(%arg0: i32) -> (i32, i32, i32) {
    %c0_i32 = arith.constant 0 : i32
    %c0_i32_0 = arith.constant 0 : i32
    %c0_i32_1 = arith.constant 0 : i32
    %c0_i32_2 = arith.constant 0 : i32
    return %c0_i32, %c0_i32_0, %c0_i32_1 : i32, i32, i32
  }
  func.func @transform_19(%arg0: i32) -> (i32, i32) {
    %c0_i32 = arith.constant 0 : i32
    %c0_i32_0 = arith.constant 0 : i32
    %c0_i32_1 = arith.constant 0 : i32
    return %c0_i32, %c0_i32_0 : i32, i32
  }
  func.func @transform_20(%arg0: i32) -> (i32, i32) {
    %c0_i32 = arith.constant 0 : i32
    %c0_i32_0 = arith.constant 0 : i32
    %c0_i32_1 = arith.constant 0 : i32
    return %c0_i32, %c0_i32_0 : i32, i32
  }
  func.func @transform_21(%arg0: i32) -> (i32, i32) {
    %c0_i32 = arith.constant 0 : i32
    %c0_i32_0 = arith.constant 0 : i32
    %c0_i32_1 = arith.constant 0 : i32
    return %c0_i32, %c0_i32_0 : i32, i32
  }
  func.func @transform_22(%arg0: i32) -> (i32, i32) {
    %c0_i32 = arith.constant 0 : i32
    %c0_i32_0 = arith.constant 0 : i32
    %c0_i32_1 = arith.constant 0 : i32
    return %c0_i32, %c0_i32_0 : i32, i32
  }
  func.func @transform_23(%arg0: i32) -> (i32, i32) {
    %c0_i32 = arith.constant 0 : i32
    %c0_i32_0 = arith.constant 0 : i32
    %c0_i32_1 = arith.constant 0 : i32
    return %c0_i32, %c0_i32_0 : i32, i32
  }
  func.func @transform_24(%arg0: i32) -> (i32, i32, i32) {
    %c0_i32 = arith.constant 0 : i32
    %c0_i32_0 = arith.constant 0 : i32
    %c0_i32_1 = arith.constant 0 : i32
    return %arg0, %c0_i32, %c0_i32_0 : i32, i32, i32
  }
}

</mosaic_0001>

<bundles_post_ra>
// kernel: tpu_custom_call.1
= control target key start
LH: loop header
LB: loop body
LE: loop exit
PB: predicated region body
PF: predicated region fallthrough
CT: control target
= control target key end

     0   :  { %s15651_s0 = inlined_call_operand.vmem [shape: f32[2,16,64], index: 0, kind: input, shape index: {}]   ;;  %s15652_s1 = inlined_call_operand.vmem [shape: f32[2,1,32], index: 1, kind: input, shape index: {}]   ;;  %s15653_s2 = inlined_call_operand.vmem [shape: f32[2,8,768], index: 2, kind: input, shape index: {}]   ;;  %s15654_s3 = inlined_call_operand.vmem [shape: f32[6,32,64], index: 3, kind: input, shape index: {}]   ;;  %s15655_s4 = inlined_call_operand.vmem [shape: f32[6,1,64], index: 4, kind: input, shape index: {}]   ;;  %s15656_s5 = inlined_call_operand.vmem [shape: f32[4,64,16], index: 5, kind: input, shape index: {}]   ;;  %s15657_s6 = inlined_call_operand.vmem [shape: f32[4,64,16], index: 6, kind: input, shape index: {}]   ;;  %s15658_s7 = inlined_call_operand.vmem [shape: f32[4,64,16], index: 7, kind: input, shape index: {}]   ;;  %s15659_s8 = inlined_call_operand.vmem [shape: f32[4,1,16], index: 8, kind: input, shape index: {}]   ;;  %s15660_s9 = inlined_call_operand.vmem [shape: f32[4,1,16], index: 9, kind: input, shape index: {}]   ;;  %s15661_s10 = inlined_call_operand.vmem [shape: f32[4,16,64], index: 10, kind: input, shape index: {}]   ;;  %s15662_s11 = inlined_call_operand.vmem [shape: f32[1,64], index: 11, kind: input, shape index: {}]   ;;  %s15663_s12 = inlined_call_operand.vmem [shape: f32[1,64], index: 12, kind: input, shape index: {}]   ;;  %s15664_s13 = inlined_call_operand.vmem [shape: f32[4,64,16], index: 13, kind: input, shape index: {}]   ;;  %s15665_s14 = inlined_call_operand.vmem [shape: f32[4,1,16], index: 14, kind: input, shape index: {}]   ;;  %s15666_s15 = inlined_call_operand.vmem [shape: f32[4,768,16], index: 15, kind: input, shape index: {}]   ;;  %s15667_s16 = inlined_call_operand.vmem [shape: f32[4,768,16], index: 16, kind: input, shape index: {}]   ;;  %s15668_s17 = inlined_call_operand.vmem [shape: f32[4,1,16], index: 17, kind: input, shape index: {}]   ;;  %s15669_s18 = inlined_call_operand.vmem [shape: f32[4,16,64], index: 18, kind: input, shape index: {}]   ;;  %s15670_s19 = inlined_call_operand.vmem [shape: f32[1,64], index: 19, kind: input, shape index: {}]   ;;  %s15671_s20 = inlined_call_operand.vmem [shape: f32[64,256], index: 20, kind: input, shape index: {}]   ;;  %s15672_s21 = inlined_call_operand.vmem [shape: f32[1,256], index: 21, kind: input, shape index: {}]   ;;  %s15673_s22 = inlined_call_operand.vmem [shape: f32[256,64], index: 22, kind: input, shape index: {}]   ;;  %s15674_s23 = inlined_call_operand.vmem [shape: f32[1,64], index: 23, kind: input, shape index: {}]   ;;  %s15675_s24 = inlined_call_operand.hbm [shape: f32[2,16,64], index: 24, kind: output, shape index: {}]  }
   0x1   :  { %15693 = sst [smem:[#allocation12_spill]] %s15651_s0 }
   0x2   :  { %15694 = sst [smem:[#allocation13_spill]] %s15652_s1 }
   0x3   :  { %15695 = sst [smem:[#allocation14_spill]] %s15653_s2 }
   0x4   :  { %15696 = sst [smem:[#allocation15_spill]] %s15654_s3 }
   0x5   :  { %15697 = sst [smem:[#allocation16_spill]] %s15655_s4 }
   0x6   :  { %15698 = sst [smem:[#allocation17_spill]] %s15656_s5 }
   0x7   :  { %15699 = sst [smem:[#allocation18_spill]] %s15657_s6 }
   0x8   :  { %15700 = sst [smem:[#allocation19_spill]] %s15658_s7 }
   0x9   :  { %15701 = sst [smem:[#allocation20_spill]] %s15659_s8 }
   0xa   :  { %15702 = sst [smem:[#allocation21_spill]] %s15660_s9 }
   0xb   :  { %15703 = sst [smem:[#allocation22_spill]] %s15661_s10 }
   0xc   :  { %15704 = sst [smem:[#allocation23_spill]] %s15674_s23 }
   0xd   :  { %15705 = sst [smem:[#allocation24_spill]] %s15675_s24 }
   0xe   :  { %29 = vsyncpa [#allocation3], 0 }
   0xf   :  { %31 = vsyncpa [#allocation3 + $0x1], 0  ;;  %s11973_s5 = smov 0   ;;  %s11975_s26 = smov 0  }
  0x10   :  { %s11977_s27 = smov 0   ;;  %s11979_s28 = smov 0  }
  0x11 LB: > { %15706 = sst [smem:[#allocation5_spill]] %s11827_s5  ;;  %s11994_s6 = sadd.s32 4294967295, %s11839_s28   ;;  %s11839_s28 = sphi %s11979_s28, %s15734_s28   ;;  %s11835_s27 = sphi %s11977_s27, %s15736_s27   ;;  %s11831_s26 = sphi %s11975_s26, %s15738_s26   ;;  %s11827_s5 = sphi %s11973_s5, %s15737_s5  }
  0x12   : > { %15707 = sst [smem:[#allocation6_spill]] %s11835_s27  ;;  %s7902_s2 = sadd.s32 4294967294, %s11839_s28  }
  0x13   : > { %15708 = sst [smem:[#allocation7_spill]] %s11839_s28  ;;  %s11998_s29 = sadd.s32 1, %s11839_s28  }
  0x14   : > { %15709 = sst [smem:[#allocation8_spill]] %s11998_s29  ;;  %s563_s0 = sadd.s32 1, %s11835_s27 }
  0x15   : > { %s560_s7 = ssub.s32 %s11839_s28, %s11998_s29  ;;  %p573_p0 = scmp.ne.s32.totalorder %s11835_s27, %s11831_s26 }
  0x16   : > { %p561_p1 = scmp.eq.s32.totalorder %s560_s7, 0  ;;  %p574_p2 = scmp.eq.s32.totalorder %s11994_s6, 1 }
  0x17   : > { %p579_p3 = scmp.ne.s32.totalorder %s11831_s26, %s11827_s5  ;;  %p580_p4 = scmp.eq.s32.totalorder %s7902_s2, 1 }
  0x18   : > { %s12009_s30 = scalar_select %p561_p1, %s11835_s27, %s563_s0  }
  0x19   : > { %p12011_p5 = por %p574_p2, %p573_p0  ;;  %p12015_p6 = por %p580_p4, %p579_p3 }
  0x1a   : > { %15710 = sst [smem:[#allocation9_spill]] %s12009_s30  ;;  %p7905_p7 = scmp.ge.s32.totalorder %s11839_s28, 1 }
  0x1b   : > { %s15711_s3 = scalar_select %p12011_p5, 1, 0 }
  0x1c   : > { %s15713_s25 = scalar_select %p12015_p6, 1, 0 }
  0x1d   : > { %15712 = sst [smem:[#allocation10_spill]] %s15711_s3  ;;  %p683_p8 = scmp.lt.s32.totalorder %s11839_s28, 3 }
  0x1e   : > { %15714 = sst [smem:[#allocation11_spill]] %s15713_s25 }
  0x1f   : > { %p684_p9 = pnand %p7905_p7, %p683_p8 }
  0x20   : > { %p757_p10 = scmp.lt.s32.totalorder (!%p684_p9), %s11994_s6, 1  ;;  %s15715_s1 = sld [smem:[#allocation15_spill]] (!%p684_p9)  ;;  %v11841_v3 = vmov (!%p684_p9), 0.0|0.0   ;;  %vm11842_vm0 = vmmov (!%p684_p9), 0   ;;  %v11843_v6 = vmov (!%p684_p9), 0.0   ;;  %vm1253_vm1 = vcmask (!%p684_p9), 523264  }
  0x21   : > { %687 = sbr.rel (%p684_p9) target bundleno = 8091 (0x1f9b), region = 116  ;;  %10437 = vmatprep.subr.bf16.mxu0 (!%p684_p9), %v11841_v3  ;;  %10455 = vmatprep.subr.bf16.mxu1 (!%p684_p9), %v11841_v3  ;;  %s15716_s29 = sld [smem:[#allocation13_spill]] (!%p684_p9)  ;;  %vm785_vm2 = vcmask (!%p684_p9), 261120   ;;  %vm1563_vm3 = vcmask (!%p684_p9), 130048   ;;  %vm4332_vm7 = vcmask (!%p684_p9), 64512  }
  0x22   : > { %9923 = vmatprep.mubr.msk.f32.mxu0 (!%p684_p9), %vm11842_vm0, %v11843_v6  ;;  %9956 = vmatprep.mubr.msk.f32.mxu1 (!%p684_p9), %vm11842_vm0, %v11843_v6  ;;  %s15717_s25 = sld [smem:[#allocation12_spill]] (!%p684_p9)  ;;  %s15719_s23 = sld [smem:[#allocation18_spill]] (!%p684_p9)  ;;  %vm12290_vm4 = vmpackc.low (!%p684_p9), %vm1563_vm3, %vm1563_vm3 }
  0x23   : > { %s15720_s4 = sld [smem:[#allocation19_spill]] (!%p684_p9)  ;;  %s15721_s0 = sld [smem:[#allocation16_spill]] (!%p684_p9) }
  0x24   : > { %s15722_s24 = sld [smem:[#allocation20_spill]] (!%p684_p9)  ;;  %s15725_s9 = sld [smem:[#allocation21_spill]] (!%p684_p9) }
  0x25   : > { %s15726_s10 = sld [smem:[#allocation22_spill]] (!%p684_p9) }
  0x26   : > { %v780_v0 = vld [vmem:[%s15715_s1] sm:$0xff] (!%p684_p9)  ;;  %v781_v1 = vld [vmem:[%s15715_s1 + $0x8] sm:$0xff] (!%p684_p9)  ;;  %v782_v2 = vld [vmem:[%s15715_s1 + $0x10] sm:$0xff] (!%p684_p9)  ;;  %s15727_s27 = sld [smem:[#allocation14_spill]] (!%p684_p9) }
  0x27   : > { %v10438_v4 = vpack.c.bf16 (!%p684_p9), %v781_v1, %v780_v0  ;;  %v783_v5 = vld [vmem:[%s15715_s1 + $0x18] sm:$0xff] (!%p684_p9)  ;;  %v7912_v16 = vld [vmem:[%s15715_s1 + $0x20] sm:$0xff] (!%p684_p9)  ;;  %v7913_v17 = vld [vmem:[%s15715_s1 + $0x28] sm:$0xff] (!%p684_p9) }
  0x28   : > { %s12037_s8 = scalar_select %p757_p10, %s11994_s6, 1  ;;  %v10441_v7 = vpack.c.bf16 %v783_v5, %v782_v2  ;;  %v10444_v19 = vpack.c.bf16 %v7913_v17, %v7912_v16  ;;  %v7914_v21 = vld [vmem:[%s15715_s1 + $0x30] sm:$0xff]  ;;  %v7915_v22 = vld [vmem:[%s15715_s1 + $0x38] sm:$0xff]  ;;  %v7918_v24 = vld [vmem:[%s15715_s1 + $0x40] sm:$0xff] }
  0x29   : > { %10439 = vmatpush3.bf16.msra.mxu0 %v10438_v4  ;;  %v10447_v23 = vpack.c.bf16 %v7915_v22, %v7914_v21  ;;  %v7919_v25 = vld [vmem:[%s15715_s1 + $0x48] sm:$0xff]  ;;  %v7920_v27 = vld [vmem:[%s15715_s1 + $0x50] sm:$0xff]  ;;  %v7921_v28 = vld [vmem:[%s15715_s1 + $0x58] sm:$0xff] }
  0x2a   : > { %s8757_s30 = sshll.u32 %s12037_s8, 4  ;;  %s764_s2 = scalar_lea.vmem %s15716_s29, %s12037_s8  ;;  %10440 = vmatprep.subr.bf16.mxu0 %v11841_v3  ;;  %v10450_v26 = vpack.c.bf16 %v7919_v25, %v7918_v24  ;;  %v10453_v29 = vpack.c.bf16 %v7921_v28, %v7920_v27  ;;  %v7930_v30 = vld [vmem:[%s15715_s1 + $0x80] sm:$0xff]  ;;  %v7931_v31 = vld [vmem:[%s15715_s1 + $0x88] sm:$0xff]  ;;  %v7932_v33 = vld [vmem:[%s15715_s1 + $0x90] sm:$0xff] }
  0x2b   : > { %s12052_s5 = scalar_lea.vmem %s15717_s25, %s8757_s30  ;;  %v772_v8 = vld [vmem:[%s764_s2] sm:$0x1]  ;;  %v10462_v32 = vpack.c.bf16 %v7931_v31, %v7930_v30  ;;  %v7933_v34 = vld [vmem:[%s15715_s1 + $0x98] sm:$0xff]  ;;  %v7925_v37 = vld [vmem:[%s15715_s1 + $0x68] sm:$0xff]  ;;  %s15718_s30 = sld [smem:[#allocation17_spill]] }
  0x2c   : > { %v12055_v9 = vld [vmem:[%s12052_s5] sm:$0xff]  ;;  %v7910_v10 = vmul.f32 -1.442695, %v772_v8  ;;  %v12058_v11 = vld [vmem:[%s12052_s5 + $0x8] sm:$0xff]  ;;  %v10465_v35 = vpack.c.bf16 %v7933_v34, %v7932_v33  ;;  %v7926_v38 = vld [vmem:[%s15715_s1 + $0x70] sm:$0xff]  ;;  %v1244_v34 = vlaneseq  ;;  %s11629_s3 = smul.u32 48, %s12037_s8 }
  0x2d   : > { %v1254_v12 = vsel %vm1253_vm1, %v12055_v9, 0.0  ;;  %10442 = vmatpush3.bf16.msra.mxu0 %v10441_v7  ;;  %v1257_v13 = vsel %vm1253_vm1, %v12058_v11, 0.0  ;;  %v7924_v36 = vld [vmem:[%s15715_s1 + $0x60] sm:$0xff]  ;;  %v7927_v40 = vld [vmem:[%s15715_s1 + $0x78] sm:$0xff]  ;;  %v7937_v53 = vld [vmem:[%s15715_s1 + $0xa8] sm:$0xff]  ;;  %s8758_s8 = sshll.u32 %s11994_s6, 8 }
  0x2e   : > { %11675 = vpow2.f32 %v7910_v10  ;;  %1255 = vadd.xlane.f32.xlu0 %v1254_v12  ;;  %10443 = vmatprep.subr.bf16.mxu0 %v11841_v3  ;;  %v10456_v39 = vpack.c.bf16 %v7925_v37, %v7924_v36  ;;  %v10459_v41 = vpack.c.bf16 %v7927_v40, %v7926_v38  ;;  %v7936_v52 = vld [vmem:[%s15715_s1 + $0xa0] sm:$0xff]  ;;  %v7938_v55 = vld [vmem:[%s15715_s1 + $0xb0] sm:$0xff]  ;;  %v7939_v56 = vld [vmem:[%s15715_s1 + $0xb8] sm:$0xff]  ;;  %s12845_s29 = scalar_lea.vmem %s15727_s27, %s11629_s3  ;;  %s754_s27 = sand.u32 1, %s11831_s26  }
  0x2f   : > { %v10468_v54 = vpack.c.bf16 %v7937_v53, %v7936_v52  ;;  %v10471_v57 = vpack.c.bf16 %v7939_v56, %v7938_v55  ;;  %v1390_v61 = vld [vmem:[%s15719_s23] sm:$0xff]  ;;  %v1391_v62 = vld [vmem:[%s15719_s23 + $0x8] sm:$0xff]  ;;  %v1393_v4 = vld [vmem:[%s15719_s23 + $0x18] sm:$0xff]  ;;  %s15730_s25 = sld [smem:[#allocation24_spill]]  ;;  %s15610_s6 = scalar_lea.sflag [#allocation3], %s754_s27 }
  0x30   : > { %10457 = vmatpush3.bf16.msra.mxu1 %v10456_v39  ;;  %v10489_v63 = vpack.c.bf16 %v1391_v62, %v1390_v61  ;;  %v1394_v10 = vld [vmem:[%s15719_s23 + $0x20] sm:$0xff]  ;;  %v1396_v16 = vld [vmem:[%s15719_s23 + $0x30] sm:$0xff]  ;;  %v1397_v17 = vld [vmem:[%s15719_s23 + $0x38] sm:$0xff]  ;;  %v12229_v39 = vshrl.u32 %v1244_v34, 7 }
  0x31   : > { %10458 = vmatprep.subr.bf16.mxu1 %v11841_v3  ;;  %v1294_v58 = vld [vmem:[%s15718_s30] sm:$0xff]  ;;  %v1295_v59 = vld [vmem:[%s15718_s30 + $0x8] sm:$0xff]  ;;  %v1296_v0 = vld [vmem:[%s15718_s30 + $0x10] sm:$0xff] }
  0x32   : > { %1258 = vadd.xlane.f32.xlu0 %v1257_v13  ;;  %v10473_v60 = vpack.c.bf16 %v1295_v59, %v1294_v58  ;;  %v1297_v1 = vld [vmem:[%s15718_s30 + $0x18] sm:$0xff]  ;;  %v1298_v7 = vld [vmem:[%s15718_s30 + $0x20] sm:$0xff]  ;;  %v1300_v13 = vld [vmem:[%s15718_s30 + $0x30] sm:$0xff] }
  0x33   : > { %v10477_v2 = vpack.c.bf16 %v1297_v1, %v1296_v0  ;;  %v7922_v33 = vld [vmem:[%s15721_s0 + $0x2] sm:$0x1]  ;;  %v7934_v40 = vld [vmem:[%s15721_s0 + $0x4] sm:$0x1]  ;;  %v1476_v55 = vld [vmem:[%s15720_s4 + $0x18] sm:$0xff] }
  0x34   : > { %10460 = vmatpush3.bf16.msra.mxu1 %v10459_v41  ;;  %v1478_v58 = vld [vmem:[%s15720_s4 + $0x28] sm:$0xff]  ;;  %v1480_v61 = vld [vmem:[%s15720_s4 + $0x38] sm:$0xff] }
  0x35   : > { %10467 = vmatprep.subr.bf16.mxu1 %v11841_v3  ;;  %s15604_s1 = scalar_lea.hbm %s15730_s25, %s8758_s8 }
  0x38   : > { %v11676_v14 = vpop.eup %11675 }
  0x39   : > { %v776_v15 = vadd.f32 1.0, %v11676_v14  ;;  %v1301_v14 = vld [vmem:[%s15718_s30 + $0x38] sm:$0xff] }
  0x3b   : > { %11677 = vrcp.f32 %v776_v15  ;;  %v10485_v15 = vpack.c.bf16 %v1301_v14, %v1300_v13 }
  0x45   : > { %v11678_v18 = vpop.eup %11677 }
  0x46   : > { %v12071_v20 = vmul.f32 %v11678_v18, %v772_v8  ;;  %v1299_v8 = vld [vmem:[%s15718_s30 + $0x28] sm:$0xff]  ;;  %v10501_v18 = vpack.c.bf16 %v1397_v17, %v1396_v16  ;;  %v7959_v16 = vld [vmem:[%s15718_s30 + $0x58] sm:$0xff] }
  0x48   : > { %9924 = vmatmul.mubr.msk.f32.vlgmr.msra.gmra.mrb[0].mxu0 %vm785_vm2, %v12071_v20  ;;  %9957 = vmatmul.mubr.msk.f32.vlgmr.msra.gmra.mrb[0].mxu1 %vm785_vm2, %v12071_v20 }
  0x49   : > { %10445 = vmatpush3.bf16.msra.mxu0 %v10444_v19  ;;  %9934 = vmatprep.mubr.msk.f32.mxu0 %vm11842_vm0, %v11843_v6  ;;  %v1473_v19 = vld [vmem:[%s15720_s4] sm:$0xff] }
  0x4a   : > { %10446 = vmatprep.subr.bf16.mxu0 %v11841_v3  ;;  %9978 = vmatprep.mubr.msk.f32.mxu1 %vm11842_vm0, %v11843_v6 }
  0x4b   : > { %10469 = vmatpush3.bf16.msra.mxu1 %v10468_v54  ;;  %v1475_v54 = vld [vmem:[%s15720_s4 + $0x10] sm:$0xff] }
  0x4c   : > { %10470 = vmatprep.subr.bf16.mxu1 %v11841_v3 }
  0x4d   : > { %10448 = vmatpush3.bf16.msra.mxu0 %v10447_v23 }
  0x4e   : > { %10449 = vmatprep.subr.bf16.mxu0 %v11841_v3 }
  0x4f   : > { %10472 = vmatpush3.bf16.msra.mxu1 %v10471_v57  ;;  %v1477_v57 = vld [vmem:[%s15720_s4 + $0x20] sm:$0xff] }
  0x50   : > { %9935 = vmatmul.mubr.msk.f32.vlgmr.msra.gmra.mrb[2].mxu0 %vm785_vm2, %v12071_v20  ;;  %10490 = vmatprep.subr.bf16.mxu1 %v10489_v63  ;;  %v10513_v59 = vpack.c.bf16 %v1478_v58, %v1477_v57  ;;  %v8007_v57 = vld [vmem:[%s15718_s30 + $0xa8] sm:$0xff] }
  0x51   : > { %10451 = vmatpush3.bf16.msra.mxu0 %v10450_v26  ;;  %9945 = vmatprep.mubr.msk.f32.mxu0 %vm11842_vm0, %v11843_v6 }
  0x52   : > { %10452 = vmatprep.subr.bf16.mxu0 %v11841_v3  ;;  %9979 = vmatmul.mubr.msk.f32.vlgmr.msra.gmra.mrb[2].mxu1 %vm785_vm2, %v12071_v20 }
  0x53   : > { %10492 = vmatpush3.bf16.msra.mxu1 %v10489_v63 }
  0x55   : > { %10454 = vmatpush3.bf16.msra.mxu0 %v10453_v29 }
  0x56   : > { %10461 = vmatprep.subr.bf16.mxu0 %v11841_v3 }
  0x58   : > { %9946 = vmatmul.mubr.msk.f32.vlgmr.msra.gmra.mrb[4].mxu0 %vm785_vm2, %v12071_v20 }
  0x59   : > { %10463 = vmatpush3.bf16.msra.mxu0 %v10462_v32  ;;  %9967 = vmatprep.mubr.msk.f32.mxu0 %vm11842_vm0, %v11843_v6 }
  0x5a   : > { %10464 = vmatprep.subr.bf16.mxu0 %v11841_v3  ;;  %v1392_v3 = vld [vmem:[%s15719_s23 + $0x10] sm:$0xff] }
  0x5b   : > { %v10493_v5 = vpack.c.bf16 %v1393_v4, %v1392_v3  ;;  %v7942_v3 = vld [vmem:[%s15722_s24] ss:$0 sm:$0xff] }
  0x5c   : > { %v7956_v4 = vld [vmem:[%s15718_s30 + $0x40] sm:$0xff] }
  0x5d   : > { %10466 = vmatpush3.bf16.msra.mxu0 %v10465_v35  ;;  %10494 = vmatprep.subr.bf16.mxu1 %v10493_v5 }
  0x5e   : > { %10474 = vmatprep.subr.bf16.mxu0 %v10473_v60  ;;  %10496 = vmatpush3.bf16.msra.mxu1 %v10493_v5  ;;  %v7957_v5 = vld [vmem:[%s15718_s30 + $0x48] sm:$0xff] }
  0x5f   : > { %v10531_v14 = vpack.c.bf16 %v7957_v5, %v7956_v4  ;;  %v8027_v4 = vld [vmem:[%s15720_s4 + $0x98] sm:$0xff] }
  0x60   : > { %9968 = vmatmul.mubr.msk.f32.vlgmr.msra.gmra.mrb[6].mxu0 %vm785_vm2, %v12071_v20  ;;  %v1474_v20 = vld [vmem:[%s15720_s4 + $0x8] sm:$0xff] }
  0x61   : > { %10476 = vmatpush3.bf16.msra.mxu0 %v10473_v60  ;;  %v10505_v21 = vpack.c.bf16 %v1474_v20, %v1473_v19  ;;  %v1479_v60 = vld [vmem:[%s15720_s4 + $0x30] sm:$0xff]  ;;  %v7960_v19 = vld [vmem:[%s15718_s30 + $0x60] sm:$0xff]  ;;  %v7961_v20 = vld [vmem:[%s15718_s30 + $0x68] sm:$0xff] }
  0x62   : > { %10478 = vmatprep.subr.bf16.mxu0 %v10477_v2  ;;  %v10517_v62 = vpack.c.bf16 %v1480_v61, %v1479_v60  ;;  %v8009_v60 = vld [vmem:[%s15718_s30 + $0xb8] sm:$0xff] }
  0x65   : > { %10480 = vmatpush3.bf16.msra.mxu0 %v10477_v2 }
  0xbb   : > { %v1256_v42 = vpop.xlane.xlu0 %1255 }
  0xbc   : > { %v1261_v43 = vmul.f32 0.015625, %v1256_v42  ;;  %v12235_v42 = vsub.s32 0, %v12229_v39 }
  0xbe   : > { %v12141_v44 = vsub.f32 %v12055_v9, %v1261_v43  ;;  %v10481_v9 = vpack.c.bf16 %v1299_v8, %v1298_v7 }
  0xbf   : > { %v1259_v45 = vpop.xlane.xlu0 %1258 }
  0xc0   : > { %v1262_v46 = vmul.f32 0.015625, %v1259_v45  ;;  %v1265_v47 = vmul.f32 %v12141_v44, %v12141_v44  ;;  %10482 = vmatprep.subr.bf16.mxu0 %v10481_v9 }
  0xc1   : > { %10484 = vmatpush3.bf16.msra.mxu0 %v10481_v9 }
  0xc2   : > { %v12146_v48 = vsub.f32 %v12058_v11, %v1262_v46  ;;  %v1267_v49 = vsel %vm1253_vm1, %v1265_v47, 0.0  ;;  %v1395_v11 = vld [vmem:[%s15719_s23 + $0x28] sm:$0xff]  ;;  %10486 = vmatprep.subr.bf16.mxu0 %v10485_v15 }
  0xc3   : > { %1268 = vadd.xlane.f32.xlu1 %v1267_v49  ;;  %v10497_v12 = vpack.c.bf16 %v1395_v11, %v1394_v10 }
  0xc4   : > { %v1266_v50 = vmul.f32 %v12146_v48, %v12146_v48 }
  0xc5   : > { %10498 = vmatprep.subr.bf16.mxu1 %v10497_v12  ;;  %10488 = vmatpush3.bf16.msra.mxu0 %v10485_v15  ;;  %v7958_v15 = vld [vmem:[%s15718_s30 + $0x50] sm:$0xff] }
  0xc6   : > { %v1270_v51 = vsel %vm1253_vm1, %v1266_v50, 0.0  ;;  %10500 = vmatpush3.bf16.msra.mxu1 %v10497_v12  ;;  %10506 = vmatprep.subr.bf16.mxu0 %v10505_v21 }
  0xc7   : > { %1271 = vadd.xlane.f32.xlu1 %v1270_v51  ;;  %10502 = vmatprep.subr.bf16.mxu1 %v10501_v18 }
  0xca   : > { %10504 = vmatpush3.bf16.msra.mxu1 %v10501_v18  ;;  %v10535_v18 = vpack.c.bf16 %v7959_v16, %v7958_v15  ;;  %v8047_v15 = vld [vmem:[%s15718_s30 + $0xc8] sm:$0xff] }
 0x11b   : > { %v12221_v22 = vpop.f32.mrb[0].mxu0  ;;  %v12275_v63 = vpop.f32.mrb[0].mxu1 }
 0x11c   : > { %v9925_v23 = vpop.f32.mrb[1].mxu0  ;;  %v9958_v0 = vpop.f32.mrb[1].mxu1 }
 0x11d   : > { %v10539_v23 = vpack.c.bf16 %v7961_v20, %v7960_v19  ;;  %v8025_v0 = vld [vmem:[%s15720_s4 + $0x88] sm:$0xff]  ;;  %v8050_v20 = vld [vmem:[%s15718_s30 + $0xe0] sm:$0xff] }
 0x123   : > { %v12223_v24 = vpop.f32.mrb[2].mxu0 }
 0x124   : > { %v9936_v25 = vpop.f32.mrb[3].mxu0 }
 0x125   : > { %v12277_v1 = vpop.f32.mrb[2].mxu1  ;;  %v7962_v25 = vld [vmem:[%s15718_s30 + $0x70] sm:$0xff] }
 0x126   : > { %v9980_v2 = vpop.f32.mrb[3].mxu1 }
 0x12b   : > { %v1009_v26 = vpop.f32.mrb[4].mxu0 }
 0x12c   : > { %v9947_v27 = vpop.f32.mrb[5].mxu0  ;;  %v1010_v37 = vadd.f32 %v7922_v33, %v1009_v26  ;;  %v7963_v26 = vld [vmem:[%s15718_s30 + $0x78] sm:$0xff]  ;;  %v7979_v33 = vld [vmem:[%s15720_s4 + $0x48] sm:$0xff] }
 0x12e   : > { %v1281_v41 = vadd.f32 1.0, %v1010_v37  ;;  %v7980_v37 = vld [vmem:[%s15720_s4 + $0x50] sm:$0xff] }
 0x130   : > { %v1285_v45 = vrot.slane %v1281_v41, %v12235_v42  ;;  %v7982_v41 = vld [vmem:[%s15720_s4 + $0x60] sm:$0xff] }
 0x133   : > { %v1163_v28 = vpop.f32.mrb[6].mxu0 }
 0x134   : > { %v9969_v29 = vpop.f32.mrb[7].mxu0  ;;  %v1164_v43 = vadd.f32 %v7934_v40, %v1163_v28 }
 0x136   : > { %v1291_v49 = vrot.slane %v1164_v43, %v12235_v42  ;;  %v7983_v43 = vld [vmem:[%s15720_s4 + $0x68] sm:$0xff] }
 0x150   : > { %v1269_v30 = vpop.xlane.xlu1 %1268 }
 0x151   : > { %v1273_v31 = vmul.f32 0.015625, %v1269_v30 }
 0x153   : > { %v1275_v32 = vadd.f32 1e-06, %v1273_v31  ;;  %v10543_v31 = vpack.c.bf16 %v7963_v26, %v7962_v25  ;;  %v8052_v25 = vld [vmem:[%s15718_s30 + $0xf0] sm:$0xff]  ;;  %v8053_v26 = vld [vmem:[%s15718_s30 + $0xf8] sm:$0xff] }
 0x154   : > { %v1272_v35 = vpop.xlane.xlu1 %1271 }
 0x155   : > { %11679 = vrsqrt.f32 %v1275_v32  ;;  %v1274_v36 = vmul.f32 0.015625, %v1272_v35  ;;  %v7978_v32 = vld [vmem:[%s15720_s4 + $0x40] sm:$0xff] }
 0x157   : > { %v1276_v38 = vadd.f32 1e-06, %v1274_v36  ;;  %v10563_v36 = vpack.c.bf16 %v7979_v33, %v7978_v32  ;;  %v8071_v32 = vld [vmem:[%s15720_s4 + $0xd8] sm:$0xff] }
 0x159   : > { %11681 = vrsqrt.f32 %v1276_v38  ;;  %v7981_v38 = vld [vmem:[%s15720_s4 + $0x58] sm:$0xff] }
 0x15a   : > { %v10567_v40 = vpack.c.bf16 %v7981_v38, %v7980_v37  ;;  %v8074_v38 = vld [vmem:[%s15720_s4 + $0xf0] sm:$0xff] }
 0x15f   : > { %v11680_v46 = vpop.eup %11679 }
 0x160   : > { %v1279_v47 = vmul.f32 %v11680_v46, %v12141_v44  ;;  %v7984_v46 = vld [vmem:[%s15720_s4 + $0x70] sm:$0xff] }
 0x162   : > { %v1286_v50 = vmul.f32 %v1285_v45, %v1279_v47  ;;  %v7985_v47 = vld [vmem:[%s15720_s4 + $0x78] sm:$0xff] }
 0x163   : > { %v11682_v51 = vpop.eup %11681 }
 0x164   : > { %v1280_v52 = vmul.f32 %v11682_v51, %v12146_v48  ;;  %v12241_v53 = vadd.f32 %v1291_v49, %v1286_v50  ;;  %v10509_v48 = vpack.c.bf16 %v1476_v55, %v1475_v54  ;;  %v8002_v50 = vld [vmem:[%s15718_s30 + $0x80] sm:$0xff]  ;;  %v8003_v51 = vld [vmem:[%s15718_s30 + $0x88] sm:$0xff]  ;;  %v8004_v54 = vld [vmem:[%s15718_s30 + $0x90] sm:$0xff] }
 0x165   : > { %v8005_v55 = vld [vmem:[%s15718_s30 + $0x98] sm:$0xff] }
 0x166   : > { %v1287_v56 = vmul.f32 %v1285_v45, %v1280_v52  ;;  %9997 = vmatprep.mubr.msk.f32.mxu0 %vm1253_vm1, %v12241_v53  ;;  %10016 = vmatprep.mubr.msk.f32.mxu1 %vm1253_vm1, %v12241_v53  ;;  %v10571_v45 = vpack.c.bf16 %v7983_v43, %v7982_v41  ;;  %v10597_v52 = vpack.c.bf16 %v8003_v51, %v8002_v50  ;;  %v1246_v43 = vadd.s32 8, %v12229_v39 }
 0x168   : > { %v12253_v44 = vadd.f32 %v1291_v49, %v1287_v56  ;;  %v10575_v49 = vpack.c.bf16 %v7985_v47, %v7984_v46  ;;  %v10601_v56 = vpack.c.bf16 %v8005_v55, %v8004_v54  ;;  %v11844_v47 = vmov -1e+30  }
 0x16a   : > { %9998 = vmatmul.mubr.msk.f32.vlgmr.msra.gmra.mrb[8].mxu0 %vm1253_vm1, %v12253_v44  ;;  %10017 = vmatmul.mubr.msk.f32.vlgmr.msra.gmra.mrb[4].mxu1 %vm1253_vm1, %v12253_v44 }
 0x16b   : > { %10508 = vmatpush3.bf16.msra.mxu0 %v10505_v21  ;;  %10035 = vmatprep.mubr.msk.f32.mxu0 %vm1253_vm1, %v12241_v53  ;;  %v7947_v21 = vld [vmem:[%s15725_s9] ss:$0 sm:$0xff] }
 0x16c   : > { %10510 = vmatprep.subr.bf16.mxu0 %v10509_v48 }
 0x16f   : > { %10512 = vmatpush3.bf16.msra.mxu0 %v10509_v48  ;;  %v8006_v48 = vld [vmem:[%s15718_s30 + $0xa0] sm:$0xff] }
 0x170   : > { %10514 = vmatprep.subr.bf16.mxu0 %v10513_v59  ;;  %v10605_v58 = vpack.c.bf16 %v8007_v57, %v8006_v48  ;;  %v12479_v57 = vld [vmem:[%s15722_s24 + $0x1] ss:$0 sm:$0xff] }
 0x173   : > { %10516 = vmatpush3.bf16.msra.mxu0 %v10513_v59  ;;  %v8008_v59 = vld [vmem:[%s15718_s30 + $0xb0] sm:$0xff] }
 0x174   : > { %10518 = vmatprep.subr.bf16.mxu0 %v10517_v62  ;;  %v10609_v61 = vpack.c.bf16 %v8009_v60, %v8008_v59 }
 0x177   : > { %10520 = vmatpush3.bf16.msra.mxu0 %v10517_v62  ;;  %v8024_v62 = vld [vmem:[%s15720_s4 + $0x80] sm:$0xff] }
 0x178   : > { %v10629_v2 = vpack.c.bf16 %v8025_v0, %v8024_v62 }
 0x17a   : > { %10036 = vmatmul.mubr.msk.f32.vlgmr.msra.gmra.mrb[10].mxu0 %vm1253_vm1, %v12253_v44 }
 0x23d   : > { %v9999_v7 = vpop.f32.mrb[8].mxu0  ;;  %v10018_v8 = vpop.f32.mrb[4].mxu1 }
 0x23e   : > { %v1381_v9 = vpop.f32.mrb[9].mxu0  ;;  %v1464_v10 = vpop.f32.mrb[5].mxu1  ;;  %v1387_v17 = vadd.f32 %v9999_v7, %v7942_v3  ;;  %v8028_v7 = vld [vmem:[%s15720_s4 + $0xa0] sm:$0xff] }
 0x23f   : > { %v1382_v12 = vadd.f32 %v7942_v3, %v1381_v9  ;;  %v10521_v13 = vpack.c.bf16 %v10018_v8, %v1464_v10  ;;  %v8026_v3 = vld [vmem:[%s15720_s4 + $0x90] sm:$0xff]  ;;  %v8029_v8 = vld [vmem:[%s15720_s4 + $0xa8] sm:$0xff] }
 0x240   : > { %v10633_v5 = vpack.c.bf16 %v8027_v4, %v8026_v3  ;;  %v10637_v9 = vpack.c.bf16 %v8029_v8, %v8028_v7  ;;  %v8030_v10 = vld [vmem:[%s15720_s4 + $0xb0] sm:$0xff]  ;;  %v7968_v4 = vld [vmem:[%s15719_s23 + $0x40] sm:$0xff] }
 0x241   : > { %10523 = vmatprep.subr.msk.bf16.mxu1 %vm12290_vm4, %v10521_v13  ;;  %10042 = vmatprep.mubr.msk.f32.mxu1 %vm1563_vm3, %v1382_v12  ;;  %v8031_v12 = vld [vmem:[%s15720_s4 + $0xb8] sm:$0xff] }
 0x242   : > { %10526 = vmatpush3.bf16.xpose.msk.msra.mxu1 %vm12290_vm4, %v10521_v13  ;;  %v10641_v13 = vpack.c.bf16 %v8031_v12, %v8030_v10 }
 0x243   : > { %10532 = vmatprep.subr.bf16.mxu1 %v10531_v14 }
 0x249   : > { %10043 = vmatmul.mubr.msk.f32.vlgmr.msra.gmra.mrb[6].mxu1 %vm1563_vm3, %v1387_v17  ;;  %v8048_v17 = vld [vmem:[%s15718_s30 + $0xd0] sm:$0xff] }
 0x24a   : > { %10534 = vmatpush3.bf16.msra.mxu1 %v10531_v14  ;;  %10068 = vmatprep.mubr.msk.f32.mxu1 %vm1253_vm1, %v12241_v53  ;;  %v8046_v14 = vld [vmem:[%s15718_s30 + $0xc0] sm:$0xff] }
 0x24b   : > { %10536 = vmatprep.subr.bf16.mxu1 %v10535_v18  ;;  %v10659_v16 = vpack.c.bf16 %v8047_v15, %v8046_v14  ;;  %v8033_v14 = vld [vmem:[%s15725_s9 + $0x2] ss:$0 sm:$0xff] }
 0x24d   : > { %v10037_v27 = vpop.f32.mrb[10].mxu0 }
 0x24e   : > { %v1560_v28 = vadd.f32 %v10037_v27, %v7947_v21  ;;  %v1554_v29 = vpop.f32.mrb[11].mxu0  ;;  %10538 = vmatpush3.bf16.msra.mxu1 %v10535_v18  ;;  %v8049_v18 = vld [vmem:[%s15718_s30 + $0xd8] sm:$0xff]  ;;  %v10671_v27 = vpack.c.bf16 %v8053_v26, %v8052_v25  ;;  %v8077_v26 = vld [vmem:[%s15725_s9 + $0x3] ss:$0 sm:$0xff] }
 0x24f   : > { %v1555_v30 = vadd.f32 %v7947_v21, %v1554_v29  ;;  %10540 = vmatprep.subr.bf16.mxu1 %v10539_v23  ;;  %v10663_v19 = vpack.c.bf16 %v8049_v18, %v8048_v17  ;;  %v8051_v21 = vld [vmem:[%s15718_s30 + $0xe8] sm:$0xff] }
 0x250   : > { %v8069_v29 = vld [vmem:[%s15720_s4 + $0xc8] sm:$0xff] }
 0x251   : > { %v10527_v35 = vpack.c.bf16 %v1560_v28, %v1555_v30  ;;  %v8068_v28 = vld [vmem:[%s15720_s4 + $0xc0] sm:$0xff] }
 0x252   : > { %10542 = vmatpush3.bf16.msra.mxu1 %v10539_v23  ;;  %v10667_v23 = vpack.c.bf16 %v8051_v21, %v8050_v20  ;;  %v10691_v30 = vpack.c.bf16 %v8069_v29, %v8068_v28  ;;  %v12513_v20 = vld [vmem:[%s15722_s24 + $0x3] ss:$0 sm:$0xff] }
 0x253   : > { %10528 = vmatprep.subr.bf16.mxu0 %v10527_v35  ;;  %10544 = vmatprep.subr.bf16.mxu1 %v10543_v31 }
 0x254   : > { %10530 = vmatpush3.bf16.msra.mxu0 %v10527_v35  ;;  %v8072_v35 = vld [vmem:[%s15720_s4 + $0xe0] sm:$0xff] }
 0x256   : > { %10546 = vmatpush3.bf16.msra.mxu1 %v10543_v31  ;;  %v8070_v31 = vld [vmem:[%s15720_s4 + $0xd0] sm:$0xff] }
 0x257   : > { %10564 = vmatprep.subr.bf16.mxu1 %v10563_v36  ;;  %v10695_v33 = vpack.c.bf16 %v8071_v32, %v8070_v31 }
 0x259   : > { %10069 = vmatmul.mubr.msk.f32.vlgmr.msra.gmra.mrb[8].mxu1 %vm1253_vm1, %v12253_v44 }
 0x25a   : > { %10566 = vmatpush3.bf16.msra.mxu1 %v10563_v36  ;;  %10106 = vmatprep.mubr.msk.f32.mxu1 %vm1253_vm1, %v12241_v53  ;;  %v8073_v36 = vld [vmem:[%s15720_s4 + $0xe8] sm:$0xff] }
 0x25b   : > { %10568 = vmatprep.subr.bf16.mxu1 %v10567_v40  ;;  %v10699_v37 = vpack.c.bf16 %v8073_v36, %v8072_v35 }
 0x25e   : > { %10570 = vmatpush3.bf16.msra.mxu1 %v10567_v40  ;;  %v8075_v40 = vld [vmem:[%s15720_s4 + $0xf8] sm:$0xff]  ;;  %s15728_s4 = sld [smem:[#allocation23_spill]] }
 0x25f   : > { %10572 = vmatprep.subr.bf16.mxu1 %v10571_v45  ;;  %v10703_v41 = vpack.c.bf16 %v8075_v40, %v8074_v38  ;;  %v7970_v40 = vld [vmem:[%s15719_s23 + $0x50] sm:$0xff] }
 0x262   : > { %10574 = vmatpush3.bf16.msra.mxu1 %v10571_v45  ;;  %v1248_v45 = vand.u32 127, %v1244_v34 }
 0x263   : > { %10576 = vmatprep.subr.bf16.mxu1 %v10575_v49 }
 0x264   : > { %vm1250_vm5 = vcmp.le.s32.totalorder %v1248_v45, %v1246_v43  ;;  %vm1249_vm6 = vcmp.le.s32.totalorder %v1248_v45, %v12229_v39 }
 0x266   : > { %10578 = vmatpush3.bf16.msra.mxu1 %v10575_v49  ;;  %v12468_v49 = vsel %vm1250_vm5, 0.0, %v11844_v47 }
 0x267   : > { %10598 = vmatprep.subr.bf16.mxu1 %v10597_v52 }
 0x269   : > { %10107 = vmatmul.mubr.msk.f32.vlgmr.msra.gmra.mrb[10].mxu1 %vm1253_vm1, %v12253_v44 }
 0x26a   : > { %10600 = vmatpush3.bf16.msra.mxu1 %v10597_v52  ;;  %10153 = vmatprep.mubr.msk.f32.mxu1 %vm1253_vm1, %v12241_v53  ;;  %v12470_v52 = vsel %vm1249_vm6, 0.0, %v11844_v47  ;;  %v7972_v47 = vld [vmem:[%s15719_s23 + $0x60] sm:$0xff] }
 0x26b   : > { %10602 = vmatprep.subr.bf16.mxu1 %v10601_v56 }
 0x26e   : > { %10604 = vmatpush3.bf16.msra.mxu1 %v10601_v56 }
 0x26f   : > { %10606 = vmatprep.subr.bf16.mxu1 %v10605_v58 }
 0x272   : > { %10608 = vmatpush3.bf16.msra.mxu1 %v10605_v58 }
 0x273   : > { %10610 = vmatprep.subr.bf16.mxu1 %v10609_v61 }
 0x276   : > { %10612 = vmatpush3.bf16.msra.mxu1 %v10609_v61  ;;  %v7987_v61 = vld [vmem:[%s15725_s9 + $0x1] ss:$0 sm:$0xff]  ;;  %s11845_s9 = smov [#allocation2]  }
 0x277   : > { %10630 = vmatprep.subr.bf16.mxu1 %v10629_v2 }
 0x279   : > { %10154 = vmatmul.mubr.msk.f32.vlgmr.msra.gmra.mrb[12].mxu1 %vm1253_vm1, %v12253_v44 }
 0x27a   : > { %10632 = vmatpush3.bf16.msra.mxu1 %v10629_v2  ;;  %10191 = vmatprep.mubr.msk.f32.mxu1 %vm1253_vm1, %v12241_v53 }
 0x27b   : > { %10634 = vmatprep.subr.bf16.mxu1 %v10633_v5 }
 0x27e   : > { %10636 = vmatpush3.bf16.msra.mxu1 %v10633_v5  ;;  %v7969_v5 = vld [vmem:[%s15719_s23 + $0x48] sm:$0xff] }
 0x27f   : > { %10638 = vmatprep.subr.bf16.mxu1 %v10637_v9  ;;  %v10547_v7 = vpack.c.bf16 %v7969_v5, %v7968_v4 }
 0x281   : > { %10548 = vmatprep.subr.bf16.mxu0 %v10547_v7 }
 0x282   : > { %10640 = vmatpush3.bf16.msra.mxu1 %v10637_v9  ;;  %v12498_v9 = vld [vmem:[%s15722_s24 + $0x2] ss:$0 sm:$0xff] }
 0x283   : > { %10642 = vmatprep.subr.bf16.mxu1 %v10641_v13 }
 0x286   : > { %10644 = vmatpush3.bf16.msra.mxu1 %v10641_v13 }
 0x287   : > { %10660 = vmatprep.subr.bf16.mxu1 %v10659_v16 }
 0x289   : > { %10192 = vmatmul.mubr.msk.f32.vlgmr.msra.gmra.mrb[14].mxu1 %vm1253_vm1, %v12253_v44 }
 0x28a   : > { %10662 = vmatpush3.bf16.msra.mxu1 %v10659_v16  ;;  %10231 = vmatprep.mubr.msk.f32.mxu1 %vm1253_vm1, %v12241_v53 }
 0x28b   : > { %10664 = vmatprep.subr.bf16.mxu1 %v10663_v19 }
 0x28e   : > { %10666 = vmatpush3.bf16.msra.mxu1 %v10663_v19 }
 0x28f   : > { %10668 = vmatprep.subr.bf16.mxu1 %v10667_v23 }
 0x292   : > { %10670 = vmatpush3.bf16.msra.mxu1 %v10667_v23 }
 0x293   : > { %10672 = vmatprep.subr.bf16.mxu1 %v10671_v27 }
 0x296   : > { %10674 = vmatpush3.bf16.msra.mxu1 %v10671_v27 }
 0x297   : > { %10692 = vmatprep.subr.bf16.mxu1 %v10691_v30 }
 0x299   : > { %10232 = vmatmul.mubr.msk.f32.vlgmr.msra.gmra.mrb[16].mxu1 %vm1253_vm1, %v12253_v44 }
 0x29a   : > { %10694 = vmatpush3.bf16.msra.mxu1 %v10691_v30  ;;  %10269 = vmatprep.mubr.msk.f32.mxu1 %vm1253_vm1, %v12241_v53 }
 0x29b   : > { %10696 = vmatprep.subr.bf16.mxu1 %v10695_v33 }
 0x29e   : > { %10698 = vmatpush3.bf16.msra.mxu1 %v10695_v33 }
 0x29f   : > { %10700 = vmatprep.subr.bf16.mxu1 %v10699_v37 }
 0x2a2   : > { %10702 = vmatpush3.bf16.msra.mxu1 %v10699_v37 }
 0x2a3   : > { %10704 = vmatprep.subr.bf16.mxu1 %v10703_v41 }
 0x2a6   : > { %10706 = vmatpush3.bf16.msra.mxu1 %v10703_v41  ;;  %v7971_v41 = vld [vmem:[%s15719_s23 + $0x58] sm:$0xff] }
 0x2a7   : > { %v10551_v45 = vpack.c.bf16 %v7971_v41, %v7970_v40 }
 0x2a9   : > { %10270 = vmatmul.mubr.msk.f32.vlgmr.msra.gmra.mrb[18].mxu1 %vm1253_vm1, %v12253_v44 }
 0x31c   : > { %v10044_v46 = vpop.f32.mrb[6].mxu1 }
 0x31d   : > { %v1652_v50 = vmul.f32 0.0625, %v10044_v46  ;;  %v1642_v51 = vpop.f32.mrb[7].mxu1 }
 0x31e   : > { %v1651_v54 = vmul.f32 0.0625, %v1642_v51 }
 0x31f   : > { %v1654_v55 = vadd.f32 %v1652_v50, %v12468_v49  ;;  %v7973_v50 = vld [vmem:[%s15719_s23 + $0x68] sm:$0xff] }
 0x320   : > { %v1653_v56 = vadd.f32 %v1651_v54, %v12470_v52  ;;  %v10555_v51 = vpack.c.bf16 %v7973_v50, %v7972_v47  ;;  %v7974_v54 = vld [vmem:[%s15719_s23 + $0x70] sm:$0xff]  ;;  %v8014_v47 = vld [vmem:[%s15719_s23 + $0x80] sm:$0xff]  ;;  %v8015_v50 = vld [vmem:[%s15719_s23 + $0x88] sm:$0xff] }
 0x321   : > { %v1658_v48 = vsel %vm1563_vm3, %v1654_v55, -inf }
 0x322   : > { %1659 = vmax.xlane.f32.xlu1 %v1658_v48  ;;  %v1655_v34 = vsel %vm1563_vm3, %v1653_v56, -inf }
 0x323   : > { %1656 = vmax.xlane.f32.xlu0 %v1655_v34 }
 0x32c   : > { %v10070_v58 = vpop.f32.mrb[8].mxu1 }
 0x32d   : > { %v12482_v59 = vadd.f32 %v10070_v58, %v12479_v57  ;;  %v1843_v60 = vpop.f32.mrb[9].mxu1 }
 0x32e   : > { %v1844_v48 = vadd.f32 %v12479_v57, %v1843_v60 }
 0x33c   : > { %v10108_v62 = vpop.f32.mrb[10].mxu1 }
 0x33d   : > { %v2025_v0 = vadd.f32 %v10108_v62, %v7987_v61  ;;  %v2019_v2 = vpop.f32.mrb[11].mxu1 }
 0x33e   : > { %v2020_v3 = vadd.f32 %v7987_v61, %v2019_v2 }
 0x340   : > { %v12493_v8 = vpack.c.bf16 %v2025_v0, %v2020_v3 }
 0x34c   : > { %v10155_v10 = vpop.f32.mrb[12].mxu1 }
 0x34d   : > { %v12501_v12 = vadd.f32 %v10155_v10, %v12498_v9  ;;  %v12503_v13 = vpop.f32.mrb[13].mxu1 }
 0x35c   : > { %v10193_v15 = vpop.f32.mrb[14].mxu1 }
 0x35d   : > { %v2652_v16 = vadd.f32 %v10193_v15, %v8033_v14  ;;  %v2646_v17 = vpop.f32.mrb[15].mxu1 }
 0x35e   : > { %v2647_v18 = vadd.f32 %v8033_v14, %v2646_v17 }
 0x360   : > { %v12508_v19 = vpack.c.bf16 %v2652_v16, %v2647_v18 }
 0x36c   : > { %v10233_v21 = vpop.f32.mrb[16].mxu1 }
 0x36d   : > { %v12516_v23 = vadd.f32 %v10233_v21, %v12513_v20  ;;  %v12518_v25 = vpop.f32.mrb[17].mxu1 }
 0x37c   : > { %v10271_v27 = vpop.f32.mrb[18].mxu1 }
 0x37d   : > { %v3200_v28 = vadd.f32 %v10271_v27, %v8077_v26  ;;  %v3194_v29 = vpop.f32.mrb[19].mxu1 }
 0x37e   : > { %v3195_v30 = vadd.f32 %v8077_v26, %v3194_v29 }
 0x380   : > { %v12523_v31 = vpack.c.bf16 %v3200_v28, %v3195_v30  ;;  %v7996_v30 = vld [vmem:[%s15726_s10 + $0x10] sm:$0xff] }
 0x3af   : > { %v1660_v32 = vpop.xlane.xlu1 %1659 }
 0x3b0   : > { %v1662_v33 = vsub.f32 %v1654_v55, %v1660_v32  ;;  %v1657_v35 = vpop.xlane.xlu0 %1656  ;;  %v7975_v55 = vld [vmem:[%s15719_s23 + $0x78] sm:$0xff] }
 0x3b1   : > { %v1661_v36 = vsub.f32 %v1653_v56, %v1657_v35  ;;  %v10559_v56 = vpack.c.bf16 %v7975_v55, %v7974_v54  ;;  %v7997_v32 = vld [vmem:[%s15726_s10 + $0x18] sm:$0xff]  ;;  %v1758_v35 = vld [vmem:[%s15726_s10] sm:$0xff] }
 0x3b2   : > { %v1665_v37 = vmul.f32 1.442695, %v1662_v33  ;;  %v10589_v33 = vpack.c.bf16 %v7997_v32, %v7996_v30 }
 0x3b3   : > { %v1663_v38 = vmul.f32 1.442695, %v1661_v36  ;;  %v1759_v36 = vld [vmem:[%s15726_s10 + $0x8] sm:$0xff] }
 0x3b5   : > { %11683 = vpow2.f32 %v1663_v38 }
 0x3b6   : > { %11685 = vpow2.f32 %v1665_v37  ;;  %v10593_v37 = vpack.c.bf16 %v1759_v36, %v1758_v35 }
 0x3bf   : > { %v11684_v43 = vpop.eup %11683 }
 0x3c0   : > { %v11686_v46 = vpop.eup %11685  ;;  %10049 = vmatprep.mubr.msk.f32.mxu0 %vm1563_vm3, %v11684_v43  ;;  %v1667_v29 = vsel %vm1563_vm3, %v11684_v43, 0.0 }
 0x3c1   : > { %10050 = vmatmul.mubr.msk.f32.vlgmr.msra.gmra.mrb[12].mxu0 %vm1563_vm3, %v11686_v46  ;;  %v1670_v28 = vsel %vm1563_vm3, %v11686_v46, 0.0 }
 0x3c2   : > { %10550 = vmatpush3.bf16.msra.mxu0 %v10547_v7  ;;  %10087 = vmatprep.mubr.msk.f32.mxu0 %vm1253_vm1, %v12241_v53 }
 0x3c3   : > { %10552 = vmatprep.subr.bf16.mxu0 %v10551_v45 }
 0x3c6   : > { %10554 = vmatpush3.bf16.msra.mxu0 %v10551_v45 }
 0x3c7   : > { %10556 = vmatprep.subr.bf16.mxu0 %v10555_v51 }
 0x3ca   : > { %10558 = vmatpush3.bf16.msra.mxu0 %v10555_v51 }
 0x3cb   : > { %10560 = vmatprep.subr.bf16.mxu0 %v10559_v56 }
 0x3ce   : > { %10562 = vmatpush3.bf16.msra.mxu0 %v10559_v56 }
 0x3d1   : > { %10088 = vmatmul.mubr.msk.f32.vlgmr.msra.gmra.mrb[14].mxu0 %vm1253_vm1, %v12253_v44 }
 0x3d2   : > { %10113 = vmatprep.mubr.msk.f32.mxu0 %vm1563_vm3, %v1844_v48 }
 0x494   : > { %v12551_v34 = vpop.f32.mrb[12].mxu0 }
 0x495   : > { %v12553_v58 = vpop.f32.mrb[13].mxu0 }
 0x4a4   : > { %v10089_v61 = vpop.f32.mrb[14].mxu0 }
 0x4a5   : > { %v1927_v62 = vpop.f32.mrb[15].mxu0 }
 0x4a6   : > { %v10579_v0 = vpack.c.bf16 %v10089_v61, %v1927_v62  ;;  %v10613_v61 = vpack.c.bf16 %v8015_v50, %v8014_v47 }
 0x4a8   : > { %10581 = vmatprep.subr.msk.bf16.mxu0 %vm12290_vm4, %v10579_v0 }
 0x4a9   : > { %10584 = vmatpush3.bf16.xpose.msk.msra.mxu0 %vm12290_vm4, %v10579_v0 }
 0x4aa   : > { %10586 = vmatprep.subr.bf16.mxu0 %v12493_v8 }
 0x4b0   : > { %10114 = vmatmul.mubr.msk.f32.vlgmr.msra.gmra.mrb[16].mxu0 %vm1563_vm3, %v12482_v59 }
 0x4b1   : > { %10588 = vmatpush3.bf16.msra.mxu0 %v12493_v8 }
 0x4b2   : > { %10590 = vmatprep.subr.bf16.mxu0 %v10589_v33 }
 0x583   : > { %v10115_v57 = vpop.f32.mrb[16].mxu0 }
 0x584   : > { %v2116_v60 = vmul.f32 0.0625, %v10115_v57  ;;  %v2106_v2 = vpop.f32.mrb[17].mxu0  ;;  %v8016_v57 = vld [vmem:[%s15719_s23 + $0x90] sm:$0xff] }
 0x585   : > { %v2115_v3 = vmul.f32 0.0625, %v2106_v2 }
 0x586   : > { %v2118_v4 = vadd.f32 %v2116_v60, %v12468_v49  ;;  %v8017_v60 = vld [vmem:[%s15719_s23 + $0x98] sm:$0xff] }
 0x587   : > { %v2117_v5 = vadd.f32 %v2115_v3, %v12470_v52  ;;  %v10617_v3 = vpack.c.bf16 %v8017_v60, %v8016_v57  ;;  %v8062_v60 = vld [vmem:[%s15719_s23 + $0xe0] sm:$0xff] }
 0x588   : > { %v2122_v7 = vsel %vm1563_vm3, %v2118_v4, -inf }
 0x589   : > { %2123 = vmax.xlane.f32.xlu1 %v2122_v7  ;;  %v2119_v10 = vsel %vm1563_vm3, %v2117_v5, -inf  ;;  %v8021_v7 = vld [vmem:[%s15719_s23 + $0xb8] sm:$0xff] }
 0x58a   : > { %2120 = vmax.xlane.f32.xlu0 %v2119_v10 }
 0x616   : > { %v2124_v14 = vpop.xlane.xlu1 %2123 }
 0x617   : > { %v2126_v15 = vsub.f32 %v2118_v4, %v2124_v14  ;;  %v2121_v16 = vpop.xlane.xlu0 %2120  ;;  %v8019_v4 = vld [vmem:[%s15719_s23 + $0xa8] sm:$0xff]  ;;  %v2471_v14 = vadd.f32 %v12498_v9, %v12503_v13 }
 0x618   : > { %v2125_v59 = vsub.f32 %v2117_v5, %v2121_v16 }
 0x619   : > { %v2129_v17 = vmul.f32 1.442695, %v2126_v15 }
 0x61a   : > { %v2127_v8 = vmul.f32 1.442695, %v2125_v59 }
 0x61b   : > { %11687 = vpow2.f32 %v2129_v17 }
 0x61c   : > { %11689 = vpow2.f32 %v2127_v8 }
 0x625   : > { %v11688_v18 = vpop.eup %11687 }
 0x626   : > { %v11690_v21 = vpop.eup %11689  ;;  %v2134_v26 = vsel %vm1563_vm3, %v11688_v18, 0.0 }
 0x627   : > { %2135 = vadd.xlane.f32.xlu1 %v2134_v26  ;;  %10120 = vmatprep.mubr.msk.f32.mxu0 %vm1563_vm3, %v11690_v21  ;;  %v2131_v27 = vsel %vm1563_vm3, %v11690_v21, 0.0 }
 0x628   : > { %10121 = vmatmul.mubr.msk.f32.vlgmr.msra.gmra.mrb[18].mxu0 %vm1563_vm3, %v11688_v18  ;;  %2132 = vadd.xlane.f32.xlu0 %v2131_v27 }
 0x629   : > { %10592 = vmatpush3.bf16.msra.mxu0 %v10589_v33 }
 0x62a   : > { %10594 = vmatprep.subr.bf16.mxu0 %v10593_v37 }
 0x62b   : > { %1671 = vadd.xlane.f32.xlu1 %v1670_v28 }
 0x62c   : > { %1668 = vadd.xlane.f32.xlu0 %v1667_v29 }
 0x6b4   : > { %v2136_v41 = vpop.xlane.xlu1 %2135 }
 0x6b5   : > { %v2133_v38 = vpop.xlane.xlu0 %2132 }
 0x6b6   : > { %11691 = vrcp.f32 %v2133_v38  ;;  %v8042_v38 = vld [vmem:[%s15726_s10 + $0x20] sm:$0xff] }
 0x6b8   : > { %v1672_v43 = vpop.xlane.xlu1 %1671 }
 0x6b9   : > { %v1669_v40 = vpop.xlane.xlu0 %1668 }
 0x6ba   : > { %11693 = vrcp.f32 %v1669_v40  ;;  %v8043_v40 = vld [vmem:[%s15726_s10 + $0x28] sm:$0xff] }
 0x6bb   : > { %11695 = vrcp.f32 %v2136_v41  ;;  %v10655_v41 = vpack.c.bf16 %v8043_v40, %v8042_v38  ;;  %v3644_v38 = vld [vmem:[%s15666_s15 + $0x88] sm:$0xff]  ;;  %v3627_v40 = vld [vmem:[%s15666_s15] sm:$0xff] }
 0x6bc   : > { %11697 = vrcp.f32 %v1672_v43  ;;  %v8058_v43 = vld [vmem:[%s15719_s23 + $0xc0] sm:$0xff] }
 0x6c0   : > { %v11692_v45 = vpop.eup %11691 }
 0x6c4   : > { %v11694_v51 = vpop.eup %11693 }
 0x6c5   : > { %v11696_v55 = vpop.eup %11695  ;;  %v1755_v62 = vmul.f32 %v11694_v51, %v12553_v58  ;;  %v8018_v58 = vld [vmem:[%s15719_s23 + $0xa0] sm:$0xff] }
 0x6c6   : > { %v11698_v0 = vpop.eup %11697  ;;  %v10621_v5 = vpack.c.bf16 %v8019_v4, %v8018_v58  ;;  %v8064_v58 = vld [vmem:[%s15719_s23 + $0xf0] sm:$0xff]  ;;  %v8065_v4 = vld [vmem:[%s15719_s23 + $0xf8] sm:$0xff] }
 0x6c7   : > { %v1757_v2 = vmul.f32 %v11698_v0, %v12551_v34  ;;  %v8020_v34 = vld [vmem:[%s15719_s23 + $0xb0] sm:$0xff] }
 0x6c8   : > { %v10625_v10 = vpack.c.bf16 %v8021_v7, %v8020_v34  ;;  %v3019_v34 = vadd.f32 %v12513_v20, %v12518_v25 }
 0x6fb   : > { %v10122_v46 = vpop.f32.mrb[18].mxu0 }
 0x6fc   : > { %v2209_v54 = vpop.f32.mrb[19].mxu0  ;;  %v2221_v48 = vmul.f32 %v11696_v55, %v10122_v46  ;;  %v8061_v55 = vld [vmem:[%s15719_s23 + $0xd8] sm:$0xff] }
 0x6fd   : > { %v2219_v56 = vmul.f32 %v11692_v45, %v2209_v54  ;;  %v8059_v45 = vld [vmem:[%s15719_s23 + $0xc8] sm:$0xff]  ;;  %v8060_v54 = vld [vmem:[%s15719_s23 + $0xd0] sm:$0xff] }
 0x6fe   : > { %v10675_v46 = vpack.c.bf16 %v8059_v45, %v8058_v43  ;;  %v10679_v57 = vpack.c.bf16 %v8061_v55, %v8060_v54  ;;  %v3628_v43 = vld [vmem:[%s15666_s15 + $0x8] sm:$0xff]  ;;  %v3645_v45 = vld [vmem:[%s15666_s15 + $0x90] sm:$0xff]  ;;  %v3630_v54 = vld [vmem:[%s15666_s15 + $0x18] sm:$0xff] }
 0x6ff   : > { %10127 = vmatprep.mubr.msk.f32.mxu0 %vm1563_vm3, %v2219_v56  ;;  %v3647_v55 = vld [vmem:[%s15666_s15 + $0xa0] sm:$0xff] }
 0x700   : > { %10128 = vmatmul.mubr.msk.f32.vlgmr.msra.gmra.mrb[20].mxu0 %vm1563_vm3, %v2221_v48 }
 0x701   : > { %10596 = vmatpush3.bf16.msra.mxu0 %v10593_v37  ;;  %10134 = vmatprep.mubr.msk.f32.mxu0 %vm1563_vm3, %v1755_v62 }
 0x702   : > { %10614 = vmatprep.subr.bf16.mxu0 %v10613_v61 }
 0x708   : > { %10135 = vmatmul.mubr.msk.f32.vlgmr.msra.gmra.mrb[20].mxu0 %vm1563_vm3, %v1757_v2  ;;  %v8063_v2 = vld [vmem:[%s15719_s23 + $0xe8] sm:$0xff] }
 0x709   : > { %10616 = vmatpush3.bf16.msra.mxu0 %v10613_v61  ;;  %10172 = vmatprep.mubr.msk.f32.mxu0 %vm1253_vm1, %v12241_v53 }
 0x70a   : > { %10618 = vmatprep.subr.bf16.mxu0 %v10617_v3 }
 0x70d   : > { %10620 = vmatpush3.bf16.msra.mxu0 %v10617_v3  ;;  %v10683_v3 = vpack.c.bf16 %v8063_v2, %v8062_v60  ;;  %v784_v60 = vld [vmem:[%s15721_s0] sm:$0x1] }
 0x70e   : > { %10622 = vmatprep.subr.bf16.mxu0 %v10621_v5  ;;  %v856_v2 = vadd.f32 %v12221_v22, %v784_v60  ;;  %v3642_v60 = vld [vmem:[%s15666_s15 + $0x78] sm:$0xff] }
 0x711   : > { %10624 = vmatpush3.bf16.msra.mxu0 %v10621_v5  ;;  %v10687_v5 = vpack.c.bf16 %v8065_v4, %v8064_v58  ;;  %v3495_v4 = vrot.slane %v856_v2, %v12235_v42 }
 0x712   : > { %10626 = vmatprep.subr.bf16.mxu0 %v10625_v10 }
 0x715   : > { %10628 = vmatpush3.bf16.msra.mxu0 %v10625_v10 }
 0x718   : > { %10173 = vmatmul.mubr.msk.f32.vlgmr.msra.gmra.mrb[22].mxu0 %vm1253_vm1, %v12253_v44 }
 0x719   : > { %10198 = vmatprep.mubr.msk.f32.mxu0 %vm1563_vm3, %v2471_v14 }
 0x7eb   : > { %v10174_v15 = vpop.f32.mrb[22].mxu0 }
 0x7ec   : > { %v2554_v16 = vpop.f32.mrb[23].mxu0 }
 0x7ed   : > { %v10645_v59 = vpack.c.bf16 %v10174_v15, %v2554_v16 }
 0x7ef   : > { %10647 = vmatprep.subr.msk.bf16.mxu0 %vm12290_vm4, %v10645_v59 }
 0x7f0   : > { %10650 = vmatpush3.bf16.xpose.msk.msra.mxu0 %vm12290_vm4, %v10645_v59 }
 0x7f1   : > { %10652 = vmatprep.subr.bf16.mxu0 %v12508_v19 }
 0x7f7   : > { %10199 = vmatmul.mubr.msk.f32.vlgmr.msra.gmra.mrb[24].mxu0 %vm1563_vm3, %v12501_v12 }
 0x7f8   : > { %10654 = vmatpush3.bf16.msra.mxu0 %v12508_v19 }
 0x7f9   : > { %10656 = vmatprep.subr.bf16.mxu0 %v10655_v41 }
 0x8ca   : > { %v10200_v9 = vpop.f32.mrb[24].mxu0 }
 0x8cb   : > { %v2743_v13 = vmul.f32 0.0625, %v10200_v9  ;;  %v2733_v17 = vpop.f32.mrb[25].mxu0 }
 0x8cc   : > { %v2742_v8 = vmul.f32 0.0625, %v2733_v17 }
 0x8cd   : > { %v2745_v18 = vadd.f32 %v2743_v13, %v12468_v49 }
 0x8ce   : > { %v2744_v21 = vadd.f32 %v2742_v8, %v12470_v52 }
 0x8cf   : > { %v2749_v26 = vsel %vm1563_vm3, %v2745_v18, -inf }
 0x8d0   : > { %2750 = vmax.xlane.f32.xlu1 %v2749_v26  ;;  %v2746_v27 = vsel %vm1563_vm3, %v2744_v21, -inf  ;;  %v8086_v26 = vld [vmem:[%s15726_s10 + $0x30] sm:$0xff] }
 0x8d1   : > { %2747 = vmax.xlane.f32.xlu0 %v2746_v27  ;;  %v8087_v27 = vld [vmem:[%s15726_s10 + $0x38] sm:$0xff] }
 0x95d   : > { %v2751_v28 = vpop.xlane.xlu1 %2750 }
 0x95e   : > { %v2753_v29 = vsub.f32 %v2745_v18, %v2751_v28  ;;  %v2748_v30 = vpop.xlane.xlu0 %2747  ;;  %v10717_v28 = vpack.c.bf16 %v8087_v27, %v8086_v26  ;;  %v3635_v27 = vld [vmem:[%s15666_s15 + $0x40] sm:$0xff] }
 0x95f   : > { %v2752_v12 = vsub.f32 %v2744_v21, %v2748_v30 }
 0x960   : > { %v2756_v32 = vmul.f32 1.442695, %v2753_v29 }
 0x961   : > { %v2754_v19 = vmul.f32 1.442695, %v2752_v12 }
 0x962   : > { %11699 = vpow2.f32 %v2756_v32 }
 0x963   : > { %11701 = vpow2.f32 %v2754_v19 }
 0x96c   : > { %v11700_v33 = vpop.eup %11699 }
 0x96d   : > { %v11702_v35 = vpop.eup %11701  ;;  %v2761_v36 = vsel %vm1563_vm3, %v11700_v33, 0.0 }
 0x96e   : > { %2762 = vadd.xlane.f32.xlu1 %v2761_v36  ;;  %10205 = vmatprep.mubr.msk.f32.mxu0 %vm1563_vm3, %v11702_v35  ;;  %v2758_v37 = vsel %vm1563_vm3, %v11702_v35, 0.0 }
 0x96f   : > { %10206 = vmatmul.mubr.msk.f32.vlgmr.msra.gmra.mrb[26].mxu0 %vm1563_vm3, %v11700_v33  ;;  %2759 = vadd.xlane.f32.xlu0 %v2758_v37  ;;  %v3643_v37 = vld [vmem:[%s15666_s15 + $0x80] sm:$0xff] }
 0x970   : > { %10658 = vmatpush3.bf16.msra.mxu0 %v10655_v41  ;;  %v10737_v41 = vpack.c.bf16 %v3644_v38, %v3643_v37 }
 0x971   : > { %10676 = vmatprep.subr.bf16.mxu0 %v10675_v46 }
 0x9fb   : > { %v2763_v50 = vpop.xlane.xlu1 %2762 }
 0x9fc   : > { %v2760_v47 = vpop.xlane.xlu0 %2759 }
 0x9fd   : > { %11703 = vrcp.f32 %v2760_v47  ;;  %v10739_v47 = vpack.c.bf16 %v3628_v43, %v3627_v40  ;;  %v3535_v40 = vld [vmem:[%s15664_s13 + $0x20] sm:$0xff] }
 0x9fe   : > { %11705 = vrcp.f32 %v2763_v50  ;;  %v3655_v43 = vld [vmem:[%s15666_s15 + $0xe0] sm:$0xff] }
 0xa07   : > { %v11704_v56 = vpop.eup %11703 }
 0xa08   : > { %v11706_v61 = vpop.eup %11705 }
 0xa42   : > { %v10207_v51 = vpop.f32.mrb[26].mxu0 }
 0xa43   : > { %v2836_v48 = vpop.f32.mrb[27].mxu0  ;;  %v2848_v0 = vmul.f32 %v11706_v61, %v10207_v51  ;;  %v3629_v51 = vld [vmem:[%s15666_s15 + $0x10] sm:$0xff] }
 0xa44   : > { %v2846_v62 = vmul.f32 %v11704_v56, %v2836_v48  ;;  %v3648_v56 = vld [vmem:[%s15666_s15 + $0xa8] sm:$0xff]  ;;  %v10743_v48 = vpack.c.bf16 %v3630_v54, %v3629_v51  ;;  %v3537_v54 = vld [vmem:[%s15664_s13 + $0x30] sm:$0xff] }
 0xa45   : > { %v10745_v61 = vpack.c.bf16 %v3648_v56, %v3647_v55  ;;  %v3538_v55 = vld [vmem:[%s15664_s13 + $0x38] sm:$0xff]  ;;  %v3657_v56 = vld [vmem:[%s15666_s15 + $0xf0] sm:$0xff] }
 0xa46   : > { %10212 = vmatprep.mubr.msk.f32.mxu0 %vm1563_vm3, %v2846_v62  ;;  %v3631_v62 = vld [vmem:[%s15666_s15 + $0x20] sm:$0xff] }
 0xa47   : > { %10213 = vmatmul.mubr.msk.f32.vlgmr.msra.gmra.mrb[20].mxu0 %vm1563_vm3, %v2848_v0  ;;  %v3632_v0 = vld [vmem:[%s15666_s15 + $0x28] sm:$0xff] }
 0xa48   : > { %10678 = vmatpush3.bf16.msra.mxu0 %v10675_v46  ;;  %10250 = vmatprep.mubr.msk.f32.mxu0 %vm1253_vm1, %v12241_v53  ;;  %v3646_v46 = vld [vmem:[%s15666_s15 + $0x98] sm:$0xff] }
 0xa49   : > { %10680 = vmatprep.subr.bf16.mxu0 %v10679_v57  ;;  %v10741_v50 = vpack.c.bf16 %v3646_v46, %v3645_v45  ;;  %v3656_v46 = vld [vmem:[%s15666_s15 + $0xe8] sm:$0xff] }
 0xa4a   : > { %v10761_v51 = vpack.c.bf16 %v3656_v46, %v3655_v43  ;;  %v3720_v46 = vld [vmem:[%s15666_s15 + $0x2e8] sm:$0xff] }
 0xa4c   : > { %10682 = vmatpush3.bf16.msra.mxu0 %v10679_v57  ;;  %v10747_v57 = vpack.c.bf16 %v3632_v0, %v3631_v62  ;;  %v3658_v62 = vld [vmem:[%s15666_s15 + $0xf8] sm:$0xff] }
 0xa4d   : > { %10684 = vmatprep.subr.bf16.mxu0 %v10683_v3  ;;  %v10765_v0 = vpack.c.bf16 %v3658_v62, %v3657_v56  ;;  %v3722_v56 = vld [vmem:[%s15666_s15 + $0x2f8] sm:$0xff] }
 0xa50   : > { %10686 = vmatpush3.bf16.msra.mxu0 %v10683_v3  ;;  %v8090_v3 = vld [vmem:[%s15662_s11] ss:$0 sm:$0xff] }
 0xa51   : > { %10688 = vmatprep.subr.bf16.mxu0 %v10687_v5 }
 0xa54   : > { %10690 = vmatpush3.bf16.msra.mxu0 %v10687_v5 }
 0xa57   : > { %10251 = vmatmul.mubr.msk.f32.vlgmr.msra.gmra.mrb[28].mxu0 %vm1253_vm1, %v12253_v44 }
 0xa58   : > { %10276 = vmatprep.mubr.msk.f32.mxu0 %vm1563_vm3, %v3019_v34 }
 0xb2a   : > { %v10252_v53 = vpop.f32.mrb[28].mxu0 }
 0xb2b   : > { %v3102_v7 = vpop.f32.mrb[29].mxu0 }
 0xb2c   : > { %v10707_v10 = vpack.c.bf16 %v10252_v53, %v3102_v7 }
 0xb2e   : > { %10709 = vmatprep.subr.msk.bf16.mxu0 %vm12290_vm4, %v10707_v10 }
 0xb2f   : > { %10712 = vmatpush3.bf16.xpose.msk.msra.mxu0 %vm12290_vm4, %v10707_v10 }
 0xb30   : > { %10714 = vmatprep.subr.bf16.mxu0 %v12523_v31 }
 0xb36   : > { %10277 = vmatmul.mubr.msk.f32.vlgmr.msra.gmra.mrb[30].mxu0 %vm1563_vm3, %v12516_v23 }
 0xb37   : > { %10716 = vmatpush3.bf16.msra.mxu0 %v12523_v31 }
 0xb38   : > { %10718 = vmatprep.subr.bf16.mxu0 %v10717_v28 }
 0xc09   : > { %v10278_v20 = vpop.f32.mrb[30].mxu0 }
 0xc0a   : > { %v3291_v44 = vmul.f32 0.0625, %v10278_v20  ;;  %v3281_v25 = vpop.f32.mrb[31].mxu0  ;;  %v11763_v20 = vld [vmem:[%s12052_s5 + $0x8] sm:$0xff] }
 0xc0b   : > { %v3290_v14 = vmul.f32 0.0625, %v3281_v25  ;;  %v11764_v25 = vld [vmem:[%s12052_s5] sm:$0xff]  ;;  %s7906_s5 = sshll.u32 %s754_s27, 4 }
 0xc0c   : > { %v3293_v15 = vadd.f32 %v3291_v44, %v12468_v49  ;;  %s756_s2 = scalar_lea.vmem [#allocation2], %s7906_s5 }
 0xc0d   : > { %v3292_v16 = vadd.f32 %v3290_v14, %v12470_v52  ;;  %s7819_s28 = sshll.u32 %s756_s2, 4  ;;  %s15606_s28 = int_to_ptr.vmem [resolvable:$true] %s7819_s28 }
 0xc0e   : > { %v3297_v59 = vsel %vm1563_vm3, %v3293_v15, -inf }
 0xc0f   : > { %3298 = vmax.xlane.f32.xlu1 %v3297_v59  ;;  %v3294_v11 = vsel %vm1563_vm3, %v3292_v16, -inf }
 0xc10   : > { %3295 = vmax.xlane.f32.xlu0 %v3294_v11  ;;  %v3649_v11 = vld [vmem:[%s15666_s15 + $0xb0] sm:$0xff] }
 0xc9c   : > { %v3299_v9 = vpop.xlane.xlu1 %3298 }
 0xc9d   : > { %v3301_v13 = vsub.f32 %v3293_v15, %v3299_v9  ;;  %v3296_v17 = vpop.xlane.xlu0 %3295  ;;  %v3650_v9 = vld [vmem:[%s15666_s15 + $0xb8] sm:$0xff] }
 0xc9e   : > { %v3300_v23 = vsub.f32 %v3292_v16, %v3296_v17  ;;  %v3633_v17 = vld [vmem:[%s15666_s15 + $0x30] sm:$0xff] }
 0xc9f   : > { %v3304_v8 = vmul.f32 1.442695, %v3301_v13  ;;  %v10749_v13 = vpack.c.bf16 %v3650_v9, %v3649_v11  ;;  %v3694_v11 = vld [vmem:[%s15666_s15 + $0x218] sm:$0xff] }
 0xca0   : > { %v3302_v31 = vmul.f32 1.442695, %v3300_v23  ;;  %v3634_v23 = vld [vmem:[%s15666_s15 + $0x38] sm:$0xff] }
 0xca1   : > { %11707 = vpow2.f32 %v3304_v8  ;;  %v10751_v8 = vpack.c.bf16 %v3634_v23, %v3633_v17  ;;  %v3711_v17 = vld [vmem:[%s15666_s15 + $0x2a0] sm:$0xff]  ;;  %v3712_v23 = vld [vmem:[%s15666_s15 + $0x2a8] sm:$0xff] }
 0xca2   : > { %11709 = vpow2.f32 %v3302_v31  ;;  %v3531_v31 = vld [vmem:[%s15664_s13] sm:$0xff] }
 0xcab   : > { %v11708_v18 = vpop.eup %11707 }
 0xcac   : > { %v11710_v21 = vpop.eup %11709  ;;  %v3309_v49 = vsel %vm1563_vm3, %v11708_v18, 0.0 }
 0xcad   : > { %3310 = vadd.xlane.f32.xlu1 %v3309_v49  ;;  %10283 = vmatprep.mubr.msk.f32.mxu0 %vm1563_vm3, %v11710_v21  ;;  %v3306_v52 = vsel %vm1563_vm3, %v11710_v21, 0.0  ;;  %v3651_v49 = vld [vmem:[%s15666_s15 + $0xc0] sm:$0xff] }
 0xcae   : > { %10284 = vmatmul.mubr.msk.f32.vlgmr.msra.gmra.mrb[32].mxu0 %vm1563_vm3, %v11708_v18  ;;  %3307 = vadd.xlane.f32.xlu0 %v3306_v52  ;;  %v3532_v18 = vld [vmem:[%s15664_s13 + $0x8] sm:$0xff] }
 0xcaf   : > { %10720 = vmatpush3.bf16.msra.mxu0 %v10717_v28  ;;  %v10721_v21 = vpack.c.bf16 %v3532_v18, %v3531_v31  ;;  %v3652_v52 = vld [vmem:[%s15666_s15 + $0xc8] sm:$0xff]  ;;  %v10809_v18 = vpack.c.bf16 %v3712_v23, %v3711_v17  ;;  %v3969_v17 = vld [vmem:[%s15667_s16 + $0x120] sm:$0xff] }
 0xcb0   : > { %10738 = vmatprep.subr.bf16.mxu0 %v10737_v41  ;;  %v10753_v26 = vpack.c.bf16 %v3652_v52, %v3651_v49  ;;  %v3636_v28 = vld [vmem:[%s15666_s15 + $0x48] sm:$0xff]  ;;  %v3713_v49 = vld [vmem:[%s15666_s15 + $0x2b0] sm:$0xff]  ;;  %v3714_v52 = vld [vmem:[%s15666_s15 + $0x2b8] sm:$0xff] }
 0xcb1   : > { %10722 = vmatprep.subr.bf16.mxu1 %v10721_v21  ;;  %v3536_v41 = vld [vmem:[%s15664_s13 + $0x28] sm:$0xff] }
 0xcb2   : > { %10724 = vmatpush3.bf16.msra.mxu1 %v10721_v21  ;;  %v10729_v45 = vpack.c.bf16 %v3536_v41, %v3535_v40  ;;  %v3696_v31 = vld [vmem:[%s15666_s15 + $0x228] sm:$0xff]  ;;  %v3702_v40 = vld [vmem:[%s15666_s15 + $0x258] sm:$0xff] }
 0xcb3   : > { %v3970_v23 = vld [vmem:[%s15667_s16 + $0x128] sm:$0xff] }
 0xd3a   : > { %v3311_v30 = vpop.xlane.xlu1 %3310 }
 0xd3b   : > { %v3308_v29 = vpop.xlane.xlu0 %3307 }
 0xd3c   : > { %11711 = vrcp.f32 %v3308_v29  ;;  %v10755_v29 = vpack.c.bf16 %v3636_v28, %v3635_v27  ;;  %v3698_v27 = vld [vmem:[%s15666_s15 + $0x238] sm:$0xff]  ;;  %v10813_v28 = vpack.c.bf16 %v3714_v52, %v3713_v49  ;;  %v3971_v49 = vld [vmem:[%s15667_s16 + $0x130] sm:$0xff] }
 0xd3d   : > { %11713 = vrcp.f32 %v3311_v30  ;;  %v3533_v30 = vld [vmem:[%s15664_s13 + $0x10] sm:$0xff]  ;;  %v3972_v52 = vld [vmem:[%s15667_s16 + $0x138] sm:$0xff] }
 0xd46   : > { %v11712_v32 = vpop.eup %11711 }
 0xd47   : > { %v11714_v33 = vpop.eup %11713 }
 0xd81   : > { %v10285_v12 = vpop.f32.mrb[32].mxu0 }
 0xd82   : > { %v3384_v19 = vpop.f32.mrb[33].mxu0  ;;  %v3396_v36 = vmul.f32 %v11714_v33, %v10285_v12  ;;  %v3534_v12 = vld [vmem:[%s15664_s13 + $0x18] sm:$0xff] }
 0xd83   : > { %v3394_v35 = vmul.f32 %v11712_v32, %v3384_v19  ;;  %v3653_v32 = vld [vmem:[%s15666_s15 + $0xd0] sm:$0xff]  ;;  %v10725_v19 = vpack.c.bf16 %v3534_v12, %v3533_v30  ;;  %v3654_v33 = vld [vmem:[%s15666_s15 + $0xd8] sm:$0xff]  ;;  %v3715_v30 = vld [vmem:[%s15666_s15 + $0x2c0] sm:$0xff] }
 0xd84   : > { %v10757_v37 = vpack.c.bf16 %v3654_v33, %v3653_v32  ;;  %v3716_v12 = vld [vmem:[%s15666_s15 + $0x2c8] sm:$0xff]  ;;  %v3699_v32 = vld [vmem:[%s15666_s15 + $0x240] sm:$0xff] }
 0xd85   : > { %10290 = vmatprep.mubr.msk.f32.mxu0 %vm1563_vm3, %v3394_v35  ;;  %v3637_v35 = vld [vmem:[%s15666_s15 + $0x50] sm:$0xff]  ;;  %10726 = vmatprep.subr.bf16.mxu1 %v10725_v19  ;;  %v10817_v33 = vpack.c.bf16 %v3716_v12, %v3715_v30  ;;  %v3973_v30 = vld [vmem:[%s15667_s16 + $0x140] sm:$0xff]  ;;  %v3974_v12 = vld [vmem:[%s15667_s16 + $0x148] sm:$0xff] }
 0xd86   : > { %10291 = vmatmul.mubr.msk.f32.vlgmr.msra.gmra.mrb[20].mxu0 %vm1563_vm3, %v3396_v36  ;;  %v3638_v36 = vld [vmem:[%s15666_s15 + $0x58] sm:$0xff]  ;;  %10728 = vmatpush3.bf16.msra.mxu1 %v10725_v19  ;;  %v3700_v19 = vld [vmem:[%s15666_s15 + $0x248] sm:$0xff] }
 0xd87   : > { %10740 = vmatpush3.bf16.msra.mxu0 %v10739_v47  ;;  %v10759_v38 = vpack.c.bf16 %v3638_v36, %v3637_v35  ;;  %v3639_v47 = vld [vmem:[%s15666_s15 + $0x60] sm:$0xff]  ;;  %10730 = vmatprep.subr.bf16.mxu1 %v10729_v45  ;;  %v10819_v35 = vpack.c.bf16 %v3700_v19, %v3699_v32  ;;  %v3717_v36 = vld [vmem:[%s15666_s15 + $0x2d0] sm:$0xff]  ;;  %v3992_v19 = vld [vmem:[%s15667_s16 + $0x1d8] sm:$0xff] }
 0xd88   : > { %10742 = vmatprep.subr.bf16.mxu0 %v10741_v50  ;;  %v3640_v50 = vld [vmem:[%s15666_s15 + $0x68] sm:$0xff]  ;;  %v3991_v32 = vld [vmem:[%s15667_s16 + $0x1d0] sm:$0xff] }
 0xd8a   : > { %10732 = vmatpush3.bf16.msra.mxu1 %v10729_v45  ;;  %v3719_v45 = vld [vmem:[%s15666_s15 + $0x2e0] sm:$0xff] }
 0xd8b   : > { %10744 = vmatpush3.bf16.msra.mxu0 %v10743_v48  ;;  %v10763_v48 = vpack.c.bf16 %v3640_v50, %v3639_v47  ;;  %v3703_v47 = vld [vmem:[%s15666_s15 + $0x260] sm:$0xff]  ;;  %v3704_v50 = vld [vmem:[%s15666_s15 + $0x268] sm:$0xff] }
 0xd8c   : > { %10746 = vmatprep.subr.bf16.mxu0 %v10745_v61  ;;  %v10733_v61 = vpack.c.bf16 %v3538_v55, %v3537_v54  ;;  %v10827_v54 = vpack.c.bf16 %v3704_v50, %v3703_v47  ;;  %v3721_v55 = vld [vmem:[%s15666_s15 + $0x2f0] sm:$0xff]  ;;  %v3996_v50 = vld [vmem:[%s15667_s16 + $0x1f8] sm:$0xff] }
 0xd8d   : > { %v10829_v62 = vpack.c.bf16 %v3722_v56, %v3721_v55  ;;  %v3995_v47 = vld [vmem:[%s15667_s16 + $0x1f0] sm:$0xff] }
 0xd8e   : > { %10734 = vmatprep.subr.bf16.mxu1 %v10733_v61 }
 0xd8f   : > { %10748 = vmatpush3.bf16.msra.mxu0 %v10747_v57  ;;  %v3641_v57 = vld [vmem:[%s15666_s15 + $0x70] sm:$0xff]  ;;  %10736 = vmatpush3.bf16.msra.mxu1 %v10733_v61  ;;  %v3706_v61 = vld [vmem:[%s15666_s15 + $0x278] sm:$0xff] }
 0xd90   : > { %10750 = vmatprep.subr.bf16.mxu0 %v10749_v13  ;;  %v10767_v2 = vpack.c.bf16 %v3642_v60, %v3641_v57  ;;  %v12958_v57 = vld [vmem:[%s12845_s29 + $0x28] sm:$0xff]  ;;  %v12962_v60 = vld [vmem:[%s12845_s29 + $0x20] sm:$0xff] }
 0xd93   : > { %10752 = vmatpush3.bf16.msra.mxu0 %v10751_v8  ;;  %v3695_v8 = vld [vmem:[%s15666_s15 + $0x220] sm:$0xff] }
 0xd94   : > { %10754 = vmatprep.subr.bf16.mxu0 %v10753_v26  ;;  %v10811_v21 = vpack.c.bf16 %v3696_v31, %v3695_v8  ;;  %v3697_v26 = vld [vmem:[%s15666_s15 + $0x230] sm:$0xff]  ;;  %v10875_v31 = vpack.c.bf16 %v3970_v23, %v3969_v17  ;;  %v3679_v17 = vld [vmem:[%s15666_s15 + $0x1a0] sm:$0xff]  ;;  %v3680_v23 = vld [vmem:[%s15666_s15 + $0x1a8] sm:$0xff] }
 0xd95   : > { %v3987_v8 = vld [vmem:[%s15667_s16 + $0x1b0] sm:$0xff] }
 0xd97   : > { %10756 = vmatpush3.bf16.msra.mxu0 %v10755_v29  ;;  %v10815_v29 = vpack.c.bf16 %v3698_v27, %v3697_v26  ;;  %v3989_v26 = vld [vmem:[%s15667_s16 + $0x1c0] sm:$0xff]  ;;  %v3990_v27 = vld [vmem:[%s15667_s16 + $0x1c8] sm:$0xff] }
 0xd98   : > { %10758 = vmatprep.subr.bf16.mxu0 %v10757_v37  ;;  %v3718_v37 = vld [vmem:[%s15666_s15 + $0x2d8] sm:$0xff] }
 0xd99   : > { %v10821_v41 = vpack.c.bf16 %v3718_v37, %v3717_v36  ;;  %v3975_v36 = vld [vmem:[%s15667_s16 + $0x150] sm:$0xff]  ;;  %v3976_v37 = vld [vmem:[%s15667_s16 + $0x158] sm:$0xff] }
 0xd9b   : > { %10760 = vmatpush3.bf16.msra.mxu0 %v10759_v38  ;;  %v3701_v38 = vld [vmem:[%s15666_s15 + $0x250] sm:$0xff] }
 0xd9c   : > { %10762 = vmatprep.subr.bf16.mxu0 %v10761_v51  ;;  %v10823_v43 = vpack.c.bf16 %v3702_v40, %v3701_v38  ;;  %v10825_v51 = vpack.c.bf16 %v3720_v46, %v3719_v45  ;;  %v3993_v38 = vld [vmem:[%s15667_s16 + $0x1e0] sm:$0xff]  ;;  %v3994_v40 = vld [vmem:[%s15667_s16 + $0x1e8] sm:$0xff] }
 0xd9d   : > { %v3977_v45 = vld [vmem:[%s15667_s16 + $0x160] sm:$0xff]  ;;  %v3978_v46 = vld [vmem:[%s15667_s16 + $0x168] sm:$0xff] }
 0xd9f   : > { %10764 = vmatpush3.bf16.msra.mxu0 %v10763_v48  ;;  %v3705_v48 = vld [vmem:[%s15666_s15 + $0x270] sm:$0xff] }
 0xda0   : > { %10766 = vmatprep.subr.bf16.mxu0 %v10765_v0  ;;  %v10831_v0 = vpack.c.bf16 %v3706_v61, %v3705_v48 }
 0xda3   : > { %10768 = vmatpush3.bf16.msra.mxu0 %v10767_v2  ;;  %v3981_v2 = vld [vmem:[%s15667_s16 + $0x180] sm:$0xff] }
 0xe59   : > { %v10292_v58 = vpop.f32.mrb[20].mxu0 }
 0xe5a   : > { %v3491_v5 = vadd.f32 %v10292_v58, %v8090_v3  ;;  %v3472_v34 = vpop.f32.mrb[21].mxu0  ;;  %v3676_v58 = vld [vmem:[%s15666_s15 + $0x188] sm:$0xff] }
 0xe5b   : > { %v3490_v53 = vadd.f32 %v8090_v3, %v3472_v34  ;;  %v3675_v3 = vld [vmem:[%s15666_s15 + $0x180] sm:$0xff]  ;;  %v3708_v34 = vld [vmem:[%s15666_s15 + $0x288] sm:$0xff] }
 0xe5c   : > { %v3497_v7 = vmul.f32 %v3495_v4, %v3491_v5  ;;  %v3707_v5 = vld [vmem:[%s15666_s15 + $0x280] sm:$0xff] }
 0xe5d   : > { %v3496_v10 = vmul.f32 %v3495_v4, %v3490_v53  ;;  %v10769_v4 = vpack.c.bf16 %v3676_v58, %v3675_v3  ;;  %v12860_v53 = vld [vmem:[%s12845_s29 + $0x8] sm:$0xff] }
 0xe5e   : > { %v12746_v44 = vadd.f32 %v11763_v20, %v3497_v7  ;;  %v10801_v7 = vpack.c.bf16 %v3708_v34, %v3707_v5  ;;  %v3692_v20 = vld [vmem:[%s15666_s15 + $0x208] sm:$0xff]  ;;  %3787 = vmatprep.mubr.f32.mxu0 %v12860_v53  ;;  %v12977_v34 = vld [vmem:[%s12845_s29 + $0x18] sm:$0xff] }
 0xe5f   : > { %v12749_v14 = vadd.f32 %v11764_v25, %v3496_v10  ;;  %10770 = vmatprep.subr.bf16.mxu1 %v10769_v4  ;;  %v3691_v10 = vld [vmem:[%s15666_s15 + $0x200] sm:$0xff]  ;;  %v3982_v3 = vld [vmem:[%s15667_s16 + $0x188] sm:$0xff] }
 0xe60   : > { %v3501_v22 = vmul.f32 %v12746_v44, %v12746_v44  ;;  %v10803_v25 = vpack.c.bf16 %v3692_v20, %v3691_v10  ;;  %10802 = vmatprep.subr.bf16.mxu0 %v10801_v7  ;;  %v10865_v58 = vpack.c.bf16 %v3982_v3, %v3981_v2  ;;  %v3965_v4 = vld [vmem:[%s15667_s16 + $0x100] sm:$0xff]  ;;  %v3966_v5 = vld [vmem:[%s15667_s16 + $0x108] sm:$0xff]  ;;  %v3983_v10 = vld [vmem:[%s15667_s16 + $0x190] sm:$0xff] }
 0xe61   : > { %v3500_v15 = vmul.f32 %v12749_v14, %v12749_v14  ;;  %v10867_v7 = vpack.c.bf16 %v3966_v5, %v3965_v4  ;;  %v3984_v20 = vld [vmem:[%s15667_s16 + $0x198] sm:$0xff]  ;;  %v8091_v4 = vld [vmem:[%s15663_s12] ss:$0 sm:$0xff] }
 0xe62   : > { %v3505_v16 = vsel %vm1253_vm1, %v3501_v22, 0.0  ;;  %v12870_v22 = vld [vmem:[%s12845_s29] sm:$0xff] }
 0xe63   : > { %3506 = vadd.xlane.f32.xlu1 %v3505_v16  ;;  %v3502_v59 = vsel %vm1253_vm1, %v3500_v15, 0.0  ;;  %3788 = vmatmul.mubr.f32.vlgmr.msra.gmra.mrb[34].mxu0 %v12870_v22  ;;  %v3709_v15 = vld [vmem:[%s15666_s15 + $0x290] sm:$0xff]  ;;  %v3710_v16 = vld [vmem:[%s15666_s15 + $0x298] sm:$0xff]  ;;  %v3659_v5 = vld [vmem:[%s15666_s15 + $0x100] sm:$0xff] }
 0xe64   : > { %3503 = vadd.xlane.f32.xlu0 %v3502_v59  ;;  %10804 = vmatpush3.bf16.msra.mxu0 %v10803_v25  ;;  %v3693_v59 = vld [vmem:[%s15666_s15 + $0x210] sm:$0xff]  ;;  %v10805_v9 = vpack.c.bf16 %v3710_v16, %v3709_v15  ;;  %v10869_v25 = vpack.c.bf16 %v3984_v20, %v3983_v10  ;;  %v3968_v16 = vld [vmem:[%s15667_s16 + $0x118] sm:$0xff] }
 0xe65   : > { %v10807_v13 = vpack.c.bf16 %v3694_v11, %v3693_v59  ;;  %3927 = vmatprep.mubr.f32.mxu0 %v12958_v57  ;;  %v3967_v15 = vld [vmem:[%s15667_s16 + $0x110] sm:$0xff]  ;;  %v3985_v11 = vld [vmem:[%s15667_s16 + $0x1a0] sm:$0xff] }
 0xe66   : > { %10806 = vmatprep.subr.bf16.mxu0 %v10805_v9  ;;  %v10871_v59 = vpack.c.bf16 %v3968_v16, %v3967_v15  ;;  %v3986_v9 = vld [vmem:[%s15667_s16 + $0x1a8] sm:$0xff]  ;;  %v3677_v20 = vld [vmem:[%s15666_s15 + $0x190] sm:$0xff] }
 0xe68   : > { %10808 = vmatpush3.bf16.msra.mxu0 %v10807_v13  ;;  %v10873_v13 = vpack.c.bf16 %v3986_v9, %v3985_v11  ;;  %v3661_v9 = vld [vmem:[%s15666_s15 + $0x110] sm:$0xff] }
 0xe69   : > { %10810 = vmatprep.subr.bf16.mxu0 %v10809_v18  ;;  %v3988_v18 = vld [vmem:[%s15667_s16 + $0x1b8] sm:$0xff] }
 0xe6c   : > { %10812 = vmatpush3.bf16.msra.mxu0 %v10811_v21  ;;  %v10877_v21 = vpack.c.bf16 %v3988_v18, %v3987_v8  ;;  %v3663_v18 = vld [vmem:[%s15666_s15 + $0x120] sm:$0xff] }
 0xe6d   : > { %10814 = vmatprep.subr.bf16.mxu0 %v10813_v28  ;;  %v10879_v28 = vpack.c.bf16 %v3972_v52, %v3971_v49  ;;  %v3681_v49 = vld [vmem:[%s15666_s15 + $0x1b0] sm:$0xff]  ;;  %v3682_v52 = vld [vmem:[%s15666_s15 + $0x1b8] sm:$0xff] }
 0xe70   : > { %10816 = vmatpush3.bf16.msra.mxu0 %v10815_v29  ;;  %v10881_v29 = vpack.c.bf16 %v3990_v27, %v3989_v26  ;;  %v10781_v27 = vpack.c.bf16 %v3682_v52, %v3681_v49  ;;  %v3955_v49 = vld [vmem:[%s15667_s16 + $0xb0] sm:$0xff]  ;;  %v3956_v52 = vld [vmem:[%s15667_s16 + $0xb8] sm:$0xff] }
 0xe71   : > { %10818 = vmatprep.subr.bf16.mxu0 %v10817_v33  ;;  %v10883_v33 = vpack.c.bf16 %v3974_v12, %v3973_v30  ;;  %v3683_v30 = vld [vmem:[%s15666_s15 + $0x1c0] sm:$0xff]  ;;  %v3684_v12 = vld [vmem:[%s15666_s15 + $0x1c8] sm:$0xff] }
 0xe74   : > { %10820 = vmatpush3.bf16.msra.mxu0 %v10819_v35  ;;  %v10885_v35 = vpack.c.bf16 %v3992_v19, %v3991_v32  ;;  %v10785_v19 = vpack.c.bf16 %v3684_v12, %v3683_v30  ;;  %v3957_v30 = vld [vmem:[%s15667_s16 + $0xc0] sm:$0xff]  ;;  %v3958_v12 = vld [vmem:[%s15667_s16 + $0xc8] sm:$0xff] }
 0xe75   : > { %10822 = vmatprep.subr.bf16.mxu0 %v10821_v41  ;;  %v10887_v41 = vpack.c.bf16 %v3976_v37, %v3975_v36  ;;  %v3685_v36 = vld [vmem:[%s15666_s15 + $0x1d0] sm:$0xff]  ;;  %v3686_v37 = vld [vmem:[%s15666_s15 + $0x1d8] sm:$0xff] }
 0xe78   : > { %10824 = vmatpush3.bf16.msra.mxu0 %v10823_v43  ;;  %v10889_v43 = vpack.c.bf16 %v3994_v40, %v3993_v38  ;;  %v10789_v40 = vpack.c.bf16 %v3686_v37, %v3685_v36  ;;  %v3959_v36 = vld [vmem:[%s15667_s16 + $0xd0] sm:$0xff]  ;;  %v3960_v37 = vld [vmem:[%s15667_s16 + $0xd8] sm:$0xff] }
 0xe79   : > { %10826 = vmatprep.subr.bf16.mxu0 %v10825_v51  ;;  %v10891_v51 = vpack.c.bf16 %v3978_v46, %v3977_v45  ;;  %v3687_v45 = vld [vmem:[%s15666_s15 + $0x1e0] sm:$0xff]  ;;  %v3688_v46 = vld [vmem:[%s15666_s15 + $0x1e8] sm:$0xff] }
 0xe7c   : > { %10828 = vmatpush3.bf16.msra.mxu0 %v10827_v54  ;;  %v10893_v54 = vpack.c.bf16 %v3996_v50, %v3995_v47  ;;  %v10793_v50 = vpack.c.bf16 %v3688_v46, %v3687_v45  ;;  %v3961_v45 = vld [vmem:[%s15667_s16 + $0xe0] sm:$0xff]  ;;  %v3962_v46 = vld [vmem:[%s15667_s16 + $0xe8] sm:$0xff] }
 0xe7d   : > { %10830 = vmatprep.subr.bf16.mxu0 %v10829_v62 }
 0xe80   : > { %10832 = vmatpush3.bf16.msra.mxu0 %v10831_v0 }
 0xe81   : > { %10866 = vmatprep.subr.bf16.mxu0 %v10865_v58 }
 0xe83   : > { %3928 = vmatmul.mubr.f32.vlgmr.msra.gmra.mrb[36].mxu0 %v12962_v60 }
 0xe84   : > { %4170 = vmatprep.mubr.f32.mxu0 %v12977_v34  ;;  %10868 = vmatpush3.bf16.msra.mxu0 %v10867_v7  ;;  %v3660_v7 = vld [vmem:[%s15666_s15 + $0x108] sm:$0xff] }
 0xe85   : > { %10870 = vmatprep.subr.bf16.mxu0 %v10869_v25  ;;  %v3678_v25 = vld [vmem:[%s15666_s15 + $0x198] sm:$0xff]  ;;  %v10771_v16 = vpack.c.bf16 %v3660_v7, %v3659_v5  ;;  %v3933_v5 = vld [vmem:[%s15667_s16] sm:$0xff]  ;;  %v3934_v7 = vld [vmem:[%s15667_s16 + $0x8] sm:$0xff] }
 0xe86   : > { %v10773_v11 = vpack.c.bf16 %v3678_v25, %v3677_v20  ;;  %v3952_v20 = vld [vmem:[%s15667_s16 + $0x98] sm:$0xff]  ;;  %v13182_v25 = vld [vmem:[%s12845_s29 + $0x10] sm:$0xff] }
 0xe88   : > { %10872 = vmatpush3.bf16.msra.mxu0 %v10871_v59 }
 0xe89   : > { %10874 = vmatprep.subr.bf16.mxu0 %v10873_v13  ;;  %v3662_v13 = vld [vmem:[%s15666_s15 + $0x118] sm:$0xff] }
 0xe8a   : > { %v10775_v8 = vpack.c.bf16 %v3662_v13, %v3661_v9  ;;  %v3935_v9 = vld [vmem:[%s15667_s16 + $0x10] sm:$0xff]  ;;  %v3936_v13 = vld [vmem:[%s15667_s16 + $0x18] sm:$0xff] }
 0xe8c   : > { %10876 = vmatpush3.bf16.msra.mxu0 %v10875_v31  ;;  %v10777_v31 = vpack.c.bf16 %v3680_v23, %v3679_v17  ;;  %v3953_v17 = vld [vmem:[%s15667_s16 + $0xa0] sm:$0xff]  ;;  %v3954_v23 = vld [vmem:[%s15667_s16 + $0xa8] sm:$0xff] }
 0xe8d   : > { %10878 = vmatprep.subr.bf16.mxu0 %v10877_v21  ;;  %v3664_v21 = vld [vmem:[%s15666_s15 + $0x128] sm:$0xff] }
 0xe8e   : > { %v10779_v26 = vpack.c.bf16 %v3664_v21, %v3663_v18  ;;  %v3937_v18 = vld [vmem:[%s15667_s16 + $0x20] sm:$0xff]  ;;  %v3938_v21 = vld [vmem:[%s15667_s16 + $0x28] sm:$0xff] }
 0xe90   : > { %10880 = vmatpush3.bf16.msra.mxu0 %v10879_v28  ;;  %v3665_v28 = vld [vmem:[%s15666_s15 + $0x130] sm:$0xff] }
 0xe91   : > { %10882 = vmatprep.subr.bf16.mxu0 %v10881_v29  ;;  %v3666_v29 = vld [vmem:[%s15666_s15 + $0x138] sm:$0xff] }
 0xe92   : > { %v10783_v32 = vpack.c.bf16 %v3666_v29, %v3665_v28  ;;  %v3939_v28 = vld [vmem:[%s15667_s16 + $0x30] sm:$0xff]  ;;  %v3940_v29 = vld [vmem:[%s15667_s16 + $0x38] sm:$0xff] }
 0xe94   : > { %10884 = vmatpush3.bf16.msra.mxu0 %v10883_v33  ;;  %v3667_v33 = vld [vmem:[%s15666_s15 + $0x140] sm:$0xff] }
 0xe95   : > { %10886 = vmatprep.subr.bf16.mxu0 %v10885_v35  ;;  %v3668_v35 = vld [vmem:[%s15666_s15 + $0x148] sm:$0xff] }
 0xe96   : > { %v10787_v38 = vpack.c.bf16 %v3668_v35, %v3667_v33  ;;  %v3941_v33 = vld [vmem:[%s15667_s16 + $0x40] sm:$0xff]  ;;  %v3942_v35 = vld [vmem:[%s15667_s16 + $0x48] sm:$0xff] }
 0xe98   : > { %10888 = vmatpush3.bf16.msra.mxu0 %v10887_v41  ;;  %v3669_v41 = vld [vmem:[%s15666_s15 + $0x150] sm:$0xff] }
 0xe99   : > { %10890 = vmatprep.subr.bf16.mxu0 %v10889_v43  ;;  %v3670_v43 = vld [vmem:[%s15666_s15 + $0x158] sm:$0xff] }
 0xe9a   : > { %v10791_v47 = vpack.c.bf16 %v3670_v43, %v3669_v41  ;;  %v3943_v41 = vld [vmem:[%s15667_s16 + $0x50] sm:$0xff]  ;;  %v3944_v43 = vld [vmem:[%s15667_s16 + $0x58] sm:$0xff] }
 0xe9c   : > { %10892 = vmatpush3.bf16.msra.mxu0 %v10891_v51  ;;  %v3671_v51 = vld [vmem:[%s15666_s15 + $0x160] sm:$0xff] }
 0xe9d   : > { %10894 = vmatprep.subr.bf16.mxu0 %v10893_v54  ;;  %v3672_v54 = vld [vmem:[%s15666_s15 + $0x168] sm:$0xff] }
 0xef0   : > { %v3507_v55 = vpop.xlane.xlu1 %3506 }
 0xef1   : > { %v3509_v56 = vmul.f32 0.015625, %v3507_v55  ;;  %v3504_v48 = vpop.xlane.xlu0 %3503  ;;  %v3689_v55 = vld [vmem:[%s15666_s15 + $0x1f0] sm:$0xff] }
 0xef2   : > { %v3508_v61 = vmul.f32 0.015625, %v3504_v48  ;;  %v10795_v48 = vpack.c.bf16 %v3672_v54, %v3671_v51  ;;  %v3945_v51 = vld [vmem:[%s15667_s16 + $0x60] sm:$0xff]  ;;  %v3946_v54 = vld [vmem:[%s15667_s16 + $0x68] sm:$0xff] }
 0xef3   : > { %v3511_v62 = vadd.f32 1e-05, %v3509_v56  ;;  %v3690_v56 = vld [vmem:[%s15666_s15 + $0x1f8] sm:$0xff] }
 0xef4   : > { %v3510_v0 = vadd.f32 1e-05, %v3508_v61  ;;  %v10797_v61 = vpack.c.bf16 %v3690_v56, %v3689_v55  ;;  %v3979_v55 = vld [vmem:[%s15667_s16 + $0x170] sm:$0xff]  ;;  %v10859_v56 = vpack.c.bf16 %v3946_v54, %v3945_v51  ;;  %v4008_v54 = vld [vmem:[%s15667_s16 + $0x258] sm:$0xff] }
 0xef5   : > { %11715 = vrsqrt.f32 %v3511_v62  ;;  %v3673_v62 = vld [vmem:[%s15666_s15 + $0x170] sm:$0xff] }
 0xef6   : > { %11717 = vrsqrt.f32 %v3510_v0  ;;  %v3674_v0 = vld [vmem:[%s15666_s15 + $0x178] sm:$0xff]  ;;  %v4007_v51 = vld [vmem:[%s15667_s16 + $0x250] sm:$0xff] }
 0xeff   : > { %v11716_v2 = vpop.eup %11715 }
 0xf00   : > { %v11718_v3 = vpop.eup %11717  ;;  %v3515_v58 = vmul.f32 %v11716_v2, %v12746_v44  ;;  %v3949_v2 = vld [vmem:[%s15667_s16 + $0x80] sm:$0xff] }
 0xf01   : > { %v3514_v10 = vmul.f32 %v11718_v3, %v12749_v14  ;;  %v3950_v3 = vld [vmem:[%s15667_s16 + $0x88] sm:$0xff] }
 0xf02   : > { %v13078_v59 = vmul.f32 %v8091_v4, %v3515_v58  ;;  %v10799_v58 = vpack.c.bf16 %v3674_v0, %v3673_v62  ;;  %v3963_v62 = vld [vmem:[%s15667_s16 + $0xf0] sm:$0xff]  ;;  %v3964_v0 = vld [vmem:[%s15667_s16 + $0xf8] sm:$0xff] }
 0xf03   : > { %v13076_v15 = vmul.f32 %v8091_v4, %v3514_v10  ;;  %v10833_v4 = vpack.c.bf16 %v3950_v3, %v3949_v2  ;;  %v3951_v10 = vld [vmem:[%s15667_s16 + $0x90] sm:$0xff]  ;;  %v10861_v3 = vpack.c.bf16 %v3964_v0, %v3963_v62  ;;  %v4009_v62 = vld [vmem:[%s15667_s16 + $0x260] sm:$0xff]  ;;  %v4010_v0 = vld [vmem:[%s15667_s16 + $0x268] sm:$0xff] }
 0xf05   : > { %10309 = vmatprep.mubr.msk.f32.mxu1 %vm1253_vm1, %v13076_v15 }
 0xf06   : > { %10310 = vmatmul.mubr.msk.f32.vlgmr.msra.gmra.mrb[20].mxu1 %vm1253_vm1, %v13078_v59 }
 0xf07   : > { %10772 = vmatpush3.bf16.msra.mxu1 %v10771_v16  ;;  %3857 = vmatprep.mubr.f32.mxu1 %v12977_v34  ;;  %v10835_v16 = vpack.c.bf16 %v3934_v7, %v3933_v5 }
 0xf08   : > { %10774 = vmatprep.subr.bf16.mxu1 %v10773_v11  ;;  %v10837_v11 = vpack.c.bf16 %v3952_v20, %v3951_v10  ;;  %v4013_v20 = vld [vmem:[%s15667_s16 + $0x280] sm:$0xff] }
 0xf0b   : > { %10776 = vmatpush3.bf16.msra.mxu1 %v10775_v8  ;;  %v10839_v8 = vpack.c.bf16 %v3936_v13, %v3935_v9  ;;  %v3998_v13 = vld [vmem:[%s15667_s16 + $0x208] sm:$0xff] }
 0xf0c   : > { %10778 = vmatprep.subr.bf16.mxu1 %v10777_v31  ;;  %v10841_v31 = vpack.c.bf16 %v3954_v23, %v3953_v17  ;;  %v4015_v17 = vld [vmem:[%s15667_s16 + $0x290] sm:$0xff]  ;;  %v4016_v23 = vld [vmem:[%s15667_s16 + $0x298] sm:$0xff] }
 0xf0f   : > { %10780 = vmatpush3.bf16.msra.mxu1 %v10779_v26  ;;  %v10843_v26 = vpack.c.bf16 %v3938_v21, %v3937_v18  ;;  %v3999_v18 = vld [vmem:[%s15667_s16 + $0x210] sm:$0xff]  ;;  %v4000_v21 = vld [vmem:[%s15667_s16 + $0x218] sm:$0xff] }
 0xf10   : > { %10782 = vmatprep.subr.bf16.mxu1 %v10781_v27  ;;  %v10845_v27 = vpack.c.bf16 %v3956_v52, %v3955_v49  ;;  %v4017_v49 = vld [vmem:[%s15667_s16 + $0x2a0] sm:$0xff]  ;;  %v4018_v52 = vld [vmem:[%s15667_s16 + $0x2a8] sm:$0xff] }
 0xf13   : > { %10784 = vmatpush3.bf16.msra.mxu1 %v10783_v32  ;;  %v10847_v32 = vpack.c.bf16 %v3940_v29, %v3939_v28  ;;  %v4001_v28 = vld [vmem:[%s15667_s16 + $0x220] sm:$0xff]  ;;  %v4002_v29 = vld [vmem:[%s15667_s16 + $0x228] sm:$0xff] }
 0xf14   : > { %10786 = vmatprep.subr.bf16.mxu1 %v10785_v19  ;;  %v10849_v19 = vpack.c.bf16 %v3958_v12, %v3957_v30  ;;  %v4019_v30 = vld [vmem:[%s15667_s16 + $0x2b0] sm:$0xff]  ;;  %v4020_v12 = vld [vmem:[%s15667_s16 + $0x2b8] sm:$0xff] }
 0xf17   : > { %10788 = vmatpush3.bf16.msra.mxu1 %v10787_v38  ;;  %v10851_v38 = vpack.c.bf16 %v3942_v35, %v3941_v33  ;;  %v4003_v33 = vld [vmem:[%s15667_s16 + $0x230] sm:$0xff]  ;;  %v4004_v35 = vld [vmem:[%s15667_s16 + $0x238] sm:$0xff] }
 0xf18   : > { %10790 = vmatprep.subr.bf16.mxu1 %v10789_v40  ;;  %v10853_v40 = vpack.c.bf16 %v3960_v37, %v3959_v36  ;;  %v4021_v36 = vld [vmem:[%s15667_s16 + $0x2c0] sm:$0xff]  ;;  %v4022_v37 = vld [vmem:[%s15667_s16 + $0x2c8] sm:$0xff] }
 0xf1b   : > { %10792 = vmatpush3.bf16.msra.mxu1 %v10791_v47  ;;  %v10855_v47 = vpack.c.bf16 %v3944_v43, %v3943_v41  ;;  %v4005_v41 = vld [vmem:[%s15667_s16 + $0x240] sm:$0xff]  ;;  %v4006_v43 = vld [vmem:[%s15667_s16 + $0x248] sm:$0xff] }
 0xf1c   : > { %10794 = vmatprep.subr.bf16.mxu1 %v10793_v50  ;;  %v10857_v50 = vpack.c.bf16 %v3962_v46, %v3961_v45  ;;  %v4023_v45 = vld [vmem:[%s15667_s16 + $0x2d0] sm:$0xff]  ;;  %v4024_v46 = vld [vmem:[%s15667_s16 + $0x2d8] sm:$0xff] }
 0xf1f   : > { %10796 = vmatpush3.bf16.msra.mxu1 %v10795_v48  ;;  %v3980_v48 = vld [vmem:[%s15667_s16 + $0x178] sm:$0xff] }
 0xf20   : > { %10798 = vmatprep.subr.bf16.mxu1 %v10797_v61  ;;  %v10895_v61 = vpack.c.bf16 %v3980_v48, %v3979_v55  ;;  %v10919_v55 = vpack.c.bf16 %v4008_v54, %v4007_v51  ;;  %v4026_v48 = vld [vmem:[%s15667_s16 + $0x2e8] sm:$0xff]  ;;  %v8113_v54 = vld [vmem:[%s15666_s15 + $0x300] sm:$0xff] }
 0xf22   : > { %10896 = vmatpush3.bf16.msra.mxu0 %v10895_v61 }
 0xf23   : > { %10800 = vmatpush3.bf16.msra.mxu1 %v10799_v58  ;;  %v3947_v58 = vld [vmem:[%s15667_s16 + $0x70] sm:$0xff] }
 0xf24   : > { %10834 = vmatprep.subr.bf16.mxu1 %v10833_v4  ;;  %v3948_v4 = vld [vmem:[%s15667_s16 + $0x78] sm:$0xff] }
 0xf25   : > { %v10863_v7 = vpack.c.bf16 %v3948_v4, %v3947_v58  ;;  %4171 = vmatmul.mubr.f32.vlgmr.msra.gmra.mrb[38].mxu0 %v13182_v25  ;;  %v4028_v58 = vld [vmem:[%s15667_s16 + $0x2f8] sm:$0xff] }
 0xf26   : > { %3858 = vmatmul.mubr.f32.vlgmr.msra.gmra.mrb[22].mxu1 %v13182_v25 }
 0xf27   : > { %10836 = vmatpush3.bf16.msra.mxu1 %v10835_v16  ;;  %4100 = vmatprep.mubr.f32.mxu1 %v12860_v53  ;;  %v4014_v16 = vld [vmem:[%s15667_s16 + $0x288] sm:$0xff] }
 0xf28   : > { %10838 = vmatprep.subr.bf16.mxu1 %v10837_v11  ;;  %v3997_v11 = vld [vmem:[%s15667_s16 + $0x200] sm:$0xff]  ;;  %v10897_v9 = vpack.c.bf16 %v4014_v16, %v4013_v20  ;;  %v4012_v20 = vld [vmem:[%s15667_s16 + $0x278] sm:$0xff] }
 0xf2b   : > { %10840 = vmatpush3.bf16.msra.mxu1 %v10839_v8  ;;  %v10899_v8 = vpack.c.bf16 %v3998_v13, %v3997_v11  ;;  %v8092_v13 = vld [vmem:[%s15665_s14] ss:$0 sm:$0xff] }
 0xf2c   : > { %10842 = vmatprep.subr.bf16.mxu1 %v10841_v31  ;;  %v10901_v31 = vpack.c.bf16 %v4016_v23, %v4015_v17 }
 0xf2f   : > { %10844 = vmatpush3.bf16.msra.mxu1 %v10843_v26  ;;  %v10903_v26 = vpack.c.bf16 %v4000_v21, %v3999_v18 }
 0xf30   : > { %10846 = vmatprep.subr.bf16.mxu1 %v10845_v27  ;;  %v10905_v27 = vpack.c.bf16 %v4018_v52, %v4017_v49 }
 0xf33   : > { %10848 = vmatpush3.bf16.msra.mxu1 %v10847_v32  ;;  %v10907_v32 = vpack.c.bf16 %v4002_v29, %v4001_v28 }
 0xf34   : > { %10850 = vmatprep.subr.bf16.mxu1 %v10849_v19  ;;  %v10909_v19 = vpack.c.bf16 %v4020_v12, %v4019_v30  ;;  %v8095_v30 = vld [vmem:[%s15668_s17] ss:$0 sm:$0xff] }
 0xf36   : > { %v8999_v2 = vpop.f32.mrb[34].mxu0 }
 0xf37   : > { %10852 = vmatpush3.bf16.msra.mxu1 %v10851_v38  ;;  %v9000_v5 = vpop.f32.mrb[35].mxu0  ;;  %v10911_v38 = vpack.c.bf16 %v4004_v35, %v4003_v33 }
 0xf38   : > { %10854 = vmatprep.subr.bf16.mxu1 %v10853_v40  ;;  %v13270_v10 = vadd.f32 %v9000_v5, %v8999_v2  ;;  %v10913_v40 = vpack.c.bf16 %v4022_v37, %v4021_v36  ;;  %v10923_v2 = vpack.c.bf16 %v4010_v0, %v4009_v62  ;;  %v8115_v0 = vld [vmem:[%s15666_s15 + $0x310] sm:$0xff] }
 0xf3b   : > { %10856 = vmatpush3.bf16.msra.mxu1 %v10855_v47  ;;  %v10915_v47 = vpack.c.bf16 %v4006_v43, %v4005_v41 }
 0xf3c   : > { %10858 = vmatprep.subr.bf16.mxu1 %v10857_v50  ;;  %v10917_v50 = vpack.c.bf16 %v4024_v46, %v4023_v45 }
 0xf3f   : > { %10860 = vmatpush3.bf16.msra.mxu1 %v10859_v56  ;;  %v4025_v56 = vld [vmem:[%s15667_s16 + $0x2e0] sm:$0xff] }
 0xf40   : > { %10862 = vmatprep.subr.bf16.mxu1 %v10861_v3  ;;  %v10921_v61 = vpack.c.bf16 %v4026_v48, %v4025_v56  ;;  %v4027_v3 = vld [vmem:[%s15667_s16 + $0x2f0] sm:$0xff] }
 0xf41   : > { %v10925_v5 = vpack.c.bf16 %v4028_v58, %v4027_v3  ;;  %v8131_v48 = vld [vmem:[%s15666_s15 + $0x390] sm:$0xff]  ;;  %v8133_v58 = vld [vmem:[%s15666_s15 + $0x3a0] sm:$0xff] }
 0xf43   : > { %10864 = vmatpush3.bf16.msra.mxu1 %v10863_v7  ;;  %v4011_v7 = vld [vmem:[%s15667_s16 + $0x270] sm:$0xff] }
 0xf44   : > { %10898 = vmatprep.subr.bf16.mxu1 %v10897_v9  ;;  %v10927_v11 = vpack.c.bf16 %v4012_v20, %v4011_v7  ;;  %v8118_v20 = vld [vmem:[%s15666_s15 + $0x328] sm:$0xff] }
 0xf46   : > { %4101 = vmatmul.mubr.f32.vlgmr.msra.gmra.mrb[24].mxu1 %v12870_v22 }
 0xf47   : > { %10900 = vmatpush3.bf16.msra.mxu1 %v10899_v8  ;;  %4240 = vmatprep.mubr.f32.mxu1 %v12958_v57 }
 0xf48   : > { %10902 = vmatprep.subr.bf16.mxu1 %v10901_v31 }
 0xf4b   : > { %10904 = vmatpush3.bf16.msra.mxu1 %v10903_v26 }
 0xf4c   : > { %10906 = vmatprep.subr.bf16.mxu1 %v10905_v27 }
 0xf4f   : > { %10908 = vmatpush3.bf16.msra.mxu1 %v10907_v32 }
 0xf50   : > { %10910 = vmatprep.subr.bf16.mxu1 %v10909_v19 }
 0xf53   : > { %10912 = vmatpush3.bf16.msra.mxu1 %v10911_v38 }
 0xf54   : > { %10914 = vmatprep.subr.bf16.mxu1 %v10913_v40 }
 0xf56   : > { %v9069_v4 = vpop.f32.mrb[36].mxu0 }
 0xf57   : > { %10916 = vmatpush3.bf16.msra.mxu1 %v10915_v47  ;;  %v9070_v16 = vpop.f32.mrb[37].mxu0  ;;  %v8129_v47 = vld [vmem:[%s15666_s15 + $0x380] sm:$0xff] }
 0xf58   : > { %10918 = vmatprep.subr.bf16.mxu1 %v10917_v50  ;;  %v9071_v9 = vadd.f32 %v9070_v16, %v9069_v4  ;;  %v8130_v50 = vld [vmem:[%s15666_s15 + $0x388] sm:$0xff]  ;;  %v8135_v16 = vld [vmem:[%s15666_s15 + $0x3b0] sm:$0xff] }
 0xf59   : > { %v10945_v51 = vpack.c.bf16 %v8130_v50, %v8129_v47  ;;  %v8134_v4 = vld [vmem:[%s15666_s15 + $0x3a8] sm:$0xff]  ;;  %v8127_v50 = vld [vmem:[%s15666_s15 + $0x370] sm:$0xff] }
 0xf5a   : > { %v10953_v7 = vpack.c.bf16 %v8134_v4, %v8133_v58  ;;  %v8179_v58 = vld [vmem:[%s15666_s15 + $0x510] sm:$0xff] }
 0xf5b   : > { %10920 = vmatpush3.bf16.msra.mxu1 %v10919_v55  ;;  %v8114_v55 = vld [vmem:[%s15666_s15 + $0x308] sm:$0xff] }
 0xf5c   : > { %10922 = vmatprep.subr.bf16.mxu1 %v10921_v61  ;;  %v10947_v56 = vpack.c.bf16 %v8114_v55, %v8113_v54  ;;  %v8132_v61 = vld [vmem:[%s15666_s15 + $0x398] sm:$0xff]  ;;  %v8193_v55 = vld [vmem:[%s15666_s15 + $0x580] sm:$0xff] }
 0xf5d   : > { %v10949_v62 = vpack.c.bf16 %v8132_v61, %v8131_v48  ;;  %v8177_v48 = vld [vmem:[%s15666_s15 + $0x500] sm:$0xff]  ;;  %v8178_v61 = vld [vmem:[%s15666_s15 + $0x508] sm:$0xff] }
 0xf5f   : > { %10924 = vmatpush3.bf16.msra.mxu1 %v10923_v2  ;;  %v8116_v2 = vld [vmem:[%s15666_s15 + $0x318] sm:$0xff] }
 0xf60   : > { %10926 = vmatprep.subr.bf16.mxu1 %v10925_v5  ;;  %v10951_v3 = vpack.c.bf16 %v8116_v2, %v8115_v0  ;;  %v8117_v5 = vld [vmem:[%s15666_s15 + $0x320] sm:$0xff]  ;;  %v11011_v0 = vpack.c.bf16 %v8178_v61, %v8177_v48  ;;  %v8195_v2 = vld [vmem:[%s15666_s15 + $0x590] sm:$0xff] }
 0xf63   : > { %10928 = vmatpush3.bf16.msra.mxu1 %v10927_v11  ;;  %v8136_v11 = vld [vmem:[%s15666_s15 + $0x3b8] sm:$0xff] }
 0xf64   : > { %10946 = vmatprep.subr.bf16.mxu1 %v10945_v51  ;;  %v8128_v51 = vld [vmem:[%s15666_s15 + $0x378] sm:$0xff] }
 0xf65   : > { %v10975_v54 = vpack.c.bf16 %v8128_v51, %v8127_v50  ;;  %v8192_v50 = vld [vmem:[%s15666_s15 + $0x578] sm:$0xff] }
 0xf66   : > { %4241 = vmatmul.mubr.f32.vlgmr.msra.gmra.mrb[26].mxu1 %v12962_v60 }
 0xf67   : > { %4691 = vmatprep.mubr.f32.mxu1 %v12860_v53  ;;  %10948 = vmatpush3.bf16.msra.mxu1 %v10947_v56  ;;  %v8194_v56 = vld [vmem:[%s15666_s15 + $0x588] sm:$0xff] }
 0xf68   : > { %10950 = vmatprep.subr.bf16.mxu1 %v10949_v62  ;;  %v11009_v62 = vpack.c.bf16 %v8194_v56, %v8193_v55 }
 0xf6b   : > { %10952 = vmatpush3.bf16.msra.mxu1 %v10951_v3  ;;  %v8196_v3 = vld [vmem:[%s15666_s15 + $0x598] sm:$0xff] }
 0xf6c   : > { %10954 = vmatprep.subr.bf16.mxu1 %v10953_v7  ;;  %v11013_v4 = vpack.c.bf16 %v8196_v3, %v8195_v2  ;;  %v8198_v7 = vld [vmem:[%s15666_s15 + $0x5a8] sm:$0xff]  ;;  %v8103_v2 = vld [vmem:[%s15664_s13 + $0x50] sm:$0xff] }
 0xfd9   : > { %v10311_v17 = vpop.f32.mrb[20].mxu1 }
 0xfda   : > { %v3618_v23 = vpop.f32.mrb[21].mxu1  ;;  %v3624_v53 = vadd.f32 %v10311_v17, %v8092_v13  ;;  %v8119_v17 = vld [vmem:[%s15666_s15 + $0x330] sm:$0xff] }
 0xfdb   : > { %v3619_v8 = vadd.f32 %v8092_v13, %v3618_v23  ;;  %v10957_v13 = vpack.c.bf16 %v8136_v11, %v8135_v16  ;;  %v8120_v23 = vld [vmem:[%s15666_s15 + $0x338] sm:$0xff]  ;;  %v8182_v16 = vld [vmem:[%s15666_s15 + $0x528] sm:$0xff] }
 0xfdd   : > { %10314 = vmatprep.mubr.msk.f32.mxu0 %vm1563_vm3, %v3619_v8  ;;  %v10959_v8 = vpack.c.bf16 %v8120_v23, %v8119_v17  ;;  %v8200_v17 = vld [vmem:[%s15666_s15 + $0x5b8] sm:$0xff]  ;;  %v8183_v23 = vld [vmem:[%s15666_s15 + $0x530] sm:$0xff] }
 0xff8   : > { %v9139_v26 = vpop.f32.mrb[38].mxu0 }
 0xff9   : > { %v9034_v31 = vpop.f32.mrb[22].mxu1  ;;  %v9140_v27 = vpop.f32.mrb[39].mxu0 }
 0xffa   : > { %v9035_v18 = vpop.f32.mrb[23].mxu1  ;;  %v9141_v28 = vadd.f32 %v9140_v27, %v9139_v26  ;;  %v8121_v26 = vld [vmem:[%s15666_s15 + $0x340] sm:$0xff]  ;;  %v8122_v27 = vld [vmem:[%s15666_s15 + $0x348] sm:$0xff] }
 0xffb   : > { %v9036_v21 = vadd.f32 %v9035_v18, %v9034_v31  ;;  %v8101_v31 = vld [vmem:[%s15664_s13 + $0x40] sm:$0xff]  ;;  %v8102_v18 = vld [vmem:[%s15664_s13 + $0x48] sm:$0xff] }
 0xffd   : > { %v3860_v49 = vadd.f32 %v9036_v21, %v13270_v10  ;;  %v13446_v21 = vpack.c.bf16 %v8102_v18, %v8101_v31 }
 0xfff   : > { %v3930_v52 = vadd.f32 %v9071_v9, %v3860_v49  ;;  %v10955_v9 = vpack.c.bf16 %v8118_v20, %v8117_v5  ;;  %v8137_v49 = vld [vmem:[%s15666_s15 + $0x3c0] sm:$0xff] }
0x1000   : > { %v8181_v20 = vld [vmem:[%s15666_s15 + $0x520] sm:$0xff] }
0x1001   : > { %10312 = vmatprep.subr.msk.mxu0 %vm1563_vm3, %v3930_v52  ;;  %10956 = vmatpush3.bf16.msra.mxu1 %v10955_v9  ;;  %v11019_v9 = vpack.c.bf16 %v8182_v16, %v8181_v20  ;;  %v8259_v20 = vld [vmem:[%s15667_s16 + $0x490] sm:$0xff]  ;;  %v8260_v16 = vld [vmem:[%s15667_s16 + $0x498] sm:$0xff] }
0x1002   : > { %10313 = vmatpush3.xpose.msk.msra.mxu0 %vm1563_vm3, %v3930_v52  ;;  %10958 = vmatprep.subr.bf16.mxu1 %v10957_v13  ;;  %v8138_v52 = vld [vmem:[%s15666_s15 + $0x3c8] sm:$0xff]  ;;  %v8199_v13 = vld [vmem:[%s15666_s15 + $0x5b0] sm:$0xff] }
0x1003   : > { %v11021_v31 = vpack.c.bf16 %v8200_v17, %v8199_v13  ;;  %v8243_v13 = vld [vmem:[%s15667_s16 + $0x410] sm:$0xff]  ;;  %v8244_v17 = vld [vmem:[%s15667_s16 + $0x418] sm:$0xff] }
0x1005   : > { %10315 = vmatmul.mubr.msk.f32.vlgmr.msra.gmra.mrb[40].mxu0 %vm1563_vm3, %v3624_v53  ;;  %10960 = vmatpush3.bf16.msra.mxu1 %v10959_v8  ;;  %v10961_v53 = vpack.c.bf16 %v8138_v52, %v8137_v49  ;;  %v8184_v8 = vld [vmem:[%s15666_s15 + $0x538] sm:$0xff]  ;;  %v8201_v49 = vld [vmem:[%s15666_s15 + $0x5c0] sm:$0xff]  ;;  %v8202_v52 = vld [vmem:[%s15666_s15 + $0x5c8] sm:$0xff] }
0x1006   : > { %v11023_v18 = vpack.c.bf16 %v8184_v8, %v8183_v23  ;;  %v8261_v23 = vld [vmem:[%s15667_s16 + $0x4a0] sm:$0xff]  ;;  %v8107_v8 = vld [vmem:[%s15664_s13 + $0x70] sm:$0xff] }
0x1007   : > { %10962 = vmatprep.subr.bf16.mxu1 %v10961_v53  ;;  %v8185_v53 = vld [vmem:[%s15666_s15 + $0x540] sm:$0xff] }
0x1019   : > { %v9104_v29 = vpop.f32.mrb[24].mxu1 }
0x101a   : > { %v9105_v12 = vpop.f32.mrb[25].mxu1 }
0x101b   : > { %v9106_v32 = vadd.f32 %v9105_v12, %v9104_v29  ;;  %v8139_v29 = vld [vmem:[%s15666_s15 + $0x3d0] sm:$0xff] }
0x101d   : > { %v4103_v19 = vadd.f32 %v9106_v32, %v8095_v30  ;;  %v8140_v30 = vld [vmem:[%s15666_s15 + $0x3d8] sm:$0xff]  ;;  %v8123_v32 = vld [vmem:[%s15666_s15 + $0x350] sm:$0xff] }
0x101e   : > { %v10965_v12 = vpack.c.bf16 %v8140_v30, %v8139_v29  ;;  %v8203_v29 = vld [vmem:[%s15666_s15 + $0x5d0] sm:$0xff]  ;;  %v8204_v30 = vld [vmem:[%s15666_s15 + $0x5d8] sm:$0xff] }
0x101f   : > { %v4173_v10 = vadd.f32 %v9141_v28, %v4103_v19  ;;  %v10963_v28 = vpack.c.bf16 %v8122_v27, %v8121_v26  ;;  %v8124_v19 = vld [vmem:[%s15666_s15 + $0x358] sm:$0xff]  ;;  %v8186_v26 = vld [vmem:[%s15666_s15 + $0x548] sm:$0xff]  ;;  %v11025_v27 = vpack.c.bf16 %v8202_v52, %v8201_v49  ;;  %v11079_v49 = vpack.c.bf16 %v8244_v17, %v8243_v13  ;;  %v8155_v17 = vld [vmem:[%s15666_s15 + $0x450] sm:$0xff] }
0x1021   : > { %10964 = vmatpush3.bf16.msra.mxu1 %v10963_v28  ;;  %v11027_v28 = vpack.c.bf16 %v8186_v26, %v8185_v53  ;;  %v8245_v53 = vld [vmem:[%s15667_s16 + $0x420] sm:$0xff]  ;;  %v8246_v26 = vld [vmem:[%s15667_s16 + $0x428] sm:$0xff] }
0x1022   : > { %10966 = vmatprep.subr.bf16.mxu1 %v10965_v12  ;;  %v8187_v12 = vld [vmem:[%s15666_s15 + $0x550] sm:$0xff] }
0x1039   : > { %v9174_v33 = vpop.f32.mrb[26].mxu1 }
0x103a   : > { %v9175_v35 = vpop.f32.mrb[27].mxu1 }
0x103b   : > { %v9176_v36 = vadd.f32 %v9175_v35, %v9174_v33  ;;  %v8141_v33 = vld [vmem:[%s15666_s15 + $0x3e0] sm:$0xff]  ;;  %v8142_v35 = vld [vmem:[%s15666_s15 + $0x3e8] sm:$0xff] }
0x103d   : > { %v4243_v37 = vadd.f32 %v9176_v36, %v4173_v10  ;;  %v10967_v10 = vpack.c.bf16 %v8124_v19, %v8123_v32  ;;  %v10969_v36 = vpack.c.bf16 %v8142_v35, %v8141_v33  ;;  %v8188_v32 = vld [vmem:[%s15666_s15 + $0x558] sm:$0xff]  ;;  %v11029_v19 = vpack.c.bf16 %v8204_v30, %v8203_v29  ;;  %v8205_v33 = vld [vmem:[%s15666_s15 + $0x5e0] sm:$0xff]  ;;  %v8206_v35 = vld [vmem:[%s15666_s15 + $0x5e8] sm:$0xff] }
0x103e   : > { %v8264_v29 = vld [vmem:[%s15667_s16 + $0x4b8] sm:$0xff]  ;;  %v8161_v30 = vld [vmem:[%s15666_s15 + $0x480] sm:$0xff] }
0x103f   : > { %10317 = vmatprep.subr.mxu0 %v4243_v37  ;;  %10968 = vmatpush3.bf16.msra.mxu1 %v10967_v10  ;;  %v11031_v10 = vpack.c.bf16 %v8188_v32, %v8187_v12  ;;  %v8162_v12 = vld [vmem:[%s15666_s15 + $0x488] sm:$0xff]  ;;  %v11083_v32 = vpack.c.bf16 %v8246_v26, %v8245_v53  ;;  %v8175_v26 = vld [vmem:[%s15666_s15 + $0x4f0] sm:$0xff] }
0x1040   : > { %10318 = vmatpush3.msra.mxu0 %v4243_v37  ;;  %v8125_v37 = vld [vmem:[%s15666_s15 + $0x360] sm:$0xff]  ;;  %10970 = vmatprep.subr.bf16.mxu1 %v10969_v36  ;;  %v8158_v53 = vld [vmem:[%s15666_s15 + $0x468] sm:$0xff] }
0x1041   : > { %10930 = vmatprep.subr.bf16.mxu0 %v13446_v21  ;;  %v8189_v36 = vld [vmem:[%s15666_s15 + $0x560] sm:$0xff] }
0x10d8   : > { %v10316_v38 = vpop.f32.mrb[40].mxu0 }
0x10d9   : > { %v13384_v40 = vmul.f32 0.018042196, %v10316_v38  ;;  %v4321_v41 = vpop.f32.mrb[41].mxu0  ;;  %v8126_v38 = vld [vmem:[%s15666_s15 + $0x368] sm:$0xff] }
0x10da   : > { %v13386_v43 = vmul.f32 0.018042196, %v4321_v41  ;;  %v10971_v41 = vpack.c.bf16 %v8126_v38, %v8125_v37  ;;  %v8190_v37 = vld [vmem:[%s15666_s15 + $0x568] sm:$0xff]  ;;  %v11033_v38 = vpack.c.bf16 %v8206_v35, %v8205_v33  ;;  %v8248_v33 = vld [vmem:[%s15667_s16 + $0x438] sm:$0xff]  ;;  %v10977_v35 = vpack.c.bf16 %v8162_v12, %v8161_v30  ;;  %v8159_v30 = vld [vmem:[%s15666_s15 + $0x470] sm:$0xff] }
0x10db   : > { %v4336_v45 = vsel %vm4332_vm7, %v13384_v40, -inf  ;;  %v8160_v12 = vld [vmem:[%s15666_s15 + $0x478] sm:$0xff] }
0x10dc   : > { %4337 = vmax.xlane.f32.xlu1 %v4336_v45  ;;  %v4333_v46 = vsel %vm4332_vm7, %v13386_v43, -inf  ;;  %10972 = vmatpush3.bf16.msra.mxu1 %v10971_v41  ;;  %v8143_v45 = vld [vmem:[%s15666_s15 + $0x3f0] sm:$0xff]  ;;  %v11035_v41 = vpack.c.bf16 %v8190_v37, %v8189_v36  ;;  %v8145_v36 = vld [vmem:[%s15666_s15 + $0x400] sm:$0xff]  ;;  %v8146_v37 = vld [vmem:[%s15666_s15 + $0x408] sm:$0xff] }
0x10dd   : > { %4334 = vmax.xlane.f32.xlu0 %v4333_v46  ;;  %v8144_v46 = vld [vmem:[%s15666_s15 + $0x3f8] sm:$0xff] }
0x10de   : > { %v10973_v47 = vpack.c.bf16 %v8144_v46, %v8143_v45  ;;  %v8207_v45 = vld [vmem:[%s15666_s15 + $0x5f0] sm:$0xff]  ;;  %v8208_v46 = vld [vmem:[%s15666_s15 + $0x5f8] sm:$0xff] }
0x10df   : > { %v11037_v51 = vpack.c.bf16 %v8208_v46, %v8207_v45  ;;  %v10979_v46 = vpack.c.bf16 %v8146_v37, %v8145_v36  ;;  %v8210_v36 = vld [vmem:[%s15667_s16 + $0x308] sm:$0xff]  ;;  %v8227_v37 = vld [vmem:[%s15667_s16 + $0x390] sm:$0xff] }
0x10e0   : > { %10974 = vmatprep.subr.bf16.mxu1 %v10973_v47  ;;  %v8191_v47 = vld [vmem:[%s15666_s15 + $0x570] sm:$0xff] }
0x10e1   : > { %10976 = vmatpush3.bf16.msra.mxu1 %v10975_v54  ;;  %v11039_v54 = vpack.c.bf16 %v8192_v50, %v8191_v47  ;;  %v8147_v50 = vld [vmem:[%s15666_s15 + $0x410] sm:$0xff] }
0x10e2   : > { %11010 = vmatprep.subr.bf16.mxu1 %v11009_v62 }
0x10e4   : > { %4692 = vmatmul.mubr.f32.vlgmr.msra.gmra.mrb[28].mxu1 %v12870_v22  ;;  %v8180_v22 = vld [vmem:[%s15666_s15 + $0x518] sm:$0xff] }
0x10e5   : > { %4831 = vmatprep.mubr.f32.mxu1 %v12958_v57  ;;  %11012 = vmatpush3.bf16.msra.mxu1 %v11011_v0  ;;  %v11015_v5 = vpack.c.bf16 %v8180_v22, %v8179_v58  ;;  %v8197_v57 = vld [vmem:[%s15666_s15 + $0x5a0] sm:$0xff] }
0x10e6   : > { %11014 = vmatprep.subr.bf16.mxu1 %v11013_v4  ;;  %v11017_v11 = vpack.c.bf16 %v8198_v7, %v8197_v57  ;;  %v8257_v22 = vld [vmem:[%s15667_s16 + $0x480] sm:$0xff]  ;;  %v8258_v4 = vld [vmem:[%s15667_s16 + $0x488] sm:$0xff] }
0x10e7   : > { %v11073_v57 = vpack.c.bf16 %v8258_v4, %v8257_v22  ;;  %v8242_v7 = vld [vmem:[%s15667_s16 + $0x408] sm:$0xff]  ;;  %v8152_v22 = vld [vmem:[%s15666_s15 + $0x438] sm:$0xff]  ;;  %v8169_v4 = vld [vmem:[%s15666_s15 + $0x4c0] sm:$0xff] }
0x10e9   : > { %11016 = vmatpush3.bf16.msra.mxu1 %v11015_v5  ;;  %v8241_v5 = vld [vmem:[%s15667_s16 + $0x400] sm:$0xff] }
0x10ea   : > { %11018 = vmatprep.subr.bf16.mxu1 %v11017_v11 }
0x10ed   : > { %11020 = vmatpush3.bf16.msra.mxu1 %v11019_v9  ;;  %v11075_v9 = vpack.c.bf16 %v8242_v7, %v8241_v5  ;;  %v8170_v5 = vld [vmem:[%s15666_s15 + $0x4c8] sm:$0xff] }
0x10ee   : > { %11022 = vmatprep.subr.bf16.mxu1 %v11021_v31  ;;  %v8108_v31 = vld [vmem:[%s15664_s13 + $0x78] sm:$0xff]  ;;  %v10993_v7 = vpack.c.bf16 %v8170_v5, %v8169_v4 }
0x10f1   : > { %11024 = vmatpush3.bf16.msra.mxu1 %v11023_v18  ;;  %v8262_v18 = vld [vmem:[%s15667_s16 + $0x4a8] sm:$0xff] }
0x10f2   : > { %11026 = vmatprep.subr.bf16.mxu1 %v11025_v27  ;;  %v11081_v52 = vpack.c.bf16 %v8262_v18, %v8261_v23  ;;  %v10941_v27 = vpack.c.bf16 %v8108_v31, %v8107_v8  ;;  %v8156_v23 = vld [vmem:[%s15666_s15 + $0x458] sm:$0xff]  ;;  %v8173_v8 = vld [vmem:[%s15666_s15 + $0x4e0] sm:$0xff]  ;;  %v8174_v31 = vld [vmem:[%s15666_s15 + $0x4e8] sm:$0xff] }
0x10f3   : > { %v10999_v18 = vpack.c.bf16 %v8156_v23, %v8155_v17  ;;  %v8237_v17 = vld [vmem:[%s15667_s16 + $0x3e0] sm:$0xff]  ;;  %v8238_v23 = vld [vmem:[%s15667_s16 + $0x3e8] sm:$0xff] }
0x10f5   : > { %11028 = vmatpush3.bf16.msra.mxu1 %v11027_v28  ;;  %v8263_v28 = vld [vmem:[%s15667_s16 + $0x4b0] sm:$0xff] }
0x10f6   : > { %11030 = vmatprep.subr.bf16.mxu1 %v11029_v19  ;;  %v11085_v19 = vpack.c.bf16 %v8264_v29, %v8263_v28 }
0x10f9   : > { %11032 = vmatpush3.bf16.msra.mxu1 %v11031_v10  ;;  %v8247_v10 = vld [vmem:[%s15667_s16 + $0x430] sm:$0xff] }
0x10fa   : > { %11034 = vmatprep.subr.bf16.mxu1 %v11033_v38  ;;  %v8163_v38 = vld [vmem:[%s15666_s15 + $0x490] sm:$0xff]  ;;  %v11087_v45 = vpack.c.bf16 %v8248_v33, %v8247_v10  ;;  %v11007_v10 = vpack.c.bf16 %v8160_v12, %v8159_v30  ;;  %v8289_v30 = vld [vmem:[%s15667_s16 + $0x580] sm:$0xff]  ;;  %v8290_v12 = vld [vmem:[%s15667_s16 + $0x588] sm:$0xff] }
0x10fd   : > { %11036 = vmatpush3.bf16.msra.mxu1 %v11035_v41  ;;  %v8164_v41 = vld [vmem:[%s15666_s15 + $0x498] sm:$0xff] }
0x10fe   : > { %11038 = vmatprep.subr.bf16.mxu1 %v11037_v51  ;;  %v10981_v47 = vpack.c.bf16 %v8164_v41, %v8163_v38  ;;  %v8148_v51 = vld [vmem:[%s15666_s15 + $0x418] sm:$0xff] }
0x10ff   : > { %v8228_v38 = vld [vmem:[%s15667_s16 + $0x398] sm:$0xff] }
0x1101   : > { %11040 = vmatpush3.bf16.msra.mxu1 %v11039_v54  ;;  %v8165_v54 = vld [vmem:[%s15666_s15 + $0x4a0] sm:$0xff] }
0x1102   : > { %11074 = vmatprep.subr.bf16.mxu1 %v11073_v57 }
0x1104   : > { %4832 = vmatmul.mubr.f32.vlgmr.msra.gmra.mrb[30].mxu1 %v12962_v60  ;;  %v8104_v60 = vld [vmem:[%s15664_s13 + $0x58] sm:$0xff] }
0x1105   : > { %5076 = vmatprep.mubr.f32.mxu1 %v12977_v34  ;;  %v10933_v34 = vpack.c.bf16 %v8104_v60, %v8103_v2  ;;  %11076 = vmatpush3.bf16.msra.mxu1 %v11075_v9  ;;  %v8167_v2 = vld [vmem:[%s15666_s15 + $0x4b0] sm:$0xff]  ;;  %v8168_v60 = vld [vmem:[%s15666_s15 + $0x4b8] sm:$0xff] }
0x1106   : > { %v8172_v9 = vld [vmem:[%s15666_s15 + $0x4d8] sm:$0xff] }
0x1169   : > { %v4338_v55 = vpop.xlane.xlu1 %4337 }
0x116a   : > { %v4340_v56 = vsub.f32 %v13384_v40, %v4338_v55  ;;  %v4335_v48 = vpop.xlane.xlu0 %4334  ;;  %v8105_v40 = vld [vmem:[%s15664_s13 + $0x60] sm:$0xff]  ;;  %v8166_v55 = vld [vmem:[%s15666_s15 + $0x4a8] sm:$0xff] }
0x116b   : > { %v4339_v61 = vsub.f32 %v13386_v43, %v4335_v48  ;;  %v8106_v43 = vld [vmem:[%s15664_s13 + $0x68] sm:$0xff]  ;;  %v13709_v48 = vld [vmem:[%s12845_s29 + $0x18] sm:$0xff] }
0x116c   : > { %v4343_v62 = vmul.f32 1.442695, %v4340_v56  ;;  %v10937_v11 = vpack.c.bf16 %v8106_v43, %v8105_v40  ;;  %v10983_v56 = vpack.c.bf16 %v8148_v51, %v8147_v50  ;;  %v10989_v40 = vpack.c.bf16 %v8168_v60, %v8167_v2  ;;  %v8151_v43 = vld [vmem:[%s15666_s15 + $0x430] sm:$0xff]  ;;  %v8229_v50 = vld [vmem:[%s15667_s16 + $0x3a0] sm:$0xff]  ;;  %v8230_v51 = vld [vmem:[%s15667_s16 + $0x3a8] sm:$0xff] }
0x116d   : > { %v4341_v0 = vmul.f32 1.442695, %v4339_v61  ;;  %v10985_v61 = vpack.c.bf16 %v8166_v55, %v8165_v54  ;;  %v10991_v57 = vpack.c.bf16 %v8152_v22, %v8151_v43  ;;  %v13810_v55 = vld [vmem:[%s12845_s29 + $0x8] sm:$0xff]  ;;  %v8233_v43 = vld [vmem:[%s15667_s16 + $0x3c0] sm:$0xff] }
0x116e   : > { %v8234_v22 = vld [vmem:[%s15667_s16 + $0x3c8] sm:$0xff] }
0x116f   : > { %11719 = vpow2.f32 %v4341_v0  ;;  %v8150_v0 = vld [vmem:[%s15666_s15 + $0x428] sm:$0xff]  ;;  %v11057_v5 = vpack.c.bf16 %v8234_v22, %v8233_v43  ;;  %v8249_v43 = vld [vmem:[%s15667_s16 + $0x440] sm:$0xff] }
0x1170   : > { %11721 = vpow2.f32 %v4343_v62  ;;  %v8149_v62 = vld [vmem:[%s15666_s15 + $0x420] sm:$0xff]  ;;  %v8250_v22 = vld [vmem:[%s15667_s16 + $0x448] sm:$0xff] }
0x1179   : > { %v13605_v3 = vpop.eup %11719 }
0x117a   : > { %v13607_v58 = vpop.eup %11721  ;;  %10319 = vmatprep.mubr.msk.f32.mxu0 %vm4332_vm7, %v13605_v3 }
0x117b   : > { %10320 = vmatmul.mubr.msk.f32.vlgmr.msra.gmra.mrb[42].mxu0 %vm4332_vm7, %v13607_v58 }
0x117c   : > { %10932 = vmatpush3.bf16.msra.mxu0 %v13446_v21  ;;  %10338 = vmatprep.mubr.msk.f32.mxu0 %vm1253_vm1, %v13076_v15  ;;  %v11077_v21 = vpack.c.bf16 %v8260_v16, %v8259_v20  ;;  %v8153_v20 = vld [vmem:[%s15666_s15 + $0x440] sm:$0xff]  ;;  %v8154_v16 = vld [vmem:[%s15666_s15 + $0x448] sm:$0xff] }
0x117d   : > { %10934 = vmatprep.subr.bf16.mxu0 %v10933_v34 }
0x117e   : > { %11078 = vmatprep.subr.bf16.mxu1 %v11077_v21  ;;  %v10995_v21 = vpack.c.bf16 %v8154_v16, %v8153_v20  ;;  %v8235_v20 = vld [vmem:[%s15667_s16 + $0x3d0] sm:$0xff]  ;;  %v8236_v16 = vld [vmem:[%s15667_s16 + $0x3d8] sm:$0xff] }
0x117f   : > { %11080 = vmatpush3.bf16.msra.mxu1 %v11079_v49  ;;  %v11001_v49 = vpack.c.bf16 %v8174_v31, %v8173_v8  ;;  %v11065_v31 = vpack.c.bf16 %v8238_v23, %v8237_v17  ;;  %v8270_v17 = vld [vmem:[%s15667_s16 + $0x4e8] sm:$0xff]  ;;  %v8297_v23 = vld [vmem:[%s15667_s16 + $0x5c0] sm:$0xff] }
0x1180   : > { %10936 = vmatpush3.bf16.msra.mxu0 %v10933_v34  ;;  %11082 = vmatprep.subr.bf16.mxu1 %v11081_v52  ;;  %v10987_v34 = vpack.c.bf16 %v8150_v0, %v8149_v62  ;;  %v8157_v52 = vld [vmem:[%s15666_s15 + $0x460] sm:$0xff]  ;;  %v8214_v62 = vld [vmem:[%s15667_s16 + $0x328] sm:$0xff]  ;;  %v8232_v0 = vld [vmem:[%s15667_s16 + $0x3b8] sm:$0xff] }
0x1181   : > { %10938 = vmatprep.subr.bf16.mxu0 %v10937_v11  ;;  %v11003_v28 = vpack.c.bf16 %v8158_v53, %v8157_v52  ;;  %v8239_v52 = vld [vmem:[%s15667_s16 + $0x3f0] sm:$0xff]  ;;  %v8240_v53 = vld [vmem:[%s15667_s16 + $0x3f8] sm:$0xff] }
0x1183   : > { %11084 = vmatpush3.bf16.msra.mxu1 %v11083_v32  ;;  %v8225_v32 = vld [vmem:[%s15667_s16 + $0x380] sm:$0xff] }
0x1184   : > { %10940 = vmatpush3.bf16.msra.mxu0 %v10937_v11  ;;  %11086 = vmatprep.subr.bf16.mxu1 %v11085_v19  ;;  %v8171_v11 = vld [vmem:[%s15666_s15 + $0x4d0] sm:$0xff]  ;;  %v8226_v19 = vld [vmem:[%s15667_s16 + $0x388] sm:$0xff] }
0x1185   : > { %10942 = vmatprep.subr.bf16.mxu0 %v10941_v27  ;;  %v10997_v13 = vpack.c.bf16 %v8172_v9, %v8171_v11  ;;  %v11041_v33 = vpack.c.bf16 %v8226_v19, %v8225_v32  ;;  %v11061_v9 = vpack.c.bf16 %v8236_v16, %v8235_v20  ;;  %v11105_v19 = vpack.c.bf16 %v8290_v12, %v8289_v30  ;;  %v8251_v20 = vld [vmem:[%s15667_s16 + $0x450] sm:$0xff]  ;;  %v8252_v16 = vld [vmem:[%s15667_s16 + $0x458] sm:$0xff]  ;;  %v8282_v30 = vld [vmem:[%s15667_s16 + $0x548] sm:$0xff] }
0x1186   : > { %v8299_v12 = vld [vmem:[%s15667_s16 + $0x5d0] sm:$0xff] }
0x1187   : > { %11088 = vmatpush3.bf16.msra.mxu1 %v11087_v45  ;;  %v11045_v45 = vpack.c.bf16 %v8228_v38, %v8227_v37 }
0x1188   : > { %10944 = vmatpush3.bf16.msra.mxu0 %v10941_v27  ;;  %v8176_v27 = vld [vmem:[%s15666_s15 + $0x4f8] sm:$0xff] }
0x1189   : > { %10978 = vmatprep.subr.bf16.mxu0 %v10977_v35  ;;  %v11005_v29 = vpack.c.bf16 %v8176_v27, %v8175_v26  ;;  %v8209_v35 = vld [vmem:[%s15667_s16 + $0x300] sm:$0xff]  ;;  %v11069_v27 = vpack.c.bf16 %v8240_v53, %v8239_v52  ;;  %v8254_v52 = vld [vmem:[%s15667_s16 + $0x468] sm:$0xff] }
0x118a   : > { %v11043_v41 = vpack.c.bf16 %v8210_v36, %v8209_v35  ;;  %v8291_v35 = vld [vmem:[%s15667_s16 + $0x590] sm:$0xff]  ;;  %v8292_v36 = vld [vmem:[%s15667_s16 + $0x598] sm:$0xff] }
0x118b   : > { %10339 = vmatmul.mubr.msk.f32.vlgmr.msra.gmra.mrb[44].mxu0 %vm1253_vm1, %v13078_v59  ;;  %v11109_v38 = vpack.c.bf16 %v8292_v36, %v8291_v35  ;;  %v8283_v36 = vld [vmem:[%s15667_s16 + $0x550] sm:$0xff] }
0x118c   : > { %10980 = vmatpush3.bf16.msra.mxu0 %v10979_v46  ;;  %4761 = vmatprep.mubr.f32.mxu0 %v13709_v48  ;;  %v8211_v46 = vld [vmem:[%s15667_s16 + $0x310] sm:$0xff] }
0x118d   : > { %10982 = vmatprep.subr.bf16.mxu0 %v10981_v47  ;;  %v8212_v47 = vld [vmem:[%s15667_s16 + $0x318] sm:$0xff] }
0x118e   : > { %v11047_v54 = vpack.c.bf16 %v8212_v47, %v8211_v46  ;;  %v8293_v46 = vld [vmem:[%s15667_s16 + $0x5a0] sm:$0xff]  ;;  %v8294_v47 = vld [vmem:[%s15667_s16 + $0x5a8] sm:$0xff] }
0x1190   : > { %10984 = vmatpush3.bf16.msra.mxu0 %v10983_v56  ;;  %v11049_v56 = vpack.c.bf16 %v8230_v51, %v8229_v50  ;;  %v13910_v50 = vld [vmem:[%s12845_s29] sm:$0xff] }
0x1191   : > { %10986 = vmatprep.subr.bf16.mxu0 %v10985_v61  ;;  %v8213_v61 = vld [vmem:[%s15667_s16 + $0x320] sm:$0xff] }
0x1192   : > { %v11051_v2 = vpack.c.bf16 %v8214_v62, %v8213_v61  ;;  %v8277_v61 = vld [vmem:[%s15667_s16 + $0x520] sm:$0xff]  ;;  %v8278_v62 = vld [vmem:[%s15667_s16 + $0x528] sm:$0xff] }
0x1194   : > { %10988 = vmatpush3.bf16.msra.mxu0 %v10987_v34  ;;  %v8215_v34 = vld [vmem:[%s15667_s16 + $0x330] sm:$0xff] }
0x1195   : > { %10990 = vmatprep.subr.bf16.mxu0 %v10989_v40  ;;  %v8216_v40 = vld [vmem:[%s15667_s16 + $0x338] sm:$0xff] }
0x1196   : > { %v11055_v4 = vpack.c.bf16 %v8216_v40, %v8215_v34  ;;  %v8279_v34 = vld [vmem:[%s15667_s16 + $0x530] sm:$0xff] }
0x1198   : > { %10992 = vmatpush3.bf16.msra.mxu0 %v10991_v57  ;;  %v8217_v57 = vld [vmem:[%s15667_s16 + $0x340] sm:$0xff] }
0x1199   : > { %10994 = vmatprep.subr.bf16.mxu0 %v10993_v7  ;;  %v8218_v7 = vld [vmem:[%s15667_s16 + $0x348] sm:$0xff] }
0x119a   : > { %v11059_v11 = vpack.c.bf16 %v8218_v7, %v8217_v57  ;;  %v11091_v57 = vpack.c.bf16 %v8250_v22, %v8249_v43  ;;  %v8268_v7 = vld [vmem:[%s15667_s16 + $0x4d8] sm:$0xff] }
0x119b   : > { %v8288_v43 = vld [vmem:[%s15667_s16 + $0x578] sm:$0xff] }
0x119c   : > { %10996 = vmatpush3.bf16.msra.mxu0 %v10995_v21  ;;  %v8219_v21 = vld [vmem:[%s15667_s16 + $0x350] sm:$0xff] }
0x119d   : > { %10998 = vmatprep.subr.bf16.mxu0 %v10997_v13  ;;  %v8220_v13 = vld [vmem:[%s15667_s16 + $0x358] sm:$0xff] }
0x119e   : > { %v11063_v8 = vpack.c.bf16 %v8220_v13, %v8219_v21  ;;  %v8269_v13 = vld [vmem:[%s15667_s16 + $0x4e0] sm:$0xff] }
0x11a0   : > { %11000 = vmatpush3.bf16.msra.mxu0 %v10999_v18  ;;  %v8221_v18 = vld [vmem:[%s15667_s16 + $0x360] sm:$0xff] }
0x11a1   : > { %11002 = vmatprep.subr.bf16.mxu0 %v11001_v49  ;;  %v8222_v49 = vld [vmem:[%s15667_s16 + $0x368] sm:$0xff] }
0x11a2   : > { %v11067_v26 = vpack.c.bf16 %v8222_v49, %v8221_v18  ;;  %v11097_v18 = vpack.c.bf16 %v8270_v17, %v8269_v13  ;;  %v8253_v49 = vld [vmem:[%s15667_s16 + $0x460] sm:$0xff]  ;;  %v8323_v17 = vld [vmem:[%s15664_s13 + $0xa8] sm:$0xff] }
0x11a3   : > { %v8322_v13 = vld [vmem:[%s15664_s13 + $0xa0] sm:$0xff] }
0x11a4   : > { %11004 = vmatpush3.bf16.msra.mxu0 %v11003_v28  ;;  %v8223_v28 = vld [vmem:[%s15667_s16 + $0x370] sm:$0xff] }
0x11a5   : > { %11006 = vmatprep.subr.bf16.mxu0 %v11005_v29  ;;  %v8224_v29 = vld [vmem:[%s15667_s16 + $0x378] sm:$0xff] }
0x11a6   : > { %v11071_v32 = vpack.c.bf16 %v8224_v29, %v8223_v28  ;;  %v8281_v29 = vld [vmem:[%s15667_s16 + $0x540] sm:$0xff] }
0x11a8   : > { %11008 = vmatpush3.bf16.msra.mxu0 %v11007_v10  ;;  %v8273_v10 = vld [vmem:[%s15667_s16 + $0x500] sm:$0xff] }
0x11a9   : > { %11042 = vmatprep.subr.bf16.mxu0 %v11041_v33  ;;  %v8274_v33 = vld [vmem:[%s15667_s16 + $0x508] sm:$0xff] }
0x11aa   : > { %v11107_v37 = vpack.c.bf16 %v8274_v33, %v8273_v10  ;;  %v11123_v33 = vpack.c.bf16 %v8282_v30, %v8281_v29  ;;  %v8110_v29 = vld [vmem:[%s15665_s14 + $0x1] ss:$0 sm:$0xff] }
0x11ab   : > { %4762 = vmatmul.mubr.f32.vlgmr.msra.gmra.mrb[46].mxu0 %v13182_v25  ;;  %v8231_v25 = vld [vmem:[%s15667_s16 + $0x3b0] sm:$0xff] }
0x11ac   : > { %11044 = vmatpush3.bf16.msra.mxu0 %v11043_v41  ;;  %5006 = vmatprep.mubr.f32.mxu0 %v13810_v55  ;;  %v11053_v60 = vpack.c.bf16 %v8232_v0, %v8231_v25  ;;  %v8275_v41 = vld [vmem:[%s15667_s16 + $0x510] sm:$0xff]  ;;  %v8296_v0 = vld [vmem:[%s15667_s16 + $0x5b8] sm:$0xff] }
0x11ad   : > { %11046 = vmatprep.subr.bf16.mxu0 %v11045_v45  ;;  %v8276_v45 = vld [vmem:[%s15667_s16 + $0x518] sm:$0xff]  ;;  %v8295_v25 = vld [vmem:[%s15667_s16 + $0x5b0] sm:$0xff] }
0x11ae   : > { %v11111_v51 = vpack.c.bf16 %v8276_v45, %v8275_v41  ;;  %v8302_v41 = vld [vmem:[%s15667_s16 + $0x5e8] sm:$0xff]  ;;  %v8255_v45 = vld [vmem:[%s15667_s16 + $0x470] sm:$0xff] }
0x11b0   : > { %11048 = vmatpush3.bf16.msra.mxu0 %v11047_v54  ;;  %v13914_v54 = vld [vmem:[%s12845_s29 + $0x28] sm:$0xff] }
0x11b1   : > { %11050 = vmatprep.subr.bf16.mxu0 %v11049_v56  ;;  %v11113_v56 = vpack.c.bf16 %v8294_v47, %v8293_v46  ;;  %v8256_v46 = vld [vmem:[%s15667_s16 + $0x478] sm:$0xff] }
0x11b4   : > { %11052 = vmatpush3.bf16.msra.mxu0 %v11051_v2  ;;  %v8265_v2 = vld [vmem:[%s15667_s16 + $0x4c0] sm:$0xff] }
0x11b5   : > { %11054 = vmatprep.subr.bf16.mxu0 %v11053_v60  ;;  %v8266_v60 = vld [vmem:[%s15667_s16 + $0x4c8] sm:$0xff] }
0x11b6   : > { %v11089_v40 = vpack.c.bf16 %v8266_v60, %v8265_v2 }
0x11b7   : > { %v9225_v60 = vpop.f32.mrb[28].mxu1 }
0x11b8   : > { %11056 = vmatpush3.bf16.msra.mxu0 %v11055_v4  ;;  %v8267_v4 = vld [vmem:[%s15667_s16 + $0x4d0] sm:$0xff]  ;;  %11090 = vmatprep.subr.bf16.mxu1 %v11089_v40  ;;  %v9226_v22 = vpop.f32.mrb[29].mxu1 }
0x11b9   : > { %11058 = vmatprep.subr.bf16.mxu0 %v11057_v5  ;;  %v11115_v5 = vpack.c.bf16 %v8278_v62, %v8277_v61  ;;  %v11093_v21 = vpack.c.bf16 %v8268_v7, %v8267_v4  ;;  %11092 = vmatpush3.bf16.msra.mxu1 %v11091_v57  ;;  %v8285_v61 = vld [vmem:[%s15667_s16 + $0x560] sm:$0xff]  ;;  %v8286_v62 = vld [vmem:[%s15667_s16 + $0x568] sm:$0xff]  ;;  %v8287_v40 = vld [vmem:[%s15667_s16 + $0x570] sm:$0xff]  ;;  %v9227_v7 = vadd.f32 %v9226_v22, %v9225_v60 }
0x11ba   : > { %v11131_v2 = vpack.c.bf16 %v8286_v62, %v8285_v61  ;;  %v14032_v4 = vld [vmem:[%s12845_s29 + $0x10] sm:$0xff]  ;;  %v8319_v57 = vld [vmem:[%s15664_s13 + $0x88] sm:$0xff] }
0x11bb   : > { %11094 = vmatprep.subr.bf16.mxu1 %v11093_v21 }
0x11bc   : > { %11060 = vmatpush3.bf16.msra.mxu0 %v11059_v11  ;;  %v11117_v11 = vpack.c.bf16 %v8296_v0, %v8295_v25  ;;  %v8303_v25 = vld [vmem:[%s15667_s16 + $0x5f0] sm:$0xff]  ;;  %v8304_v0 = vld [vmem:[%s15667_s16 + $0x5f8] sm:$0xff] }
0x11bd   : > { %11062 = vmatprep.subr.bf16.mxu0 %v11061_v9  ;;  %v8280_v9 = vld [vmem:[%s15667_s16 + $0x538] sm:$0xff] }
0x11be   : > { %v11119_v53 = vpack.c.bf16 %v8280_v9, %v8279_v34  ;;  %v11133_v34 = vpack.c.bf16 %v8304_v0, %v8303_v25  ;;  %v8321_v9 = vld [vmem:[%s15664_s13 + $0x98] sm:$0xff] }
0x11c0   : > { %11064 = vmatpush3.bf16.msra.mxu0 %v11063_v8  ;;  %v8298_v8 = vld [vmem:[%s15667_s16 + $0x5c8] sm:$0xff] }
0x11c1   : > { %11066 = vmatprep.subr.bf16.mxu0 %v11065_v31  ;;  %v11095_v31 = vpack.c.bf16 %v8252_v16, %v8251_v20  ;;  %v11121_v28 = vpack.c.bf16 %v8298_v8, %v8297_v23  ;;  %v11135_v20 = vpack.c.bf16 %v8288_v43, %v8287_v40  ;;  %v14054_v23 = vld [vmem:[%s12845_s29 + $0x20] sm:$0xff]  ;;  %v11153_v8 = vpack.c.bf16 %v8323_v17, %v8322_v13 }
0x11c3   : > { %11096 = vmatpush3.bf16.msra.mxu1 %v11095_v31  ;;  %v8324_v31 = vld [vmem:[%s15664_s13 + $0xb0] sm:$0xff] }
0x11c4   : > { %11068 = vmatpush3.bf16.msra.mxu0 %v11067_v26  ;;  %v8271_v26 = vld [vmem:[%s15667_s16 + $0x4f0] sm:$0xff]  ;;  %11098 = vmatprep.subr.bf16.mxu1 %v11097_v18  ;;  %v8325_v18 = vld [vmem:[%s15664_s13 + $0xb8] sm:$0xff] }
0x11c5   : > { %11070 = vmatprep.subr.bf16.mxu0 %v11069_v27  ;;  %v8272_v27 = vld [vmem:[%s15667_s16 + $0x4f8] sm:$0xff] }
0x11c6   : > { %v11101_v10 = vpack.c.bf16 %v8272_v27, %v8271_v26 }
0x11c8   : > { %11072 = vmatpush3.bf16.msra.mxu0 %v11071_v32  ;;  %v8300_v32 = vld [vmem:[%s15667_s16 + $0x5d8] sm:$0xff] }
0x11c9   : > { %11106 = vmatprep.subr.bf16.mxu0 %v11105_v19  ;;  %v11099_v19 = vpack.c.bf16 %v8254_v52, %v8253_v49  ;;  %v11125_v35 = vpack.c.bf16 %v8300_v32, %v8299_v12  ;;  %v11157_v49 = vpack.c.bf16 %v8325_v18, %v8324_v31 }
0x11cb   : > { %5007 = vmatmul.mubr.f32.vlgmr.msra.gmra.mrb[48].mxu0 %v13910_v50  ;;  %11100 = vmatpush3.bf16.msra.mxu1 %v11099_v19 }
0x11cc   : > { %11108 = vmatpush3.bf16.msra.mxu0 %v11107_v37  ;;  %5146 = vmatprep.mubr.f32.mxu0 %v13914_v54  ;;  %v8284_v37 = vld [vmem:[%s15667_s16 + $0x558] sm:$0xff] }
0x11cd   : > { %11110 = vmatprep.subr.bf16.mxu0 %v11109_v38  ;;  %v8301_v38 = vld [vmem:[%s15667_s16 + $0x5e0] sm:$0xff]  ;;  %11102 = vmatprep.subr.bf16.mxu1 %v11101_v10  ;;  %v11127_v47 = vpack.c.bf16 %v8284_v37, %v8283_v36 }
0x11d0   : > { %11112 = vmatpush3.bf16.msra.mxu0 %v11111_v51  ;;  %v11103_v51 = vpack.c.bf16 %v8256_v46, %v8255_v45  ;;  %v8306_v45 = vld [vmem:[%s15668_s17 + $0x1] ss:$0 sm:$0xff] }
0x11d1   : > { %11114 = vmatprep.subr.bf16.mxu0 %v11113_v56  ;;  %v11129_v56 = vpack.c.bf16 %v8302_v41, %v8301_v38 }
0x11d2   : > { %11104 = vmatpush3.bf16.msra.mxu1 %v11103_v51 }
0x11d4   : > { %11116 = vmatpush3.bf16.msra.mxu0 %v11115_v5  ;;  %v8318_v5 = vld [vmem:[%s15664_s13 + $0x80] sm:$0xff] }
0x11d5   : > { %11118 = vmatprep.subr.bf16.mxu0 %v11117_v11  ;;  %5077 = vmatmul.mubr.f32.vlgmr.msra.gmra.mrb[32].mxu1 %v14032_v4  ;;  %v11145_v16 = vpack.c.bf16 %v8319_v57, %v8318_v5  ;;  %v8320_v11 = vld [vmem:[%s15664_s13 + $0x90] sm:$0xff] }
0x11d6   : > { %v11149_v21 = vpack.c.bf16 %v8321_v9, %v8320_v11 }
0x11d7   : > { %v9295_v52 = vpop.f32.mrb[30].mxu1 }
0x11d8   : > { %11120 = vmatpush3.bf16.msra.mxu0 %v11119_v53  ;;  %v9296_v53 = vpop.f32.mrb[31].mxu1 }
0x11d9   : > { %11122 = vmatprep.subr.bf16.mxu0 %v11121_v28  ;;  %v9297_v26 = vadd.f32 %v9296_v53, %v9295_v52  ;;  %v4348_v53 = vsel %vm4332_vm7, %v13607_v58, 0.0  ;;  %v4436_v58 = vld [vmem:[%s15669_s18] sm:$0xff] }
0x11dc   : > { %11124 = vmatpush3.bf16.msra.mxu0 %v11123_v33 }
0x11dd   : > { %11126 = vmatprep.subr.bf16.mxu0 %v11125_v35 }
0x11e0   : > { %11128 = vmatpush3.bf16.msra.mxu0 %v11127_v47 }
0x11e1   : > { %11130 = vmatprep.subr.bf16.mxu0 %v11129_v56 }
0x11e4   : > { %11132 = vmatpush3.bf16.msra.mxu0 %v11131_v2  ;;  %v14085_v2 = vld [vmem:[%s15665_s14 + $0x2] ss:$0 sm:$0xff] }
0x11e5   : > { %11134 = vmatprep.subr.bf16.mxu0 %v11133_v34 }
0x11e8   : > { %11136 = vmatpush3.bf16.msra.mxu0 %v11135_v20 }
0x11e9   : > { %11146 = vmatprep.subr.bf16.mxu0 %v11145_v16 }
0x11eb   : > { %5147 = vmatmul.mubr.f32.vlgmr.msra.gmra.mrb[50].mxu0 %v14054_v23 }
0x11ec   : > { %11148 = vmatpush3.bf16.msra.mxu0 %v11145_v16  ;;  %10381 = vmatprep.mubr.msk.f32.mxu0 %vm1253_vm1, %v13076_v15 }
0x11ed   : > { %11150 = vmatprep.subr.bf16.mxu0 %v11149_v21 }
0x11f0   : > { %11152 = vmatpush3.bf16.msra.mxu0 %v11149_v21 }
0x11f1   : > { %11154 = vmatprep.subr.bf16.mxu0 %v11153_v8 }
0x11f4   : > { %11156 = vmatpush3.bf16.msra.mxu0 %v11153_v8 }
0x11f5   : > { %11158 = vmatprep.subr.bf16.mxu0 %v11157_v49 }
0x11f8   : > { %11160 = vmatpush3.bf16.msra.mxu0 %v11157_v49 }
0x11fb   : > { %10382 = vmatmul.mubr.msk.f32.vlgmr.msra.gmra.mrb[52].mxu0 %vm1253_vm1, %v13078_v59 }
0x11fc   : > { %5829 = vmatprep.mubr.f32.mxu0 %v13709_v48 }
0x124e   : > { %v14068_v27 = vpop.f32.mrb[42].mxu0 }
0x124f   : > { %v14070_v28 = vpop.f32.mrb[43].mxu0 }
0x125e   : > { %v10340_v30 = vpop.f32.mrb[44].mxu0 }
0x125f   : > { %v4521_v12 = vpop.f32.mrb[45].mxu0  ;;  %v4527_v36 = vadd.f32 %v10340_v30, %v8110_v29  ;;  %v8313_v30 = vld [vmem:[%s15669_s18 + $0x18] sm:$0xff] }
0x1260   : > { %v4522_v32 = vadd.f32 %v8110_v29, %v4521_v12  ;;  %v8312_v29 = vld [vmem:[%s15669_s18 + $0x10] sm:$0xff] }
0x1261   : > { %v11137_v12 = vpack.c.bf16 %v8313_v30, %v8312_v29  ;;  %v8374_v30 = vld [vmem:[%s15666_s15 + $0x760] sm:$0xff] }
0x1262   : > { %10343 = vmatprep.mubr.msk.f32.mxu1 %vm1563_vm3, %v4522_v32 }
0x127e   : > { %v9260_v19 = vpop.f32.mrb[46].mxu0 }
0x127f   : > { %v9261_v10 = vpop.f32.mrb[47].mxu0 }
0x1280   : > { %v9262_v33 = vadd.f32 %v9261_v10, %v9260_v19  ;;  %v8378_v19 = vld [vmem:[%s15666_s15 + $0x780] sm:$0xff]  ;;  %v8379_v10 = vld [vmem:[%s15666_s15 + $0x788] sm:$0xff] }
0x1282   : > { %v4764_v48 = vadd.f32 %v9262_v33, %v9227_v7  ;;  %v11193_v33 = vpack.c.bf16 %v8379_v10, %v8378_v19  ;;  %v8393_v19 = vld [vmem:[%s15666_s15 + $0x7f8] sm:$0xff] }
0x1284   : > { %v4834_v35 = vadd.f32 %v9297_v26, %v4764_v48  ;;  %v4345_v26 = vsel %vm4332_vm7, %v13605_v3, 0.0  ;;  %v4437_v3 = vld [vmem:[%s15669_s18 + $0x8] sm:$0xff]  ;;  %11194 = vmatprep.subr.bf16.mxu0 %v11193_v33  ;;  %v8362_v48 = vld [vmem:[%s15666_s15 + $0x700] sm:$0xff]  ;;  %v8376_v33 = vld [vmem:[%s15666_s15 + $0x770] sm:$0xff] }
0x1285   : > { %v14114_v32 = vpack.c.bf16 %v4437_v3, %v4436_v58  ;;  %v8392_v3 = vld [vmem:[%s15666_s15 + $0x7f0] sm:$0xff] }
0x1286   : > { %10341 = vmatprep.subr.msk.mxu1 %vm1563_vm3, %v4834_v35  ;;  %v11221_v10 = vpack.c.bf16 %v8393_v19, %v8392_v3 }
0x1287   : > { %10342 = vmatpush3.xpose.msk.msra.mxu1 %vm1563_vm3, %v4834_v35  ;;  %v8363_v35 = vld [vmem:[%s15666_s15 + $0x708] sm:$0xff] }
0x128a   : > { %10344 = vmatmul.mubr.msk.f32.vlgmr.msra.gmra.mrb[34].mxu1 %vm1563_vm3, %v4527_v36  ;;  %v11195_v36 = vpack.c.bf16 %v8363_v35, %v8362_v48  ;;  %v8377_v48 = vld [vmem:[%s15666_s15 + $0x778] sm:$0xff] }
0x128b   : > { %v11223_v35 = vpack.c.bf16 %v8377_v48, %v8376_v33  ;;  %v8347_v33 = vld [vmem:[%s15666_s15 + $0x688] sm:$0xff]  ;;  %v8436_v48 = vld [vmem:[%s15667_s16 + $0x650] sm:$0xff] }
0x128c   : > { %11196 = vmatpush3.bf16.msra.mxu0 %v11195_v36 }
0x129e   : > { %v9330_v37 = vpop.f32.mrb[48].mxu0 }
0x129f   : > { %v9331_v38 = vpop.f32.mrb[49].mxu0 }
0x12a0   : > { %v9332_v41 = vadd.f32 %v9331_v38, %v9330_v37  ;;  %v8380_v37 = vld [vmem:[%s15666_s15 + $0x790] sm:$0xff]  ;;  %v8381_v38 = vld [vmem:[%s15666_s15 + $0x798] sm:$0xff] }
0x12a2   : > { %v5009_v46 = vadd.f32 %v9332_v41, %v8306_v45  ;;  %v11197_v41 = vpack.c.bf16 %v8381_v38, %v8380_v37  ;;  %v8364_v45 = vld [vmem:[%s15666_s15 + $0x710] sm:$0xff]  ;;  %v8442_v37 = vld [vmem:[%s15667_s16 + $0x680] sm:$0xff]  ;;  %v8443_v38 = vld [vmem:[%s15667_s16 + $0x688] sm:$0xff] }
0x12a4   : > { %11198 = vmatprep.subr.bf16.mxu0 %v11197_v41  ;;  %v8426_v41 = vld [vmem:[%s15667_s16 + $0x600] sm:$0xff] }
0x12a8   : > { %v9365_v47 = vpop.f32.mrb[32].mxu1 }
0x12a9   : > { %v9366_v51 = vpop.f32.mrb[33].mxu1 }
0x12aa   : > { %v9367_v56 = vadd.f32 %v9366_v51, %v9365_v47  ;;  %v8382_v51 = vld [vmem:[%s15666_s15 + $0x7a0] sm:$0xff] }
0x12ac   : > { %v5079_v61 = vadd.f32 %v9367_v56, %v5009_v46  ;;  %v8365_v46 = vld [vmem:[%s15666_s15 + $0x718] sm:$0xff]  ;;  %v8383_v56 = vld [vmem:[%s15666_s15 + $0x7a8] sm:$0xff] }
0x12ad   : > { %v11199_v47 = vpack.c.bf16 %v8365_v46, %v8364_v45  ;;  %v11257_v45 = vpack.c.bf16 %v8443_v38, %v8442_v37  ;;  %v8427_v46 = vld [vmem:[%s15667_s16 + $0x608] sm:$0xff]  ;;  %v8454_v38 = vld [vmem:[%s15667_s16 + $0x6e0] sm:$0xff] }
0x12af   : > { %11200 = vmatpush3.bf16.msra.mxu0 %v11199_v47  ;;  %v8444_v47 = vld [vmem:[%s15667_s16 + $0x690] sm:$0xff] }
0x12be   : > { %v9400_v62 = vpop.f32.mrb[50].mxu0 }
0x12bf   : > { %v9401_v25 = vpop.f32.mrb[51].mxu0 }
0x12c0   : > { %v9402_v0 = vadd.f32 %v9401_v25, %v9400_v62  ;;  %v8366_v62 = vld [vmem:[%s15666_s15 + $0x720] sm:$0xff]  ;;  %v8367_v25 = vld [vmem:[%s15666_s15 + $0x728] sm:$0xff] }
0x12c2   : > { %v5149_v43 = vadd.f32 %v9402_v0, %v5079_v61  ;;  %v11201_v61 = vpack.c.bf16 %v8383_v56, %v8382_v51  ;;  %v11203_v0 = vpack.c.bf16 %v8367_v25, %v8366_v62  ;;  %v8445_v51 = vld [vmem:[%s15667_s16 + $0x698] sm:$0xff]  ;;  %v11259_v56 = vpack.c.bf16 %v8427_v46, %v8426_v41  ;;  %v8428_v62 = vld [vmem:[%s15667_s16 + $0x610] sm:$0xff]  ;;  %v8455_v41 = vld [vmem:[%s15667_s16 + $0x6e8] sm:$0xff] }
0x12c3   : > { %v8429_v25 = vld [vmem:[%s15667_s16 + $0x618] sm:$0xff] }
0x12c4   : > { %10346 = vmatprep.subr.mxu1 %v5149_v43  ;;  %11202 = vmatprep.subr.bf16.mxu0 %v11201_v61  ;;  %v11261_v61 = vpack.c.bf16 %v8445_v51, %v8444_v47 }
0x12c5   : > { %10347 = vmatpush3.msra.mxu1 %v5149_v43  ;;  %11204 = vmatpush3.bf16.msra.mxu0 %v11203_v0  ;;  %v8385_v43 = vld [vmem:[%s15666_s15 + $0x7b8] sm:$0xff]  ;;  %v8446_v0 = vld [vmem:[%s15667_s16 + $0x6a0] sm:$0xff] }
0x12c6   : > { %11138 = vmatprep.subr.bf16.mxu1 %v11137_v12 }
0x12ce   : > { %v10383_v60 = vpop.f32.mrb[52].mxu0 }
0x12cf   : > { %v14088_v34 = vadd.f32 %v10383_v60, %v14085_v2  ;;  %v14090_v40 = vpop.f32.mrb[53].mxu0  ;;  %v8384_v60 = vld [vmem:[%s15666_s15 + $0x7b0] sm:$0xff] }
0x135d   : > { %v10345_v22 = vpop.f32.mrb[34].mxu1 }
0x135e   : > { %v5237_v5 = vmul.f32 0.018042196, %v10345_v22  ;;  %v5227_v57 = vpop.f32.mrb[35].mxu1  ;;  %v11205_v22 = vpack.c.bf16 %v8385_v43, %v8384_v60  ;;  %v8447_v60 = vld [vmem:[%s15667_s16 + $0x6a8] sm:$0xff]  ;;  %v11263_v43 = vpack.c.bf16 %v8429_v25, %v8428_v62  ;;  %v11281_v62 = vpack.c.bf16 %v8455_v41, %v8454_v38  ;;  %v8438_v25 = vld [vmem:[%s15667_s16 + $0x660] sm:$0xff] }
0x135f   : > { %v5236_v7 = vmul.f32 0.018042196, %v5227_v57  ;;  %v8369_v57 = vld [vmem:[%s15666_s15 + $0x738] sm:$0xff]  ;;  %v8359_v38 = vld [vmem:[%s15666_s15 + $0x6e8] sm:$0xff] }
0x1360   : > { %v5241_v20 = vsel %vm4332_vm7, %v5237_v5, -inf  ;;  %11206 = vmatprep.subr.bf16.mxu0 %v11205_v22  ;;  %v11265_v22 = vpack.c.bf16 %v8447_v60, %v8446_v0  ;;  %v8439_v0 = vld [vmem:[%s15667_s16 + $0x668] sm:$0xff] }
0x1361   : > { %5242 = vmax.xlane.f32.xlu1 %v5241_v20  ;;  %v5238_v16 = vsel %vm4332_vm7, %v5236_v7, -inf  ;;  %v8386_v20 = vld [vmem:[%s15666_s15 + $0x7c0] sm:$0xff]  ;;  %v8331_v60 = vld [vmem:[%s15666_s15 + $0x608] sm:$0xff] }
0x1362   : > { %5239 = vmax.xlane.f32.xlu0 %v5238_v16  ;;  %v8387_v16 = vld [vmem:[%s15666_s15 + $0x7c8] sm:$0xff] }
0x13ee   : > { %v5243_v11 = vpop.xlane.xlu1 %5242 }
0x13ef   : > { %v5245_v9 = vsub.f32 %v5237_v5, %v5243_v11  ;;  %v5240_v21 = vpop.xlane.xlu0 %5239  ;;  %v8368_v5 = vld [vmem:[%s15666_s15 + $0x730] sm:$0xff]  ;;  %v11209_v11 = vpack.c.bf16 %v8387_v16, %v8386_v20  ;;  %v8449_v16 = vld [vmem:[%s15667_s16 + $0x6b8] sm:$0xff] }
0x13f0   : > { %v5244_v13 = vsub.f32 %v5236_v7, %v5240_v21  ;;  %v11207_v7 = vpack.c.bf16 %v8369_v57, %v8368_v5  ;;  %v8371_v21 = vld [vmem:[%s15666_s15 + $0x748] sm:$0xff]  ;;  %v8430_v5 = vld [vmem:[%s15667_s16 + $0x620] sm:$0xff]  ;;  %v8448_v20 = vld [vmem:[%s15667_s16 + $0x6b0] sm:$0xff] }
0x13f1   : > { %v5248_v17 = vmul.f32 1.442695, %v5245_v9  ;;  %v8370_v9 = vld [vmem:[%s15666_s15 + $0x740] sm:$0xff]  ;;  %v8431_v57 = vld [vmem:[%s15667_s16 + $0x628] sm:$0xff] }
0x13f2   : > { %v5246_v8 = vmul.f32 1.442695, %v5244_v13  ;;  %11208 = vmatpush3.bf16.msra.mxu0 %v11207_v7  ;;  %v11211_v13 = vpack.c.bf16 %v8371_v21, %v8370_v9  ;;  %v11267_v9 = vpack.c.bf16 %v8431_v57, %v8430_v5  ;;  %v11269_v21 = vpack.c.bf16 %v8449_v16, %v8448_v20  ;;  %v8348_v5 = vld [vmem:[%s15666_s15 + $0x690] sm:$0xff] }
0x13f3   : > { %11723 = vpow2.f32 %v5248_v17  ;;  %11210 = vmatprep.subr.bf16.mxu0 %v11209_v11  ;;  %v8388_v17 = vld [vmem:[%s15666_s15 + $0x7d0] sm:$0xff] }
0x13f4   : > { %11725 = vpow2.f32 %v5246_v8  ;;  %v8389_v8 = vld [vmem:[%s15666_s15 + $0x7d8] sm:$0xff]  ;;  %v8332_v16 = vld [vmem:[%s15666_s15 + $0x610] sm:$0xff] }
0x13f6   : > { %11212 = vmatpush3.bf16.msra.mxu0 %v11211_v13  ;;  %v8432_v13 = vld [vmem:[%s15667_s16 + $0x630] sm:$0xff] }
0x13fd   : > { %v11724_v31 = vpop.eup %11723 }
0x13fe   : > { %v11726_v18 = vpop.eup %11725  ;;  %v5253_v49 = vsel %vm4332_vm7, %v11724_v31, 0.0 }
0x13ff   : > { %5254 = vadd.xlane.f32.xlu1 %v5253_v49  ;;  %10348 = vmatprep.mubr.msk.f32.mxu1 %vm4332_vm7, %v11726_v18  ;;  %v5250_v52 = vsel %vm4332_vm7, %v11726_v18, 0.0  ;;  %v8372_v18 = vld [vmem:[%s15666_s15 + $0x750] sm:$0xff]  ;;  %v8373_v49 = vld [vmem:[%s15666_s15 + $0x758] sm:$0xff] }
0x1400   : > { %10349 = vmatmul.mubr.msk.f32.vlgmr.msra.gmra.mrb[36].mxu1 %vm4332_vm7, %v11724_v31  ;;  %5251 = vadd.xlane.f32.xlu0 %v5250_v52  ;;  %v11213_v31 = vpack.c.bf16 %v8389_v8, %v8388_v17  ;;  %v11215_v52 = vpack.c.bf16 %v8373_v49, %v8372_v18  ;;  %v8433_v17 = vld [vmem:[%s15667_s16 + $0x638] sm:$0xff]  ;;  %v8450_v8 = vld [vmem:[%s15667_s16 + $0x6c0] sm:$0xff] }
0x1401   : > { %11140 = vmatpush3.bf16.msra.mxu1 %v11137_v12  ;;  %v8375_v12 = vld [vmem:[%s15666_s15 + $0x768] sm:$0xff]  ;;  %v11271_v18 = vpack.c.bf16 %v8433_v17, %v8432_v13  ;;  %v8334_v17 = vld [vmem:[%s15666_s15 + $0x620] sm:$0xff] }
0x1402   : > { %11142 = vmatprep.subr.bf16.mxu1 %v14114_v32  ;;  %11214 = vmatprep.subr.bf16.mxu0 %v11213_v31  ;;  %v11219_v58 = vpack.c.bf16 %v8375_v12, %v8374_v30  ;;  %v8451_v31 = vld [vmem:[%s15667_s16 + $0x6c8] sm:$0xff]  ;;  %v8453_v30 = vld [vmem:[%s15667_s16 + $0x6d8] sm:$0xff] }
0x1403   : > { %4349 = vadd.xlane.f32.xlu1 %v4348_v53  ;;  %v8390_v53 = vld [vmem:[%s15666_s15 + $0x7e0] sm:$0xff]  ;;  %11216 = vmatpush3.bf16.msra.mxu0 %v11215_v52  ;;  %v11273_v52 = vpack.c.bf16 %v8451_v31, %v8450_v8  ;;  %v8335_v8 = vld [vmem:[%s15666_s15 + $0x628] sm:$0xff]  ;;  %v8352_v31 = vld [vmem:[%s15666_s15 + $0x6b0] sm:$0xff] }
0x1404   : > { %4346 = vadd.xlane.f32.xlu0 %v4345_v26  ;;  %v8391_v26 = vld [vmem:[%s15666_s15 + $0x7e8] sm:$0xff] }
0x1405   : > { %v11217_v29 = vpack.c.bf16 %v8391_v26, %v8390_v53  ;;  %v8434_v53 = vld [vmem:[%s15667_s16 + $0x640] sm:$0xff]  ;;  %v8435_v26 = vld [vmem:[%s15667_s16 + $0x648] sm:$0xff] }
0x1406   : > { %v11275_v12 = vpack.c.bf16 %v8435_v26, %v8434_v53  ;;  %v8337_v53 = vld [vmem:[%s15666_s15 + $0x638] sm:$0xff]  ;;  %v8354_v26 = vld [vmem:[%s15666_s15 + $0x6c0] sm:$0xff] }
0x1407   : > { %11218 = vmatprep.subr.bf16.mxu0 %v11217_v29  ;;  %v8452_v29 = vld [vmem:[%s15667_s16 + $0x6d0] sm:$0xff] }
0x1408   : > { %11220 = vmatpush3.bf16.msra.mxu0 %v11219_v58  ;;  %v8346_v58 = vld [vmem:[%s15666_s15 + $0x680] sm:$0xff]  ;;  %v11277_v3 = vpack.c.bf16 %v8453_v30, %v8452_v29  ;;  %v8355_v29 = vld [vmem:[%s15666_s15 + $0x6c8] sm:$0xff] }
0x1409   : > { %11222 = vmatprep.subr.bf16.mxu0 %v11221_v10  ;;  %v11161_v51 = vpack.c.bf16 %v8347_v33, %v8346_v58  ;;  %v8338_v58 = vld [vmem:[%s15666_s15 + $0x640] sm:$0xff] }
0x140c   : > { %11224 = vmatpush3.bf16.msra.mxu0 %v11223_v35  ;;  %v8437_v35 = vld [vmem:[%s15667_s16 + $0x658] sm:$0xff] }
0x140d   : > { %11258 = vmatprep.subr.bf16.mxu0 %v11257_v45 }
0x140f   : > { %5830 = vmatmul.mubr.f32.vlgmr.msra.gmra.mrb[54].mxu0 %v14032_v4 }
0x1410   : > { %6074 = vmatprep.mubr.f32.mxu0 %v13810_v55  ;;  %11260 = vmatpush3.bf16.msra.mxu0 %v11259_v56  ;;  %v11279_v56 = vpack.c.bf16 %v8437_v35, %v8436_v48  ;;  %v8340_v35 = vld [vmem:[%s15666_s15 + $0x650] sm:$0xff] }
0x1411   : > { %11262 = vmatprep.subr.bf16.mxu0 %v11261_v61 }
0x1414   : > { %11264 = vmatpush3.bf16.msra.mxu0 %v11263_v43  ;;  %v11283_v43 = vpack.c.bf16 %v8439_v0, %v8438_v25  ;;  %v8344_v25 = vld [vmem:[%s15666_s15 + $0x670] sm:$0xff]  ;;  %v8345_v0 = vld [vmem:[%s15666_s15 + $0x678] sm:$0xff] }
0x1415   : > { %11266 = vmatprep.subr.bf16.mxu0 %v11265_v22 }
0x1418   : > { %11268 = vmatpush3.bf16.msra.mxu0 %v11267_v9  ;;  %v8350_v9 = vld [vmem:[%s15666_s15 + $0x6a0] sm:$0xff] }
0x1419   : > { %11270 = vmatprep.subr.bf16.mxu0 %v11269_v21  ;;  %v8351_v21 = vld [vmem:[%s15666_s15 + $0x6a8] sm:$0xff] }
0x141a   : > { %v11169_v13 = vpack.c.bf16 %v8351_v21, %v8350_v9  ;;  %v8397_v9 = vld [vmem:[%s15666_s15 + $0x818] sm:$0xff]  ;;  %v8414_v21 = vld [vmem:[%s15666_s15 + $0x8a0] sm:$0xff] }
0x141c   : > { %11272 = vmatpush3.bf16.msra.mxu0 %v11271_v18  ;;  %v8353_v18 = vld [vmem:[%s15666_s15 + $0x6b8] sm:$0xff] }
0x141d   : > { %11274 = vmatprep.subr.bf16.mxu0 %v11273_v52  ;;  %v8336_v52 = vld [vmem:[%s15666_s15 + $0x630] sm:$0xff] }
0x141e   : > { %v11175_v30 = vpack.c.bf16 %v8337_v53, %v8336_v52  ;;  %v8401_v52 = vld [vmem:[%s15666_s15 + $0x838] sm:$0xff]  ;;  %v8418_v53 = vld [vmem:[%s15666_s15 + $0x8c0] sm:$0xff] }
0x1420   : > { %11276 = vmatpush3.bf16.msra.mxu0 %v11275_v12  ;;  %v11177_v12 = vpack.c.bf16 %v8355_v29, %v8354_v26  ;;  %v8419_v26 = vld [vmem:[%s15666_s15 + $0x8c8] sm:$0xff] }
0x1421   : > { %11278 = vmatprep.subr.bf16.mxu0 %v11277_v3  ;;  %v8339_v3 = vld [vmem:[%s15666_s15 + $0x648] sm:$0xff] }
0x1422   : > { %v11179_v33 = vpack.c.bf16 %v8339_v3, %v8338_v58  ;;  %v8403_v58 = vld [vmem:[%s15666_s15 + $0x848] sm:$0xff]  ;;  %v8420_v3 = vld [vmem:[%s15666_s15 + $0x8d0] sm:$0xff] }
0x1424   : > { %11280 = vmatpush3.bf16.msra.mxu0 %v11279_v56  ;;  %v8361_v56 = vld [vmem:[%s15666_s15 + $0x6f8] sm:$0xff] }
0x1425   : > { %11282 = vmatprep.subr.bf16.mxu0 %v11281_v62 }
0x1428   : > { %11284 = vmatpush3.bf16.msra.mxu0 %v11283_v43  ;;  %v11191_v43 = vpack.c.bf16 %v8345_v0, %v8344_v25  ;;  %v8409_v25 = vld [vmem:[%s15666_s15 + $0x878] sm:$0xff]  ;;  %v8474_v0 = vld [vmem:[%s15667_s16 + $0x780] sm:$0xff] }
0x148c   : > { %v5255_v11 = vpop.xlane.xlu1 %5254 }
0x148d   : > { %v5252_v36 = vpop.xlane.xlu0 %5251 }
0x148e   : > { %11727 = vrcp.f32 %v5252_v36 }
0x1490   : > { %v4350_v49 = vpop.xlane.xlu1 %4349 }
0x1491   : > { %v4347_v7 = vpop.xlane.xlu0 %4346 }
0x1492   : > { %11729 = vrcp.f32 %v4347_v7 }
0x1493   : > { %11731 = vrcp.f32 %v5255_v11  ;;  %v8333_v11 = vld [vmem:[%s15666_s15 + $0x618] sm:$0xff] }
0x1494   : > { %11733 = vrcp.f32 %v4350_v49  ;;  %v11173_v49 = vpack.c.bf16 %v8353_v18, %v8352_v31  ;;  %v8399_v31 = vld [vmem:[%s15666_s15 + $0x828] sm:$0xff]  ;;  %v8416_v18 = vld [vmem:[%s15666_s15 + $0x8b0] sm:$0xff] }
0x1498   : > { %v11728_v19 = vpop.eup %11727 }
0x149c   : > { %v11730_v36 = vpop.eup %11729 }
0x149d   : > { %v11732_v45 = vpop.eup %11731  ;;  %v4433_v61 = vmul.f32 %v11730_v36, %v14070_v28  ;;  %v8330_v28 = vld [vmem:[%s15666_s15 + $0x600] sm:$0xff]  ;;  %v8341_v36 = vld [vmem:[%s15666_s15 + $0x658] sm:$0xff] }
0x149e   : > { %v11734_v22 = vpop.eup %11733  ;;  %v11163_v57 = vpack.c.bf16 %v8331_v60, %v8330_v28  ;;  %v11183_v41 = vpack.c.bf16 %v8341_v36, %v8340_v35  ;;  %v8410_v28 = vld [vmem:[%s15666_s15 + $0x880] sm:$0xff]  ;;  %v8411_v60 = vld [vmem:[%s15666_s15 + $0x888] sm:$0xff]  ;;  %v8405_v35 = vld [vmem:[%s15666_s15 + $0x858] sm:$0xff] }
0x149f   : > { %v4435_v7 = vmul.f32 %v11734_v22, %v14068_v27  ;;  %v11167_v27 = vpack.c.bf16 %v8333_v11, %v8332_v16  ;;  %v11225_v22 = vpack.c.bf16 %v8411_v60, %v8410_v28  ;;  %v8396_v11 = vld [vmem:[%s15666_s15 + $0x810] sm:$0xff]  ;;  %v8422_v36 = vld [vmem:[%s15666_s15 + $0x8e0] sm:$0xff]  ;;  %v8475_v28 = vld [vmem:[%s15667_s16 + $0x788] sm:$0xff] }
0x14d3   : > { %v10350_v10 = vpop.f32.mrb[36].mxu1 }
0x14d4   : > { %v5328_v37 = vpop.f32.mrb[37].mxu1  ;;  %v5340_v47 = vmul.f32 %v11732_v45, %v10350_v10  ;;  %v8357_v10 = vld [vmem:[%s15666_s15 + $0x6d8] sm:$0xff] }
0x14d5   : > { %v5338_v46 = vmul.f32 %v11728_v19, %v5328_v37  ;;  %v8356_v19 = vld [vmem:[%s15666_s15 + $0x6d0] sm:$0xff]  ;;  %v8358_v37 = vld [vmem:[%s15666_s15 + $0x6e0] sm:$0xff] }
0x14d6   : > { %v11181_v48 = vpack.c.bf16 %v8357_v10, %v8356_v19  ;;  %v11185_v45 = vpack.c.bf16 %v8359_v38, %v8358_v37  ;;  %v8421_v19 = vld [vmem:[%s15666_s15 + $0x8d8] sm:$0xff]  ;;  %v8423_v37 = vld [vmem:[%s15666_s15 + $0x8e8] sm:$0xff] }
0x14d7   : > { %10355 = vmatprep.mubr.msk.f32.mxu1 %vm1563_vm3, %v5338_v46  ;;  %v8342_v46 = vld [vmem:[%s15666_s15 + $0x660] sm:$0xff] }
0x14d8   : > { %10356 = vmatmul.mubr.msk.f32.vlgmr.msra.gmra.mrb[38].mxu1 %vm1563_vm3, %v5340_v47  ;;  %v8343_v47 = vld [vmem:[%s15666_s15 + $0x668] sm:$0xff] }
0x14d9   : > { %11144 = vmatpush3.bf16.msra.mxu1 %v14114_v32  ;;  %10362 = vmatprep.mubr.msk.f32.mxu1 %vm1563_vm3, %v4433_v61  ;;  %v8349_v32 = vld [vmem:[%s15666_s15 + $0x698] sm:$0xff]  ;;  %v11187_v61 = vpack.c.bf16 %v8343_v47, %v8342_v46  ;;  %v8407_v46 = vld [vmem:[%s15666_s15 + $0x868] sm:$0xff]  ;;  %v8424_v47 = vld [vmem:[%s15666_s15 + $0x8f0] sm:$0xff] }
0x14da   : > { %11162 = vmatprep.subr.bf16.mxu1 %v11161_v51  ;;  %v11165_v20 = vpack.c.bf16 %v8349_v32, %v8348_v5  ;;  %v8360_v51 = vld [vmem:[%s15666_s15 + $0x6f0] sm:$0xff]  ;;  %v8394_v5 = vld [vmem:[%s15666_s15 + $0x800] sm:$0xff]  ;;  %v8395_v32 = vld [vmem:[%s15666_s15 + $0x808] sm:$0xff] }
0x14db   : > { %v11189_v62 = vpack.c.bf16 %v8361_v56, %v8360_v51  ;;  %v8425_v51 = vld [vmem:[%s15666_s15 + $0x8f8] sm:$0xff] }
0x14e0   : > { %10363 = vmatmul.mubr.msk.f32.vlgmr.msra.gmra.mrb[38].mxu1 %vm1563_vm3, %v4435_v7  ;;  %v8413_v7 = vld [vmem:[%s15666_s15 + $0x898] sm:$0xff] }
0x14e1   : > { %11164 = vmatpush3.bf16.msra.mxu1 %v11163_v57  ;;  %5759 = vmatprep.mubr.f32.mxu1 %v13810_v55  ;;  %v11171_v55 = vpack.c.bf16 %v8335_v8, %v8334_v17  ;;  %v8412_v57 = vld [vmem:[%s15666_s15 + $0x890] sm:$0xff]  ;;  %v8398_v8 = vld [vmem:[%s15666_s15 + $0x820] sm:$0xff] }
0x14e2   : > { %11166 = vmatprep.subr.bf16.mxu1 %v11165_v20  ;;  %v11227_v20 = vpack.c.bf16 %v8395_v32, %v8394_v5  ;;  %v11229_v16 = vpack.c.bf16 %v8413_v7, %v8412_v57  ;;  %v8459_v5 = vld [vmem:[%s15667_s16 + $0x708] sm:$0xff]  ;;  %v8476_v32 = vld [vmem:[%s15667_s16 + $0x790] sm:$0xff]  ;;  %v8477_v57 = vld [vmem:[%s15667_s16 + $0x798] sm:$0xff] }
0x14e5   : > { %11168 = vmatpush3.bf16.msra.mxu1 %v11167_v27  ;;  %v8415_v27 = vld [vmem:[%s15666_s15 + $0x8a8] sm:$0xff] }
0x14e6   : > { %11170 = vmatprep.subr.bf16.mxu1 %v11169_v13  ;;  %v11231_v13 = vpack.c.bf16 %v8397_v9, %v8396_v11  ;;  %v11233_v17 = vpack.c.bf16 %v8415_v27, %v8414_v21  ;;  %v8461_v11 = vld [vmem:[%s15667_s16 + $0x718] sm:$0xff]  ;;  %v8478_v9 = vld [vmem:[%s15667_s16 + $0x7a0] sm:$0xff]  ;;  %v8479_v21 = vld [vmem:[%s15667_s16 + $0x7a8] sm:$0xff] }
0x14e9   : > { %11172 = vmatpush3.bf16.msra.mxu1 %v11171_v55 }
0x14ea   : > { %11174 = vmatprep.subr.bf16.mxu1 %v11173_v49  ;;  %v8400_v49 = vld [vmem:[%s15666_s15 + $0x830] sm:$0xff] }
0x14eb   : > { %v11239_v29 = vpack.c.bf16 %v8401_v52, %v8400_v49  ;;  %v8465_v49 = vld [vmem:[%s15667_s16 + $0x738] sm:$0xff]  ;;  %v8482_v52 = vld [vmem:[%s15667_s16 + $0x7c0] sm:$0xff] }
0x14ed   : > { %11176 = vmatpush3.bf16.msra.mxu1 %v11175_v30  ;;  %v11241_v30 = vpack.c.bf16 %v8419_v26, %v8418_v53  ;;  %v8483_v53 = vld [vmem:[%s15667_s16 + $0x7c8] sm:$0xff] }
0x14ee   : > { %11178 = vmatprep.subr.bf16.mxu1 %v11177_v12  ;;  %v8402_v12 = vld [vmem:[%s15666_s15 + $0x840] sm:$0xff] }
0x14ef   : > { %v11243_v10 = vpack.c.bf16 %v8403_v58, %v8402_v12  ;;  %v8467_v12 = vld [vmem:[%s15667_s16 + $0x748] sm:$0xff]  ;;  %v8484_v58 = vld [vmem:[%s15667_s16 + $0x7d0] sm:$0xff] }
0x14f1   : > { %11180 = vmatpush3.bf16.msra.mxu1 %v11179_v33  ;;  %v11245_v33 = vpack.c.bf16 %v8421_v19, %v8420_v3  ;;  %v8485_v3 = vld [vmem:[%s15667_s16 + $0x7d8] sm:$0xff] }
0x14f2   : > { %11182 = vmatprep.subr.bf16.mxu1 %v11181_v48  ;;  %v8404_v48 = vld [vmem:[%s15666_s15 + $0x850] sm:$0xff] }
0x14f3   : > { %v11247_v38 = vpack.c.bf16 %v8405_v35, %v8404_v48  ;;  %v8469_v48 = vld [vmem:[%s15667_s16 + $0x758] sm:$0xff]  ;;  %v8486_v35 = vld [vmem:[%s15667_s16 + $0x7e0] sm:$0xff] }
0x14f5   : > { %11184 = vmatpush3.bf16.msra.mxu1 %v11183_v41  ;;  %v11249_v41 = vpack.c.bf16 %v8423_v37, %v8422_v36  ;;  %v8487_v36 = vld [vmem:[%s15667_s16 + $0x7e8] sm:$0xff] }
0x14f6   : > { %11186 = vmatprep.subr.bf16.mxu1 %v11185_v45  ;;  %v8406_v45 = vld [vmem:[%s15666_s15 + $0x860] sm:$0xff] }
0x14f7   : > { %v11251_v56 = vpack.c.bf16 %v8407_v46, %v8406_v45  ;;  %v8471_v45 = vld [vmem:[%s15667_s16 + $0x768] sm:$0xff]  ;;  %v8488_v46 = vld [vmem:[%s15667_s16 + $0x7f0] sm:$0xff] }
0x14f9   : > { %11188 = vmatpush3.bf16.msra.mxu1 %v11187_v61  ;;  %v11253_v61 = vpack.c.bf16 %v8425_v51, %v8424_v47  ;;  %v8489_v47 = vld [vmem:[%s15667_s16 + $0x7f8] sm:$0xff] }
0x14fa   : > { %11190 = vmatprep.subr.bf16.mxu1 %v11189_v62  ;;  %v8408_v62 = vld [vmem:[%s15666_s15 + $0x870] sm:$0xff] }
0x14fb   : > { %v11255_v60 = vpack.c.bf16 %v8409_v25, %v8408_v62  ;;  %v8473_v62 = vld [vmem:[%s15667_s16 + $0x778] sm:$0xff] }
0x14fd   : > { %11192 = vmatpush3.bf16.msra.mxu1 %v11191_v43  ;;  %v11289_v43 = vpack.c.bf16 %v8475_v28, %v8474_v0  ;;  %v5590_v0 = vadd.f32 %v14085_v2, %v14090_v40  ;;  %v8456_v28 = vld [vmem:[%s15667_s16 + $0x6f0] sm:$0xff]  ;;  %v8441_v2 = vld [vmem:[%s15667_s16 + $0x678] sm:$0xff] }
0x14fe   : > { %11226 = vmatprep.subr.bf16.mxu1 %v11225_v22  ;;  %v8458_v22 = vld [vmem:[%s15667_s16 + $0x700] sm:$0xff] }
0x14ff   : > { %v11291_v7 = vpack.c.bf16 %v8459_v5, %v8458_v22  ;;  %v8440_v22 = vld [vmem:[%s15667_s16 + $0x670] sm:$0xff] }
0x1500   : > { %5760 = vmatmul.mubr.f32.vlgmr.msra.gmra.mrb[40].mxu1 %v13910_v50  ;;  %v8417_v50 = vld [vmem:[%s15666_s15 + $0x8b8] sm:$0xff]  ;;  %v11287_v40 = vpack.c.bf16 %v8441_v2, %v8440_v22  ;;  %v8504_v2 = vld [vmem:[%s15667_s16 + $0x870] sm:$0xff] }
0x1501   : > { %11228 = vmatpush3.bf16.msra.mxu1 %v11227_v20  ;;  %5899 = vmatprep.mubr.f32.mxu1 %v13914_v54  ;;  %v11235_v54 = vpack.c.bf16 %v8399_v31, %v8398_v8  ;;  %v11237_v55 = vpack.c.bf16 %v8417_v50, %v8416_v18  ;;  %v11293_v20 = vpack.c.bf16 %v8477_v57, %v8476_v32  ;;  %v8462_v8 = vld [vmem:[%s15667_s16 + $0x720] sm:$0xff]  ;;  %v8463_v31 = vld [vmem:[%s15667_s16 + $0x728] sm:$0xff]  ;;  %v8481_v18 = vld [vmem:[%s15667_s16 + $0x7b8] sm:$0xff] }
0x1502   : > { %11230 = vmatprep.subr.bf16.mxu1 %v11229_v16  ;;  %v8460_v16 = vld [vmem:[%s15667_s16 + $0x710] sm:$0xff]  ;;  %v11299_v50 = vpack.c.bf16 %v8463_v31, %v8462_v8  ;;  %v8506_v57 = vld [vmem:[%s15667_s16 + $0x880] sm:$0xff]  ;;  %v8493_v8 = vld [vmem:[%s15667_s16 + $0x818] sm:$0xff] }
0x1503   : > { %v11295_v27 = vpack.c.bf16 %v8461_v11, %v8460_v16  ;;  %v8490_v16 = vld [vmem:[%s15667_s16 + $0x800] sm:$0xff]  ;;  %v8491_v11 = vld [vmem:[%s15667_s16 + $0x808] sm:$0xff] }
0x1504   : > { %v14645_v31 = vld [vmem:[%s12845_s29] sm:$0xff] }
0x1505   : > { %11232 = vmatpush3.bf16.msra.mxu1 %v11231_v13  ;;  %v14533_v13 = vld [vmem:[%s12845_s29 + $0x18] sm:$0xff] }
0x1506   : > { %11234 = vmatprep.subr.bf16.mxu1 %v11233_v17  ;;  %v11297_v17 = vpack.c.bf16 %v8479_v21, %v8478_v9  ;;  %v8508_v9 = vld [vmem:[%s15667_s16 + $0x890] sm:$0xff]  ;;  %v11323_v21 = vpack.c.bf16 %v8491_v11, %v8490_v16 }
0x1509   : > { %11236 = vmatpush3.bf16.msra.mxu1 %v11235_v54 }
0x150a   : > { %11238 = vmatprep.subr.bf16.mxu1 %v11237_v55  ;;  %v8464_v55 = vld [vmem:[%s15667_s16 + $0x730] sm:$0xff] }
0x150b   : > { %v11303_v26 = vpack.c.bf16 %v8465_v49, %v8464_v55  ;;  %v14655_v55 = vld [vmem:[%s12845_s29 + $0x28] sm:$0xff] }
0x150d   : > { %11240 = vmatpush3.bf16.msra.mxu1 %v11239_v29  ;;  %v11305_v29 = vpack.c.bf16 %v8483_v53, %v8482_v52  ;;  %v8494_v52 = vld [vmem:[%s15667_s16 + $0x820] sm:$0xff]  ;;  %v8495_v53 = vld [vmem:[%s15667_s16 + $0x828] sm:$0xff] }
0x150e   : > { %11242 = vmatprep.subr.bf16.mxu1 %v11241_v30  ;;  %v8466_v30 = vld [vmem:[%s15667_s16 + $0x740] sm:$0xff] }
0x150f   : > { %v11307_v19 = vpack.c.bf16 %v8467_v12, %v8466_v30  ;;  %v11331_v30 = vpack.c.bf16 %v8495_v53, %v8494_v52 }
0x1511   : > { %11244 = vmatpush3.bf16.msra.mxu1 %v11243_v10  ;;  %v11309_v10 = vpack.c.bf16 %v8485_v3, %v8484_v58  ;;  %v8496_v58 = vld [vmem:[%s15667_s16 + $0x830] sm:$0xff]  ;;  %v8497_v3 = vld [vmem:[%s15667_s16 + $0x838] sm:$0xff] }
0x1512   : > { %11246 = vmatprep.subr.bf16.mxu1 %v11245_v33  ;;  %v8468_v33 = vld [vmem:[%s15667_s16 + $0x750] sm:$0xff] }
0x1513   : > { %v11311_v37 = vpack.c.bf16 %v8469_v48, %v8468_v33  ;;  %v11335_v33 = vpack.c.bf16 %v8497_v3, %v8496_v58 }
0x1515   : > { %11248 = vmatpush3.bf16.msra.mxu1 %v11247_v38  ;;  %v11313_v38 = vpack.c.bf16 %v8487_v36, %v8486_v35  ;;  %v8498_v35 = vld [vmem:[%s15667_s16 + $0x840] sm:$0xff]  ;;  %v8499_v36 = vld [vmem:[%s15667_s16 + $0x848] sm:$0xff] }
0x1516   : > { %11250 = vmatprep.subr.bf16.mxu1 %v11249_v41  ;;  %v8470_v41 = vld [vmem:[%s15667_s16 + $0x760] sm:$0xff] }
0x1517   : > { %v11315_v51 = vpack.c.bf16 %v8471_v45, %v8470_v41  ;;  %v11339_v41 = vpack.c.bf16 %v8499_v36, %v8498_v35 }
0x1519   : > { %11252 = vmatpush3.bf16.msra.mxu1 %v11251_v56  ;;  %v11317_v56 = vpack.c.bf16 %v8489_v47, %v8488_v46  ;;  %v8500_v46 = vld [vmem:[%s15667_s16 + $0x850] sm:$0xff]  ;;  %v8501_v47 = vld [vmem:[%s15667_s16 + $0x858] sm:$0xff] }
0x151a   : > { %11254 = vmatprep.subr.bf16.mxu1 %v11253_v61  ;;  %v8472_v61 = vld [vmem:[%s15667_s16 + $0x770] sm:$0xff] }
0x151b   : > { %v11319_v25 = vpack.c.bf16 %v8473_v62, %v8472_v61  ;;  %v11343_v61 = vpack.c.bf16 %v8501_v47, %v8500_v46 }
0x151d   : > { %11256 = vmatpush3.bf16.msra.mxu1 %v11255_v60  ;;  %v8457_v60 = vld [vmem:[%s15667_s16 + $0x6f8] sm:$0xff] }
0x151e   : > { %11290 = vmatprep.subr.bf16.mxu1 %v11289_v43  ;;  %v11285_v43 = vpack.c.bf16 %v8457_v60, %v8456_v28  ;;  %v8520_v60 = vld [vmem:[%s15667_s16 + $0x8f0] sm:$0xff] }
0x1520   : > { %5900 = vmatmul.mubr.f32.vlgmr.msra.gmra.mrb[42].mxu1 %v14054_v23  ;;  %v8480_v23 = vld [vmem:[%s15667_s16 + $0x7b0] sm:$0xff]  ;;  %11286 = vmatprep.subr.bf16.mxu0 %v11285_v43  ;;  %v8521_v43 = vld [vmem:[%s15667_s16 + $0x8f8] sm:$0xff] }
0x1521   : > { %11292 = vmatpush3.bf16.msra.mxu1 %v11291_v7  ;;  %6144 = vmatprep.mubr.f32.mxu1 %v14533_v13  ;;  %v11301_v54 = vpack.c.bf16 %v8481_v18, %v8480_v23  ;;  %v8507_v7 = vld [vmem:[%s15667_s16 + $0x888] sm:$0xff]  ;;  %v8510_v18 = vld [vmem:[%s15667_s16 + $0x8a0] sm:$0xff]  ;;  %v11349_v22 = vpack.c.bf16 %v8521_v43, %v8520_v60  ;;  %v8564_v60 = vld [vmem:[%s15666_s15 + $0x998] sm:$0xff] }
0x1522   : > { %11294 = vmatprep.subr.bf16.mxu1 %v11293_v20  ;;  %11288 = vmatpush3.bf16.msra.mxu0 %v11287_v40  ;;  %v11321_v20 = vpack.c.bf16 %v8507_v7, %v8506_v57  ;;  %v14729_v57 = vld [vmem:[%s12845_s29 + $0x8] sm:$0xff] }
0x1524   : > { %11322 = vmatprep.subr.bf16.mxu0 %v11321_v20 }
0x1525   : > { %11296 = vmatpush3.bf16.msra.mxu1 %v11295_v27  ;;  %v8509_v27 = vld [vmem:[%s15667_s16 + $0x898] sm:$0xff]  ;;  %6075 = vmatmul.mubr.f32.vlgmr.msra.gmra.mrb[56].mxu0 %v14645_v31 }
0x1526   : > { %11298 = vmatprep.subr.bf16.mxu1 %v11297_v17  ;;  %v8492_v17 = vld [vmem:[%s15667_s16 + $0x810] sm:$0xff]  ;;  %v11325_v23 = vpack.c.bf16 %v8509_v27, %v8508_v9  ;;  %11324 = vmatpush3.bf16.msra.mxu0 %v11323_v21 }
0x1527   : > { %6214 = vmatprep.mubr.f32.mxu0 %v14655_v55 }
0x1528   : > { %11326 = vmatprep.subr.bf16.mxu0 %v11325_v23 }
0x1529   : > { %11300 = vmatpush3.bf16.msra.mxu1 %v11299_v50  ;;  %v8511_v50 = vld [vmem:[%s15667_s16 + $0x8a8] sm:$0xff] }
0x152a   : > { %11302 = vmatprep.subr.bf16.mxu1 %v11301_v54  ;;  %v11327_v54 = vpack.c.bf16 %v8493_v8, %v8492_v17  ;;  %v11329_v49 = vpack.c.bf16 %v8511_v50, %v8510_v18 }
0x152c   : > { %11328 = vmatpush3.bf16.msra.mxu0 %v11327_v54  ;;  %v8523_v54 = vld [vmem:[%s15668_s17 + $0x2] ss:$0 sm:$0xff] }
0x152d   : > { %11304 = vmatpush3.bf16.msra.mxu1 %v11303_v26  ;;  %v8512_v26 = vld [vmem:[%s15667_s16 + $0x8b0] sm:$0xff]  ;;  %11330 = vmatprep.subr.bf16.mxu0 %v11329_v49 }
0x152e   : > { %11306 = vmatprep.subr.bf16.mxu1 %v11305_v29  ;;  %v8513_v29 = vld [vmem:[%s15667_s16 + $0x8b8] sm:$0xff] }
0x152f   : > { %v11333_v12 = vpack.c.bf16 %v8513_v29, %v8512_v26 }
0x1530   : > { %11332 = vmatpush3.bf16.msra.mxu0 %v11331_v30 }
0x1531   : > { %11308 = vmatpush3.bf16.msra.mxu1 %v11307_v19  ;;  %v8514_v19 = vld [vmem:[%s15667_s16 + $0x8c0] sm:$0xff]  ;;  %11334 = vmatprep.subr.bf16.mxu0 %v11333_v12 }
0x1532   : > { %11310 = vmatprep.subr.bf16.mxu1 %v11309_v10  ;;  %v8515_v10 = vld [vmem:[%s15667_s16 + $0x8c8] sm:$0xff] }
0x1533   : > { %v11337_v48 = vpack.c.bf16 %v8515_v10, %v8514_v19 }
0x1534   : > { %11336 = vmatpush3.bf16.msra.mxu0 %v11335_v33 }
0x1535   : > { %11312 = vmatpush3.bf16.msra.mxu1 %v11311_v37  ;;  %v8516_v37 = vld [vmem:[%s15667_s16 + $0x8d0] sm:$0xff]  ;;  %11338 = vmatprep.subr.bf16.mxu0 %v11337_v48 }
0x1536   : > { %11314 = vmatprep.subr.bf16.mxu1 %v11313_v38  ;;  %v8517_v38 = vld [vmem:[%s15667_s16 + $0x8d8] sm:$0xff] }
0x1537   : > { %v11341_v45 = vpack.c.bf16 %v8517_v38, %v8516_v37 }
0x1538   : > { %11340 = vmatpush3.bf16.msra.mxu0 %v11339_v41 }
0x1539   : > { %11316 = vmatpush3.bf16.msra.mxu1 %v11315_v51  ;;  %v8518_v51 = vld [vmem:[%s15667_s16 + $0x8e0] sm:$0xff]  ;;  %11342 = vmatprep.subr.bf16.mxu0 %v11341_v45 }
0x153a   : > { %11318 = vmatprep.subr.bf16.mxu1 %v11317_v56  ;;  %v8519_v56 = vld [vmem:[%s15667_s16 + $0x8e8] sm:$0xff] }
0x153b   : > { %v11345_v62 = vpack.c.bf16 %v8519_v56, %v8518_v51  ;;  %v8561_v56 = vld [vmem:[%s15666_s15 + $0x980] sm:$0xff] }
0x153c   : > { %11344 = vmatpush3.bf16.msra.mxu0 %v11343_v61  ;;  %v8562_v61 = vld [vmem:[%s15666_s15 + $0x988] sm:$0xff] }
0x153d   : > { %11320 = vmatpush3.bf16.msra.mxu1 %v11319_v25  ;;  %v8502_v25 = vld [vmem:[%s15667_s16 + $0x860] sm:$0xff]  ;;  %11346 = vmatprep.subr.bf16.mxu0 %v11345_v62 }
0x153e   : > { %v8545_v62 = vld [vmem:[%s15666_s15 + $0x900] sm:$0xff] }
0x1540   : > { %6145 = vmatmul.mubr.f32.vlgmr.msra.gmra.mrb[44].mxu1 %v14032_v4  ;;  %v9494_v4 = vpop.f32.mrb[54].mxu0 }
0x1541   : > { %10386 = vmatprep.mubr.msk.f32.mxu1 %vm1563_vm3, %v5590_v0  ;;  %v9495_v5 = vpop.f32.mrb[55].mxu0  ;;  %v8503_v0 = vld [vmem:[%s15667_s16 + $0x868] sm:$0xff] }
0x1542   : > { %v14618_v32 = vadd.f32 %v9495_v5, %v9494_v4  ;;  %v11347_v28 = vpack.c.bf16 %v8503_v0, %v8502_v25  ;;  %v8505_v4 = vld [vmem:[%s15667_s16 + $0x878] sm:$0xff]  ;;  %v14725_v5 = vld [vmem:[%s12845_s29 + $0x20] sm:$0xff]  ;;  %v11373_v25 = vpack.c.bf16 %v8562_v61, %v8561_v56  ;;  %v8546_v0 = vld [vmem:[%s15666_s15 + $0x908] sm:$0xff] }
0x1543   : > { %v11351_v40 = vpack.c.bf16 %v8505_v4, %v8504_v2  ;;  %v11375_v43 = vpack.c.bf16 %v8546_v0, %v8545_v62  ;;  %v8547_v2 = vld [vmem:[%s15666_s15 + $0x910] sm:$0xff]  ;;  %v8548_v4 = vld [vmem:[%s15666_s15 + $0x918] sm:$0xff] }
0x1544   : > { %11348 = vmatpush3.bf16.msra.mxu0 %v11347_v28  ;;  %v8563_v28 = vld [vmem:[%s15666_s15 + $0x990] sm:$0xff]  ;;  %v8576_v56 = vld [vmem:[%s15666_s15 + $0x9f8] sm:$0xff] }
0x1545   : > { %11350 = vmatprep.subr.bf16.mxu0 %v11349_v22  ;;  %v11377_v22 = vpack.c.bf16 %v8564_v60, %v8563_v28  ;;  %v8559_v62 = vld [vmem:[%s15666_s15 + $0x970] sm:$0xff]  ;;  %v8625_v28 = vld [vmem:[%s15666_s15 + $0xb80] sm:$0xff]  ;;  %v8626_v60 = vld [vmem:[%s15666_s15 + $0xb88] sm:$0xff] }
0x1548   : > { %11352 = vmatpush3.bf16.msra.mxu0 %v11351_v40  ;;  %v8565_v40 = vld [vmem:[%s15666_s15 + $0x9a0] sm:$0xff] }
0x1549   : > { %11374 = vmatprep.subr.bf16.mxu0 %v11373_v25  ;;  %v8560_v25 = vld [vmem:[%s15666_s15 + $0x978] sm:$0xff] }
0x154a   : > { %v11403_v0 = vpack.c.bf16 %v8560_v25, %v8559_v62  ;;  %v8624_v62 = vld [vmem:[%s15666_s15 + $0xb78] sm:$0xff] }
0x154b   : > { %6215 = vmatmul.mubr.f32.vlgmr.msra.gmra.mrb[58].mxu0 %v14725_v5 }
0x154c   : > { %6748 = vmatprep.mubr.f32.mxu0 %v14729_v57  ;;  %11376 = vmatpush3.bf16.msra.mxu0 %v11375_v43  ;;  %v8609_v43 = vld [vmem:[%s15666_s15 + $0xb00] sm:$0xff] }
0x154d   : > { %11378 = vmatprep.subr.bf16.mxu0 %v11377_v22  ;;  %v8610_v22 = vld [vmem:[%s15666_s15 + $0xb08] sm:$0xff] }
0x15d3   : > { %v9459_v7 = vpop.f32.mrb[40].mxu1 }
0x15d4   : > { %v9460_v20 = vpop.f32.mrb[41].mxu1 }
0x15d5   : > { %v9461_v16 = vadd.f32 %v9460_v20, %v9459_v7  ;;  %v8566_v7 = vld [vmem:[%s15666_s15 + $0x9a8] sm:$0xff]  ;;  %v11379_v20 = vpack.c.bf16 %v8548_v4, %v8547_v2  ;;  %v11437_v2 = vpack.c.bf16 %v8626_v60, %v8625_v28  ;;  %v11439_v4 = vpack.c.bf16 %v8610_v22, %v8609_v43  ;;  %v8689_v28 = vld [vmem:[%s15667_s16 + $0xa80] sm:$0xff] }
0x15d6   : > { %v8690_v60 = vld [vmem:[%s15667_s16 + $0xa88] sm:$0xff]  ;;  %v8673_v43 = vld [vmem:[%s15667_s16 + $0xa00] sm:$0xff] }
0x15d7   : > { %v5832_v11 = vadd.f32 %v14618_v32, %v9461_v16  ;;  %v11381_v16 = vpack.c.bf16 %v8566_v7, %v8565_v40  ;;  %11380 = vmatpush3.bf16.msra.mxu0 %v11379_v20  ;;  %v8627_v40 = vld [vmem:[%s15666_s15 + $0xb90] sm:$0xff]  ;;  %v8628_v7 = vld [vmem:[%s15666_s15 + $0xb98] sm:$0xff]  ;;  %v11501_v22 = vpack.c.bf16 %v8690_v60, %v8689_v28 }
0x15d8   : > { %v8611_v20 = vld [vmem:[%s15666_s15 + $0xb10] sm:$0xff]  ;;  %v8536_v60 = vld [vmem:[%s15664_s13 + $0xd8] sm:$0xff] }
0x15d9   : > { %11382 = vmatprep.subr.bf16.mxu0 %v11381_v16  ;;  %v8612_v16 = vld [vmem:[%s15666_s15 + $0xb18] sm:$0xff]  ;;  %v8535_v28 = vld [vmem:[%s15664_s13 + $0xd0] sm:$0xff] }
0x15f3   : > { %v9529_v9 = vpop.f32.mrb[42].mxu1 }
0x15f4   : > { %v9530_v21 = vpop.f32.mrb[43].mxu1 }
0x15f5   : > { %v9531_v27 = vadd.f32 %v9530_v21, %v9529_v9  ;;  %v8550_v9 = vld [vmem:[%s15666_s15 + $0x928] sm:$0xff] }
0x15f7   : > { %v5902_v17 = vadd.f32 %v9531_v27, %v5832_v11  ;;  %v8549_v11 = vld [vmem:[%s15666_s15 + $0x920] sm:$0xff] }
0x15f8   : > { %v9564_v50 = vpop.f32.mrb[56].mxu0  ;;  %v11383_v21 = vpack.c.bf16 %v8550_v9, %v8549_v11  ;;  %v8529_v27 = vld [vmem:[%s15669_s18 + $0x20] sm:$0xff]  ;;  %v11441_v11 = vpack.c.bf16 %v8628_v7, %v8627_v40  ;;  %v11443_v9 = vpack.c.bf16 %v8612_v16, %v8611_v20  ;;  %v8692_v40 = vld [vmem:[%s15667_s16 + $0xa98] sm:$0xff]  ;;  %v8675_v16 = vld [vmem:[%s15667_s16 + $0xa10] sm:$0xff] }
0x15f9   : > { %10384 = vmatprep.subr.msk.mxu1 %vm1563_vm3, %v5902_v17  ;;  %v9565_v32 = vpop.f32.mrb[57].mxu0 }
0x15fa   : > { %10385 = vmatpush3.xpose.msk.msra.mxu1 %vm1563_vm3, %v5902_v17  ;;  %v9566_v49 = vadd.f32 %v9565_v32, %v9564_v50  ;;  %11384 = vmatpush3.bf16.msra.mxu0 %v11383_v21  ;;  %v8530_v17 = vld [vmem:[%s15669_s18 + $0x28] sm:$0xff]  ;;  %v8552_v32 = vld [vmem:[%s15666_s15 + $0x938] sm:$0xff]  ;;  %v8629_v21 = vld [vmem:[%s15666_s15 + $0xba0] sm:$0xff] }
0x15fc   : > { %v6077_v52 = vadd.f32 %v9566_v49, %v8523_v54  ;;  %v8551_v54 = vld [vmem:[%s15666_s15 + $0x930] sm:$0xff] }
0x15fd   : > { %10387 = vmatmul.mubr.msk.f32.vlgmr.msra.gmra.mrb[46].mxu1 %vm1563_vm3, %v14088_v34  ;;  %v11387_v49 = vpack.c.bf16 %v8552_v32, %v8551_v54  ;;  %v8632_v54 = vld [vmem:[%s15666_s15 + $0xbb8] sm:$0xff]  ;;  %v8615_v32 = vld [vmem:[%s15666_s15 + $0xb30] sm:$0xff] }
0x1613   : > { %v9599_v8 = vpop.f32.mrb[44].mxu1 }
0x1614   : > { %v9600_v23 = vpop.f32.mrb[45].mxu1 }
0x1615   : > { %v9601_v18 = vadd.f32 %v9600_v23, %v9599_v8  ;;  %v11353_v8 = vpack.c.bf16 %v8530_v17, %v8529_v27  ;;  %v8567_v23 = vld [vmem:[%s15666_s15 + $0x9b0] sm:$0xff]  ;;  %v8630_v27 = vld [vmem:[%s15666_s15 + $0xba8] sm:$0xff]  ;;  %v8613_v17 = vld [vmem:[%s15666_s15 + $0xb20] sm:$0xff] }
0x1617   : > { %v6147_v53 = vadd.f32 %v9601_v18, %v6077_v52  ;;  %v8568_v18 = vld [vmem:[%s15666_s15 + $0x9b8] sm:$0xff]  ;;  %v8533_v52 = vld [vmem:[%s15664_s13 + $0xc0] sm:$0xff] }
0x1618   : > { %v11385_v50 = vpack.c.bf16 %v8568_v18, %v8567_v23  ;;  %v11445_v23 = vpack.c.bf16 %v8630_v27, %v8629_v21  ;;  %v8693_v21 = vld [vmem:[%s15667_s16 + $0xaa0] sm:$0xff]  ;;  %v8694_v27 = vld [vmem:[%s15667_s16 + $0xaa8] sm:$0xff] }
0x161a   : > { %11386 = vmatprep.subr.bf16.mxu0 %v11385_v50  ;;  %v8631_v50 = vld [vmem:[%s15666_s15 + $0xbb0] sm:$0xff] }
0x161b   : > { %11388 = vmatpush3.bf16.msra.mxu0 %v11387_v49  ;;  %v8616_v49 = vld [vmem:[%s15666_s15 + $0xb38] sm:$0xff] }
0x161e   : > { %v9634_v26 = vpop.f32.mrb[58].mxu0 }
0x161f   : > { %v9635_v29 = vpop.f32.mrb[59].mxu0 }
0x1620   : > { %v9636_v30 = vadd.f32 %v9635_v29, %v9634_v26  ;;  %v8569_v29 = vld [vmem:[%s15666_s15 + $0x9c0] sm:$0xff] }
0x1622   : > { %v6217_v12 = vadd.f32 %v9636_v30, %v6147_v53  ;;  %v8534_v53 = vld [vmem:[%s15664_s13 + $0xc8] sm:$0xff] }
0x1623   : > { %v14806_v26 = vpack.c.bf16 %v8534_v53, %v8533_v52  ;;  %v8570_v30 = vld [vmem:[%s15666_s15 + $0x9c8] sm:$0xff]  ;;  %v11449_v52 = vpack.c.bf16 %v8632_v54, %v8631_v50  ;;  %v11451_v53 = vpack.c.bf16 %v8616_v49, %v8615_v32  ;;  %v8696_v50 = vld [vmem:[%s15667_s16 + $0xab8] sm:$0xff]  ;;  %v8679_v49 = vld [vmem:[%s15667_s16 + $0xa30] sm:$0xff] }
0x1624   : > { %10389 = vmatprep.subr.mxu1 %v6217_v12 }
0x1625   : > { %10390 = vmatpush3.msra.mxu1 %v6217_v12  ;;  %v11389_v12 = vpack.c.bf16 %v8570_v30, %v8569_v29  ;;  %v8633_v29 = vld [vmem:[%s15666_s15 + $0xbc0] sm:$0xff]  ;;  %v8634_v30 = vld [vmem:[%s15666_s15 + $0xbc8] sm:$0xff] }
0x1626   : > { %11354 = vmatprep.subr.bf16.mxu1 %v11353_v8 }
0x1627   : > { %11390 = vmatprep.subr.bf16.mxu0 %v11389_v12  ;;  %v8617_v12 = vld [vmem:[%s15666_s15 + $0xb40] sm:$0xff] }
0x16d0   : > { %v10388_v58 = vpop.f32.mrb[46].mxu1 }
0x16d1   : > { %v6305_v34 = vmul.f32 0.018042196, %v10388_v58  ;;  %v6295_v3 = vpop.f32.mrb[47].mxu1  ;;  %v8553_v58 = vld [vmem:[%s15666_s15 + $0x940] sm:$0xff] }
0x16d2   : > { %v6304_v19 = vmul.f32 0.018042196, %v6295_v3 }
0x16d3   : > { %v6309_v10 = vsel %vm4332_vm7, %v6305_v34, -inf }
0x16d4   : > { %6310 = vmax.xlane.f32.xlu1 %v6309_v10  ;;  %v6306_v33 = vsel %vm4332_vm7, %v6304_v19, -inf  ;;  %v8572_v10 = vld [vmem:[%s15666_s15 + $0x9d8] sm:$0xff] }
0x16d5   : > { %6307 = vmax.xlane.f32.xlu0 %v6306_v33 }
0x1761   : > { %v6311_v48 = vpop.xlane.xlu1 %6310 }
0x1762   : > { %v6313_v35 = vsub.f32 %v6305_v34, %v6311_v48  ;;  %v6308_v36 = vpop.xlane.xlu0 %6307  ;;  %v8554_v34 = vld [vmem:[%s15666_s15 + $0x948] sm:$0xff]  ;;  %v8555_v48 = vld [vmem:[%s15666_s15 + $0x950] sm:$0xff] }
0x1763   : > { %v6312_v37 = vsub.f32 %v6304_v19, %v6308_v36  ;;  %v11391_v3 = vpack.c.bf16 %v8554_v34, %v8553_v58  ;;  %v8571_v19 = vld [vmem:[%s15666_s15 + $0x9d0] sm:$0xff]  ;;  %v8618_v58 = vld [vmem:[%s15666_s15 + $0xb48] sm:$0xff]  ;;  %v11453_v34 = vpack.c.bf16 %v8634_v30, %v8633_v29 }
0x1764   : > { %v6316_v38 = vmul.f32 1.442695, %v6313_v35  ;;  %v11393_v33 = vpack.c.bf16 %v8572_v10, %v8571_v19  ;;  %v8556_v35 = vld [vmem:[%s15666_s15 + $0x958] sm:$0xff]  ;;  %v8635_v19 = vld [vmem:[%s15666_s15 + $0xbd0] sm:$0xff]  ;;  %v8698_v29 = vld [vmem:[%s15667_s16 + $0xac8] sm:$0xff] }
0x1765   : > { %v6314_v41 = vmul.f32 1.442695, %v6312_v37  ;;  %11392 = vmatpush3.bf16.msra.mxu0 %v11391_v3  ;;  %v11395_v36 = vpack.c.bf16 %v8556_v35, %v8555_v48  ;;  %v8573_v37 = vld [vmem:[%s15666_s15 + $0x9e0] sm:$0xff]  ;;  %v11455_v3 = vpack.c.bf16 %v8618_v58, %v8617_v12  ;;  %v8636_v10 = vld [vmem:[%s15666_s15 + $0xbd8] sm:$0xff] }
0x1766   : > { %11735 = vpow2.f32 %v6316_v38  ;;  %11394 = vmatprep.subr.bf16.mxu0 %v11393_v33  ;;  %v8574_v38 = vld [vmem:[%s15666_s15 + $0x9e8] sm:$0xff]  ;;  %v8619_v33 = vld [vmem:[%s15666_s15 + $0xb50] sm:$0xff]  ;;  %v8620_v48 = vld [vmem:[%s15666_s15 + $0xb58] sm:$0xff]  ;;  %v11457_v35 = vpack.c.bf16 %v8636_v10, %v8635_v19 }
0x1767   : > { %11737 = vpow2.f32 %v6314_v41  ;;  %v11397_v41 = vpack.c.bf16 %v8574_v38, %v8573_v37  ;;  %v8637_v37 = vld [vmem:[%s15666_s15 + $0xbe0] sm:$0xff]  ;;  %v8638_v38 = vld [vmem:[%s15666_s15 + $0xbe8] sm:$0xff]  ;;  %v8700_v19 = vld [vmem:[%s15667_s16 + $0xad8] sm:$0xff] }
0x1768   : > { %v8681_v58 = vld [vmem:[%s15667_s16 + $0xa40] sm:$0xff] }
0x1769   : > { %11396 = vmatpush3.bf16.msra.mxu0 %v11395_v36  ;;  %v11459_v36 = vpack.c.bf16 %v8620_v48, %v8619_v33  ;;  %v8683_v48 = vld [vmem:[%s15667_s16 + $0xa50] sm:$0xff] }
0x176a   : > { %11398 = vmatprep.subr.bf16.mxu0 %v11397_v41  ;;  %v8621_v41 = vld [vmem:[%s15666_s15 + $0xb60] sm:$0xff] }
0x1770   : > { %v11736_v45 = vpop.eup %11735 }
0x1771   : > { %v11738_v46 = vpop.eup %11737  ;;  %v6321_v47 = vsel %vm4332_vm7, %v11736_v45, 0.0 }
0x1772   : > { %6322 = vadd.xlane.f32.xlu1 %v6321_v47  ;;  %10391 = vmatprep.mubr.msk.f32.mxu1 %vm4332_vm7, %v11738_v46  ;;  %v6318_v51 = vsel %vm4332_vm7, %v11738_v46, 0.0  ;;  %v8558_v46 = vld [vmem:[%s15666_s15 + $0x968] sm:$0xff] }
0x1773   : > { %10392 = vmatmul.mubr.msk.f32.vlgmr.msra.gmra.mrb[48].mxu1 %vm4332_vm7, %v11736_v45  ;;  %6319 = vadd.xlane.f32.xlu0 %v6318_v51  ;;  %v8557_v45 = vld [vmem:[%s15666_s15 + $0x960] sm:$0xff]  ;;  %v8575_v51 = vld [vmem:[%s15666_s15 + $0x9f0] sm:$0xff] }
0x1774   : > { %11356 = vmatpush3.bf16.msra.mxu1 %v11353_v8  ;;  %v11399_v47 = vpack.c.bf16 %v8558_v46, %v8557_v45  ;;  %v11401_v61 = vpack.c.bf16 %v8576_v56, %v8575_v51  ;;  %v8614_v8 = vld [vmem:[%s15666_s15 + $0xb28] sm:$0xff]  ;;  %v11461_v46 = vpack.c.bf16 %v8638_v38, %v8637_v37  ;;  %v8639_v51 = vld [vmem:[%s15666_s15 + $0xbf0] sm:$0xff]  ;;  %v8640_v56 = vld [vmem:[%s15666_s15 + $0xbf8] sm:$0xff] }
0x1775   : > { %11358 = vmatprep.subr.bf16.mxu1 %v14806_v26  ;;  %v11447_v18 = vpack.c.bf16 %v8614_v8, %v8613_v17  ;;  %v8622_v45 = vld [vmem:[%s15666_s15 + $0xb68] sm:$0xff]  ;;  %v11465_v25 = vpack.c.bf16 %v8640_v56, %v8639_v51  ;;  %v11509_v17 = vpack.c.bf16 %v8694_v27, %v8693_v21  ;;  %v8677_v8 = vld [vmem:[%s15667_s16 + $0xa20] sm:$0xff]  ;;  %v8704_v51 = vld [vmem:[%s15667_s16 + $0xaf8] sm:$0xff] }
0x1776   : > { %11400 = vmatpush3.bf16.msra.mxu0 %v11399_v47  ;;  %v11463_v47 = vpack.c.bf16 %v8622_v45, %v8621_v41  ;;  %v8702_v37 = vld [vmem:[%s15667_s16 + $0xae8] sm:$0xff]  ;;  %v8685_v45 = vld [vmem:[%s15667_s16 + $0xa60] sm:$0xff]  ;;  %v8540_v21 = vld [vmem:[%s15664_s13 + $0xf8] sm:$0xff] }
0x1777   : > { %11402 = vmatprep.subr.bf16.mxu0 %v11401_v61  ;;  %v8623_v61 = vld [vmem:[%s15666_s15 + $0xb70] sm:$0xff] }
0x177a   : > { %11404 = vmatpush3.bf16.msra.mxu0 %v11403_v0  ;;  %v11467_v0 = vpack.c.bf16 %v8624_v62, %v8623_v61 }
0x177b   : > { %11438 = vmatprep.subr.bf16.mxu0 %v11437_v2  ;;  %v8674_v2 = vld [vmem:[%s15667_s16 + $0xa08] sm:$0xff] }
0x177c   : > { %v11503_v7 = vpack.c.bf16 %v8674_v2, %v8673_v43 }
0x177d   : > { %6749 = vmatmul.mubr.f32.vlgmr.msra.gmra.mrb[60].mxu0 %v14645_v31 }
0x177e   : > { %6888 = vmatprep.mubr.f32.mxu0 %v14655_v55  ;;  %11440 = vmatpush3.bf16.msra.mxu0 %v11439_v4  ;;  %v8691_v4 = vld [vmem:[%s15667_s16 + $0xa90] sm:$0xff] }
0x177f   : > { %11442 = vmatprep.subr.bf16.mxu0 %v11441_v11  ;;  %v11505_v20 = vpack.c.bf16 %v8692_v40, %v8691_v4  ;;  %v8676_v11 = vld [vmem:[%s15667_s16 + $0xa18] sm:$0xff] }
0x1782   : > { %11444 = vmatpush3.bf16.msra.mxu0 %v11443_v9  ;;  %v11507_v9 = vpack.c.bf16 %v8676_v11, %v8675_v16  ;;  %v8538_v16 = vld [vmem:[%s15664_s13 + $0xe8] sm:$0xff] }
0x1783   : > { %11446 = vmatprep.subr.bf16.mxu0 %v11445_v23  ;;  %v8678_v23 = vld [vmem:[%s15667_s16 + $0xa28] sm:$0xff] }
0x1784   : > { %v11511_v54 = vpack.c.bf16 %v8678_v23, %v8677_v8  ;;  %v8577_v8 = vld [vmem:[%s15666_s15 + $0xa00] sm:$0xff]  ;;  %v8578_v23 = vld [vmem:[%s15666_s15 + $0xa08] sm:$0xff] }
0x1786   : > { %11448 = vmatpush3.bf16.msra.mxu0 %v11447_v18  ;;  %v8695_v18 = vld [vmem:[%s15667_s16 + $0xab0] sm:$0xff] }
0x1787   : > { %11450 = vmatprep.subr.bf16.mxu0 %v11449_v52  ;;  %v11513_v32 = vpack.c.bf16 %v8696_v50, %v8695_v18  ;;  %v8680_v52 = vld [vmem:[%s15667_s16 + $0xa38] sm:$0xff]  ;;  %v8595_v18 = vld [vmem:[%s15666_s15 + $0xa90] sm:$0xff] }
0x1788   : > { %v11515_v30 = vpack.c.bf16 %v8680_v52, %v8679_v49  ;;  %v8596_v50 = vld [vmem:[%s15666_s15 + $0xa98] sm:$0xff]  ;;  %v8579_v49 = vld [vmem:[%s15666_s15 + $0xa10] sm:$0xff] }
0x1789   : > { %v8580_v52 = vld [vmem:[%s15666_s15 + $0xa18] sm:$0xff] }
0x178a   : > { %11452 = vmatpush3.bf16.msra.mxu0 %v11451_v53  ;;  %v8697_v53 = vld [vmem:[%s15667_s16 + $0xac0] sm:$0xff] }
0x178b   : > { %11454 = vmatprep.subr.bf16.mxu0 %v11453_v34  ;;  %v11517_v12 = vpack.c.bf16 %v8698_v29, %v8697_v53  ;;  %v8682_v34 = vld [vmem:[%s15667_s16 + $0xa48] sm:$0xff]  ;;  %v8597_v53 = vld [vmem:[%s15666_s15 + $0xaa0] sm:$0xff] }
0x178c   : > { %v11519_v10 = vpack.c.bf16 %v8682_v34, %v8681_v58  ;;  %v8598_v29 = vld [vmem:[%s15666_s15 + $0xaa8] sm:$0xff]  ;;  %v8581_v58 = vld [vmem:[%s15666_s15 + $0xa20] sm:$0xff] }
0x178d   : > { %v8582_v34 = vld [vmem:[%s15666_s15 + $0xa28] sm:$0xff] }
0x178e   : > { %11456 = vmatpush3.bf16.msra.mxu0 %v11455_v3  ;;  %v8699_v3 = vld [vmem:[%s15667_s16 + $0xad0] sm:$0xff] }
0x178f   : > { %11458 = vmatprep.subr.bf16.mxu0 %v11457_v35  ;;  %v11521_v33 = vpack.c.bf16 %v8700_v19, %v8699_v3  ;;  %v8684_v35 = vld [vmem:[%s15667_s16 + $0xa58] sm:$0xff]  ;;  %v8599_v3 = vld [vmem:[%s15666_s15 + $0xab0] sm:$0xff] }
0x1790   : > { %v11523_v38 = vpack.c.bf16 %v8684_v35, %v8683_v48  ;;  %v8601_v48 = vld [vmem:[%s15666_s15 + $0xac0] sm:$0xff]  ;;  %v8602_v35 = vld [vmem:[%s15666_s15 + $0xac8] sm:$0xff] }
0x1792   : > { %11460 = vmatpush3.bf16.msra.mxu0 %v11459_v36  ;;  %v8701_v36 = vld [vmem:[%s15667_s16 + $0xae0] sm:$0xff] }
0x1793   : > { %11462 = vmatprep.subr.bf16.mxu0 %v11461_v46  ;;  %v11525_v41 = vpack.c.bf16 %v8702_v37, %v8701_v36  ;;  %v8686_v46 = vld [vmem:[%s15667_s16 + $0xa68] sm:$0xff]  ;;  %v11421_v37 = vpack.c.bf16 %v8602_v35, %v8601_v48  ;;  %v8649_v48 = vld [vmem:[%s15667_s16 + $0x940] sm:$0xff] }
0x1794   : > { %v11527_v56 = vpack.c.bf16 %v8686_v46, %v8685_v45  ;;  %v8603_v45 = vld [vmem:[%s15666_s15 + $0xad0] sm:$0xff]  ;;  %v8604_v46 = vld [vmem:[%s15666_s15 + $0xad8] sm:$0xff]  ;;  %v8650_v35 = vld [vmem:[%s15667_s16 + $0x948] sm:$0xff] }
0x1796   : > { %11464 = vmatpush3.bf16.msra.mxu0 %v11463_v47  ;;  %v8703_v47 = vld [vmem:[%s15667_s16 + $0xaf0] sm:$0xff] }
0x1797   : > { %11466 = vmatprep.subr.bf16.mxu0 %v11465_v25  ;;  %v11529_v61 = vpack.c.bf16 %v8704_v51, %v8703_v47  ;;  %v11425_v51 = vpack.c.bf16 %v8604_v46, %v8603_v45  ;;  %v8651_v45 = vld [vmem:[%s15667_s16 + $0x950] sm:$0xff]  ;;  %v8652_v46 = vld [vmem:[%s15667_s16 + $0x958] sm:$0xff] }
0x179a   : > { %11468 = vmatpush3.bf16.msra.mxu0 %v11467_v0 }
0x179b   : > { %11502 = vmatprep.subr.bf16.mxu0 %v11501_v22 }
0x179d   : > { %6889 = vmatmul.mubr.f32.vlgmr.msra.gmra.mrb[62].mxu0 %v14725_v5 }
0x179e   : > { %7133 = vmatprep.mubr.f32.mxu0 %v14533_v13  ;;  %11504 = vmatpush3.bf16.msra.mxu0 %v11503_v7  ;;  %v11361_v7 = vpack.c.bf16 %v8536_v60, %v8535_v28  ;;  %v8589_v60 = vld [vmem:[%s15666_s15 + $0xa60] sm:$0xff] }
0x179f   : > { %11506 = vmatprep.subr.bf16.mxu0 %v11505_v20  ;;  %v8537_v20 = vld [vmem:[%s15664_s13 + $0xe0] sm:$0xff] }
0x17a0   : > { %v11365_v11 = vpack.c.bf16 %v8538_v16, %v8537_v20  ;;  %v8592_v20 = vld [vmem:[%s15666_s15 + $0xa78] sm:$0xff]  ;;  %v8657_v16 = vld [vmem:[%s15667_s16 + $0x980] sm:$0xff] }
0x17a2   : > { %11508 = vmatpush3.bf16.msra.mxu0 %v11507_v9  ;;  %v8539_v9 = vld [vmem:[%s15664_s13 + $0xf0] sm:$0xff] }
0x17a3   : > { %11510 = vmatprep.subr.bf16.mxu0 %v11509_v17  ;;  %v11369_v27 = vpack.c.bf16 %v8540_v21, %v8539_v9 }
0x17a6   : > { %11512 = vmatpush3.bf16.msra.mxu0 %v11511_v54  ;;  %v11407_v54 = vpack.c.bf16 %v8578_v23, %v8577_v8 }
0x17a7   : > { %11514 = vmatprep.subr.bf16.mxu0 %v11513_v32  ;;  %v11409_v32 = vpack.c.bf16 %v8596_v50, %v8595_v18  ;;  %v8643_v18 = vld [vmem:[%s15667_s16 + $0x910] sm:$0xff]  ;;  %v8644_v50 = vld [vmem:[%s15667_s16 + $0x918] sm:$0xff] }
0x17aa   : > { %11516 = vmatpush3.bf16.msra.mxu0 %v11515_v30  ;;  %v11411_v30 = vpack.c.bf16 %v8580_v52, %v8579_v49  ;;  %v11776_v49 = vld [vmem:[%s12845_s29 + $0x10] sm:$0xff]  ;;  %v11475_v52 = vpack.c.bf16 %v8644_v50, %v8643_v18  ;;  %s11777_s29 = scalar_lea.vmem %s15606_s28, 256 }
0x17ab   : > { %11518 = vmatprep.subr.bf16.mxu0 %v11517_v12  ;;  %v11413_v12 = vpack.c.bf16 %v8598_v29, %v8597_v53  ;;  %v8645_v29 = vld [vmem:[%s15667_s16 + $0x920] sm:$0xff]  ;;  %p11778_p11 = scmp.ne.s32.totalorder %s15606_s28, %s11777_s29 }
0x17ad   : > { %p11779_p12 = pnand %p11778_p11, %p12011_p5 }
0x17ae   : > { %11520 = vmatpush3.bf16.msra.mxu0 %v11519_v10  ;;  %v8583_v10 = vld [vmem:[%s15666_s15 + $0xa30] sm:$0xff] }
0x17af   : > { %11522 = vmatprep.subr.bf16.mxu0 %v11521_v33  ;;  %v8584_v33 = vld [vmem:[%s15666_s15 + $0xa38] sm:$0xff]  ;;  %p11780_p13 = pneg %p11779_p12 }
0x17b0   : > { %v11419_v36 = vpack.c.bf16 %v8584_v33, %v8583_v10 }
0x17b2   : > { %11524 = vmatpush3.bf16.msra.mxu0 %v11523_v38  ;;  %v8585_v38 = vld [vmem:[%s15666_s15 + $0xa40] sm:$0xff] }
0x17b3   : > { %11526 = vmatprep.subr.bf16.mxu0 %v11525_v41  ;;  %v8586_v41 = vld [vmem:[%s15666_s15 + $0xa48] sm:$0xff] }
0x17b4   : > { %v11423_v47 = vpack.c.bf16 %v8586_v41, %v8585_v38  ;;  %v11487_v38 = vpack.c.bf16 %v8650_v35, %v8649_v48  ;;  %v8714_v48 = vld [vmem:[%s15667_s16 + $0xb48] sm:$0xff]  ;;  %v8731_v35 = vld [vmem:[%s15667_s16 + $0xbd0] sm:$0xff] }
0x17b6   : > { %11528 = vmatpush3.bf16.msra.mxu0 %v11527_v56  ;;  %v8587_v56 = vld [vmem:[%s15666_s15 + $0xa50] sm:$0xff] }
0x17b7   : > { %11530 = vmatprep.subr.bf16.mxu0 %v11529_v61  ;;  %v8588_v61 = vld [vmem:[%s15666_s15 + $0xa58] sm:$0xff] }
0x17ff   : > { %v6323_v25 = vpop.xlane.xlu1 %6322 }
0x1800   : > { %v6320_v62 = vpop.xlane.xlu0 %6319 }
0x1801   : > { %11739 = vrcp.f32 %v6320_v62  ;;  %v8605_v62 = vld [vmem:[%s15666_s15 + $0xae0] sm:$0xff] }
0x1802   : > { %11741 = vrcp.f32 %v6323_v25  ;;  %v8606_v25 = vld [vmem:[%s15666_s15 + $0xae8] sm:$0xff] }
0x1803   : > { %v11429_v28 = vpack.c.bf16 %v8606_v25, %v8605_v62  ;;  %v8670_v25 = vld [vmem:[%s15667_s16 + $0x9e8] sm:$0xff] }
0x180b   : > { %v11740_v43 = vpop.eup %11739 }
0x180c   : > { %v11742_v2 = vpop.eup %11741 }
0x1846   : > { %v10393_v0 = vpop.f32.mrb[48].mxu1 }
0x1847   : > { %v6396_v22 = vpop.f32.mrb[49].mxu1  ;;  %v6408_v40 = vmul.f32 %v11742_v2, %v10393_v0  ;;  %v11427_v0 = vpack.c.bf16 %v8588_v61, %v8587_v56  ;;  %v8608_v2 = vld [vmem:[%s15666_s15 + $0xaf8] sm:$0xff]  ;;  %v8669_v61 = vld [vmem:[%s15667_s16 + $0x9e0] sm:$0xff] }
0x1848   : > { %v6406_v4 = vmul.f32 %v11740_v43, %v6396_v22  ;;  %v8590_v43 = vld [vmem:[%s15666_s15 + $0xa68] sm:$0xff]  ;;  %v8607_v22 = vld [vmem:[%s15666_s15 + $0xaf0] sm:$0xff]  ;;  %v8688_v56 = vld [vmem:[%s15667_s16 + $0xa78] sm:$0xff] }
0x184a   : > { %10398 = vmatprep.mubr.msk.f32.mxu1 %vm1563_vm3, %v6406_v4  ;;  %v11431_v4 = vpack.c.bf16 %v8590_v43, %v8589_v60  ;;  %v11493_v60 = vpack.c.bf16 %v8670_v25, %v8669_v61  ;;  %v8717_v61 = vld [vmem:[%s15667_s16 + $0xb60] sm:$0xff] }
0x184b   : > { %10399 = vmatmul.mubr.msk.f32.vlgmr.msra.gmra.mrb[38].mxu1 %vm1563_vm3, %v6408_v40  ;;  %v11433_v40 = vpack.c.bf16 %v8608_v2, %v8607_v22  ;;  %v8671_v22 = vld [vmem:[%s15667_s16 + $0x9f0] sm:$0xff]  ;;  %v8672_v2 = vld [vmem:[%s15667_s16 + $0x9f8] sm:$0xff] }
0x184c   : > { %11360 = vmatpush3.bf16.msra.mxu1 %v14806_v26  ;;  %10417 = vmatprep.mubr.msk.f32.mxu1 %vm1253_vm1, %v13076_v15  ;;  %v8593_v26 = vld [vmem:[%s15666_s15 + $0xa80] sm:$0xff]  ;;  %v8594_v15 = vld [vmem:[%s15666_s15 + $0xa88] sm:$0xff] }
0x184d   : > { %11362 = vmatprep.subr.bf16.mxu1 %v11361_v7  ;;  %v11405_v17 = vpack.c.bf16 %v8594_v15, %v8593_v26  ;;  %v8642_v26 = vld [vmem:[%s15667_s16 + $0x908] sm:$0xff]  ;;  %v8659_v15 = vld [vmem:[%s15667_s16 + $0x990] sm:$0xff] }
0x1850   : > { %11364 = vmatpush3.bf16.msra.mxu1 %v11361_v7  ;;  %v8591_v7 = vld [vmem:[%s15666_s15 + $0xa70] sm:$0xff] }
0x1851   : > { %11366 = vmatprep.subr.bf16.mxu1 %v11365_v11  ;;  %v11435_v9 = vpack.c.bf16 %v8592_v20, %v8591_v7  ;;  %v8655_v7 = vld [vmem:[%s15667_s16 + $0x970] sm:$0xff]  ;;  %v8656_v20 = vld [vmem:[%s15667_s16 + $0x978] sm:$0xff] }
0x1854   : > { %11368 = vmatpush3.bf16.msra.mxu1 %v11365_v11  ;;  %v8658_v11 = vld [vmem:[%s15667_s16 + $0x988] sm:$0xff] }
0x1855   : > { %11370 = vmatprep.subr.bf16.mxu1 %v11369_v27  ;;  %v11469_v21 = vpack.c.bf16 %v8658_v11, %v8657_v16  ;;  %v11499_v11 = vpack.c.bf16 %v8656_v20, %v8655_v7  ;;  %v8542_v20 = vld [vmem:[%s15665_s14 + $0x3] ss:$0 sm:$0xff] }
0x1858   : > { %11372 = vmatpush3.bf16.msra.mxu1 %v11369_v27  ;;  %v8641_v27 = vld [vmem:[%s15667_s16 + $0x900] sm:$0xff] }
0x1859   : > { %11406 = vmatprep.subr.bf16.mxu1 %v11405_v17  ;;  %v8660_v17 = vld [vmem:[%s15667_s16 + $0x998] sm:$0xff]  ;;  %v11471_v8 = vpack.c.bf16 %v8642_v26, %v8641_v27  ;;  %v8722_v27 = vld [vmem:[%s15667_s16 + $0xb88] sm:$0xff]  ;;  %v8705_v26 = vld [vmem:[%s15667_s16 + $0xb00] sm:$0xff] }
0x185a   : > { %v11473_v23 = vpack.c.bf16 %v8660_v17, %v8659_v15  ;;  %v8706_v17 = vld [vmem:[%s15667_s16 + $0xb08] sm:$0xff] }
0x185b   : > { %10418 = vmatmul.mubr.msk.f32.vlgmr.msra.gmra.mrb[50].mxu1 %vm1253_vm1, %v13078_v59  ;;  %v8600_v59 = vld [vmem:[%s15666_s15 + $0xab8] sm:$0xff]  ;;  %v11535_v18 = vpack.c.bf16 %v8706_v17, %v8705_v26 }
0x185c   : > { %11408 = vmatpush3.bf16.msra.mxu1 %v11407_v54  ;;  %6818 = vmatprep.mubr.f32.mxu1 %v14533_v13  ;;  %v11415_v13 = vpack.c.bf16 %v8582_v34, %v8581_v58  ;;  %v11417_v19 = vpack.c.bf16 %v8600_v59, %v8599_v3  ;;  %v8661_v54 = vld [vmem:[%s15667_s16 + $0x9a0] sm:$0xff]  ;;  %v8664_v58 = vld [vmem:[%s15667_s16 + $0x9b8] sm:$0xff]  ;;  %v8647_v3 = vld [vmem:[%s15667_s16 + $0x930] sm:$0xff] }
0x185d   : > { %11410 = vmatprep.subr.bf16.mxu1 %v11409_v32  ;;  %v8662_v32 = vld [vmem:[%s15667_s16 + $0x9a8] sm:$0xff]  ;;  %v8648_v59 = vld [vmem:[%s15667_s16 + $0x938] sm:$0xff] }
0x185e   : > { %v11477_v53 = vpack.c.bf16 %v8662_v32, %v8661_v54  ;;  %v11483_v10 = vpack.c.bf16 %v8648_v59, %v8647_v3  ;;  %v8707_v54 = vld [vmem:[%s15667_s16 + $0xb10] sm:$0xff]  ;;  %v8708_v32 = vld [vmem:[%s15667_s16 + $0xb18] sm:$0xff]  ;;  %v8729_v59 = vld [vmem:[%s15667_s16 + $0xbc0] sm:$0xff] }
0x185f   : > { %v8712_v3 = vld [vmem:[%s15667_s16 + $0xb38] sm:$0xff] }
0x1860   : > { %11412 = vmatpush3.bf16.msra.mxu1 %v11411_v30  ;;  %v8646_v30 = vld [vmem:[%s15667_s16 + $0x928] sm:$0xff] }
0x1861   : > { %11414 = vmatprep.subr.bf16.mxu1 %v11413_v12  ;;  %v8663_v12 = vld [vmem:[%s15667_s16 + $0x9b0] sm:$0xff] }
0x1862   : > { %v11481_v34 = vpack.c.bf16 %v8664_v58, %v8663_v12  ;;  %v8710_v12 = vld [vmem:[%s15667_s16 + $0xb28] sm:$0xff]  ;;  %v8727_v58 = vld [vmem:[%s15667_s16 + $0xbb0] sm:$0xff] }
0x1864   : > { %11416 = vmatpush3.bf16.msra.mxu1 %v11415_v13  ;;  %v8665_v13 = vld [vmem:[%s15667_s16 + $0x9c0] sm:$0xff] }
0x1865   : > { %11418 = vmatprep.subr.bf16.mxu1 %v11417_v19  ;;  %v8666_v19 = vld [vmem:[%s15667_s16 + $0x9c8] sm:$0xff] }
0x1866   : > { %v11485_v33 = vpack.c.bf16 %v8666_v19, %v8665_v13  ;;  %v8730_v13 = vld [vmem:[%s15667_s16 + $0xbc8] sm:$0xff] }
0x1868   : > { %11420 = vmatpush3.bf16.msra.mxu1 %v11419_v36  ;;  %v8667_v36 = vld [vmem:[%s15667_s16 + $0x9d0] sm:$0xff] }
0x1869   : > { %11422 = vmatprep.subr.bf16.mxu1 %v11421_v37  ;;  %v8668_v37 = vld [vmem:[%s15667_s16 + $0x9d8] sm:$0xff] }
0x186a   : > { %v11489_v41 = vpack.c.bf16 %v8668_v37, %v8667_v36  ;;  %v8732_v36 = vld [vmem:[%s15667_s16 + $0xbd8] sm:$0xff] }
0x186c   : > { %11424 = vmatpush3.bf16.msra.mxu1 %v11423_v47  ;;  %v11491_v47 = vpack.c.bf16 %v8652_v46, %v8651_v45  ;;  %v8716_v45 = vld [vmem:[%s15667_s16 + $0xb58] sm:$0xff] }
0x186d   : > { %11426 = vmatprep.subr.bf16.mxu1 %v11425_v51  ;;  %v8687_v51 = vld [vmem:[%s15667_s16 + $0xa70] sm:$0xff] }
0x186e   : > { %v11531_v62 = vpack.c.bf16 %v8688_v56, %v8687_v51  ;;  %v8734_v51 = vld [vmem:[%s15667_s16 + $0xbe8] sm:$0xff] }
0x1870   : > { %11428 = vmatpush3.bf16.msra.mxu1 %v11427_v0  ;;  %v8653_v0 = vld [vmem:[%s15667_s16 + $0x960] sm:$0xff]  ;;  %11532 = vmatpush3.bf16.msra.mxu0 %v11531_v62  ;;  %v8718_v62 = vld [vmem:[%s15667_s16 + $0xb68] sm:$0xff] }
0x1871   : > { %11430 = vmatprep.subr.bf16.mxu1 %v11429_v28  ;;  %v8654_v28 = vld [vmem:[%s15667_s16 + $0x968] sm:$0xff]  ;;  %v11559_v25 = vpack.c.bf16 %v8718_v62, %v8717_v61 }
0x1872   : > { %v11495_v43 = vpack.c.bf16 %v8654_v28, %v8653_v0  ;;  %v8735_v0 = vld [vmem:[%s15667_s16 + $0xbf0] sm:$0xff]  ;;  %v8736_v28 = vld [vmem:[%s15667_s16 + $0xbf8] sm:$0xff] }
0x1873   : > { %7134 = vmatmul.mubr.f32.vlgmr.msra.gmra.mrb[64].mxu0 %v11776_v49 }
0x1874   : > { %11432 = vmatpush3.bf16.msra.mxu1 %v11431_v4  ;;  %v9689_v4 = vpop.f32.mrb[60].mxu0 }
0x1875   : > { %11434 = vmatprep.subr.bf16.mxu1 %v11433_v40  ;;  %v11497_v40 = vpack.c.bf16 %v8672_v2, %v8671_v22  ;;  %v9690_v16 = vpop.f32.mrb[61].mxu0  ;;  %v8719_v22 = vld [vmem:[%s15667_s16 + $0xb70] sm:$0xff]  ;;  %v8720_v2 = vld [vmem:[%s15667_s16 + $0xb78] sm:$0xff] }
0x1878   : > { %11436 = vmatpush3.bf16.msra.mxu1 %v11435_v9  ;;  %v15273_v9 = vadd.f32 %v9690_v16, %v9689_v4 }
0x1879   : > { %11470 = vmatprep.subr.bf16.mxu1 %v11469_v21  ;;  %v8721_v21 = vld [vmem:[%s15667_s16 + $0xb80] sm:$0xff] }
0x187a   : > { %v11533_v15 = vpack.c.bf16 %v8722_v27, %v8721_v21 }
0x187b   : > { %6819 = vmatmul.mubr.f32.vlgmr.msra.gmra.mrb[52].mxu1 %v11776_v49  ;;  %v8725_v49 = vld [vmem:[%s15667_s16 + $0xba0] sm:$0xff] }
0x187c   : > { %11472 = vmatpush3.bf16.msra.mxu1 %v11471_v8  ;;  %7063 = vmatprep.mubr.f32.mxu1 %v14729_v57  ;;  %v11479_v57 = vpack.c.bf16 %v8646_v30, %v8645_v29  ;;  %v8723_v8 = vld [vmem:[%s15667_s16 + $0xb90] sm:$0xff]  ;;  %v8709_v30 = vld [vmem:[%s15667_s16 + $0xb20] sm:$0xff] }
0x187d   : > { %11474 = vmatprep.subr.bf16.mxu1 %v11473_v23  ;;  %v8724_v23 = vld [vmem:[%s15667_s16 + $0xb98] sm:$0xff] }
0x187e   : > { %v11537_v50 = vpack.c.bf16 %v8724_v23, %v8723_v8 }
0x1880   : > { %11476 = vmatpush3.bf16.msra.mxu1 %v11475_v52  ;;  %v8726_v52 = vld [vmem:[%s15667_s16 + $0xba8] sm:$0xff] }
0x1881   : > { %11478 = vmatprep.subr.bf16.mxu1 %v11477_v53  ;;  %v11539_v53 = vpack.c.bf16 %v8708_v32, %v8707_v54  ;;  %v11541_v29 = vpack.c.bf16 %v8726_v52, %v8725_v49  ;;  %v8738_v32 = vld [vmem:[%s15668_s17 + $0x3] ss:$0 sm:$0xff] }
0x1884   : > { %11480 = vmatpush3.bf16.msra.mxu1 %v11479_v57 }
0x1885   : > { %11482 = vmatprep.subr.bf16.mxu1 %v11481_v34  ;;  %v8711_v34 = vld [vmem:[%s15667_s16 + $0xb30] sm:$0xff] }
0x1886   : > { %v11547_v19 = vpack.c.bf16 %v8712_v3, %v8711_v34 }
0x1888   : > { %11484 = vmatpush3.bf16.msra.mxu1 %v11483_v10  ;;  %v11549_v10 = vpack.c.bf16 %v8730_v13, %v8729_v59 }
0x1889   : > { %11486 = vmatprep.subr.bf16.mxu1 %v11485_v33  ;;  %v8713_v33 = vld [vmem:[%s15667_s16 + $0xb40] sm:$0xff] }
0x188a   : > { %v11551_v37 = vpack.c.bf16 %v8714_v48, %v8713_v33 }
0x188c   : > { %11488 = vmatpush3.bf16.msra.mxu1 %v11487_v38  ;;  %v11553_v38 = vpack.c.bf16 %v8732_v36, %v8731_v35 }
0x188d   : > { %11490 = vmatprep.subr.bf16.mxu1 %v11489_v41  ;;  %v8715_v41 = vld [vmem:[%s15667_s16 + $0xb50] sm:$0xff] }
0x188e   : > { %v11555_v46 = vpack.c.bf16 %v8716_v45, %v8715_v41  ;;  %v8744_v45 = vld [vmem:[%s15669_s18 + $0x30] sm:$0xff] }
0x1890   : > { %11492 = vmatpush3.bf16.msra.mxu1 %v11491_v47  ;;  %v8733_v47 = vld [vmem:[%s15667_s16 + $0xbe0] sm:$0xff] }
0x1891   : > { %11494 = vmatprep.subr.bf16.mxu1 %v11493_v60  ;;  %v11557_v56 = vpack.c.bf16 %v8734_v51, %v8733_v47  ;;  %v9759_v60 = vpop.f32.mrb[62].mxu0 }
0x1892   : > { %v9760_v4 = vpop.f32.mrb[63].mxu0 }
0x1893   : > { %v9761_v7 = vadd.f32 %v9760_v4, %v9759_v60 }
0x1894   : > { %11496 = vmatpush3.bf16.msra.mxu1 %v11495_v43  ;;  %v11561_v43 = vpack.c.bf16 %v8736_v28, %v8735_v0 }
0x1895   : > { %11498 = vmatprep.subr.bf16.mxu1 %v11497_v40  ;;  %v11563_v40 = vpack.c.bf16 %v8720_v2, %v8719_v22  ;;  %v8748_v22 = vld [vmem:[%s15670_s19] ss:$0 sm:$0xff] }
0x1898   : > { %11500 = vmatpush3.bf16.msra.mxu1 %v11499_v11 }
0x1899   : > { %11534 = vmatprep.subr.bf16.mxu1 %v11533_v15 }
0x189b   : > { %7064 = vmatmul.mubr.f32.vlgmr.msra.gmra.mrb[54].mxu1 %v14645_v31  ;;  %v8728_v31 = vld [vmem:[%s15667_s16 + $0xbb8] sm:$0xff] }
0x189c   : > { %11536 = vmatpush3.bf16.msra.mxu1 %v11535_v18  ;;  %7203 = vmatprep.mubr.f32.mxu1 %v14655_v55  ;;  %v11543_v55 = vpack.c.bf16 %v8710_v12, %v8709_v30  ;;  %v11545_v57 = vpack.c.bf16 %v8728_v31, %v8727_v58 }
0x189d   : > { %11538 = vmatprep.subr.bf16.mxu1 %v11537_v50 }
0x18a0   : > { %11540 = vmatpush3.bf16.msra.mxu1 %v11539_v53 }
0x18a1   : > { %11542 = vmatprep.subr.bf16.mxu1 %v11541_v29 }
0x18a4   : > { %11544 = vmatpush3.bf16.msra.mxu1 %v11543_v55 }
0x18a5   : > { %11546 = vmatprep.subr.bf16.mxu1 %v11545_v57 }
0x18a8   : > { %11548 = vmatpush3.bf16.msra.mxu1 %v11547_v19 }
0x18a9   : > { %11550 = vmatprep.subr.bf16.mxu1 %v11549_v10 }
0x18ac   : > { %11552 = vmatpush3.bf16.msra.mxu1 %v11551_v37 }
0x18ad   : > { %11554 = vmatprep.subr.bf16.mxu1 %v11553_v38 }
0x18b0   : > { %11556 = vmatpush3.bf16.msra.mxu1 %v11555_v46  ;;  %v8745_v46 = vld [vmem:[%s15669_s18 + $0x38] sm:$0xff] }
0x18b1   : > { %11558 = vmatprep.subr.bf16.mxu1 %v11557_v56  ;;  %v11565_v47 = vpack.c.bf16 %v8745_v46, %v8744_v45  ;;  %v7682_v45 = vld [vmem:[%s15673_s22 + $0x8] sm:$0xff] }
0x18b4   : > { %11560 = vmatpush3.bf16.msra.mxu1 %v11559_v25 }
0x18b5   : > { %11562 = vmatprep.subr.bf16.mxu1 %v11561_v43 }
0x18b8   : > { %11564 = vmatpush3.bf16.msra.mxu1 %v11563_v40 }
0x18b9   : > { %11566 = vmatprep.subr.bf16.mxu1 %v11565_v47 }
0x18bb   : > { %7204 = vmatmul.mubr.f32.vlgmr.msra.gmra.mrb[56].mxu1 %v14725_v5 }
0x18bc   : > { %11568 = vmatpush3.bf16.msra.mxu1 %v11565_v47 }
0x192e   : > { %v10419_v16 = vpop.f32.mrb[50].mxu1 }
0x192f   : > { %v6578_v11 = vpop.f32.mrb[51].mxu1  ;;  %v6584_v5 = vadd.f32 %v10419_v16, %v8542_v20 }
0x1930   : > { %v6579_v21 = vadd.f32 %v8542_v20, %v6578_v11 }
0x1932   : > { %10422 = vmatprep.mubr.msk.f32.mxu0 %vm1563_vm3, %v6579_v21 }
0x1946   : > { %v9829_v23 = vpop.f32.mrb[64].mxu0 }
0x1947   : > { %v9830_v18 = vpop.f32.mrb[65].mxu0 }
0x1948   : > { %v9831_v50 = vadd.f32 %v9830_v18, %v9829_v23  ;;  %v7535_v18 = vld [vmem:[%s15671_s20 + $0x8] sm:$0xff] }
0x194e   : > { %v9724_v27 = vpop.f32.mrb[52].mxu1 }
0x194f   : > { %v9725_v26 = vpop.f32.mrb[53].mxu1 }
0x1950   : > { %v9726_v15 = vadd.f32 %v9725_v26, %v9724_v27 }
0x1952   : > { %v6821_v17 = vadd.f32 %v9726_v15, %v15273_v9 }
0x1954   : > { %v6891_v8 = vadd.f32 %v9761_v7, %v6821_v17 }
0x1956   : > { %10420 = vmatprep.subr.msk.mxu0 %vm1563_vm3, %v6891_v8 }
0x1957   : > { %10421 = vmatpush3.xpose.msk.msra.mxu0 %vm1563_vm3, %v6891_v8 }
0x195a   : > { %10423 = vmatmul.mubr.msk.f32.vlgmr.msra.gmra.mrb[66].mxu0 %vm1563_vm3, %v6584_v5 }
0x196e   : > { %v9794_v54 = vpop.f32.mrb[54].mxu1 }
0x196f   : > { %v9795_v49 = vpop.f32.mrb[55].mxu1 }
0x1970   : > { %v9796_v52 = vadd.f32 %v9795_v49, %v9794_v54  ;;  %v7536_v49 = vld [vmem:[%s15671_s20 + $0x10] sm:$0xff] }
0x1972   : > { %v7066_v53 = vadd.f32 %v9796_v52, %v8738_v32  ;;  %v7534_v32 = vld [vmem:[%s15671_s20] sm:$0xff] }
0x1973   : > { %v11571_v52 = vpack.c.bf16 %v7536_v49, %v7534_v32  ;;  %v7703_v49 = vld [vmem:[%s15673_s22 + $0xb0] sm:$0xff] }
0x1974   : > { %v7136_v9 = vadd.f32 %v9831_v50, %v7066_v53  ;;  %v7537_v50 = vld [vmem:[%s15671_s20 + $0x18] sm:$0xff]  ;;  %v7539_v53 = vld [vmem:[%s15671_s20 + $0x28] sm:$0xff] }
0x1975   : > { %v11569_v54 = vpack.c.bf16 %v7537_v50, %v7535_v18  ;;  %v7685_v50 = vld [vmem:[%s15673_s22 + $0x20] sm:$0xff] }
0x198e   : > { %v9864_v29 = vpop.f32.mrb[56].mxu1 }
0x198f   : > { %v9865_v30 = vpop.f32.mrb[57].mxu1 }
0x1990   : > { %v9866_v12 = vadd.f32 %v9865_v30, %v9864_v29  ;;  %v7538_v30 = vld [vmem:[%s15671_s20 + $0x20] sm:$0xff] }
0x1992   : > { %v7206_v58 = vadd.f32 %v9866_v12, %v7136_v9  ;;  %v7541_v9 = vld [vmem:[%s15671_s20 + $0x38] sm:$0xff]  ;;  %v7540_v12 = vld [vmem:[%s15671_s20 + $0x30] sm:$0xff] }
0x1993   : > { %v11573_v29 = vpack.c.bf16 %v7541_v9, %v7539_v53  ;;  %v7687_v9 = vld [vmem:[%s15673_s22 + $0x30] sm:$0xff] }
0x1994   : > { %10425 = vmatprep.subr.mxu0 %v7206_v58 }
0x1995   : > { %10426 = vmatpush3.msra.mxu0 %v7206_v58  ;;  %v11575_v58 = vpack.c.bf16 %v7540_v12, %v7538_v30  ;;  %v7705_v12 = vld [vmem:[%s15673_s22 + $0xc0] sm:$0xff] }
0x1996   : > { %11570 = vmatprep.subr.bf16.mxu0 %v11569_v54  ;;  %v7686_v54 = vld [vmem:[%s15673_s22 + $0x28] sm:$0xff] }
0x1997   : > { %v11595_v32 = vpack.c.bf16 %v7686_v54, %v7685_v50 }
0x1a2d   : > { %v10424_v31 = vpop.f32.mrb[66].mxu0 }
0x1a2e   : > { %v7294_v55 = vmul.f32 0.018042196, %v10424_v31  ;;  %v7284_v57 = vpop.f32.mrb[67].mxu0  ;;  %v7543_v31 = vld [vmem:[%s15671_s20 + $0x48] sm:$0xff] }
0x1a2f   : > { %v7293_v34 = vmul.f32 0.018042196, %v7284_v57 }
0x1a30   : > { %v7298_v3 = vsel %vm4332_vm7, %v7294_v55, -inf }
0x1a31   : > { %7299 = vmax.xlane.f32.xlu1 %v7298_v3  ;;  %v7295_v59 = vsel %vm4332_vm7, %v7293_v34, -inf  ;;  %v7544_v3 = vld [vmem:[%s15671_s20 + $0x50] sm:$0xff] }
0x1a32   : > { %7296 = vmax.xlane.f32.xlu0 %v7295_v59 }
0x1abe   : > { %v7300_v13 = vpop.xlane.xlu1 %7299 }
0x1abf   : > { %v7302_v19 = vsub.f32 %v7294_v55, %v7300_v13  ;;  %v7297_v10 = vpop.xlane.xlu0 %7296  ;;  %v7545_v55 = vld [vmem:[%s15671_s20 + $0x58] sm:$0xff]  ;;  %v7547_v13 = vld [vmem:[%s15671_s20 + $0x68] sm:$0xff] }
0x1ac0   : > { %v7301_v33 = vsub.f32 %v7293_v34, %v7297_v10  ;;  %v11577_v57 = vpack.c.bf16 %v7545_v55, %v7543_v31  ;;  %v7542_v34 = vld [vmem:[%s15671_s20 + $0x40] sm:$0xff] }
0x1ac1   : > { %v7305_v48 = vmul.f32 1.442695, %v7302_v19  ;;  %v11579_v59 = vpack.c.bf16 %v7544_v3, %v7542_v34  ;;  %v7549_v19 = vld [vmem:[%s15671_s20 + $0x78] sm:$0xff]  ;;  %v7689_v31 = vld [vmem:[%s15673_s22 + $0x40] sm:$0xff]  ;;  %v7707_v34 = vld [vmem:[%s15673_s22 + $0xd0] sm:$0xff] }
0x1ac2   : > { %v7303_v35 = vmul.f32 1.442695, %v7301_v33  ;;  %v11581_v10 = vpack.c.bf16 %v7549_v19, %v7547_v13  ;;  %v7546_v33 = vld [vmem:[%s15671_s20 + $0x60] sm:$0xff]  ;;  %v7708_v3 = vld [vmem:[%s15673_s22 + $0xd8] sm:$0xff]  ;;  %v7691_v19 = vld [vmem:[%s15673_s22 + $0x50] sm:$0xff] }
0x1ac3   : > { %11743 = vpow2.f32 %v7305_v48  ;;  %v7548_v48 = vld [vmem:[%s15671_s20 + $0x70] sm:$0xff]  ;;  %v11605_v13 = vpack.c.bf16 %v7708_v3, %v7707_v34 }
0x1ac4   : > { %11745 = vpow2.f32 %v7303_v35  ;;  %v11583_v35 = vpack.c.bf16 %v7548_v48, %v7546_v33  ;;  %v7709_v33 = vld [vmem:[%s15673_s22 + $0xe0] sm:$0xff]  ;;  %v7710_v48 = vld [vmem:[%s15673_s22 + $0xe8] sm:$0xff] }
0x1acd   : > { %v11744_v36 = vpop.eup %11743 }
0x1ace   : > { %v11746_v37 = vpop.eup %11745  ;;  %v7310_v38 = vsel %vm4332_vm7, %v11744_v36, 0.0 }
0x1acf   : > { %7311 = vadd.xlane.f32.xlu1 %v7310_v38  ;;  %10427 = vmatprep.mubr.msk.f32.mxu0 %vm4332_vm7, %v11746_v37  ;;  %v7307_v41 = vsel %vm4332_vm7, %v11746_v37, 0.0  ;;  %v7698_v37 = vld [vmem:[%s15673_s22 + $0x88] sm:$0xff]  ;;  %v7681_v38 = vld [vmem:[%s15673_s22] sm:$0xff] }
0x1ad0   : > { %10428 = vmatmul.mubr.msk.f32.vlgmr.msra.gmra.mrb[68].mxu0 %vm4332_vm7, %v11744_v36  ;;  %7308 = vadd.xlane.f32.xlu0 %v7307_v41  ;;  %v7697_v36 = vld [vmem:[%s15673_s22 + $0x80] sm:$0xff]  ;;  %v11587_v46 = vpack.c.bf16 %v7682_v45, %v7681_v38  ;;  %v7694_v38 = vld [vmem:[%s15673_s22 + $0x68] sm:$0xff]  ;;  %v7712_v45 = vld [vmem:[%s15673_s22 + $0xf8] sm:$0xff] }
0x1ad1   : > { %7632 = vmatprep.mubr.f32.mxu0 %v11843_v6  ;;  %11572 = vmatpush1.bf16.msra.mxu0 %v11571_v52  ;;  %v11585_v41 = vpack.c.bf16 %v7698_v37, %v7697_v36  ;;  %v7704_v52 = vld [vmem:[%s15673_s22 + $0xb8] sm:$0xff]  ;;  %v11609_v36 = vpack.c.bf16 %v7710_v48, %v7709_v33  ;;  %v7693_v37 = vld [vmem:[%s15673_s22 + $0x60] sm:$0xff] }
0x1ad2   : > { %11574 = vmatprep.subr.bf16.mxu0 %v11573_v29  ;;  %v11597_v53 = vpack.c.bf16 %v7704_v52, %v7703_v49  ;;  %v7688_v29 = vld [vmem:[%s15673_s22 + $0x38] sm:$0xff]  ;;  %v7916_v48 = vld [vmem:[%s15721_s0 + $0x1] sm:$0x1] }
0x1ad3   : > { %11586 = vmatprep.subr.bf16.mxu1 %v11585_v41  ;;  %v11599_v30 = vpack.c.bf16 %v7688_v29, %v7687_v9  ;;  %v7711_v41 = vld [vmem:[%s15673_s22 + $0xf0] sm:$0xff] }
0x1ad5   : > { %11576 = vmatpush1.bf16.msra.mxu0 %v11575_v58  ;;  %v7706_v58 = vld [vmem:[%s15673_s22 + $0xc8] sm:$0xff] }
0x1ad6   : > { %11578 = vmatprep.subr.bf16.mxu0 %v11577_v57  ;;  %v11601_v55 = vpack.c.bf16 %v7706_v58, %v7705_v12  ;;  %v7690_v57 = vld [vmem:[%s15673_s22 + $0x48] sm:$0xff] }
0x1ad9   : > { %11580 = vmatpush1.bf16.msra.mxu0 %v11579_v59  ;;  %v11603_v59 = vpack.c.bf16 %v7690_v57, %v7689_v31 }
0x1ada   : > { %11582 = vmatprep.subr.bf16.mxu0 %v11581_v10  ;;  %v7692_v10 = vld [vmem:[%s15673_s22 + $0x58] sm:$0xff] }
0x1add   : > { %11584 = vmatpush1.bf16.msra.mxu0 %v11583_v35  ;;  %v11607_v35 = vpack.c.bf16 %v7692_v10, %v7691_v19 }
0x1b5c   : > { %v7312_v56 = vpop.xlane.xlu1 %7311 }
0x1b5d   : > { %v7309_v51 = vpop.xlane.xlu0 %7308 }
0x1b5e   : > { %11747 = vrcp.f32 %v7309_v51 }
0x1b5f   : > { %11749 = vrcp.f32 %v7312_v56 }
0x1b68   : > { %v11748_v62 = vpop.eup %11747 }
0x1b69   : > { %v11750_v0 = vpop.eup %11749 }
0x1ba3   : > { %v10429_v61 = vpop.f32.mrb[68].mxu0 }
0x1ba4   : > { %v7385_v25 = vpop.f32.mrb[69].mxu0  ;;  %v7397_v60 = vmul.f32 %v11750_v0, %v10429_v61  ;;  %v7928_v0 = vld [vmem:[%s15721_s0 + $0x3] sm:$0x1] }
0x1ba5   : > { %v7395_v28 = vmul.f32 %v11748_v62, %v7385_v25 }
0x1ba7   : > { %10434 = vmatprep.mubr.msk.f32.mxu1 %vm1563_vm3, %v7395_v28  ;;  %v1087_v28 = vadd.f32 %v7928_v0, %v12275_v63 }
0x1ba8   : > { %10435 = vmatmul.mubr.msk.f32.vlgmr.msra.gmra.mrb[38].mxu1 %vm1563_vm3, %v7397_v60  ;;  %v7940_v60 = vld [vmem:[%s15721_s0 + $0x5] sm:$0x1] }
0x1ba9   : > { %11588 = vmatpush3.bf16.msra.mxu1 %v11587_v46  ;;  %v11611_v46 = vpack.c.bf16 %v7694_v38, %v7693_v37  ;;  %v8751_v37 = vld [vmem:[%s15728_s4] ss:$0 sm:$0xff]  ;;  %s11781_s4 = sshll.u32 %s11845_s9, 4  ;;  %s11782_s4 = int_to_ptr.vmem [resolvable:$false] %s11781_s4 }
0x1baa   : > { %s11783_s5 = scalar_lea.vmem %s11782_s4, 512  ;;  %p11784_p0 = scmp.lt.s32.totalorder %s15606_s28, %s11782_s4 }
0x1bab   : > { %p11785_p1 = scmp.lt.s32.totalorder %s11783_s5, %s11777_s29 }
0x1bad   : > { %p11786_p2 = por %p11785_p1, %p11784_p0 }
0x1baf   : > { %p11787_p3 = pnand %p11786_p2, %p11780_p13 }
0x1c7b   : > { %v10436_v43 = vpop.f32.mrb[38].mxu1 }
0x1c7c   : > { %v7485_v2 = vadd.f32 %v10436_v43, %v12746_v44  ;;  %v7473_v4 = vpop.f32.mrb[39].mxu1  ;;  %v7521_v43 = vadd.f32 1.0, %v1087_v28 }
0x1c7d   : > { %v7484_v40 = vadd.f32 %v7473_v4, %v12749_v14 }
0x1c7e   : > { %v15405_v7 = vadd.f32 %v8748_v22, %v7485_v2 }
0x1c7f   : > { %v15407_v20 = vadd.f32 %v8748_v22, %v7484_v40  ;;  %v1241_v22 = vadd.f32 %v7940_v60, %v12277_v1  ;;  %v7525_v40 = vrot.slane %v7521_v43, %v12235_v42  ;;  %v7699_v1 = vld [vmem:[%s15673_s22 + $0x90] sm:$0xff] }
0x1c80   : > { %v7498_v16 = vsel %vm1253_vm1, %v15405_v7, 0.0 }
0x1c81   : > { %7499 = vadd.xlane.f32.xlu1 %v7498_v16  ;;  %v7495_v11 = vsel %vm1253_vm1, %v15407_v20, 0.0 }
0x1c82   : > { %7496 = vadd.xlane.f32.xlu0 %v7495_v11 }
0x1d0e   : > { %v7500_v21 = vpop.xlane.xlu1 %7499 }
0x1d0f   : > { %v7502_v27 = vmul.f32 0.015625, %v7500_v21  ;;  %v7497_v26 = vpop.xlane.xlu0 %7496  ;;  %v7531_v21 = vrot.slane %v1241_v22, %v12235_v42 }
0x1d10   : > { %v7501_v15 = vmul.f32 0.015625, %v7497_v26 }
0x1d11   : > { %v15414_v44 = vsub.f32 %v15405_v7, %v7502_v27 }
0x1d12   : > { %v15417_v14 = vsub.f32 %v15407_v20, %v7501_v15 }
0x1d13   : > { %v7506_v17 = vmul.f32 %v15414_v44, %v15414_v44 }
0x1d14   : > { %v7505_v8 = vmul.f32 %v15417_v14, %v15417_v14 }
0x1d15   : > { %v7510_v5 = vsel %vm1253_vm1, %v7506_v17, 0.0  ;;  %v7683_v17 = vld [vmem:[%s15673_s22 + $0x10] sm:$0xff] }
0x1d16   : > { %7511 = vadd.xlane.f32.xlu1 %v7510_v5  ;;  %v7507_v23 = vsel %vm1253_vm1, %v7505_v8, 0.0  ;;  %v7684_v8 = vld [vmem:[%s15673_s22 + $0x18] sm:$0xff]  ;;  %v7701_v5 = vld [vmem:[%s15673_s22 + $0xa0] sm:$0xff] }
0x1d17   : > { %7508 = vadd.xlane.f32.xlu0 %v7507_v23  ;;  %v7702_v23 = vld [vmem:[%s15673_s22 + $0xa8] sm:$0xff] }
0x1d18   : > { %v11593_v18 = vpack.c.bf16 %v7702_v23, %v7701_v5 }
0x1da3   : > { %v7512_v47 = vpop.xlane.xlu1 %7511 }
0x1da4   : > { %v7514_v51 = vmul.f32 0.015625, %v7512_v47  ;;  %v7509_v56 = vpop.xlane.xlu0 %7508  ;;  %v11613_v47 = vpack.c.bf16 %v7712_v45, %v7711_v41 }
0x1da5   : > { %v7513_v61 = vmul.f32 0.015625, %v7509_v56  ;;  %v7696_v56 = vld [vmem:[%s15673_s22 + $0x78] sm:$0xff] }
0x1da6   : > { %v7516_v62 = vadd.f32 1e-06, %v7514_v51  ;;  %v7695_v51 = vld [vmem:[%s15673_s22 + $0x70] sm:$0xff] }
0x1da7   : > { %v7515_v25 = vadd.f32 1e-06, %v7513_v61  ;;  %v11615_v61 = vpack.c.bf16 %v7696_v56, %v7695_v51 }
0x1da8   : > { %11751 = vrsqrt.f32 %v7516_v62  ;;  %v7550_v62 = vld [vmem:[%s15672_s21] sm:$0x3] }
0x1da9   : > { %11753 = vrsqrt.f32 %v7515_v25  ;;  %v7558_v25 = vsub.s32 1, %v12229_v39  ;;  %v7555_v0 = vrot.slane %v7550_v62, %v12235_v42 }
0x1dab   : > { %v7559_v28 = vrot.slane %v7550_v62, %v7558_v25 }
0x1db2   : > { %v11752_v2 = vpop.eup %11751 }
0x1db3   : > { %v11754_v4 = vpop.eup %11753  ;;  %v7520_v16 = vmul.f32 %v11752_v2, %v15414_v44  ;;  %v7700_v44 = vld [vmem:[%s15673_s22 + $0x98] sm:$0xff] }
0x1db4   : > { %v7519_v11 = vmul.f32 %v11754_v4, %v15417_v14  ;;  %v11589_v14 = vpack.c.bf16 %v7700_v44, %v7699_v1 }
0x1db5   : > { %v7527_v27 = vmul.f32 %v7525_v40, %v7520_v16 }
0x1db6   : > { %v7526_v26 = vmul.f32 %v7525_v40, %v7519_v11  ;;  %11590 = vmatprep.subr.bf16.mxu1 %v11589_v14 }
0x1db7   : > { %v7533_v63 = vadd.f32 %v7531_v21, %v7527_v27 }
0x1db8   : > { %v7532_v15 = vadd.f32 %v7531_v21, %v7526_v26 }
0x1dba   : > { %8749 = vmatmul.mubr.msk.f32.vlgmr.msra.gmra.mrb[70].mxu0 %vm1253_vm1, %v7532_v15 }
0x1dbb   : > { %7638 = vmatprep.mubr.f32.mxu0 %v11843_v6  ;;  %v11591_v6 = vpack.c.bf16 %v7684_v8, %v7683_v17 }
0x1dbd   : > { %11592 = vmatpush3.bf16.msra.mxu1 %v11591_v6 }
0x1dbe   : > { %8750 = vmatmul.mubr.msk.f32.gmra.mrb[72].mxu0 %vm1253_vm1, %v7533_v63  ;;  %11594 = vmatprep.subr.bf16.mxu1 %v11593_v18 }
0x1dc1   : > { %11596 = vmatpush3.bf16.msra.mxu1 %v11595_v32 }
0x1dc2   : > { %11598 = vmatprep.subr.bf16.mxu1 %v11597_v53 }
0x1dc5   : > { %11600 = vmatpush3.bf16.msra.mxu1 %v11599_v30 }
0x1dc6   : > { %11602 = vmatprep.subr.bf16.mxu1 %v11601_v55 }
0x1dc9   : > { %11604 = vmatpush3.bf16.msra.mxu1 %v11603_v59 }
0x1dca   : > { %11606 = vmatprep.subr.bf16.mxu1 %v11605_v13 }
0x1dcd   : > { %11608 = vmatpush3.bf16.msra.mxu1 %v11607_v35  ;;  %v933_v35 = vadd.f32 %v7916_v48, %v12223_v24 }
0x1dce   : > { %11610 = vmatprep.subr.bf16.mxu1 %v11609_v36 }
0x1dcf   : > { %v7798_v45 = vrot.slane %v933_v35, %v12235_v42 }
0x1dd1   : > { %11612 = vmatpush3.bf16.msra.mxu1 %v11611_v46 }
0x1dd2   : > { %11614 = vmatprep.subr.bf16.mxu1 %v11613_v47 }
0x1dd5   : > { %11616 = vmatpush3.bf16.msra.mxu1 %v11615_v61 }
0x1e8d   : > { %v7634_v60 = vpop.f32.mrb[70].mxu0 }
0x1e8e   : > { %v7635_v43 = vadd.f32 %v7634_v60, %v7555_v0  ;;  %v7636_v22 = vpop.f32.mrb[71].mxu0 }
0x1e8f   : > { %v7637_v2 = vadd.f32 %v7636_v22, %v7559_v28 }
0x1e90   : > { %v7649_v4 = vmul.f32 0.044715, %v7635_v43  ;;  %v7645_v58 = vmul.f32 0.5, %v7635_v43 }
0x1e91   : > { %v7650_v40 = vmul.f32 0.044715, %v7637_v2  ;;  %v7640_v16 = vpop.f32.mrb[72].mxu0  ;;  %v7646_v30 = vmul.f32 0.5, %v7637_v2 }
0x1e92   : > { %v7653_v11 = vmul.f32 %v7649_v4, %v7635_v43  ;;  %v7641_v21 = vadd.f32 %v7640_v16, %v7555_v0  ;;  %v7642_v27 = vpop.f32.mrb[73].mxu0 }
0x1e93   : > { %v7654_v26 = vmul.f32 %v7650_v40, %v7637_v2  ;;  %v7643_v63 = vadd.f32 %v7642_v27, %v7559_v28 }
0x1e94   : > { %v7657_v15 = vmul.f32 %v7653_v11, %v7635_v43  ;;  %v7651_v1 = vmul.f32 0.044715, %v7641_v21  ;;  %v7647_v19 = vmul.f32 0.5, %v7641_v21 }
0x1e95   : > { %v7652_v44 = vmul.f32 0.044715, %v7643_v63  ;;  %v7658_v14 = vmul.f32 %v7654_v26, %v7637_v2  ;;  %v7648_v59 = vmul.f32 0.5, %v7643_v63 }
0x1e96   : > { %v7661_v39 = vadd.f32 %v7657_v15, %v7635_v43  ;;  %v7655_v17 = vmul.f32 %v7651_v1, %v7641_v21 }
0x1e97   : > { %v7656_v8 = vmul.f32 %v7652_v44, %v7643_v63  ;;  %v7662_v6 = vadd.f32 %v7658_v14, %v7637_v2 }
0x1e98   : > { %v7665_v5 = vmul.f32 0.7978846, %v7661_v39  ;;  %v7659_v23 = vmul.f32 %v7655_v17, %v7641_v21 }
0x1e99   : > { %v7666_v18 = vmul.f32 0.7978846, %v7662_v6  ;;  %v7660_v50 = vmul.f32 %v7656_v8, %v7643_v63 }
0x1e9a   : > { %11755 = vtanh.f32 %v7665_v5  ;;  %v7663_v54 = vadd.f32 %v7659_v23, %v7641_v21 }
0x1e9b   : > { %11757 = vtanh.f32 %v7666_v18  ;;  %v7664_v32 = vadd.f32 %v7660_v50, %v7643_v63 }
0x1e9c   : > { %v7667_v49 = vmul.f32 0.7978846, %v7663_v54 }
0x1e9d   : > { %v7668_v52 = vmul.f32 0.7978846, %v7664_v32 }
0x1e9e   : > { %11759 = vtanh.f32 %v7667_v49 }
0x1e9f   : > { %11761 = vtanh.f32 %v7668_v52 }
0x1ea4   : > { %v11756_v53 = vpop.eup %11755 }
0x1ea5   : > { %v11758_v9 = vpop.eup %11757  ;;  %v7673_v29 = vadd.f32 1.0, %v11756_v53 }
0x1ea6   : > { %v7674_v12 = vadd.f32 1.0, %v11758_v9 }
0x1ea7   : > { %v7677_v34 = vmul.f32 %v7673_v29, %v7645_v58 }
0x1ea8   : > { %v11760_v31 = vpop.eup %11759  ;;  %v7678_v55 = vmul.f32 %v7674_v12, %v7646_v30 }
0x1ea9   : > { %v11762_v57 = vpop.eup %11761  ;;  %v7675_v3 = vadd.f32 1.0, %v11760_v31 }
0x1eaa   : > { %7784 = vmatprep.mubr.f32.mxu1 %v7678_v55  ;;  %v7676_v13 = vadd.f32 1.0, %v11762_v57 }
0x1eab   : > { %7785 = vmatmul.mubr.f32.vlgmr.msra.gmra.mrb[58].mxu1 %v7677_v34  ;;  %v7679_v33 = vmul.f32 %v7675_v3, %v7647_v19 }
0x1eac   : > { %v7680_v10 = vmul.f32 %v7676_v13, %v7648_v59 }
0x1eae   : > { %7789 = vmatprep.mubr.f32.mxu1 %v7680_v10 }
0x1eaf   : > { %7790 = vmatmul.mubr.f32.gmra.mrb[60].mxu1 %v7679_v33 }
0x1f7e   : > { %v9909_v36 = vpop.f32.mrb[58].mxu1 }
0x1f7f   : > { %v9910_v38 = vpop.f32.mrb[59].mxu1 }
0x1f80   : > { %v9911_v41 = vadd.f32 %v9910_v38, %v9909_v36 }
0x1f82   : > { %v7787_v46 = vadd.f32 %v9911_v41, %v8751_v37  ;;  %v9912_v47 = vpop.f32.mrb[60].mxu1 }
0x1f83   : > { %v9913_v51 = vpop.f32.mrb[61].mxu1 }
0x1f84   : > { %v7799_v56 = vmul.f32 %v7798_v45, %v7787_v46  ;;  %v9914_v61 = vadd.f32 %v9913_v51, %v9912_v47 }
0x1f86   : > { %v7801_v62 = vadd.f32 %v7799_v56, %v15407_v20  ;;  %v7792_v24 = vadd.f32 %v9914_v61, %v8751_v37 }
0x1f88   : > { %7803 = vst.msk [vmem:[%s756_s2] sm:$0xff] %vm1253_vm1, %v7801_v62  ;;  %v7800_v25 = vmul.f32 %v7798_v45, %v7792_v24 }
0x1f8a   : > { %v7802_v42 = vadd.f32 %v7800_v25, %v15405_v7 }
0x1f8c   : > { %7804 = vst.msk [vmem:[%s756_s2 + $0x8] sm:$0xff] %vm1253_vm1, %v7802_v42 }
0x1f8d   : > { %11790 = shalt.err (!%p11787_p3)
}
0x1f8e   : > { %s11791_s27 = scalar_lea.hbm %s15604_s1, 256  ;;  %s11795_s7 = scalar_lea.hbm %s15730_s25, 512 }
0x1f8f   : > { %p11792_p4 = scmp.ne.s32.totalorder %s15604_s1, %s11791_s27  ;;  %p11796_p9 = scmp.lt.u32.totalorder %s15604_s1, %s15730_s25 }
0x1f90   : > { %p11797_p10 = scmp.lt.u32.totalorder %s11795_s7, %s11791_s27  ;;  %p11799_p12 = scmp.lt.u32.totalorder %s11791_s27, %s15604_s1 }
0x1f91   : > { %p11793_p7 = pnand %p11792_p4, %p12011_p5 }
0x1f92   : > { %p11798_p11 = por %p11797_p10, %p11796_p9 }
0x1f93   : > { %p11794_p8 = pneg %p11793_p7 }
0x1f94   : > { %p11800_p13 = por %p11799_p12, %p11798_p11 }
0x1f96   : > { %p11801_p0 = pnand %p11800_p13, %p11794_p8 }
0x1f98   : > { %11804 = shalt.err (!%p11801_p0)
}
0x1f99   : > { %s11846_s29 = smov 128   ;;  %s11847_s4 = smov 8  }
0x1f9a   : > { %11630 = dma.vmem_to_hbm [thread:$0]  (%p12011_p5), %s15606_s28, 256, %s15604_s1, %s15610_s6, %s11846_s29, %s11846_s29, %s11847_s4  }
0x1f9b PF: > { %s15731_s5 = sld [smem:[#allocation7_spill]]  ;;  %s15732_s8 = sld [smem:[#allocation5_spill]] }
0x1fa1   : > { %p11636_p1 = scmp.ge.s32.totalorder %s15731_s5, 2  ;;  %s7834_s3 = sand.u32 1, %s15732_s8  }
0x1fa2   : > { %s7835_s27 = scalar_lea.sflag [#allocation3], %s7834_s3 }
0x1fa3   : > { %p11633_p2 = pnand %p11636_p1, %p12015_p6 }
0x1fa5   : > { %11822 = dma.done.wait (!%p11633_p2), %s7835_s27, 256  }
0x1fa6   : > { %11824 = vsyncadd (!%p11633_p2), %s7835_s27, 4294967040  ;;  %s15734_s28 = sld [smem:[#allocation8_spill]]  ;;  %s15735_s7 = sld [smem:[#allocation6_spill]] }
0x1fa7   : > { %s15736_s27 = sld [smem:[#allocation9_spill]]  ;;  %s15737_s5 = smov %s11831_s26 }
0x1fac   : > { %p34_p3 = scmp.ge.s32.totalorder %s15734_s28, 4   ;;  %s15738_s26 = smov %s15735_s7 }
0x1fae   :  { %36 = sbr.rel (!%p34_p3) target bundleno = 17 (0x11), region = 203 }
0x1fb5   :  { %7840 = vsyncpa [#allocation3], 1 }
0x1fb6   :  { %7842 = vsyncpa [#allocation3 + $0x1], 1 }

</bundles_post_ra>
